<compile_context>
chip_gen: v6e
topology: v6e:2x2x1
jax: 0.10.0
libtpu: 0.0.40
codegen_flags: <defaults>
</compile_context>

<pallas_src>
import functools
import math

import jax
import jax.numpy as jnp
from jax.experimental import pallas as pl
from jax.experimental.pallas import tpu as pltpu

NEG_INF = float("-inf")   # what callers typically pass in tgt_mask
NEG_BIG = -1e30           # finite "minus infinity" used inside the kernels
LN_EPS = 1e-5

WEIGHT_ORDER = (
    "s_wq", "s_bq", "s_wk", "s_bk", "s_wv", "s_bv", "s_wo", "s_bo", "ln1_g", "ln1_b",
    "t_wq", "t_bq", "t_wk", "t_bk",
    "c_wq", "c_bq", "c_wk", "c_bk", "c_wv", "c_bv", "c_wo", "c_bo", "ln2_g", "ln2_b",
    "f_w1", "f_b1", "f_w2", "f_b2", "ln3_g", "ln3_b",
)


# ----------------------------------------------------------------------------
# Fused decoder-layer kernel.  One grid step == (batch element, query tile).
# ----------------------------------------------------------------------------
def _decoder_layer_kernel(
    # data (per grid step)
    xq_ref, xf_ref, tmask_ref, kpm_ref, titles_ref, mem_ref, tbias_ref,
    cbias_ref, notpad_ref,
    # self attention + LN1
    swq_ref, sbq_ref, swk_ref, sbk_ref, swv_ref, sbv_ref, swo_ref, sbo_ref,
    g1_ref, be1_ref,
    # title attention (SimpleMHA)
    twq_ref, tbq_ref, twk_ref, tbk_ref,
    # cross attention + LN2
    cwq_ref, cbq_ref, cwk_ref, cbk_ref, cwv_ref, cbv_ref, cwo_ref, cbo_ref,
    g2_ref, be2_ref,
    # FFN + LN3
    fw1_ref, fb1_ref, fw2_ref, fb2_ref, g3_ref, be3_ref,
    # output
    o_ref,
    *, n_head, scale, eps, num_statements, stmt_len):
    f32, bf16 = jnp.float32, jnp.bfloat16
    H, NS, S = n_head, num_statements, stmt_len

    xq = xq_ref[0]                     # (TL, E)  query tile of the layer input
    xf = xf_ref[0]                     # (L,  E)  full sequence (self-attn K/V)
    TL, E = xq.shape
    Dh = E // H

    def split_heads(t):                # (N, E) -> (H, N, Dh), transient only
        return jnp.transpose(t.reshape(t.shape[0], H, Dh), (1, 0, 2))

    def merge_heads(t):                # (H, N, Dh) -> (N, E) concat heads
        return jnp.transpose(t, (1, 0, 2)).reshape(t.shape[1], E)

    def softmax(s):
        m = jnp.max(s, axis=-1, keepdims=True)
        p = jnp.exp(s - m)
        return p * pl.reciprocal(jnp.sum(p, axis=-1, keepdims=True), approx=True)

    def add_layernorm(a, b, g, beta):
        y = a + b
        mu = jnp.mean(y, axis=-1, keepdims=True)
        yc = y - mu
        var = jnp.mean(yc * yc, axis=-1, keepdims=True)
        return yc * jax.lax.rsqrt(var + eps) * g + beta

    # ---------------- block A: masked self attention + residual + LN1 --------
    xq_b = xq.astype(bf16)
    xf_b = xf.astype(bf16)
    q = jnp.dot(xq_b, swq_ref[...], preferred_element_type=f32) + sbq_ref[...]
    k = jnp.dot(xf_b, swk_ref[...], preferred_element_type=f32) + sbk_ref[...]
    v = jnp.dot(xf_b, swv_ref[...], preferred_element_type=f32) + sbv_ref[...]
    s = jnp.einsum("hld,hsd->hls", split_heads(q), split_heads(k),
                   preferred_element_type=f32) * scale                  # (H,TL,L)
    # additive bias built in-kernel: shared (TL, L) tgt_mask tile (clamped to a
    # finite NEG_BIG) + (1, L) key-padding bias; no (B, L, L) array in HBM.
    bias = jnp.maximum(tmask_ref[...], NEG_BIG) + kpm_ref[0]            # (TL, L)
    p = softmax(s + bias[None])
    ctx = merge_heads(jnp.einsum("hls,hsd->hld", p.astype(bf16),
                                 split_heads(v).astype(bf16),
                                 preferred_element_type=f32))           # (TL, E)
    attn = jnp.dot(ctx.astype(bf16), swo_ref[...],
                   preferred_element_type=f32) + sbo_ref[...]
    x1 = add_layernorm(xq, attn, g1_ref[...], be1_ref[...])             # (TL, E)

    # ---------------- block B: title distribution over statements ------------
    # TODO(synk): SimpleMHA source not provided; implemented as multi-head
    # scaled dot-product attention weights (q/k projections), mean over heads.
    x1_b = x1.astype(bf16)
    titles_b = titles_ref[0].astype(bf16)                               # (NS, E)
    tq = jnp.dot(x1_b, twq_ref[...], preferred_element_type=f32) + tbq_ref[...]
    tk = jnp.dot(titles_b, twk_ref[...], preferred_element_type=f32) + tbk_ref[...]
    ts = jnp.einsum("hld,hnd->hln", split_heads(tq), split_heads(tk),
                    preferred_element_type=f32) * scale + tbias_ref[0][None]
    dist = jnp.mean(softmax(ts), axis=0)                                # (TL, NS)

    # ---------------- block B: batched cross attention + residual + LN2 ------
    mem_b = mem_ref[0].astype(bf16)                                     # (NS*S, E)
    cq = jnp.dot(x1_b, cwq_ref[...], preferred_element_type=f32) + cbq_ref[...]
    ck = jnp.dot(mem_b, cwk_ref[...], preferred_element_type=f32) + cbk_ref[...]
    cv = jnp.dot(mem_b, cwv_ref[...], preferred_element_type=f32) + cbv_ref[...]
    cs = jnp.einsum("hld,hsd->hls", split_heads(cq), split_heads(ck),
                    preferred_element_type=f32) * scale                 # (H,TL,NS*S)

    wgt = dist * notpad_ref[0]                                          # (TL, NS)
    cb = cbias_ref[0]                                                   # (NS, S)
    wp_parts = []
    for i in range(NS):                 # NS is small & static: only the masked
        s_i = cs[:, :, i * S:(i + 1) * S] + cb[i:i + 1, :][None]        # softmax
        wp_parts.append(softmax(s_i) * wgt[:, i:i + 1][None])           # is per-stmt
    wp = jnp.concatenate(wp_parts, axis=-1).astype(bf16)                # (H,TL,NS*S)

    cctx = merge_heads(jnp.einsum("hls,hsd->hld", wp,
                                  split_heads(cv).astype(bf16),
                                  preferred_element_type=f32))          # (TL, E)
    # hoisted output projection; bias scaled by sum_i(dist_i * notpad_i)
    coef = jnp.sum(wgt, axis=-1, keepdims=True)                         # (TL, 1)
    cross = jnp.dot(cctx.astype(bf16), cwo_ref[...],
                    preferred_element_type=f32) + cbo_ref[...] * coef
    x2 = add_layernorm(x1, cross, g2_ref[...], be2_ref[...])

    # ---------------- block C: FFN + residual + LN3 ---------------------------
    h = jnp.maximum(
        jnp.dot(x2.astype(bf16), fw1_ref[...], preferred_element_type=f32)
        + fb1_ref[...], 0.0)
    f = jnp.dot(h.astype(bf16), fw2_ref[...], preferred_element_type=f32) + fb2_ref[...]
    o_ref[0] = add_layernorm(x2, f, g3_ref[...], be3_ref[...])


# ----------------------------------------------------------------------------
# pallas_call wrapper: one fused call per decoder layer, grid = (B, L // TL)
# ----------------------------------------------------------------------------
def run_layer(x, tmask, kpm_bias, titles, mem_flat, tbias, cbias, notpad,
              lp, *, n_head):
    B, L, E = x.shape
    NS = titles.shape[1]
    S = mem_flat.shape[1] // NS
    TL = 128 if L % 128 == 0 else L          # query tile (bounds the score tensor)
    n_qt = L // TL
    scale = 1.0 / math.sqrt(E // n_head)

    weights = [lp[k] for k in WEIGHT_ORDER]

    def wspec(a):                            # full-array block, constant index map
        nd = a.ndim
        return pl.BlockSpec(tuple(a.shape), lambda b, q, _n=nd: (0,) * _n)

    in_specs = [
        pl.BlockSpec((1, TL, E), lambda b, q: (b, q, 0)),        # x (query tile)
        pl.BlockSpec((1, L, E), lambda b, q: (b, 0, 0)),         # x (full, K/V)
        pl.BlockSpec((TL, L), lambda b, q: (q, 0)),              # tgt_mask tile
        pl.BlockSpec((1, 1, L), lambda b, q: (b, 0, 0)),         # key-padding bias
        pl.BlockSpec((1, NS, E), lambda b, q: (b, 0, 0)),        # titles
        pl.BlockSpec((1, NS * S, E), lambda b, q: (b, 0, 0)),    # memory (flat)
        pl.BlockSpec((1, 1, NS), lambda b, q: (b, 0, 0)),        # title bias
        pl.BlockSpec((1, NS, S), lambda b, q: (b, 0, 0)),        # cross bias
        pl.BlockSpec((1, 1, NS), lambda b, q: (b, 0, 0)),        # not-padded flag
    ] + [wspec(w) for w in weights]

    kernel = functools.partial(
        _decoder_layer_kernel, n_head=n_head, scale=scale, eps=LN_EPS,
        num_statements=NS, stmt_len=S)

    return pl.pallas_call(
        kernel,
        grid=(B, n_qt),
        out_shape=jax.ShapeDtypeStruct((B, L, E), jnp.float32),
        in_specs=in_specs,
        out_specs=pl.BlockSpec((1, TL, E), lambda b, q: (b, q, 0)),
        compiler_params=pltpu.CompilerParams(
            dimension_semantics=("parallel", "parallel"),
            vmem_limit_bytes=64 * 1024 * 1024),                  # v7x-safe budget
    )(x, x, tmask, kpm_bias, titles, mem_flat, tbias, cbias, notpad, *weights)


# ----------------------------------------------------------------------------
# Decoder forward (masks/biases computed once; activation stays batch-first)
# ----------------------------------------------------------------------------
def decoder_forward(params, memory, tgt, tgt_mask, tgt_key_padding_mask,
                    memory_key_padding_mask, *, n_head):
    """memory (B,NS,S,E), tgt (B,L,E) -> (B,L,E)."""
    B, L, E = tgt.shape
    _, NS, S, _ = memory.shape

    tmask = jnp.asarray(tgt_mask, jnp.float32)                             # (L, L)
    kpm_bias = jnp.where(tgt_key_padding_mask, NEG_BIG, 0.0
                         ).astype(jnp.float32)[:, None, :]                 # (B, 1, L)

    titles = memory[:, :, 0, :]                                            # (B, NS, E)
    tbias = jnp.where(memory_key_padding_mask[:, :, 0], NEG_BIG, 0.0
                      ).astype(jnp.float32)[:, None, :]                    # (B, 1, NS)

    final_padding = memory_key_padding_mask.at[:, :, 0].set(False)         # keep tok 0
    cbias = jnp.where(final_padding, NEG_BIG, 0.0).astype(jnp.float32)     # (B, NS, S)

    notpad = jnp.where(memory_key_padding_mask[:, :, 0], 0.0, 1.0
                       ).astype(jnp.float32)[:, None, :]                   # (B, 1, NS)

    mem_flat = memory.reshape(B, NS * S, E)                                # (B, NS*S, E)

    # positional encoding (dropout = identity in eval)
    x = tgt + params["pos_enc"][None, :L, :]

    for lp in params["layers"]:
        x = run_layer(x, tmask, kpm_bias, titles, mem_flat, tbias, cbias,
                      notpad, lp, n_head=n_head)
    return x


def make_positional_encoding(max_len, d_model):
    # TODO(synk): PositionalEncoding source not provided; standard sinusoidal PE.
    pos = jnp.arange(max_len, dtype=jnp.float32)[:, None]
    div = jnp.exp(
        jnp.arange(0, d_model, 2, dtype=jnp.float32) * (-math.log(10000.0) / d_model))
    pe = jnp.zeros((max_len, d_model), jnp.float32)
    pe = pe.at[:, 0::2].set(jnp.sin(pos * div))
    pe = pe.at[:, 1::2].set(jnp.cos(pos * div))
    return pe


# ----------------------------------------------------------------------------
# Parameter init (PyTorch-layout) + one-time repack into kernel layout
# ----------------------------------------------------------------------------
def init_layer_params(key, d_model, dim_ff):
    ks = jax.random.split(key, 14)
    w = lambda k, s: jax.random.normal(k, s, jnp.float32) * 0.05
    return {
        "self_attn": {
            "in_w": w(ks[0], (3 * d_model, d_model)), "in_b": w(ks[1], (3 * d_model,)),
            "out_w": w(ks[2], (d_model, d_model)), "out_b": w(ks[3], (d_model,)),
        },
        "cross_attn": {
            "in_w": w(ks[4], (3 * d_model, d_model)), "in_b": w(ks[5], (3 * d_model,)),
            "out_w": w(ks[6], (d_model, d_model)), "out_b": w(ks[7], (d_model,)),
        },
        "title_attn": {
            "q_w": w(ks[8], (d_model, d_model)), "q_b": w(ks[9], (d_model,)),
            "k_w": w(ks[10], (d_model, d_model)), "k_b": w(ks[11], (d_model,)),
        },
        "ffn_w1": w(ks[12], (dim_ff, d_model)), "ffn_b1": jnp.zeros((dim_ff,), jnp.float32),
        "ffn_w2": w(ks[13], (d_model, dim_ff)), "ffn_b2": jnp.zeros((d_model,), jnp.float32),
        "norm1_g": jnp.ones((d_model,), jnp.float32), "norm1_b": jnp.zeros((d_model,), jnp.float32),
        "norm2_g": jnp.ones((d_model,), jnp.float32), "norm2_b": jnp.zeros((d_model,), jnp.float32),
        "norm3_g": jnp.ones((d_model,), jnp.float32), "norm3_b": jnp.zeros((d_model,), jnp.float32),
    }


def prepare_layer_params(raw):
    """One-time repack: transposed full-width weights, matrices in bf16 for the MXU,
    biases / LayerNorm params as (1, dim) f32 rows."""
    bf = lambda m: jnp.asarray(m, jnp.bfloat16)
    row = lambda b: jnp.asarray(b, jnp.float32).reshape(1, -1)
    E = raw["self_attn"]["out_w"].shape[0]
    sa, ca, ta = raw["self_attn"], raw["cross_attn"], raw["title_attn"]
    return {
        "s_wq": bf(sa["in_w"][:E].T), "s_bq": row(sa["in_b"][:E]),
        "s_wk": bf(sa["in_w"][E:2 * E].T), "s_bk": row(sa["in_b"][E:2 * E]),
        "s_wv": bf(sa["in_w"][2 * E:].T), "s_bv": row(sa["in_b"][2 * E:]),
        "s_wo": bf(sa["out_w"].T), "s_bo": row(sa["out_b"]),
        "ln1_g": row(raw["norm1_g"]), "ln1_b": row(raw["norm1_b"]),
        "t_wq": bf(ta["q_w"].T), "t_bq": row(ta["q_b"]),
        "t_wk": bf(ta["k_w"].T), "t_bk": row(ta["k_b"]),
        "c_wq": bf(ca["in_w"][:E].T), "c_bq": row(ca["in_b"][:E]),
        "c_wk": bf(ca["in_w"][E:2 * E].T), "c_bk": row(ca["in_b"][E:2 * E]),
        "c_wv": bf(ca["in_w"][2 * E:].T), "c_bv": row(ca["in_b"][2 * E:]),
        "c_wo": bf(ca["out_w"].T), "c_bo": row(ca["out_b"]),
        "ln2_g": row(raw["norm2_g"]), "ln2_b": row(raw["norm2_b"]),
        "f_w1": bf(raw["ffn_w1"].T), "f_b1": row(raw["ffn_b1"]),
        "f_w2": bf(raw["ffn_w2"].T), "f_b2": row(raw["ffn_b2"]),
        "ln3_g": row(raw["norm3_g"]), "ln3_b": row(raw["norm3_b"]),
    }


def init_decoder_params(key, d_model, dim_ff, n_layers, max_len=64):
    raw = init_layer_params(key, d_model, dim_ff)
    layer = prepare_layer_params(raw)
    # nn.ModuleList([copy.deepcopy(decoder_layer) ...]) -> identical initial weights
    return {
        "layers": [layer for _ in range(n_layers)],
        "pos_enc": make_positional_encoding(max_len, d_model),
    }


# ----------------------------------------------------------------------------
if __name__ == "__main__":
    B, NS, S, L, E, H, FF, NLAYERS = 2, 3, 8, 8, 64, 4, 128, 2

    key = jax.random.PRNGKey(0)
    k_mem, k_tgt, k_par = jax.random.split(key, 3)

    memory = jax.random.normal(k_mem, (B, NS, S, E), jnp.float32)
    tgt = jax.random.normal(k_tgt, (B, L, E), jnp.float32)

    # additive causal mask (0 on/below diagonal, -inf above), as callers build it
    tgt_mask = jnp.where(
        jnp.triu(jnp.ones((L, L), jnp.bool_), k=1), NEG_INF, 0.0
    ).astype(jnp.float32)

    tgt_key_padding_mask = jnp.zeros((B, L), jnp.bool_).at[1, L - 2:].set(True)

    memory_key_padding_mask = jnp.zeros((B, NS, S), jnp.bool_)
    memory_key_padding_mask = memory_key_padding_mask.at[0, 1, S - 2:].set(True)
    memory_key_padding_mask = memory_key_padding_mask.at[1, 2, :].set(True)  # fully padded

    params = init_decoder_params(k_par, E, FF, NLAYERS, max_len=64)

    fwd = jax.jit(functools.partial(decoder_forward, n_head=H))
    out = fwd(params, memory, tgt, tgt_mask,
              tgt_key_padding_mask, memory_key_padding_mask)
    out = jax.block_until_ready(out)

    assert out.shape == (B, L, E), out.shape
    assert bool(jnp.all(jnp.isfinite(out)))
    print("KERNEL_OK")
</pallas_src>

<mosaic_0001>
module attributes {stable_mosaic.version = 11 : i64} {
  func.func @_decoder_layer_kernel(%arg0: i32, %arg1: i32, %arg2: memref<1x8x64xf32, #tpu.memory_space<vmem>>, %arg3: memref<1x8x64xf32, #tpu.memory_space<vmem>>, %arg4: memref<8x8xf32, #tpu.memory_space<vmem>>, %arg5: memref<1x1x8xf32, #tpu.memory_space<vmem>>, %arg6: memref<1x3x64xf32, #tpu.memory_space<vmem>>, %arg7: memref<1x24x64xf32, #tpu.memory_space<vmem>>, %arg8: memref<1x1x3xf32, #tpu.memory_space<vmem>>, %arg9: memref<1x3x8xf32, #tpu.memory_space<vmem>>, %arg10: memref<1x1x3xf32, #tpu.memory_space<vmem>>, %arg11: memref<64x64xbf16, #tpu.memory_space<vmem>>, %arg12: memref<1x64xf32, #tpu.memory_space<vmem>>, %arg13: memref<64x64xbf16, #tpu.memory_space<vmem>>, %arg14: memref<1x64xf32, #tpu.memory_space<vmem>>, %arg15: memref<64x64xbf16, #tpu.memory_space<vmem>>, %arg16: memref<1x64xf32, #tpu.memory_space<vmem>>, %arg17: memref<64x64xbf16, #tpu.memory_space<vmem>>, %arg18: memref<1x64xf32, #tpu.memory_space<vmem>>, %arg19: memref<1x64xf32, #tpu.memory_space<vmem>>, %arg20: memref<1x64xf32, #tpu.memory_space<vmem>>, %arg21: memref<64x64xbf16, #tpu.memory_space<vmem>>, %arg22: memref<1x64xf32, #tpu.memory_space<vmem>>, %arg23: memref<64x64xbf16, #tpu.memory_space<vmem>>, %arg24: memref<1x64xf32, #tpu.memory_space<vmem>>, %arg25: memref<64x64xbf16, #tpu.memory_space<vmem>>, %arg26: memref<1x64xf32, #tpu.memory_space<vmem>>, %arg27: memref<64x64xbf16, #tpu.memory_space<vmem>>, %arg28: memref<1x64xf32, #tpu.memory_space<vmem>>, %arg29: memref<64x64xbf16, #tpu.memory_space<vmem>>, %arg30: memref<1x64xf32, #tpu.memory_space<vmem>>, %arg31: memref<64x64xbf16, #tpu.memory_space<vmem>>, %arg32: memref<1x64xf32, #tpu.memory_space<vmem>>, %arg33: memref<1x64xf32, #tpu.memory_space<vmem>>, %arg34: memref<1x64xf32, #tpu.memory_space<vmem>>, %arg35: memref<64x128xbf16, #tpu.memory_space<vmem>>, %arg36: memref<1x128xf32, #tpu.memory_space<vmem>>, %arg37: memref<128x64xbf16, #tpu.memory_space<vmem>>, %arg38: memref<1x64xf32, #tpu.memory_space<vmem>>, %arg39: memref<1x64xf32, #tpu.memory_space<vmem>>, %arg40: memref<1x64xf32, #tpu.memory_space<vmem>>, %arg41: memref<1x8x64xf32, #tpu.memory_space<vmem>>) attributes {dimension_semantics = [#tpu.dimension_semantics<parallel>, #tpu.dimension_semantics<parallel>], iteration_bounds = array<i64: 2, 1>, scalar_prefetch = 0 : i64, scratch_operands = 0 : i64, tpu.core_type = #tpu.core_type<tc>, window_params = [{transform_indices = @transform_0, window_bounds = array<i64: 1, 8, 64>}, {transform_indices = @transform_1, window_bounds = array<i64: 1, 8, 64>}, {transform_indices = @transform_2, window_bounds = array<i64: 8, 8>}, {transform_indices = @transform_3, window_bounds = array<i64: 1, 1, 8>}, {transform_indices = @transform_4, window_bounds = array<i64: 1, 3, 64>}, {transform_indices = @transform_5, window_bounds = array<i64: 1, 24, 64>}, {transform_indices = @transform_6, window_bounds = array<i64: 1, 1, 3>}, {transform_indices = @transform_7, window_bounds = array<i64: 1, 3, 8>}, {transform_indices = @transform_8, window_bounds = array<i64: 1, 1, 3>}, {pipeline_mode = #tpu.pipeline_mode<synchronous>, transform_indices = @transform_9, window_bounds = array<i64: 64, 64>}, {pipeline_mode = #tpu.pipeline_mode<synchronous>, transform_indices = @transform_10, window_bounds = array<i64: 1, 64>}, {pipeline_mode = #tpu.pipeline_mode<synchronous>, transform_indices = @transform_11, window_bounds = array<i64: 64, 64>}, {pipeline_mode = #tpu.pipeline_mode<synchronous>, transform_indices = @transform_12, window_bounds = array<i64: 1, 64>}, {pipeline_mode = #tpu.pipeline_mode<synchronous>, transform_indices = @transform_13, window_bounds = array<i64: 64, 64>}, {pipeline_mode = #tpu.pipeline_mode<synchronous>, transform_indices = @transform_14, window_bounds = array<i64: 1, 64>}, {pipeline_mode = #tpu.pipeline_mode<synchronous>, transform_indices = @transform_15, window_bounds = array<i64: 64, 64>}, {pipeline_mode = #tpu.pipeline_mode<synchronous>, transform_indices = @transform_16, window_bounds = array<i64: 1, 64>}, {pipeline_mode = #tpu.pipeline_mode<synchronous>, transform_indices = @transform_17, window_bounds = array<i64: 1, 64>}, {pipeline_mode = #tpu.pipeline_mode<synchronous>, transform_indices = @transform_18, window_bounds = array<i64: 1, 64>}, {pipeline_mode = #tpu.pipeline_mode<synchronous>, transform_indices = @transform_19, window_bounds = array<i64: 64, 64>}, {pipeline_mode = #tpu.pipeline_mode<synchronous>, transform_indices = @transform_20, window_bounds = array<i64: 1, 64>}, {pipeline_mode = #tpu.pipeline_mode<synchronous>, transform_indices = @transform_21, window_bounds = array<i64: 64, 64>}, {pipeline_mode = #tpu.pipeline_mode<synchronous>, transform_indices = @transform_22, window_bounds = array<i64: 1, 64>}, {pipeline_mode = #tpu.pipeline_mode<synchronous>, transform_indices = @transform_23, window_bounds = array<i64: 64, 64>}, {pipeline_mode = #tpu.pipeline_mode<synchronous>, transform_indices = @transform_24, window_bounds = array<i64: 1, 64>}, {pipeline_mode = #tpu.pipeline_mode<synchronous>, transform_indices = @transform_25, window_bounds = array<i64: 64, 64>}, {pipeline_mode = #tpu.pipeline_mode<synchronous>, transform_indices = @transform_26, window_bounds = array<i64: 1, 64>}, {pipeline_mode = #tpu.pipeline_mode<synchronous>, transform_indices = @transform_27, window_bounds = array<i64: 64, 64>}, {pipeline_mode = #tpu.pipeline_mode<synchronous>, transform_indices = @transform_28, window_bounds = array<i64: 1, 64>}, {pipeline_mode = #tpu.pipeline_mode<synchronous>, transform_indices = @transform_29, window_bounds = array<i64: 64, 64>}, {pipeline_mode = #tpu.pipeline_mode<synchronous>, transform_indices = @transform_30, window_bounds = array<i64: 1, 64>}, {pipeline_mode = #tpu.pipeline_mode<synchronous>, transform_indices = @transform_31, window_bounds = array<i64: 1, 64>}, {pipeline_mode = #tpu.pipeline_mode<synchronous>, transform_indices = @transform_32, window_bounds = array<i64: 1, 64>}, {pipeline_mode = #tpu.pipeline_mode<synchronous>, transform_indices = @transform_33, window_bounds = array<i64: 64, 128>}, {pipeline_mode = #tpu.pipeline_mode<synchronous>, transform_indices = @transform_34, window_bounds = array<i64: 1, 128>}, {pipeline_mode = #tpu.pipeline_mode<synchronous>, transform_indices = @transform_35, window_bounds = array<i64: 128, 64>}, {pipeline_mode = #tpu.pipeline_mode<synchronous>, transform_indices = @transform_36, window_bounds = array<i64: 1, 64>}, {pipeline_mode = #tpu.pipeline_mode<synchronous>, transform_indices = @transform_37, window_bounds = array<i64: 1, 64>}, {pipeline_mode = #tpu.pipeline_mode<synchronous>, transform_indices = @transform_38, window_bounds = array<i64: 1, 64>}, {transform_indices = @transform_39, window_bounds = array<i64: 1, 8, 64>}]} {
    %c0 = arith.constant 0 : index
    %c0_0 = arith.constant 0 : index
    %c0_1 = arith.constant 0 : index
    %0 = vector.load %arg2[%c0, %c0_0, %c0_1] : memref<1x8x64xf32, #tpu.memory_space<vmem>>, vector<1x8x64xf32>
    %1 = vector.shape_cast %0 : vector<1x8x64xf32> to vector<8x64xf32>
    %c0_2 = arith.constant 0 : index
    %c0_3 = arith.constant 0 : index
    %c0_4 = arith.constant 0 : index
    %2 = vector.load %arg3[%c0_2, %c0_3, %c0_4] : memref<1x8x64xf32, #tpu.memory_space<vmem>>, vector<1x8x64xf32>
    %3 = vector.shape_cast %2 : vector<1x8x64xf32> to vector<8x64xf32>
    %4 = arith.truncf %1 : vector<8x64xf32> to vector<8x64xbf16>
    %5 = arith.truncf %3 : vector<8x64xf32> to vector<8x64xbf16>
    %c0_5 = arith.constant 0 : index
    %c0_6 = arith.constant 0 : index
    %6 = vector.load %arg11[%c0_5, %c0_6] : memref<64x64xbf16, #tpu.memory_space<vmem>>, vector<64x64xbf16>
    %cst = arith.constant dense<0.000000e+00> : vector<8x64xf32>
    %7 = tpu.matmul %4, %6, %cst {dimension_numbers = #tpu.dot_dimension_numbers<[1], [0], [0], [1], [0, 0, 1, 1], [], []>} : vector<8x64xbf16>, vector<64x64xbf16>, vector<8x64xf32> -> vector<8x64xf32>
    %c0_7 = arith.constant 0 : index
    %c0_8 = arith.constant 0 : index
    %8 = vector.load %arg12[%c0_7, %c0_8] : memref<1x64xf32, #tpu.memory_space<vmem>>, vector<1x64xf32>
    %9 = vector.broadcast %8 : vector<1x64xf32> to vector<8x64xf32>
    %10 = arith.addf %7, %9 : vector<8x64xf32>
    %c0_9 = arith.constant 0 : index
    %c0_10 = arith.constant 0 : index
    %11 = vector.load %arg13[%c0_9, %c0_10] : memref<64x64xbf16, #tpu.memory_space<vmem>>, vector<64x64xbf16>
    %cst_11 = arith.constant dense<0.000000e+00> : vector<8x64xf32>
    %12 = tpu.matmul %5, %11, %cst_11 {dimension_numbers = #tpu.dot_dimension_numbers<[1], [0], [0], [1], [0, 0, 1, 1], [], []>} : vector<8x64xbf16>, vector<64x64xbf16>, vector<8x64xf32> -> vector<8x64xf32>
    %c0_12 = arith.constant 0 : index
    %c0_13 = arith.constant 0 : index
    %13 = vector.load %arg14[%c0_12, %c0_13] : memref<1x64xf32, #tpu.memory_space<vmem>>, vector<1x64xf32>
    %14 = vector.broadcast %13 : vector<1x64xf32> to vector<8x64xf32>
    %15 = arith.addf %12, %14 : vector<8x64xf32>
    %c0_14 = arith.constant 0 : index
    %c0_15 = arith.constant 0 : index
    %16 = vector.load %arg15[%c0_14, %c0_15] : memref<64x64xbf16, #tpu.memory_space<vmem>>, vector<64x64xbf16>
    %cst_16 = arith.constant dense<0.000000e+00> : vector<8x64xf32>
    %17 = tpu.matmul %5, %16, %cst_16 {dimension_numbers = #tpu.dot_dimension_numbers<[1], [0], [0], [1], [0, 0, 1, 1], [], []>} : vector<8x64xbf16>, vector<64x64xbf16>, vector<8x64xf32> -> vector<8x64xf32>
    %c0_17 = arith.constant 0 : index
    %c0_18 = arith.constant 0 : index
    %18 = vector.load %arg16[%c0_17, %c0_18] : memref<1x64xf32, #tpu.memory_space<vmem>>, vector<1x64xf32>
    %19 = vector.broadcast %18 : vector<1x64xf32> to vector<8x64xf32>
    %20 = arith.addf %17, %19 : vector<8x64xf32>
    %21 = vector.shape_cast %10 : vector<8x64xf32> to vector<8x4x16xf32>
    %22 = tpu.transpose %21, [1, 0, 2] : vector<8x4x16xf32> -> vector<4x8x16xf32>
    %23 = vector.shape_cast %15 : vector<8x64xf32> to vector<8x4x16xf32>
    %24 = tpu.transpose %23, [1, 0, 2] : vector<8x4x16xf32> -> vector<4x8x16xf32>
    "tpu.trace_start"() <{level = 10 : i32, message = "hld,hsd->hls"}> : () -> ()
    %cst_19 = arith.constant dense<0.000000e+00> : vector<4x8x8xf32>
    %25 = tpu.matmul %22, %24, %cst_19 {dimension_numbers = #tpu.dot_dimension_numbers<[2], [2], [1], [1], [0, 0, 0, 1, 1, 1], [0], [0]>} : vector<4x8x16xf32>, vector<4x8x16xf32>, vector<4x8x8xf32> -> vector<4x8x8xf32>
    "tpu.trace_stop"() : () -> ()
    %cst_20 = arith.constant 2.500000e-01 : f32
    %26 = vector.broadcast %cst_20 : f32 to vector<4x8x8xf32>
    %27 = arith.mulf %25, %26 : vector<4x8x8xf32>
    %c0_21 = arith.constant 0 : index
    %c0_22 = arith.constant 0 : index
    %28 = vector.load %arg4[%c0_21, %c0_22] : memref<8x8xf32, #tpu.memory_space<vmem>>, vector<8x8xf32>
    %cst_23 = arith.constant -1.000000e+30 : f32
    %29 = vector.broadcast %cst_23 : f32 to vector<8x8xf32>
    %30 = arith.maximumf %28, %29 : vector<8x8xf32>
    %c0_24 = arith.constant 0 : index
    %c0_25 = arith.constant 0 : index
    %c0_26 = arith.constant 0 : index
    %31 = vector.load %arg5[%c0_24, %c0_25, %c0_26] : memref<1x1x8xf32, #tpu.memory_space<vmem>>, vector<1x1x8xf32>
    %32 = vector.shape_cast %31 : vector<1x1x8xf32> to vector<1x8xf32>
    %33 = vector.broadcast %32 : vector<1x8xf32> to vector<8x8xf32>
    %34 = arith.addf %30, %33 : vector<8x8xf32>
    %35 = vector.shape_cast %34 : vector<8x8xf32> to vector<1x8x8xf32>
    %36 = vector.broadcast %35 : vector<1x8x8xf32> to vector<4x8x8xf32>
    %37 = arith.addf %27, %36 : vector<4x8x8xf32>
    %cst_27 = arith.constant dense<0xFF800000> : vector<4x8xf32>
    %38 = vector.multi_reduction <maximumf>, %37, %cst_27 [2] : vector<4x8x8xf32> to vector<4x8xf32>
    %39 = vector.shape_cast %38 : vector<4x8xf32> to vector<4x8x1xf32>
    %40 = vector.broadcast %39 : vector<4x8x1xf32> to vector<4x8x8xf32>
    %41 = arith.subf %37, %40 : vector<4x8x8xf32>
    %42 = math.exp %41 : vector<4x8x8xf32>
    %cst_28 = arith.constant dense<0.000000e+00> : vector<4x8xf32>
    %43 = vector.multi_reduction <add>, %42, %cst_28 [2] : vector<4x8x8xf32> to vector<4x8xf32>
    %44 = vector.shape_cast %43 : vector<4x8xf32> to vector<4x8x1xf32>
    %45 = tpu.reciprocal %44 {approx = true} : vector<4x8x1xf32> -> vector<4x8x1xf32>
    %46 = vector.broadcast %45 : vector<4x8x1xf32> to vector<4x8x8xf32>
    %47 = arith.mulf %42, %46 : vector<4x8x8xf32>
    %48 = arith.truncf %47 : vector<4x8x8xf32> to vector<4x8x8xbf16>
    %49 = vector.shape_cast %20 : vector<8x64xf32> to vector<8x4x16xf32>
    %50 = tpu.transpose %49, [1, 0, 2] : vector<8x4x16xf32> -> vector<4x8x16xf32>
    %51 = arith.truncf %50 : vector<4x8x16xf32> to vector<4x8x16xbf16>
    "tpu.trace_start"() <{level = 10 : i32, message = "hls,hsd->hld"}> : () -> ()
    %cst_29 = arith.constant dense<0.000000e+00> : vector<4x8x16xf32>
    %52 = tpu.matmul %48, %51, %cst_29 {dimension_numbers = #tpu.dot_dimension_numbers<[2], [1], [1], [2], [0, 0, 0, 1, 1, 2], [0], [0]>} : vector<4x8x8xbf16>, vector<4x8x16xbf16>, vector<4x8x16xf32> -> vector<4x8x16xf32>
    "tpu.trace_stop"() : () -> ()
    %53 = tpu.transpose %52, [1, 0, 2] : vector<4x8x16xf32> -> vector<8x4x16xf32>
    %54 = vector.shape_cast %53 : vector<8x4x16xf32> to vector<8x64xf32>
    %55 = arith.truncf %54 : vector<8x64xf32> to vector<8x64xbf16>
    %c0_30 = arith.constant 0 : index
    %c0_31 = arith.constant 0 : index
    %56 = vector.load %arg17[%c0_30, %c0_31] : memref<64x64xbf16, #tpu.memory_space<vmem>>, vector<64x64xbf16>
    %cst_32 = arith.constant dense<0.000000e+00> : vector<8x64xf32>
    %57 = tpu.matmul %55, %56, %cst_32 {dimension_numbers = #tpu.dot_dimension_numbers<[1], [0], [0], [1], [0, 0, 1, 1], [], []>} : vector<8x64xbf16>, vector<64x64xbf16>, vector<8x64xf32> -> vector<8x64xf32>
    %c0_33 = arith.constant 0 : index
    %c0_34 = arith.constant 0 : index
    %58 = vector.load %arg18[%c0_33, %c0_34] : memref<1x64xf32, #tpu.memory_space<vmem>>, vector<1x64xf32>
    %59 = vector.broadcast %58 : vector<1x64xf32> to vector<8x64xf32>
    %60 = arith.addf %57, %59 : vector<8x64xf32>
    %c0_35 = arith.constant 0 : index
    %c0_36 = arith.constant 0 : index
    %61 = vector.load %arg19[%c0_35, %c0_36] : memref<1x64xf32, #tpu.memory_space<vmem>>, vector<1x64xf32>
    %c0_37 = arith.constant 0 : index
    %c0_38 = arith.constant 0 : index
    %62 = vector.load %arg20[%c0_37, %c0_38] : memref<1x64xf32, #tpu.memory_space<vmem>>, vector<1x64xf32>
    %63 = arith.addf %1, %60 : vector<8x64xf32>
    %cst_39 = arith.constant dense<0.000000e+00> : vector<8xf32>
    %64 = vector.multi_reduction <add>, %63, %cst_39 [1] : vector<8x64xf32> to vector<8xf32>
    %65 = vector.shape_cast %64 : vector<8xf32> to vector<8x1xf32>
    %cst_40 = arith.constant 6.400000e+01 : f32
    %66 = vector.broadcast %cst_40 : f32 to vector<8x1xf32>
    %67 = arith.divf %65, %66 : vector<8x1xf32>
    %68 = vector.broadcast %67 : vector<8x1xf32> to vector<8x64xf32>
    %69 = arith.subf %63, %68 : vector<8x64xf32>
    %70 = arith.mulf %69, %69 : vector<8x64xf32>
    %cst_41 = arith.constant dense<0.000000e+00> : vector<8xf32>
    %71 = vector.multi_reduction <add>, %70, %cst_41 [1] : vector<8x64xf32> to vector<8xf32>
    %72 = vector.shape_cast %71 : vector<8xf32> to vector<8x1xf32>
    %cst_42 = arith.constant 6.400000e+01 : f32
    %73 = vector.broadcast %cst_42 : f32 to vector<8x1xf32>
    %74 = arith.divf %72, %73 : vector<8x1xf32>
    %cst_43 = arith.constant 9.99999974E-6 : f32
    %75 = vector.broadcast %cst_43 : f32 to vector<8x1xf32>
    %76 = arith.addf %74, %75 : vector<8x1xf32>
    %77 = math.rsqrt %76 : vector<8x1xf32>
    %78 = vector.broadcast %77 : vector<8x1xf32> to vector<8x64xf32>
    %79 = arith.mulf %69, %78 : vector<8x64xf32>
    %80 = vector.broadcast %61 : vector<1x64xf32> to vector<8x64xf32>
    %81 = arith.mulf %79, %80 : vector<8x64xf32>
    %82 = vector.broadcast %62 : vector<1x64xf32> to vector<8x64xf32>
    %83 = arith.addf %81, %82 : vector<8x64xf32>
    %84 = arith.truncf %83 : vector<8x64xf32> to vector<8x64xbf16>
    %c0_44 = arith.constant 0 : index
    %c0_45 = arith.constant 0 : index
    %c0_46 = arith.constant 0 : index
    %85 = vector.load %arg6[%c0_44, %c0_45, %c0_46] : memref<1x3x64xf32, #tpu.memory_space<vmem>>, vector<1x3x64xf32>
    %86 = vector.shape_cast %85 : vector<1x3x64xf32> to vector<3x64xf32>
    %87 = arith.truncf %86 : vector<3x64xf32> to vector<3x64xbf16>
    %c0_47 = arith.constant 0 : index
    %c0_48 = arith.constant 0 : index
    %88 = vector.load %arg21[%c0_47, %c0_48] : memref<64x64xbf16, #tpu.memory_space<vmem>>, vector<64x64xbf16>
    %cst_49 = arith.constant dense<0.000000e+00> : vector<8x64xf32>
    %89 = tpu.matmul %84, %88, %cst_49 {dimension_numbers = #tpu.dot_dimension_numbers<[1], [0], [0], [1], [0, 0, 1, 1], [], []>} : vector<8x64xbf16>, vector<64x64xbf16>, vector<8x64xf32> -> vector<8x64xf32>
    %c0_50 = arith.constant 0 : index
    %c0_51 = arith.constant 0 : index
    %90 = vector.load %arg22[%c0_50, %c0_51] : memref<1x64xf32, #tpu.memory_space<vmem>>, vector<1x64xf32>
    %91 = vector.broadcast %90 : vector<1x64xf32> to vector<8x64xf32>
    %92 = arith.addf %89, %91 : vector<8x64xf32>
    %c0_52 = arith.constant 0 : index
    %c0_53 = arith.constant 0 : index
    %93 = vector.load %arg23[%c0_52, %c0_53] : memref<64x64xbf16, #tpu.memory_space<vmem>>, vector<64x64xbf16>
    %cst_54 = arith.constant dense<0.000000e+00> : vector<3x64xf32>
    %94 = tpu.matmul %87, %93, %cst_54 {dimension_numbers = #tpu.dot_dimension_numbers<[1], [0], [0], [1], [0, 0, 1, 1], [], []>} : vector<3x64xbf16>, vector<64x64xbf16>, vector<3x64xf32> -> vector<3x64xf32>
    %c0_55 = arith.constant 0 : index
    %c0_56 = arith.constant 0 : index
    %95 = vector.load %arg24[%c0_55, %c0_56] : memref<1x64xf32, #tpu.memory_space<vmem>>, vector<1x64xf32>
    %96 = vector.broadcast %95 : vector<1x64xf32> to vector<3x64xf32>
    %97 = arith.addf %94, %96 : vector<3x64xf32>
    %98 = vector.shape_cast %92 : vector<8x64xf32> to vector<8x4x16xf32>
    %99 = tpu.transpose %98, [1, 0, 2] : vector<8x4x16xf32> -> vector<4x8x16xf32>
    %100 = vector.shape_cast %97 : vector<3x64xf32> to vector<3x4x16xf32>
    %101 = tpu.transpose %100, [1, 0, 2] : vector<3x4x16xf32> -> vector<4x3x16xf32>
    "tpu.trace_start"() <{level = 10 : i32, message = "hld,hnd->hln"}> : () -> ()
    %cst_57 = arith.constant dense<0.000000e+00> : vector<4x8x3xf32>
    %102 = tpu.matmul %99, %101, %cst_57 {dimension_numbers = #tpu.dot_dimension_numbers<[2], [2], [1], [1], [0, 0, 0, 1, 1, 1], [0], [0]>} : vector<4x8x16xf32>, vector<4x3x16xf32>, vector<4x8x3xf32> -> vector<4x8x3xf32>
    "tpu.trace_stop"() : () -> ()
    %cst_58 = arith.constant 2.500000e-01 : f32
    %103 = vector.broadcast %cst_58 : f32 to vector<4x8x3xf32>
    %104 = arith.mulf %102, %103 : vector<4x8x3xf32>
    %c0_59 = arith.constant 0 : index
    %c0_60 = arith.constant 0 : index
    %c0_61 = arith.constant 0 : index
    %105 = vector.load %arg8[%c0_59, %c0_60, %c0_61] : memref<1x1x3xf32, #tpu.memory_space<vmem>>, vector<1x1x3xf32>
    %106 = vector.shape_cast %105 : vector<1x1x3xf32> to vector<1x3xf32>
    %107 = vector.shape_cast %106 : vector<1x3xf32> to vector<1x1x3xf32>
    %108 = vector.broadcast %107 : vector<1x1x3xf32> to vector<4x8x3xf32>
    %109 = arith.addf %104, %108 : vector<4x8x3xf32>
    %cst_62 = arith.constant dense<0xFF800000> : vector<4x8xf32>
    %110 = vector.multi_reduction <maximumf>, %109, %cst_62 [2] : vector<4x8x3xf32> to vector<4x8xf32>
    %111 = vector.shape_cast %110 : vector<4x8xf32> to vector<4x8x1xf32>
    %112 = vector.broadcast %111 : vector<4x8x1xf32> to vector<4x8x3xf32>
    %113 = arith.subf %109, %112 : vector<4x8x3xf32>
    %114 = math.exp %113 : vector<4x8x3xf32>
    %cst_63 = arith.constant dense<0.000000e+00> : vector<4x8xf32>
    %115 = vector.multi_reduction <add>, %114, %cst_63 [2] : vector<4x8x3xf32> to vector<4x8xf32>
    %116 = vector.shape_cast %115 : vector<4x8xf32> to vector<4x8x1xf32>
    %117 = tpu.reciprocal %116 {approx = true} : vector<4x8x1xf32> -> vector<4x8x1xf32>
    %118 = vector.broadcast %117 : vector<4x8x1xf32> to vector<4x8x3xf32>
    %119 = arith.mulf %114, %118 : vector<4x8x3xf32>
    %cst_64 = arith.constant dense<0.000000e+00> : vector<8x3xf32>
    %120 = vector.multi_reduction <add>, %119, %cst_64 [0] : vector<4x8x3xf32> to vector<8x3xf32>
    %cst_65 = arith.constant 4.000000e+00 : f32
    %121 = vector.broadcast %cst_65 : f32 to vector<8x3xf32>
    %122 = arith.divf %120, %121 : vector<8x3xf32>
    %c0_66 = arith.constant 0 : index
    %c0_67 = arith.constant 0 : index
    %c0_68 = arith.constant 0 : index
    %123 = vector.load %arg7[%c0_66, %c0_67, %c0_68] : memref<1x24x64xf32, #tpu.memory_space<vmem>>, vector<1x24x64xf32>
    %124 = vector.shape_cast %123 : vector<1x24x64xf32> to vector<24x64xf32>
    %125 = arith.truncf %124 : vector<24x64xf32> to vector<24x64xbf16>
    %c0_69 = arith.constant 0 : index
    %c0_70 = arith.constant 0 : index
    %126 = vector.load %arg25[%c0_69, %c0_70] : memref<64x64xbf16, #tpu.memory_space<vmem>>, vector<64x64xbf16>
    %cst_71 = arith.constant dense<0.000000e+00> : vector<8x64xf32>
    %127 = tpu.matmul %84, %126, %cst_71 {dimension_numbers = #tpu.dot_dimension_numbers<[1], [0], [0], [1], [0, 0, 1, 1], [], []>} : vector<8x64xbf16>, vector<64x64xbf16>, vector<8x64xf32> -> vector<8x64xf32>
    %c0_72 = arith.constant 0 : index
    %c0_73 = arith.constant 0 : index
    %128 = vector.load %arg26[%c0_72, %c0_73] : memref<1x64xf32, #tpu.memory_space<vmem>>, vector<1x64xf32>
    %129 = vector.broadcast %128 : vector<1x64xf32> to vector<8x64xf32>
    %130 = arith.addf %127, %129 : vector<8x64xf32>
    %c0_74 = arith.constant 0 : index
    %c0_75 = arith.constant 0 : index
    %131 = vector.load %arg27[%c0_74, %c0_75] : memref<64x64xbf16, #tpu.memory_space<vmem>>, vector<64x64xbf16>
    %cst_76 = arith.constant dense<0.000000e+00> : vector<24x64xf32>
    %132 = tpu.matmul %125, %131, %cst_76 {dimension_numbers = #tpu.dot_dimension_numbers<[1], [0], [0], [1], [0, 0, 1, 1], [], []>} : vector<24x64xbf16>, vector<64x64xbf16>, vector<24x64xf32> -> vector<24x64xf32>
    %c0_77 = arith.constant 0 : index
    %c0_78 = arith.constant 0 : index
    %133 = vector.load %arg28[%c0_77, %c0_78] : memref<1x64xf32, #tpu.memory_space<vmem>>, vector<1x64xf32>
    %134 = vector.broadcast %133 : vector<1x64xf32> to vector<24x64xf32>
    %135 = arith.addf %132, %134 : vector<24x64xf32>
    %c0_79 = arith.constant 0 : index
    %c0_80 = arith.constant 0 : index
    %136 = vector.load %arg29[%c0_79, %c0_80] : memref<64x64xbf16, #tpu.memory_space<vmem>>, vector<64x64xbf16>
    %cst_81 = arith.constant dense<0.000000e+00> : vector<24x64xf32>
    %137 = tpu.matmul %125, %136, %cst_81 {dimension_numbers = #tpu.dot_dimension_numbers<[1], [0], [0], [1], [0, 0, 1, 1], [], []>} : vector<24x64xbf16>, vector<64x64xbf16>, vector<24x64xf32> -> vector<24x64xf32>
    %c0_82 = arith.constant 0 : index
    %c0_83 = arith.constant 0 : index
    %138 = vector.load %arg30[%c0_82, %c0_83] : memref<1x64xf32, #tpu.memory_space<vmem>>, vector<1x64xf32>
    %139 = vector.broadcast %138 : vector<1x64xf32> to vector<24x64xf32>
    %140 = arith.addf %137, %139 : vector<24x64xf32>
    %141 = vector.shape_cast %130 : vector<8x64xf32> to vector<8x4x16xf32>
    %142 = tpu.transpose %141, [1, 0, 2] : vector<8x4x16xf32> -> vector<4x8x16xf32>
    %143 = vector.shape_cast %135 : vector<24x64xf32> to vector<24x4x16xf32>
    %144 = tpu.transpose %143, [1, 0, 2] : vector<24x4x16xf32> -> vector<4x24x16xf32>
    "tpu.trace_start"() <{level = 10 : i32, message = "hld,hsd->hls"}> : () -> ()
    %cst_84 = arith.constant dense<0.000000e+00> : vector<4x8x24xf32>
    %145 = tpu.matmul %142, %144, %cst_84 {dimension_numbers = #tpu.dot_dimension_numbers<[2], [2], [1], [1], [0, 0, 0, 1, 1, 1], [0], [0]>} : vector<4x8x16xf32>, vector<4x24x16xf32>, vector<4x8x24xf32> -> vector<4x8x24xf32>
    "tpu.trace_stop"() : () -> ()
    %cst_85 = arith.constant 2.500000e-01 : f32
    %146 = vector.broadcast %cst_85 : f32 to vector<4x8x24xf32>
    %147 = arith.mulf %145, %146 : vector<4x8x24xf32>
    %c0_86 = arith.constant 0 : index
    %c0_87 = arith.constant 0 : index
    %c0_88 = arith.constant 0 : index
    %148 = vector.load %arg10[%c0_86, %c0_87, %c0_88] : memref<1x1x3xf32, #tpu.memory_space<vmem>>, vector<1x1x3xf32>
    %149 = vector.shape_cast %148 : vector<1x1x3xf32> to vector<1x3xf32>
    %150 = vector.broadcast %149 : vector<1x3xf32> to vector<8x3xf32>
    %151 = arith.mulf %122, %150 : vector<8x3xf32>
    %c0_89 = arith.constant 0 : index
    %c0_90 = arith.constant 0 : index
    %c0_91 = arith.constant 0 : index
    %152 = vector.load %arg9[%c0_89, %c0_90, %c0_91] : memref<1x3x8xf32, #tpu.memory_space<vmem>>, vector<1x3x8xf32>
    %153 = vector.shape_cast %152 : vector<1x3x8xf32> to vector<3x8xf32>
    %154 = vector.extract_strided_slice %147 {offsets = [0, 0, 0], sizes = [4, 8, 8], strides = [1, 1, 1]} : vector<4x8x24xf32> to vector<4x8x8xf32>
    %155 = vector.extract_strided_slice %153 {offsets = [0, 0], sizes = [1, 8], strides = [1, 1]} : vector<3x8xf32> to vector<1x8xf32>
    %156 = vector.shape_cast %155 : vector<1x8xf32> to vector<1x1x8xf32>
    %157 = vector.broadcast %156 : vector<1x1x8xf32> to vector<4x8x8xf32>
    %158 = arith.addf %154, %157 : vector<4x8x8xf32>
    %cst_92 = arith.constant dense<0xFF800000> : vector<4x8xf32>
    %159 = vector.multi_reduction <maximumf>, %158, %cst_92 [2] : vector<4x8x8xf32> to vector<4x8xf32>
    %160 = vector.shape_cast %159 : vector<4x8xf32> to vector<4x8x1xf32>
    %161 = vector.broadcast %160 : vector<4x8x1xf32> to vector<4x8x8xf32>
    %162 = arith.subf %158, %161 : vector<4x8x8xf32>
    %163 = math.exp %162 : vector<4x8x8xf32>
    %cst_93 = arith.constant dense<0.000000e+00> : vector<4x8xf32>
    %164 = vector.multi_reduction <add>, %163, %cst_93 [2] : vector<4x8x8xf32> to vector<4x8xf32>
    %165 = vector.shape_cast %164 : vector<4x8xf32> to vector<4x8x1xf32>
    %166 = tpu.reciprocal %165 {approx = true} : vector<4x8x1xf32> -> vector<4x8x1xf32>
    %167 = vector.broadcast %166 : vector<4x8x1xf32> to vector<4x8x8xf32>
    %168 = arith.mulf %163, %167 : vector<4x8x8xf32>
    %169 = vector.extract_strided_slice %151 {offsets = [0, 0], sizes = [8, 1], strides = [1, 1]} : vector<8x3xf32> to vector<8x1xf32>
    %170 = vector.shape_cast %169 : vector<8x1xf32> to vector<1x8x1xf32>
    %171 = vector.broadcast %170 : vector<1x8x1xf32> to vector<4x8x8xf32>
    %172 = arith.mulf %168, %171 : vector<4x8x8xf32>
    %173 = vector.extract_strided_slice %147 {offsets = [0, 0, 8], sizes = [4, 8, 8], strides = [1, 1, 1]} : vector<4x8x24xf32> to vector<4x8x8xf32>
    %174 = vector.extract_strided_slice %153 {offsets = [1, 0], sizes = [1, 8], strides = [1, 1]} : vector<3x8xf32> to vector<1x8xf32>
    %175 = vector.shape_cast %174 : vector<1x8xf32> to vector<1x1x8xf32>
    %176 = vector.broadcast %175 : vector<1x1x8xf32> to vector<4x8x8xf32>
    %177 = arith.addf %173, %176 : vector<4x8x8xf32>
    %cst_94 = arith.constant dense<0xFF800000> : vector<4x8xf32>
    %178 = vector.multi_reduction <maximumf>, %177, %cst_94 [2] : vector<4x8x8xf32> to vector<4x8xf32>
    %179 = vector.shape_cast %178 : vector<4x8xf32> to vector<4x8x1xf32>
    %180 = vector.broadcast %179 : vector<4x8x1xf32> to vector<4x8x8xf32>
    %181 = arith.subf %177, %180 : vector<4x8x8xf32>
    %182 = math.exp %181 : vector<4x8x8xf32>
    %cst_95 = arith.constant dense<0.000000e+00> : vector<4x8xf32>
    %183 = vector.multi_reduction <add>, %182, %cst_95 [2] : vector<4x8x8xf32> to vector<4x8xf32>
    %184 = vector.shape_cast %183 : vector<4x8xf32> to vector<4x8x1xf32>
    %185 = tpu.reciprocal %184 {approx = true} : vector<4x8x1xf32> -> vector<4x8x1xf32>
    %186 = vector.broadcast %185 : vector<4x8x1xf32> to vector<4x8x8xf32>
    %187 = arith.mulf %182, %186 : vector<4x8x8xf32>
    %188 = vector.extract_strided_slice %151 {offsets = [0, 1], sizes = [8, 1], strides = [1, 1]} : vector<8x3xf32> to vector<8x1xf32>
    %189 = vector.shape_cast %188 : vector<8x1xf32> to vector<1x8x1xf32>
    %190 = vector.broadcast %189 : vector<1x8x1xf32> to vector<4x8x8xf32>
    %191 = arith.mulf %187, %190 : vector<4x8x8xf32>
    %192 = vector.extract_strided_slice %147 {offsets = [0, 0, 16], sizes = [4, 8, 8], strides = [1, 1, 1]} : vector<4x8x24xf32> to vector<4x8x8xf32>
    %193 = vector.extract_strided_slice %153 {offsets = [2, 0], sizes = [1, 8], strides = [1, 1]} : vector<3x8xf32> to vector<1x8xf32>
    %194 = vector.shape_cast %193 : vector<1x8xf32> to vector<1x1x8xf32>
    %195 = vector.broadcast %194 : vector<1x1x8xf32> to vector<4x8x8xf32>
    %196 = arith.addf %192, %195 : vector<4x8x8xf32>
    %cst_96 = arith.constant dense<0xFF800000> : vector<4x8xf32>
    %197 = vector.multi_reduction <maximumf>, %196, %cst_96 [2] : vector<4x8x8xf32> to vector<4x8xf32>
    %198 = vector.shape_cast %197 : vector<4x8xf32> to vector<4x8x1xf32>
    %199 = vector.broadcast %198 : vector<4x8x1xf32> to vector<4x8x8xf32>
    %200 = arith.subf %196, %199 : vector<4x8x8xf32>
    %201 = math.exp %200 : vector<4x8x8xf32>
    %cst_97 = arith.constant dense<0.000000e+00> : vector<4x8xf32>
    %202 = vector.multi_reduction <add>, %201, %cst_97 [2] : vector<4x8x8xf32> to vector<4x8xf32>
    %203 = vector.shape_cast %202 : vector<4x8xf32> to vector<4x8x1xf32>
    %204 = tpu.reciprocal %203 {approx = true} : vector<4x8x1xf32> -> vector<4x8x1xf32>
    %205 = vector.broadcast %204 : vector<4x8x1xf32> to vector<4x8x8xf32>
    %206 = arith.mulf %201, %205 : vector<4x8x8xf32>
    %207 = vector.extract_strided_slice %151 {offsets = [0, 2], sizes = [8, 1], strides = [1, 1]} : vector<8x3xf32> to vector<8x1xf32>
    %208 = vector.shape_cast %207 : vector<8x1xf32> to vector<1x8x1xf32>
    %209 = vector.broadcast %208 : vector<1x8x1xf32> to vector<4x8x8xf32>
    %210 = arith.mulf %206, %209 : vector<4x8x8xf32>
    %211 = tpu.concatenate %172, %191, %210 in 2 : vector<4x8x8xf32>, vector<4x8x8xf32>, vector<4x8x8xf32> -> vector<4x8x24xf32>
    %212 = arith.truncf %211 : vector<4x8x24xf32> to vector<4x8x24xbf16>
    %213 = vector.shape_cast %140 : vector<24x64xf32> to vector<24x4x16xf32>
    %214 = tpu.transpose %213, [1, 0, 2] : vector<24x4x16xf32> -> vector<4x24x16xf32>
    %215 = arith.truncf %214 : vector<4x24x16xf32> to vector<4x24x16xbf16>
    "tpu.trace_start"() <{level = 10 : i32, message = "hls,hsd->hld"}> : () -> ()
    %cst_98 = arith.constant dense<0.000000e+00> : vector<4x8x16xf32>
    %216 = tpu.matmul %212, %215, %cst_98 {dimension_numbers = #tpu.dot_dimension_numbers<[2], [1], [1], [2], [0, 0, 0, 1, 1, 2], [0], [0]>} : vector<4x8x24xbf16>, vector<4x24x16xbf16>, vector<4x8x16xf32> -> vector<4x8x16xf32>
    "tpu.trace_stop"() : () -> ()
    %217 = tpu.transpose %216, [1, 0, 2] : vector<4x8x16xf32> -> vector<8x4x16xf32>
    %218 = vector.shape_cast %217 : vector<8x4x16xf32> to vector<8x64xf32>
    %cst_99 = arith.constant dense<0.000000e+00> : vector<8xf32>
    %219 = vector.multi_reduction <add>, %151, %cst_99 [1] : vector<8x3xf32> to vector<8xf32>
    %220 = vector.shape_cast %219 : vector<8xf32> to vector<8x1xf32>
    %221 = arith.truncf %218 : vector<8x64xf32> to vector<8x64xbf16>
    %c0_100 = arith.constant 0 : index
    %c0_101 = arith.constant 0 : index
    %222 = vector.load %arg31[%c0_100, %c0_101] : memref<64x64xbf16, #tpu.memory_space<vmem>>, vector<64x64xbf16>
    %cst_102 = arith.constant dense<0.000000e+00> : vector<8x64xf32>
    %223 = tpu.matmul %221, %222, %cst_102 {dimension_numbers = #tpu.dot_dimension_numbers<[1], [0], [0], [1], [0, 0, 1, 1], [], []>} : vector<8x64xbf16>, vector<64x64xbf16>, vector<8x64xf32> -> vector<8x64xf32>
    %c0_103 = arith.constant 0 : index
    %c0_104 = arith.constant 0 : index
    %224 = vector.load %arg32[%c0_103, %c0_104] : memref<1x64xf32, #tpu.memory_space<vmem>>, vector<1x64xf32>
    %225 = vector.broadcast %224 : vector<1x64xf32> to vector<8x64xf32>
    %226 = vector.broadcast %220 : vector<8x1xf32> to vector<8x64xf32>
    %227 = arith.mulf %225, %226 : vector<8x64xf32>
    %228 = arith.addf %223, %227 : vector<8x64xf32>
    %c0_105 = arith.constant 0 : index
    %c0_106 = arith.constant 0 : index
    %229 = vector.load %arg33[%c0_105, %c0_106] : memref<1x64xf32, #tpu.memory_space<vmem>>, vector<1x64xf32>
    %c0_107 = arith.constant 0 : index
    %c0_108 = arith.constant 0 : index
    %230 = vector.load %arg34[%c0_107, %c0_108] : memref<1x64xf32, #tpu.memory_space<vmem>>, vector<1x64xf32>
    %231 = arith.addf %83, %228 : vector<8x64xf32>
    %cst_109 = arith.constant dense<0.000000e+00> : vector<8xf32>
    %232 = vector.multi_reduction <add>, %231, %cst_109 [1] : vector<8x64xf32> to vector<8xf32>
    %233 = vector.shape_cast %232 : vector<8xf32> to vector<8x1xf32>
    %cst_110 = arith.constant 6.400000e+01 : f32
    %234 = vector.broadcast %cst_110 : f32 to vector<8x1xf32>
    %235 = arith.divf %233, %234 : vector<8x1xf32>
    %236 = vector.broadcast %235 : vector<8x1xf32> to vector<8x64xf32>
    %237 = arith.subf %231, %236 : vector<8x64xf32>
    %238 = arith.mulf %237, %237 : vector<8x64xf32>
    %cst_111 = arith.constant dense<0.000000e+00> : vector<8xf32>
    %239 = vector.multi_reduction <add>, %238, %cst_111 [1] : vector<8x64xf32> to vector<8xf32>
    %240 = vector.shape_cast %239 : vector<8xf32> to vector<8x1xf32>
    %cst_112 = arith.constant 6.400000e+01 : f32
    %241 = vector.broadcast %cst_112 : f32 to vector<8x1xf32>
    %242 = arith.divf %240, %241 : vector<8x1xf32>
    %cst_113 = arith.constant 9.99999974E-6 : f32
    %243 = vector.broadcast %cst_113 : f32 to vector<8x1xf32>
    %244 = arith.addf %242, %243 : vector<8x1xf32>
    %245 = math.rsqrt %244 : vector<8x1xf32>
    %246 = vector.broadcast %245 : vector<8x1xf32> to vector<8x64xf32>
    %247 = arith.mulf %237, %246 : vector<8x64xf32>
    %248 = vector.broadcast %229 : vector<1x64xf32> to vector<8x64xf32>
    %249 = arith.mulf %247, %248 : vector<8x64xf32>
    %250 = vector.broadcast %230 : vector<1x64xf32> to vector<8x64xf32>
    %251 = arith.addf %249, %250 : vector<8x64xf32>
    %252 = arith.truncf %251 : vector<8x64xf32> to vector<8x64xbf16>
    %c0_114 = arith.constant 0 : index
    %c0_115 = arith.constant 0 : index
    %253 = vector.load %arg35[%c0_114, %c0_115] : memref<64x128xbf16, #tpu.memory_space<vmem>>, vector<64x128xbf16>
    %cst_116 = arith.constant dense<0.000000e+00> : vector<8x128xf32>
    %254 = tpu.matmul %252, %253, %cst_116 {dimension_numbers = #tpu.dot_dimension_numbers<[1], [0], [0], [1], [0, 0, 1, 1], [], []>} : vector<8x64xbf16>, vector<64x128xbf16>, vector<8x128xf32> -> vector<8x128xf32>
    %c0_117 = arith.constant 0 : index
    %c0_118 = arith.constant 0 : index
    %255 = vector.load %arg36[%c0_117, %c0_118] : memref<1x128xf32, #tpu.memory_space<vmem>>, vector<1x128xf32>
    %256 = vector.broadcast %255 : vector<1x128xf32> to vector<8x128xf32>
    %257 = arith.addf %254, %256 : vector<8x128xf32>
    %cst_119 = arith.constant 0.000000e+00 : f32
    %258 = vector.broadcast %cst_119 : f32 to vector<8x128xf32>
    %259 = arith.maximumf %257, %258 : vector<8x128xf32>
    %260 = arith.truncf %259 : vector<8x128xf32> to vector<8x128xbf16>
    %c0_120 = arith.constant 0 : index
    %c0_121 = arith.constant 0 : index
    %261 = vector.load %arg37[%c0_120, %c0_121] : memref<128x64xbf16, #tpu.memory_space<vmem>>, vector<128x64xbf16>
    %cst_122 = arith.constant dense<0.000000e+00> : vector<8x64xf32>
    %262 = tpu.matmul %260, %261, %cst_122 {dimension_numbers = #tpu.dot_dimension_numbers<[1], [0], [0], [1], [0, 0, 1, 1], [], []>} : vector<8x128xbf16>, vector<128x64xbf16>, vector<8x64xf32> -> vector<8x64xf32>
    %c0_123 = arith.constant 0 : index
    %c0_124 = arith.constant 0 : index
    %263 = vector.load %arg38[%c0_123, %c0_124] : memref<1x64xf32, #tpu.memory_space<vmem>>, vector<1x64xf32>
    %264 = vector.broadcast %263 : vector<1x64xf32> to vector<8x64xf32>
    %265 = arith.addf %262, %264 : vector<8x64xf32>
    %c0_125 = arith.constant 0 : index
    %c0_126 = arith.constant 0 : index
    %266 = vector.load %arg39[%c0_125, %c0_126] : memref<1x64xf32, #tpu.memory_space<vmem>>, vector<1x64xf32>
    %c0_127 = arith.constant 0 : index
    %c0_128 = arith.constant 0 : index
    %267 = vector.load %arg40[%c0_127, %c0_128] : memref<1x64xf32, #tpu.memory_space<vmem>>, vector<1x64xf32>
    %268 = arith.addf %251, %265 : vector<8x64xf32>
    %cst_129 = arith.constant dense<0.000000e+00> : vector<8xf32>
    %269 = vector.multi_reduction <add>, %268, %cst_129 [1] : vector<8x64xf32> to vector<8xf32>
    %270 = vector.shape_cast %269 : vector<8xf32> to vector<8x1xf32>
    %cst_130 = arith.constant 6.400000e+01 : f32
    %271 = vector.broadcast %cst_130 : f32 to vector<8x1xf32>
    %272 = arith.divf %270, %271 : vector<8x1xf32>
    %273 = vector.broadcast %272 : vector<8x1xf32> to vector<8x64xf32>
    %274 = arith.subf %268, %273 : vector<8x64xf32>
    %275 = arith.mulf %274, %274 : vector<8x64xf32>
    %cst_131 = arith.constant dense<0.000000e+00> : vector<8xf32>
    %276 = vector.multi_reduction <add>, %275, %cst_131 [1] : vector<8x64xf32> to vector<8xf32>
    %277 = vector.shape_cast %276 : vector<8xf32> to vector<8x1xf32>
    %cst_132 = arith.constant 6.400000e+01 : f32
    %278 = vector.broadcast %cst_132 : f32 to vector<8x1xf32>
    %279 = arith.divf %277, %278 : vector<8x1xf32>
    %cst_133 = arith.constant 9.99999974E-6 : f32
    %280 = vector.broadcast %cst_133 : f32 to vector<8x1xf32>
    %281 = arith.addf %279, %280 : vector<8x1xf32>
    %282 = math.rsqrt %281 : vector<8x1xf32>
    %283 = vector.broadcast %282 : vector<8x1xf32> to vector<8x64xf32>
    %284 = arith.mulf %274, %283 : vector<8x64xf32>
    %285 = vector.broadcast %266 : vector<1x64xf32> to vector<8x64xf32>
    %286 = arith.mulf %284, %285 : vector<8x64xf32>
    %287 = vector.broadcast %267 : vector<1x64xf32> to vector<8x64xf32>
    %288 = arith.addf %286, %287 : vector<8x64xf32>
    %c0_134 = arith.constant 0 : index
    %c0_135 = arith.constant 0 : index
    %c0_136 = arith.constant 0 : index
    %289 = vector.load %arg41[%c0_134, %c0_135, %c0_136] : memref<1x8x64xf32, #tpu.memory_space<vmem>>, vector<1x8x64xf32>
    %290 = vector.shape_cast %289 : vector<1x8x64xf32> to vector<8x64xf32>
    %291 = vector.shape_cast %288 : vector<8x64xf32> to vector<1x8x64xf32>
    tpu.vector_store %arg41[%c0_134, %c0_135, %c0_136], %291 {strides = array<i32>} : memref<1x8x64xf32, #tpu.memory_space<vmem>>, vector<1x8x64xf32>,
    return
  }
  func.func @transform_0(%arg0: i32, %arg1: i32) -> (i32, i32, i32) {
    %c0_i32 = arith.constant 0 : i32
    %c0_i32_0 = arith.constant 0 : i32
    return %arg0, %arg1, %c0_i32 : i32, i32, i32
  }
  func.func @transform_1(%arg0: i32, %arg1: i32) -> (i32, i32, i32) {
    %c0_i32 = arith.constant 0 : i32
    %c0_i32_0 = arith.constant 0 : i32
    %c0_i32_1 = arith.constant 0 : i32
    return %arg0, %c0_i32, %c0_i32_0 : i32, i32, i32
  }
  func.func @transform_2(%arg0: i32, %arg1: i32) -> (i32, i32) {
    %c0_i32 = arith.constant 0 : i32
    %c0_i32_0 = arith.constant 0 : i32
    return %arg1, %c0_i32 : i32, i32
  }
  func.func @transform_3(%arg0: i32, %arg1: i32) -> (i32, i32, i32) {
    %c0_i32 = arith.constant 0 : i32
    %c0_i32_0 = arith.constant 0 : i32
    %c0_i32_1 = arith.constant 0 : i32
    return %arg0, %c0_i32, %c0_i32_0 : i32, i32, i32
  }
  func.func @transform_4(%arg0: i32, %arg1: i32) -> (i32, i32, i32) {
    %c0_i32 = arith.constant 0 : i32
    %c0_i32_0 = arith.constant 0 : i32
    %c0_i32_1 = arith.constant 0 : i32
    return %arg0, %c0_i32, %c0_i32_0 : i32, i32, i32
  }
  func.func @transform_5(%arg0: i32, %arg1: i32) -> (i32, i32, i32) {
    %c0_i32 = arith.constant 0 : i32
    %c0_i32_0 = arith.constant 0 : i32
    %c0_i32_1 = arith.constant 0 : i32
    return %arg0, %c0_i32, %c0_i32_0 : i32, i32, i32
  }
  func.func @transform_6(%arg0: i32, %arg1: i32) -> (i32, i32, i32) {
    %c0_i32 = arith.constant 0 : i32
    %c0_i32_0 = arith.constant 0 : i32
    %c0_i32_1 = arith.constant 0 : i32
    return %arg0, %c0_i32, %c0_i32_0 : i32, i32, i32
  }
  func.func @transform_7(%arg0: i32, %arg1: i32) -> (i32, i32, i32) {
    %c0_i32 = arith.constant 0 : i32
    %c0_i32_0 = arith.constant 0 : i32
    %c0_i32_1 = arith.constant 0 : i32
    return %arg0, %c0_i32, %c0_i32_0 : i32, i32, i32
  }
  func.func @transform_8(%arg0: i32, %arg1: i32) -> (i32, i32, i32) {
    %c0_i32 = arith.constant 0 : i32
    %c0_i32_0 = arith.constant 0 : i32
    %c0_i32_1 = arith.constant 0 : i32
    return %arg0, %c0_i32, %c0_i32_0 : i32, i32, i32
  }
  func.func @transform_9(%arg0: i32, %arg1: i32) -> (i32, i32) {
    %c0_i32 = arith.constant 0 : i32
    %c0_i32_0 = arith.constant 0 : i32
    %c0_i32_1 = arith.constant 0 : i32
    return %c0_i32, %c0_i32_0 : i32, i32
  }
  func.func @transform_10(%arg0: i32, %arg1: i32) -> (i32, i32) {
    %c0_i32 = arith.constant 0 : i32
    %c0_i32_0 = arith.constant 0 : i32
    %c0_i32_1 = arith.constant 0 : i32
    return %c0_i32, %c0_i32_0 : i32, i32
  }
  func.func @transform_11(%arg0: i32, %arg1: i32) -> (i32, i32) {
    %c0_i32 = arith.constant 0 : i32
    %c0_i32_0 = arith.constant 0 : i32
    %c0_i32_1 = arith.constant 0 : i32
    return %c0_i32, %c0_i32_0 : i32, i32
  }
  func.func @transform_12(%arg0: i32, %arg1: i32) -> (i32, i32) {
    %c0_i32 = arith.constant 0 : i32
    %c0_i32_0 = arith.constant 0 : i32
    %c0_i32_1 = arith.constant 0 : i32
    return %c0_i32, %c0_i32_0 : i32, i32
  }
  func.func @transform_13(%arg0: i32, %arg1: i32) -> (i32, i32) {
    %c0_i32 = arith.constant 0 : i32
    %c0_i32_0 = arith.constant 0 : i32
    %c0_i32_1 = arith.constant 0 : i32
    return %c0_i32, %c0_i32_0 : i32, i32
  }
  func.func @transform_14(%arg0: i32, %arg1: i32) -> (i32, i32) {
    %c0_i32 = arith.constant 0 : i32
    %c0_i32_0 = arith.constant 0 : i32
    %c0_i32_1 = arith.constant 0 : i32
    return %c0_i32, %c0_i32_0 : i32, i32
  }
  func.func @transform_15(%arg0: i32, %arg1: i32) -> (i32, i32) {
    %c0_i32 = arith.constant 0 : i32
    %c0_i32_0 = arith.constant 0 : i32
    %c0_i32_1 = arith.constant 0 : i32
    return %c0_i32, %c0_i32_0 : i32, i32
  }
  func.func @transform_16(%arg0: i32, %arg1: i32) -> (i32, i32) {
    %c0_i32 = arith.constant 0 : i32
    %c0_i32_0 = arith.constant 0 : i32
    %c0_i32_1 = arith.constant 0 : i32
    return %c0_i32, %c0_i32_0 : i32, i32
  }
  func.func @transform_17(%arg0: i32, %arg1: i32) -> (i32, i32) {
    %c0_i32 = arith.constant 0 : i32
    %c0_i32_0 = arith.constant 0 : i32
    %c0_i32_1 = arith.constant 0 : i32
    return %c0_i32, %c0_i32_0 : i32, i32
  }
  func.func @transform_18(%arg0: i32, %arg1: i32) -> (i32, i32) {
    %c0_i32 = arith.constant 0 : i32
    %c0_i32_0 = arith.constant 0 : i32
    %c0_i32_1 = arith.constant 0 : i32
    return %c0_i32, %c0_i32_0 : i32, i32
  }
  func.func @transform_19(%arg0: i32, %arg1: i32) -> (i32, i32) {
    %c0_i32 = arith.constant 0 : i32
    %c0_i32_0 = arith.constant 0 : i32
    %c0_i32_1 = arith.constant 0 : i32
    return %c0_i32, %c0_i32_0 : i32, i32
  }
  func.func @transform_20(%arg0: i32, %arg1: i32) -> (i32, i32) {
    %c0_i32 = arith.constant 0 : i32
    %c0_i32_0 = arith.constant 0 : i32
    %c0_i32_1 = arith.constant 0 : i32
    return %c0_i32, %c0_i32_0 : i32, i32
  }
  func.func @transform_21(%arg0: i32, %arg1: i32) -> (i32, i32) {
    %c0_i32 = arith.constant 0 : i32
    %c0_i32_0 = arith.constant 0 : i32
    %c0_i32_1 = arith.constant 0 : i32
    return %c0_i32, %c0_i32_0 : i32, i32
  }
  func.func @transform_22(%arg0: i32, %arg1: i32) -> (i32, i32) {
    %c0_i32 = arith.constant 0 : i32
    %c0_i32_0 = arith.constant 0 : i32
    %c0_i32_1 = arith.constant 0 : i32
    return %c0_i32, %c0_i32_0 : i32, i32
  }
  func.func @transform_23(%arg0: i32, %arg1: i32) -> (i32, i32) {
    %c0_i32 = arith.constant 0 : i32
    %c0_i32_0 = arith.constant 0 : i32
    %c0_i32_1 = arith.constant 0 : i32
    return %c0_i32, %c0_i32_0 : i32, i32
  }
  func.func @transform_24(%arg0: i32, %arg1: i32) -> (i32, i32) {
    %c0_i32 = arith.constant 0 : i32
    %c0_i32_0 = arith.constant 0 : i32
    %c0_i32_1 = arith.constant 0 : i32
    return %c0_i32, %c0_i32_0 : i32, i32
  }
  func.func @transform_25(%arg0: i32, %arg1: i32) -> (i32, i32) {
    %c0_i32 = arith.constant 0 : i32
    %c0_i32_0 = arith.constant 0 : i32
    %c0_i32_1 = arith.constant 0 : i32
    return %c0_i32, %c0_i32_0 : i32, i32
  }
  func.func @transform_26(%arg0: i32, %arg1: i32) -> (i32, i32) {
    %c0_i32 = arith.constant 0 : i32
    %c0_i32_0 = arith.constant 0 : i32
    %c0_i32_1 = arith.constant 0 : i32
    return %c0_i32, %c0_i32_0 : i32, i32
  }
  func.func @transform_27(%arg0: i32, %arg1: i32) -> (i32, i32) {
    %c0_i32 = arith.constant 0 : i32
    %c0_i32_0 = arith.constant 0 : i32
    %c0_i32_1 = arith.constant 0 : i32
    return %c0_i32, %c0_i32_0 : i32, i32
  }
  func.func @transform_28(%arg0: i32, %arg1: i32) -> (i32, i32) {
    %c0_i32 = arith.constant 0 : i32
    %c0_i32_0 = arith.constant 0 : i32
    %c0_i32_1 = arith.constant 0 : i32
    return %c0_i32, %c0_i32_0 : i32, i32
  }
  func.func @transform_29(%arg0: i32, %arg1: i32) -> (i32, i32) {
    %c0_i32 = arith.constant 0 : i32
    %c0_i32_0 = arith.constant 0 : i32
    %c0_i32_1 = arith.constant 0 : i32
    return %c0_i32, %c0_i32_0 : i32, i32
  }
  func.func @transform_30(%arg0: i32, %arg1: i32) -> (i32, i32) {
    %c0_i32 = arith.constant 0 : i32
    %c0_i32_0 = arith.constant 0 : i32
    %c0_i32_1 = arith.constant 0 : i32
    return %c0_i32, %c0_i32_0 : i32, i32
  }
  func.func @transform_31(%arg0: i32, %arg1: i32) -> (i32, i32) {
    %c0_i32 = arith.constant 0 : i32
    %c0_i32_0 = arith.constant 0 : i32
    %c0_i32_1 = arith.constant 0 : i32
    return %c0_i32, %c0_i32_0 : i32, i32
  }
  func.func @transform_32(%arg0: i32, %arg1: i32) -> (i32, i32) {
    %c0_i32 = arith.constant 0 : i32
    %c0_i32_0 = arith.constant 0 : i32
    %c0_i32_1 = arith.constant 0 : i32
    return %c0_i32, %c0_i32_0 : i32, i32
  }
  func.func @transform_33(%arg0: i32, %arg1: i32) -> (i32, i32) {
    %c0_i32 = arith.constant 0 : i32
    %c0_i32_0 = arith.constant 0 : i32
    %c0_i32_1 = arith.constant 0 : i32
    return %c0_i32, %c0_i32_0 : i32, i32
  }
  func.func @transform_34(%arg0: i32, %arg1: i32) -> (i32, i32) {
    %c0_i32 = arith.constant 0 : i32
    %c0_i32_0 = arith.constant 0 : i32
    %c0_i32_1 = arith.constant 0 : i32
    return %c0_i32, %c0_i32_0 : i32, i32
  }
  func.func @transform_35(%arg0: i32, %arg1: i32) -> (i32, i32) {
    %c0_i32 = arith.constant 0 : i32
    %c0_i32_0 = arith.constant 0 : i32
    %c0_i32_1 = arith.constant 0 : i32
    return %c0_i32, %c0_i32_0 : i32, i32
  }
  func.func @transform_36(%arg0: i32, %arg1: i32) -> (i32, i32) {
    %c0_i32 = arith.constant 0 : i32
    %c0_i32_0 = arith.constant 0 : i32
    %c0_i32_1 = arith.constant 0 : i32
    return %c0_i32, %c0_i32_0 : i32, i32
  }
  func.func @transform_37(%arg0: i32, %arg1: i32) -> (i32, i32) {
    %c0_i32 = arith.constant 0 : i32
    %c0_i32_0 = arith.constant 0 : i32
    %c0_i32_1 = arith.constant 0 : i32
    return %c0_i32, %c0_i32_0 : i32, i32
  }
  func.func @transform_38(%arg0: i32, %arg1: i32) -> (i32, i32) {
    %c0_i32 = arith.constant 0 : i32
    %c0_i32_0 = arith.constant 0 : i32
    %c0_i32_1 = arith.constant 0 : i32
    return %c0_i32, %c0_i32_0 : i32, i32
  }
  func.func @transform_39(%arg0: i32, %arg1: i32) -> (i32, i32, i32) {
    %c0_i32 = arith.constant 0 : i32
    %c0_i32_0 = arith.constant 0 : i32
    return %arg0, %arg1, %c0_i32 : i32, i32, i32
  }
}

module attributes {stable_mosaic.version = 11 : i64} {
  func.func @_decoder_layer_kernel(%arg0: i32, %arg1: i32, %arg2: memref<1x8x64xf32, #tpu.memory_space<vmem>>, %arg3: memref<1x8x64xf32, #tpu.memory_space<vmem>>, %arg4: memref<8x8xf32, #tpu.memory_space<vmem>>, %arg5: memref<1x1x8xf32, #tpu.memory_space<vmem>>, %arg6: memref<1x3x64xf32, #tpu.memory_space<vmem>>, %arg7: memref<1x24x64xf32, #tpu.memory_space<vmem>>, %arg8: memref<1x1x3xf32, #tpu.memory_space<vmem>>, %arg9: memref<1x3x8xf32, #tpu.memory_space<vmem>>, %arg10: memref<1x1x3xf32, #tpu.memory_space<vmem>>, %arg11: memref<64x64xbf16, #tpu.memory_space<vmem>>, %arg12: memref<1x64xf32, #tpu.memory_space<vmem>>, %arg13: memref<64x64xbf16, #tpu.memory_space<vmem>>, %arg14: memref<1x64xf32, #tpu.memory_space<vmem>>, %arg15: memref<64x64xbf16, #tpu.memory_space<vmem>>, %arg16: memref<1x64xf32, #tpu.memory_space<vmem>>, %arg17: memref<64x64xbf16, #tpu.memory_space<vmem>>, %arg18: memref<1x64xf32, #tpu.memory_space<vmem>>, %arg19: memref<1x64xf32, #tpu.memory_space<vmem>>, %arg20: memref<1x64xf32, #tpu.memory_space<vmem>>, %arg21: memref<64x64xbf16, #tpu.memory_space<vmem>>, %arg22: memref<1x64xf32, #tpu.memory_space<vmem>>, %arg23: memref<64x64xbf16, #tpu.memory_space<vmem>>, %arg24: memref<1x64xf32, #tpu.memory_space<vmem>>, %arg25: memref<64x64xbf16, #tpu.memory_space<vmem>>, %arg26: memref<1x64xf32, #tpu.memory_space<vmem>>, %arg27: memref<64x64xbf16, #tpu.memory_space<vmem>>, %arg28: memref<1x64xf32, #tpu.memory_space<vmem>>, %arg29: memref<64x64xbf16, #tpu.memory_space<vmem>>, %arg30: memref<1x64xf32, #tpu.memory_space<vmem>>, %arg31: memref<64x64xbf16, #tpu.memory_space<vmem>>, %arg32: memref<1x64xf32, #tpu.memory_space<vmem>>, %arg33: memref<1x64xf32, #tpu.memory_space<vmem>>, %arg34: memref<1x64xf32, #tpu.memory_space<vmem>>, %arg35: memref<64x128xbf16, #tpu.memory_space<vmem>>, %arg36: memref<1x128xf32, #tpu.memory_space<vmem>>, %arg37: memref<128x64xbf16, #tpu.memory_space<vmem>>, %arg38: memref<1x64xf32, #tpu.memory_space<vmem>>, %arg39: memref<1x64xf32, #tpu.memory_space<vmem>>, %arg40: memref<1x64xf32, #tpu.memory_space<vmem>>, %arg41: memref<1x8x64xf32, #tpu.memory_space<vmem>>) attributes {dimension_semantics = [#tpu.dimension_semantics<parallel>, #tpu.dimension_semantics<parallel>], iteration_bounds = array<i64: 2, 1>, scalar_prefetch = 0 : i64, scratch_operands = 0 : i64, tpu.core_type = #tpu.core_type<tc>, window_params = [{transform_indices = @transform_0, window_bounds = array<i64: 1, 8, 64>}, {transform_indices = @transform_1, window_bounds = array<i64: 1, 8, 64>}, {transform_indices = @transform_2, window_bounds = array<i64: 8, 8>}, {transform_indices = @transform_3, window_bounds = array<i64: 1, 1, 8>}, {transform_indices = @transform_4, window_bounds = array<i64: 1, 3, 64>}, {transform_indices = @transform_5, window_bounds = array<i64: 1, 24, 64>}, {transform_indices = @transform_6, window_bounds = array<i64: 1, 1, 3>}, {transform_indices = @transform_7, window_bounds = array<i64: 1, 3, 8>}, {transform_indices = @transform_8, window_bounds = array<i64: 1, 1, 3>}, {pipeline_mode = #tpu.pipeline_mode<synchronous>, transform_indices = @transform_9, window_bounds = array<i64: 64, 64>}, {pipeline_mode = #tpu.pipeline_mode<synchronous>, transform_indices = @transform_10, window_bounds = array<i64: 1, 64>}, {pipeline_mode = #tpu.pipeline_mode<synchronous>, transform_indices = @transform_11, window_bounds = array<i64: 64, 64>}, {pipeline_mode = #tpu.pipeline_mode<synchronous>, transform_indices = @transform_12, window_bounds = array<i64: 1, 64>}, {pipeline_mode = #tpu.pipeline_mode<synchronous>, transform_indices = @transform_13, window_bounds = array<i64: 64, 64>}, {pipeline_mode = #tpu.pipeline_mode<synchronous>, transform_indices = @transform_14, window_bounds = array<i64: 1, 64>}, {pipeline_mode = #tpu.pipeline_mode<synchronous>, transform_indices = @transform_15, window_bounds = array<i64: 64, 64>}, {pipeline_mode = #tpu.pipeline_mode<synchronous>, transform_indices = @transform_16, window_bounds = array<i64: 1, 64>}, {pipeline_mode = #tpu.pipeline_mode<synchronous>, transform_indices = @transform_17, window_bounds = array<i64: 1, 64>}, {pipeline_mode = #tpu.pipeline_mode<synchronous>, transform_indices = @transform_18, window_bounds = array<i64: 1, 64>}, {pipeline_mode = #tpu.pipeline_mode<synchronous>, transform_indices = @transform_19, window_bounds = array<i64: 64, 64>}, {pipeline_mode = #tpu.pipeline_mode<synchronous>, transform_indices = @transform_20, window_bounds = array<i64: 1, 64>}, {pipeline_mode = #tpu.pipeline_mode<synchronous>, transform_indices = @transform_21, window_bounds = array<i64: 64, 64>}, {pipeline_mode = #tpu.pipeline_mode<synchronous>, transform_indices = @transform_22, window_bounds = array<i64: 1, 64>}, {pipeline_mode = #tpu.pipeline_mode<synchronous>, transform_indices = @transform_23, window_bounds = array<i64: 64, 64>}, {pipeline_mode = #tpu.pipeline_mode<synchronous>, transform_indices = @transform_24, window_bounds = array<i64: 1, 64>}, {pipeline_mode = #tpu.pipeline_mode<synchronous>, transform_indices = @transform_25, window_bounds = array<i64: 64, 64>}, {pipeline_mode = #tpu.pipeline_mode<synchronous>, transform_indices = @transform_26, window_bounds = array<i64: 1, 64>}, {pipeline_mode = #tpu.pipeline_mode<synchronous>, transform_indices = @transform_27, window_bounds = array<i64: 64, 64>}, {pipeline_mode = #tpu.pipeline_mode<synchronous>, transform_indices = @transform_28, window_bounds = array<i64: 1, 64>}, {pipeline_mode = #tpu.pipeline_mode<synchronous>, transform_indices = @transform_29, window_bounds = array<i64: 64, 64>}, {pipeline_mode = #tpu.pipeline_mode<synchronous>, transform_indices = @transform_30, window_bounds = array<i64: 1, 64>}, {pipeline_mode = #tpu.pipeline_mode<synchronous>, transform_indices = @transform_31, window_bounds = array<i64: 1, 64>}, {pipeline_mode = #tpu.pipeline_mode<synchronous>, transform_indices = @transform_32, window_bounds = array<i64: 1, 64>}, {pipeline_mode = #tpu.pipeline_mode<synchronous>, transform_indices = @transform_33, window_bounds = array<i64: 64, 128>}, {pipeline_mode = #tpu.pipeline_mode<synchronous>, transform_indices = @transform_34, window_bounds = array<i64: 1, 128>}, {pipeline_mode = #tpu.pipeline_mode<synchronous>, transform_indices = @transform_35, window_bounds = array<i64: 128, 64>}, {pipeline_mode = #tpu.pipeline_mode<synchronous>, transform_indices = @transform_36, window_bounds = array<i64: 1, 64>}, {pipeline_mode = #tpu.pipeline_mode<synchronous>, transform_indices = @transform_37, window_bounds = array<i64: 1, 64>}, {pipeline_mode = #tpu.pipeline_mode<synchronous>, transform_indices = @transform_38, window_bounds = array<i64: 1, 64>}, {transform_indices = @transform_39, window_bounds = array<i64: 1, 8, 64>}]} {
    %c0 = arith.constant 0 : index
    %c0_0 = arith.constant 0 : index
    %c0_1 = arith.constant 0 : index
    %0 = vector.load %arg2[%c0, %c0_0, %c0_1] : memref<1x8x64xf32, #tpu.memory_space<vmem>>, vector<1x8x64xf32>
    %1 = vector.shape_cast %0 : vector<1x8x64xf32> to vector<8x64xf32>
    %c0_2 = arith.constant 0 : index
    %c0_3 = arith.constant 0 : index
    %c0_4 = arith.constant 0 : index
    %2 = vector.load %arg3[%c0_2, %c0_3, %c0_4] : memref<1x8x64xf32, #tpu.memory_space<vmem>>, vector<1x8x64xf32>
    %3 = vector.shape_cast %2 : vector<1x8x64xf32> to vector<8x64xf32>
    %4 = arith.truncf %1 : vector<8x64xf32> to vector<8x64xbf16>
    %5 = arith.truncf %3 : vector<8x64xf32> to vector<8x64xbf16>
    %c0_5 = arith.constant 0 : index
    %c0_6 = arith.constant 0 : index
    %6 = vector.load %arg11[%c0_5, %c0_6] : memref<64x64xbf16, #tpu.memory_space<vmem>>, vector<64x64xbf16>
    %cst = arith.constant dense<0.000000e+00> : vector<8x64xf32>
    %7 = tpu.matmul %4, %6, %cst {dimension_numbers = #tpu.dot_dimension_numbers<[1], [0], [0], [1], [0, 0, 1, 1], [], []>} : vector<8x64xbf16>, vector<64x64xbf16>, vector<8x64xf32> -> vector<8x64xf32>
    %c0_7 = arith.constant 0 : index
    %c0_8 = arith.constant 0 : index
    %8 = vector.load %arg12[%c0_7, %c0_8] : memref<1x64xf32, #tpu.memory_space<vmem>>, vector<1x64xf32>
    %9 = vector.broadcast %8 : vector<1x64xf32> to vector<8x64xf32>
    %10 = arith.addf %7, %9 : vector<8x64xf32>
    %c0_9 = arith.constant 0 : index
    %c0_10 = arith.constant 0 : index
    %11 = vector.load %arg13[%c0_9, %c0_10] : memref<64x64xbf16, #tpu.memory_space<vmem>>, vector<64x64xbf16>
    %cst_11 = arith.constant dense<0.000000e+00> : vector<8x64xf32>
    %12 = tpu.matmul %5, %11, %cst_11 {dimension_numbers = #tpu.dot_dimension_numbers<[1], [0], [0], [1], [0, 0, 1, 1], [], []>} : vector<8x64xbf16>, vector<64x64xbf16>, vector<8x64xf32> -> vector<8x64xf32>
    %c0_12 = arith.constant 0 : index
    %c0_13 = arith.constant 0 : index
    %13 = vector.load %arg14[%c0_12, %c0_13] : memref<1x64xf32, #tpu.memory_space<vmem>>, vector<1x64xf32>
    %14 = vector.broadcast %13 : vector<1x64xf32> to vector<8x64xf32>
    %15 = arith.addf %12, %14 : vector<8x64xf32>
    %c0_14 = arith.constant 0 : index
    %c0_15 = arith.constant 0 : index
    %16 = vector.load %arg15[%c0_14, %c0_15] : memref<64x64xbf16, #tpu.memory_space<vmem>>, vector<64x64xbf16>
    %cst_16 = arith.constant dense<0.000000e+00> : vector<8x64xf32>
    %17 = tpu.matmul %5, %16, %cst_16 {dimension_numbers = #tpu.dot_dimension_numbers<[1], [0], [0], [1], [0, 0, 1, 1], [], []>} : vector<8x64xbf16>, vector<64x64xbf16>, vector<8x64xf32> -> vector<8x64xf32>
    %c0_17 = arith.constant 0 : index
    %c0_18 = arith.constant 0 : index
    %18 = vector.load %arg16[%c0_17, %c0_18] : memref<1x64xf32, #tpu.memory_space<vmem>>, vector<1x64xf32>
    %19 = vector.broadcast %18 : vector<1x64xf32> to vector<8x64xf32>
    %20 = arith.addf %17, %19 : vector<8x64xf32>
    %21 = vector.shape_cast %10 : vector<8x64xf32> to vector<8x4x16xf32>
    %22 = tpu.transpose %21, [1, 0, 2] : vector<8x4x16xf32> -> vector<4x8x16xf32>
    %23 = vector.shape_cast %15 : vector<8x64xf32> to vector<8x4x16xf32>
    %24 = tpu.transpose %23, [1, 0, 2] : vector<8x4x16xf32> -> vector<4x8x16xf32>
    "tpu.trace_start"() <{level = 10 : i32, message = "hld,hsd->hls"}> : () -> ()
    %cst_19 = arith.constant dense<0.000000e+00> : vector<4x8x8xf32>
    %25 = tpu.matmul %22, %24, %cst_19 {dimension_numbers = #tpu.dot_dimension_numbers<[2], [2], [1], [1], [0, 0, 0, 1, 1, 1], [0], [0]>} : vector<4x8x16xf32>, vector<4x8x16xf32>, vector<4x8x8xf32> -> vector<4x8x8xf32>
    "tpu.trace_stop"() : () -> ()
    %cst_20 = arith.constant 2.500000e-01 : f32
    %26 = vector.broadcast %cst_20 : f32 to vector<4x8x8xf32>
    %27 = arith.mulf %25, %26 : vector<4x8x8xf32>
    %c0_21 = arith.constant 0 : index
    %c0_22 = arith.constant 0 : index
    %28 = vector.load %arg4[%c0_21, %c0_22] : memref<8x8xf32, #tpu.memory_space<vmem>>, vector<8x8xf32>
    %cst_23 = arith.constant -1.000000e+30 : f32
    %29 = vector.broadcast %cst_23 : f32 to vector<8x8xf32>
    %30 = arith.maximumf %28, %29 : vector<8x8xf32>
    %c0_24 = arith.constant 0 : index
    %c0_25 = arith.constant 0 : index
    %c0_26 = arith.constant 0 : index
    %31 = vector.load %arg5[%c0_24, %c0_25, %c0_26] : memref<1x1x8xf32, #tpu.memory_space<vmem>>, vector<1x1x8xf32>
    %32 = vector.shape_cast %31 : vector<1x1x8xf32> to vector<1x8xf32>
    %33 = vector.broadcast %32 : vector<1x8xf32> to vector<8x8xf32>
    %34 = arith.addf %30, %33 : vector<8x8xf32>
    %35 = vector.shape_cast %34 : vector<8x8xf32> to vector<1x8x8xf32>
    %36 = vector.broadcast %35 : vector<1x8x8xf32> to vector<4x8x8xf32>
    %37 = arith.addf %27, %36 : vector<4x8x8xf32>
    %cst_27 = arith.constant dense<0xFF800000> : vector<4x8xf32>
    %38 = vector.multi_reduction <maximumf>, %37, %cst_27 [2] : vector<4x8x8xf32> to vector<4x8xf32>
    %39 = vector.shape_cast %38 : vector<4x8xf32> to vector<4x8x1xf32>
    %40 = vector.broadcast %39 : vector<4x8x1xf32> to vector<4x8x8xf32>
    %41 = arith.subf %37, %40 : vector<4x8x8xf32>
    %42 = math.exp %41 : vector<4x8x8xf32>
    %cst_28 = arith.constant dense<0.000000e+00> : vector<4x8xf32>
    %43 = vector.multi_reduction <add>, %42, %cst_28 [2] : vector<4x8x8xf32> to vector<4x8xf32>
    %44 = vector.shape_cast %43 : vector<4x8xf32> to vector<4x8x1xf32>
    %45 = tpu.reciprocal %44 {approx = true} : vector<4x8x1xf32> -> vector<4x8x1xf32>
    %46 = vector.broadcast %45 : vector<4x8x1xf32> to vector<4x8x8xf32>
    %47 = arith.mulf %42, %46 : vector<4x8x8xf32>
    %48 = arith.truncf %47 : vector<4x8x8xf32> to vector<4x8x8xbf16>
    %49 = vector.shape_cast %20 : vector<8x64xf32> to vector<8x4x16xf32>
    %50 = tpu.transpose %49, [1, 0, 2] : vector<8x4x16xf32> -> vector<4x8x16xf32>
    %51 = arith.truncf %50 : vector<4x8x16xf32> to vector<4x8x16xbf16>
    "tpu.trace_start"() <{level = 10 : i32, message = "hls,hsd->hld"}> : () -> ()
    %cst_29 = arith.constant dense<0.000000e+00> : vector<4x8x16xf32>
    %52 = tpu.matmul %48, %51, %cst_29 {dimension_numbers = #tpu.dot_dimension_numbers<[2], [1], [1], [2], [0, 0, 0, 1, 1, 2], [0], [0]>} : vector<4x8x8xbf16>, vector<4x8x16xbf16>, vector<4x8x16xf32> -> vector<4x8x16xf32>
    "tpu.trace_stop"() : () -> ()
    %53 = tpu.transpose %52, [1, 0, 2] : vector<4x8x16xf32> -> vector<8x4x16xf32>
    %54 = vector.shape_cast %53 : vector<8x4x16xf32> to vector<8x64xf32>
    %55 = arith.truncf %54 : vector<8x64xf32> to vector<8x64xbf16>
    %c0_30 = arith.constant 0 : index
    %c0_31 = arith.constant 0 : index
    %56 = vector.load %arg17[%c0_30, %c0_31] : memref<64x64xbf16, #tpu.memory_space<vmem>>, vector<64x64xbf16>
    %cst_32 = arith.constant dense<0.000000e+00> : vector<8x64xf32>
    %57 = tpu.matmul %55, %56, %cst_32 {dimension_numbers = #tpu.dot_dimension_numbers<[1], [0], [0], [1], [0, 0, 1, 1], [], []>} : vector<8x64xbf16>, vector<64x64xbf16>, vector<8x64xf32> -> vector<8x64xf32>
    %c0_33 = arith.constant 0 : index
    %c0_34 = arith.constant 0 : index
    %58 = vector.load %arg18[%c0_33, %c0_34] : memref<1x64xf32, #tpu.memory_space<vmem>>, vector<1x64xf32>
    %59 = vector.broadcast %58 : vector<1x64xf32> to vector<8x64xf32>
    %60 = arith.addf %57, %59 : vector<8x64xf32>
    %c0_35 = arith.constant 0 : index
    %c0_36 = arith.constant 0 : index
    %61 = vector.load %arg19[%c0_35, %c0_36] : memref<1x64xf32, #tpu.memory_space<vmem>>, vector<1x64xf32>
    %c0_37 = arith.constant 0 : index
    %c0_38 = arith.constant 0 : index
    %62 = vector.load %arg20[%c0_37, %c0_38] : memref<1x64xf32, #tpu.memory_space<vmem>>, vector<1x64xf32>
    %63 = arith.addf %1, %60 : vector<8x64xf32>
    %cst_39 = arith.constant dense<0.000000e+00> : vector<8xf32>
    %64 = vector.multi_reduction <add>, %63, %cst_39 [1] : vector<8x64xf32> to vector<8xf32>
    %65 = vector.shape_cast %64 : vector<8xf32> to vector<8x1xf32>
    %cst_40 = arith.constant 6.400000e+01 : f32
    %66 = vector.broadcast %cst_40 : f32 to vector<8x1xf32>
    %67 = arith.divf %65, %66 : vector<8x1xf32>
    %68 = vector.broadcast %67 : vector<8x1xf32> to vector<8x64xf32>
    %69 = arith.subf %63, %68 : vector<8x64xf32>
    %70 = arith.mulf %69, %69 : vector<8x64xf32>
    %cst_41 = arith.constant dense<0.000000e+00> : vector<8xf32>
    %71 = vector.multi_reduction <add>, %70, %cst_41 [1] : vector<8x64xf32> to vector<8xf32>
    %72 = vector.shape_cast %71 : vector<8xf32> to vector<8x1xf32>
    %cst_42 = arith.constant 6.400000e+01 : f32
    %73 = vector.broadcast %cst_42 : f32 to vector<8x1xf32>
    %74 = arith.divf %72, %73 : vector<8x1xf32>
    %cst_43 = arith.constant 9.99999974E-6 : f32
    %75 = vector.broadcast %cst_43 : f32 to vector<8x1xf32>
    %76 = arith.addf %74, %75 : vector<8x1xf32>
    %77 = math.rsqrt %76 : vector<8x1xf32>
    %78 = vector.broadcast %77 : vector<8x1xf32> to vector<8x64xf32>
    %79 = arith.mulf %69, %78 : vector<8x64xf32>
    %80 = vector.broadcast %61 : vector<1x64xf32> to vector<8x64xf32>
    %81 = arith.mulf %79, %80 : vector<8x64xf32>
    %82 = vector.broadcast %62 : vector<1x64xf32> to vector<8x64xf32>
    %83 = arith.addf %81, %82 : vector<8x64xf32>
    %84 = arith.truncf %83 : vector<8x64xf32> to vector<8x64xbf16>
    %c0_44 = arith.constant 0 : index
    %c0_45 = arith.constant 0 : index
    %c0_46 = arith.constant 0 : index
    %85 = vector.load %arg6[%c0_44, %c0_45, %c0_46] : memref<1x3x64xf32, #tpu.memory_space<vmem>>, vector<1x3x64xf32>
    %86 = vector.shape_cast %85 : vector<1x3x64xf32> to vector<3x64xf32>
    %87 = arith.truncf %86 : vector<3x64xf32> to vector<3x64xbf16>
    %c0_47 = arith.constant 0 : index
    %c0_48 = arith.constant 0 : index
    %88 = vector.load %arg21[%c0_47, %c0_48] : memref<64x64xbf16, #tpu.memory_space<vmem>>, vector<64x64xbf16>
    %cst_49 = arith.constant dense<0.000000e+00> : vector<8x64xf32>
    %89 = tpu.matmul %84, %88, %cst_49 {dimension_numbers = #tpu.dot_dimension_numbers<[1], [0], [0], [1], [0, 0, 1, 1], [], []>} : vector<8x64xbf16>, vector<64x64xbf16>, vector<8x64xf32> -> vector<8x64xf32>
    %c0_50 = arith.constant 0 : index
    %c0_51 = arith.constant 0 : index
    %90 = vector.load %arg22[%c0_50, %c0_51] : memref<1x64xf32, #tpu.memory_space<vmem>>, vector<1x64xf32>
    %91 = vector.broadcast %90 : vector<1x64xf32> to vector<8x64xf32>
    %92 = arith.addf %89, %91 : vector<8x64xf32>
    %c0_52 = arith.constant 0 : index
    %c0_53 = arith.constant 0 : index
    %93 = vector.load %arg23[%c0_52, %c0_53] : memref<64x64xbf16, #tpu.memory_space<vmem>>, vector<64x64xbf16>
    %cst_54 = arith.constant dense<0.000000e+00> : vector<3x64xf32>
    %94 = tpu.matmul %87, %93, %cst_54 {dimension_numbers = #tpu.dot_dimension_numbers<[1], [0], [0], [1], [0, 0, 1, 1], [], []>} : vector<3x64xbf16>, vector<64x64xbf16>, vector<3x64xf32> -> vector<3x64xf32>
    %c0_55 = arith.constant 0 : index
    %c0_56 = arith.constant 0 : index
    %95 = vector.load %arg24[%c0_55, %c0_56] : memref<1x64xf32, #tpu.memory_space<vmem>>, vector<1x64xf32>
    %96 = vector.broadcast %95 : vector<1x64xf32> to vector<3x64xf32>
    %97 = arith.addf %94, %96 : vector<3x64xf32>
    %98 = vector.shape_cast %92 : vector<8x64xf32> to vector<8x4x16xf32>
    %99 = tpu.transpose %98, [1, 0, 2] : vector<8x4x16xf32> -> vector<4x8x16xf32>
    %100 = vector.shape_cast %97 : vector<3x64xf32> to vector<3x4x16xf32>
    %101 = tpu.transpose %100, [1, 0, 2] : vector<3x4x16xf32> -> vector<4x3x16xf32>
    "tpu.trace_start"() <{level = 10 : i32, message = "hld,hnd->hln"}> : () -> ()
    %cst_57 = arith.constant dense<0.000000e+00> : vector<4x8x3xf32>
    %102 = tpu.matmul %99, %101, %cst_57 {dimension_numbers = #tpu.dot_dimension_numbers<[2], [2], [1], [1], [0, 0, 0, 1, 1, 1], [0], [0]>} : vector<4x8x16xf32>, vector<4x3x16xf32>, vector<4x8x3xf32> -> vector<4x8x3xf32>
    "tpu.trace_stop"() : () -> ()
    %cst_58 = arith.constant 2.500000e-01 : f32
    %103 = vector.broadcast %cst_58 : f32 to vector<4x8x3xf32>
    %104 = arith.mulf %102, %103 : vector<4x8x3xf32>
    %c0_59 = arith.constant 0 : index
    %c0_60 = arith.constant 0 : index
    %c0_61 = arith.constant 0 : index
    %105 = vector.load %arg8[%c0_59, %c0_60, %c0_61] : memref<1x1x3xf32, #tpu.memory_space<vmem>>, vector<1x1x3xf32>
    %106 = vector.shape_cast %105 : vector<1x1x3xf32> to vector<1x3xf32>
    %107 = vector.shape_cast %106 : vector<1x3xf32> to vector<1x1x3xf32>
    %108 = vector.broadcast %107 : vector<1x1x3xf32> to vector<4x8x3xf32>
    %109 = arith.addf %104, %108 : vector<4x8x3xf32>
    %cst_62 = arith.constant dense<0xFF800000> : vector<4x8xf32>
    %110 = vector.multi_reduction <maximumf>, %109, %cst_62 [2] : vector<4x8x3xf32> to vector<4x8xf32>
    %111 = vector.shape_cast %110 : vector<4x8xf32> to vector<4x8x1xf32>
    %112 = vector.broadcast %111 : vector<4x8x1xf32> to vector<4x8x3xf32>
    %113 = arith.subf %109, %112 : vector<4x8x3xf32>
    %114 = math.exp %113 : vector<4x8x3xf32>
    %cst_63 = arith.constant dense<0.000000e+00> : vector<4x8xf32>
    %115 = vector.multi_reduction <add>, %114, %cst_63 [2] : vector<4x8x3xf32> to vector<4x8xf32>
    %116 = vector.shape_cast %115 : vector<4x8xf32> to vector<4x8x1xf32>
    %117 = tpu.reciprocal %116 {approx = true} : vector<4x8x1xf32> -> vector<4x8x1xf32>
    %118 = vector.broadcast %117 : vector<4x8x1xf32> to vector<4x8x3xf32>
    %119 = arith.mulf %114, %118 : vector<4x8x3xf32>
    %cst_64 = arith.constant dense<0.000000e+00> : vector<8x3xf32>
    %120 = vector.multi_reduction <add>, %119, %cst_64 [0] : vector<4x8x3xf32> to vector<8x3xf32>
    %cst_65 = arith.constant 4.000000e+00 : f32
    %121 = vector.broadcast %cst_65 : f32 to vector<8x3xf32>
    %122 = arith.divf %120, %121 : vector<8x3xf32>
    %c0_66 = arith.constant 0 : index
    %c0_67 = arith.constant 0 : index
    %c0_68 = arith.constant 0 : index
    %123 = vector.load %arg7[%c0_66, %c0_67, %c0_68] : memref<1x24x64xf32, #tpu.memory_space<vmem>>, vector<1x24x64xf32>
    %124 = vector.shape_cast %123 : vector<1x24x64xf32> to vector<24x64xf32>
    %125 = arith.truncf %124 : vector<24x64xf32> to vector<24x64xbf16>
    %c0_69 = arith.constant 0 : index
    %c0_70 = arith.constant 0 : index
    %126 = vector.load %arg25[%c0_69, %c0_70] : memref<64x64xbf16, #tpu.memory_space<vmem>>, vector<64x64xbf16>
    %cst_71 = arith.constant dense<0.000000e+00> : vector<8x64xf32>
    %127 = tpu.matmul %84, %126, %cst_71 {dimension_numbers = #tpu.dot_dimension_numbers<[1], [0], [0], [1], [0, 0, 1, 1], [], []>} : vector<8x64xbf16>, vector<64x64xbf16>, vector<8x64xf32> -> vector<8x64xf32>
    %c0_72 = arith.constant 0 : index
    %c0_73 = arith.constant 0 : index
    %128 = vector.load %arg26[%c0_72, %c0_73] : memref<1x64xf32, #tpu.memory_space<vmem>>, vector<1x64xf32>
    %129 = vector.broadcast %128 : vector<1x64xf32> to vector<8x64xf32>
    %130 = arith.addf %127, %129 : vector<8x64xf32>
    %c0_74 = arith.constant 0 : index
    %c0_75 = arith.constant 0 : index
    %131 = vector.load %arg27[%c0_74, %c0_75] : memref<64x64xbf16, #tpu.memory_space<vmem>>, vector<64x64xbf16>
    %cst_76 = arith.constant dense<0.000000e+00> : vector<24x64xf32>
    %132 = tpu.matmul %125, %131, %cst_76 {dimension_numbers = #tpu.dot_dimension_numbers<[1], [0], [0], [1], [0, 0, 1, 1], [], []>} : vector<24x64xbf16>, vector<64x64xbf16>, vector<24x64xf32> -> vector<24x64xf32>
    %c0_77 = arith.constant 0 : index
    %c0_78 = arith.constant 0 : index
    %133 = vector.load %arg28[%c0_77, %c0_78] : memref<1x64xf32, #tpu.memory_space<vmem>>, vector<1x64xf32>
    %134 = vector.broadcast %133 : vector<1x64xf32> to vector<24x64xf32>
    %135 = arith.addf %132, %134 : vector<24x64xf32>
    %c0_79 = arith.constant 0 : index
    %c0_80 = arith.constant 0 : index
    %136 = vector.load %arg29[%c0_79, %c0_80] : memref<64x64xbf16, #tpu.memory_space<vmem>>, vector<64x64xbf16>
    %cst_81 = arith.constant dense<0.000000e+00> : vector<24x64xf32>
    %137 = tpu.matmul %125, %136, %cst_81 {dimension_numbers = #tpu.dot_dimension_numbers<[1], [0], [0], [1], [0, 0, 1, 1], [], []>} : vector<24x64xbf16>, vector<64x64xbf16>, vector<24x64xf32> -> vector<24x64xf32>
    %c0_82 = arith.constant 0 : index
    %c0_83 = arith.constant 0 : index
    %138 = vector.load %arg30[%c0_82, %c0_83] : memref<1x64xf32, #tpu.memory_space<vmem>>, vector<1x64xf32>
    %139 = vector.broadcast %138 : vector<1x64xf32> to vector<24x64xf32>
    %140 = arith.addf %137, %139 : vector<24x64xf32>
    %141 = vector.shape_cast %130 : vector<8x64xf32> to vector<8x4x16xf32>
    %142 = tpu.transpose %141, [1, 0, 2] : vector<8x4x16xf32> -> vector<4x8x16xf32>
    %143 = vector.shape_cast %135 : vector<24x64xf32> to vector<24x4x16xf32>
    %144 = tpu.transpose %143, [1, 0, 2] : vector<24x4x16xf32> -> vector<4x24x16xf32>
    "tpu.trace_start"() <{level = 10 : i32, message = "hld,hsd->hls"}> : () -> ()
    %cst_84 = arith.constant dense<0.000000e+00> : vector<4x8x24xf32>
    %145 = tpu.matmul %142, %144, %cst_84 {dimension_numbers = #tpu.dot_dimension_numbers<[2], [2], [1], [1], [0, 0, 0, 1, 1, 1], [0], [0]>} : vector<4x8x16xf32>, vector<4x24x16xf32>, vector<4x8x24xf32> -> vector<4x8x24xf32>
    "tpu.trace_stop"() : () -> ()
    %cst_85 = arith.constant 2.500000e-01 : f32
    %146 = vector.broadcast %cst_85 : f32 to vector<4x8x24xf32>
    %147 = arith.mulf %145, %146 : vector<4x8x24xf32>
    %c0_86 = arith.constant 0 : index
    %c0_87 = arith.constant 0 : index
    %c0_88 = arith.constant 0 : index
    %148 = vector.load %arg10[%c0_86, %c0_87, %c0_88] : memref<1x1x3xf32, #tpu.memory_space<vmem>>, vector<1x1x3xf32>
    %149 = vector.shape_cast %148 : vector<1x1x3xf32> to vector<1x3xf32>
    %150 = vector.broadcast %149 : vector<1x3xf32> to vector<8x3xf32>
    %151 = arith.mulf %122, %150 : vector<8x3xf32>
    %c0_89 = arith.constant 0 : index
    %c0_90 = arith.constant 0 : index
    %c0_91 = arith.constant 0 : index
    %152 = vector.load %arg9[%c0_89, %c0_90, %c0_91] : memref<1x3x8xf32, #tpu.memory_space<vmem>>, vector<1x3x8xf32>
    %153 = vector.shape_cast %152 : vector<1x3x8xf32> to vector<3x8xf32>
    %154 = vector.extract_strided_slice %147 {offsets = [0, 0, 0], sizes = [4, 8, 8], strides = [1, 1, 1]} : vector<4x8x24xf32> to vector<4x8x8xf32>
    %155 = vector.extract_strided_slice %153 {offsets = [0, 0], sizes = [1, 8], strides = [1, 1]} : vector<3x8xf32> to vector<1x8xf32>
    %156 = vector.shape_cast %155 : vector<1x8xf32> to vector<1x1x8xf32>
    %157 = vector.broadcast %156 : vector<1x1x8xf32> to vector<4x8x8xf32>
    %158 = arith.addf %154, %157 : vector<4x8x8xf32>
    %cst_92 = arith.constant dense<0xFF800000> : vector<4x8xf32>
    %159 = vector.multi_reduction <maximumf>, %158, %cst_92 [2] : vector<4x8x8xf32> to vector<4x8xf32>
    %160 = vector.shape_cast %159 : vector<4x8xf32> to vector<4x8x1xf32>
    %161 = vector.broadcast %160 : vector<4x8x1xf32> to vector<4x8x8xf32>
    %162 = arith.subf %158, %161 : vector<4x8x8xf32>
    %163 = math.exp %162 : vector<4x8x8xf32>
    %cst_93 = arith.constant dense<0.000000e+00> : vector<4x8xf32>
    %164 = vector.multi_reduction <add>, %163, %cst_93 [2] : vector<4x8x8xf32> to vector<4x8xf32>
    %165 = vector.shape_cast %164 : vector<4x8xf32> to vector<4x8x1xf32>
    %166 = tpu.reciprocal %165 {approx = true} : vector<4x8x1xf32> -> vector<4x8x1xf32>
    %167 = vector.broadcast %166 : vector<4x8x1xf32> to vector<4x8x8xf32>
    %168 = arith.mulf %163, %167 : vector<4x8x8xf32>
    %169 = vector.extract_strided_slice %151 {offsets = [0, 0], sizes = [8, 1], strides = [1, 1]} : vector<8x3xf32> to vector<8x1xf32>
    %170 = vector.shape_cast %169 : vector<8x1xf32> to vector<1x8x1xf32>
    %171 = vector.broadcast %170 : vector<1x8x1xf32> to vector<4x8x8xf32>
    %172 = arith.mulf %168, %171 : vector<4x8x8xf32>
    %173 = vector.extract_strided_slice %147 {offsets = [0, 0, 8], sizes = [4, 8, 8], strides = [1, 1, 1]} : vector<4x8x24xf32> to vector<4x8x8xf32>
    %174 = vector.extract_strided_slice %153 {offsets = [1, 0], sizes = [1, 8], strides = [1, 1]} : vector<3x8xf32> to vector<1x8xf32>
    %175 = vector.shape_cast %174 : vector<1x8xf32> to vector<1x1x8xf32>
    %176 = vector.broadcast %175 : vector<1x1x8xf32> to vector<4x8x8xf32>
    %177 = arith.addf %173, %176 : vector<4x8x8xf32>
    %cst_94 = arith.constant dense<0xFF800000> : vector<4x8xf32>
    %178 = vector.multi_reduction <maximumf>, %177, %cst_94 [2] : vector<4x8x8xf32> to vector<4x8xf32>
    %179 = vector.shape_cast %178 : vector<4x8xf32> to vector<4x8x1xf32>
    %180 = vector.broadcast %179 : vector<4x8x1xf32> to vector<4x8x8xf32>
    %181 = arith.subf %177, %180 : vector<4x8x8xf32>
    %182 = math.exp %181 : vector<4x8x8xf32>
    %cst_95 = arith.constant dense<0.000000e+00> : vector<4x8xf32>
    %183 = vector.multi_reduction <add>, %182, %cst_95 [2] : vector<4x8x8xf32> to vector<4x8xf32>
    %184 = vector.shape_cast %183 : vector<4x8xf32> to vector<4x8x1xf32>
    %185 = tpu.reciprocal %184 {approx = true} : vector<4x8x1xf32> -> vector<4x8x1xf32>
    %186 = vector.broadcast %185 : vector<4x8x1xf32> to vector<4x8x8xf32>
    %187 = arith.mulf %182, %186 : vector<4x8x8xf32>
    %188 = vector.extract_strided_slice %151 {offsets = [0, 1], sizes = [8, 1], strides = [1, 1]} : vector<8x3xf32> to vector<8x1xf32>
    %189 = vector.shape_cast %188 : vector<8x1xf32> to vector<1x8x1xf32>
    %190 = vector.broadcast %189 : vector<1x8x1xf32> to vector<4x8x8xf32>
    %191 = arith.mulf %187, %190 : vector<4x8x8xf32>
    %192 = vector.extract_strided_slice %147 {offsets = [0, 0, 16], sizes = [4, 8, 8], strides = [1, 1, 1]} : vector<4x8x24xf32> to vector<4x8x8xf32>
    %193 = vector.extract_strided_slice %153 {offsets = [2, 0], sizes = [1, 8], strides = [1, 1]} : vector<3x8xf32> to vector<1x8xf32>
    %194 = vector.shape_cast %193 : vector<1x8xf32> to vector<1x1x8xf32>
    %195 = vector.broadcast %194 : vector<1x1x8xf32> to vector<4x8x8xf32>
    %196 = arith.addf %192, %195 : vector<4x8x8xf32>
    %cst_96 = arith.constant dense<0xFF800000> : vector<4x8xf32>
    %197 = vector.multi_reduction <maximumf>, %196, %cst_96 [2] : vector<4x8x8xf32> to vector<4x8xf32>
    %198 = vector.shape_cast %197 : vector<4x8xf32> to vector<4x8x1xf32>
    %199 = vector.broadcast %198 : vector<4x8x1xf32> to vector<4x8x8xf32>
    %200 = arith.subf %196, %199 : vector<4x8x8xf32>
    %201 = math.exp %200 : vector<4x8x8xf32>
    %cst_97 = arith.constant dense<0.000000e+00> : vector<4x8xf32>
    %202 = vector.multi_reduction <add>, %201, %cst_97 [2] : vector<4x8x8xf32> to vector<4x8xf32>
    %203 = vector.shape_cast %202 : vector<4x8xf32> to vector<4x8x1xf32>
    %204 = tpu.reciprocal %203 {approx = true} : vector<4x8x1xf32> -> vector<4x8x1xf32>
    %205 = vector.broadcast %204 : vector<4x8x1xf32> to vector<4x8x8xf32>
    %206 = arith.mulf %201, %205 : vector<4x8x8xf32>
    %207 = vector.extract_strided_slice %151 {offsets = [0, 2], sizes = [8, 1], strides = [1, 1]} : vector<8x3xf32> to vector<8x1xf32>
    %208 = vector.shape_cast %207 : vector<8x1xf32> to vector<1x8x1xf32>
    %209 = vector.broadcast %208 : vector<1x8x1xf32> to vector<4x8x8xf32>
    %210 = arith.mulf %206, %209 : vector<4x8x8xf32>
    %211 = tpu.concatenate %172, %191, %210 in 2 : vector<4x8x8xf32>, vector<4x8x8xf32>, vector<4x8x8xf32> -> vector<4x8x24xf32>
    %212 = arith.truncf %211 : vector<4x8x24xf32> to vector<4x8x24xbf16>
    %213 = vector.shape_cast %140 : vector<24x64xf32> to vector<24x4x16xf32>
    %214 = tpu.transpose %213, [1, 0, 2] : vector<24x4x16xf32> -> vector<4x24x16xf32>
    %215 = arith.truncf %214 : vector<4x24x16xf32> to vector<4x24x16xbf16>
    "tpu.trace_start"() <{level = 10 : i32, message = "hls,hsd->hld"}> : () -> ()
    %cst_98 = arith.constant dense<0.000000e+00> : vector<4x8x16xf32>
    %216 = tpu.matmul %212, %215, %cst_98 {dimension_numbers = #tpu.dot_dimension_numbers<[2], [1], [1], [2], [0, 0, 0, 1, 1, 2], [0], [0]>} : vector<4x8x24xbf16>, vector<4x24x16xbf16>, vector<4x8x16xf32> -> vector<4x8x16xf32>
    "tpu.trace_stop"() : () -> ()
    %217 = tpu.transpose %216, [1, 0, 2] : vector<4x8x16xf32> -> vector<8x4x16xf32>
    %218 = vector.shape_cast %217 : vector<8x4x16xf32> to vector<8x64xf32>
    %cst_99 = arith.constant dense<0.000000e+00> : vector<8xf32>
    %219 = vector.multi_reduction <add>, %151, %cst_99 [1] : vector<8x3xf32> to vector<8xf32>
    %220 = vector.shape_cast %219 : vector<8xf32> to vector<8x1xf32>
    %221 = arith.truncf %218 : vector<8x64xf32> to vector<8x64xbf16>
    %c0_100 = arith.constant 0 : index
    %c0_101 = arith.constant 0 : index
    %222 = vector.load %arg31[%c0_100, %c0_101] : memref<64x64xbf16, #tpu.memory_space<vmem>>, vector<64x64xbf16>
    %cst_102 = arith.constant dense<0.000000e+00> : vector<8x64xf32>
    %223 = tpu.matmul %221, %222, %cst_102 {dimension_numbers = #tpu.dot_dimension_numbers<[1], [0], [0], [1], [0, 0, 1, 1], [], []>} : vector<8x64xbf16>, vector<64x64xbf16>, vector<8x64xf32> -> vector<8x64xf32>
    %c0_103 = arith.constant 0 : index
    %c0_104 = arith.constant 0 : index
    %224 = vector.load %arg32[%c0_103, %c0_104] : memref<1x64xf32, #tpu.memory_space<vmem>>, vector<1x64xf32>
    %225 = vector.broadcast %224 : vector<1x64xf32> to vector<8x64xf32>
    %226 = vector.broadcast %220 : vector<8x1xf32> to vector<8x64xf32>
    %227 = arith.mulf %225, %226 : vector<8x64xf32>
    %228 = arith.addf %223, %227 : vector<8x64xf32>
    %c0_105 = arith.constant 0 : index
    %c0_106 = arith.constant 0 : index
    %229 = vector.load %arg33[%c0_105, %c0_106] : memref<1x64xf32, #tpu.memory_space<vmem>>, vector<1x64xf32>
    %c0_107 = arith.constant 0 : index
    %c0_108 = arith.constant 0 : index
    %230 = vector.load %arg34[%c0_107, %c0_108] : memref<1x64xf32, #tpu.memory_space<vmem>>, vector<1x64xf32>
    %231 = arith.addf %83, %228 : vector<8x64xf32>
    %cst_109 = arith.constant dense<0.000000e+00> : vector<8xf32>
    %232 = vector.multi_reduction <add>, %231, %cst_109 [1] : vector<8x64xf32> to vector<8xf32>
    %233 = vector.shape_cast %232 : vector<8xf32> to vector<8x1xf32>
    %cst_110 = arith.constant 6.400000e+01 : f32
    %234 = vector.broadcast %cst_110 : f32 to vector<8x1xf32>
    %235 = arith.divf %233, %234 : vector<8x1xf32>
    %236 = vector.broadcast %235 : vector<8x1xf32> to vector<8x64xf32>
    %237 = arith.subf %231, %236 : vector<8x64xf32>
    %238 = arith.mulf %237, %237 : vector<8x64xf32>
    %cst_111 = arith.constant dense<0.000000e+00> : vector<8xf32>
    %239 = vector.multi_reduction <add>, %238, %cst_111 [1] : vector<8x64xf32> to vector<8xf32>
    %240 = vector.shape_cast %239 : vector<8xf32> to vector<8x1xf32>
    %cst_112 = arith.constant 6.400000e+01 : f32
    %241 = vector.broadcast %cst_112 : f32 to vector<8x1xf32>
    %242 = arith.divf %240, %241 : vector<8x1xf32>
    %cst_113 = arith.constant 9.99999974E-6 : f32
    %243 = vector.broadcast %cst_113 : f32 to vector<8x1xf32>
    %244 = arith.addf %242, %243 : vector<8x1xf32>
    %245 = math.rsqrt %244 : vector<8x1xf32>
    %246 = vector.broadcast %245 : vector<8x1xf32> to vector<8x64xf32>
    %247 = arith.mulf %237, %246 : vector<8x64xf32>
    %248 = vector.broadcast %229 : vector<1x64xf32> to vector<8x64xf32>
    %249 = arith.mulf %247, %248 : vector<8x64xf32>
    %250 = vector.broadcast %230 : vector<1x64xf32> to vector<8x64xf32>
    %251 = arith.addf %249, %250 : vector<8x64xf32>
    %252 = arith.truncf %251 : vector<8x64xf32> to vector<8x64xbf16>
    %c0_114 = arith.constant 0 : index
    %c0_115 = arith.constant 0 : index
    %253 = vector.load %arg35[%c0_114, %c0_115] : memref<64x128xbf16, #tpu.memory_space<vmem>>, vector<64x128xbf16>
    %cst_116 = arith.constant dense<0.000000e+00> : vector<8x128xf32>
    %254 = tpu.matmul %252, %253, %cst_116 {dimension_numbers = #tpu.dot_dimension_numbers<[1], [0], [0], [1], [0, 0, 1, 1], [], []>} : vector<8x64xbf16>, vector<64x128xbf16>, vector<8x128xf32> -> vector<8x128xf32>
    %c0_117 = arith.constant 0 : index
    %c0_118 = arith.constant 0 : index
    %255 = vector.load %arg36[%c0_117, %c0_118] : memref<1x128xf32, #tpu.memory_space<vmem>>, vector<1x128xf32>
    %256 = vector.broadcast %255 : vector<1x128xf32> to vector<8x128xf32>
    %257 = arith.addf %254, %256 : vector<8x128xf32>
    %cst_119 = arith.constant 0.000000e+00 : f32
    %258 = vector.broadcast %cst_119 : f32 to vector<8x128xf32>
    %259 = arith.maximumf %257, %258 : vector<8x128xf32>
    %260 = arith.truncf %259 : vector<8x128xf32> to vector<8x128xbf16>
    %c0_120 = arith.constant 0 : index
    %c0_121 = arith.constant 0 : index
    %261 = vector.load %arg37[%c0_120, %c0_121] : memref<128x64xbf16, #tpu.memory_space<vmem>>, vector<128x64xbf16>
    %cst_122 = arith.constant dense<0.000000e+00> : vector<8x64xf32>
    %262 = tpu.matmul %260, %261, %cst_122 {dimension_numbers = #tpu.dot_dimension_numbers<[1], [0], [0], [1], [0, 0, 1, 1], [], []>} : vector<8x128xbf16>, vector<128x64xbf16>, vector<8x64xf32> -> vector<8x64xf32>
    %c0_123 = arith.constant 0 : index
    %c0_124 = arith.constant 0 : index
    %263 = vector.load %arg38[%c0_123, %c0_124] : memref<1x64xf32, #tpu.memory_space<vmem>>, vector<1x64xf32>
    %264 = vector.broadcast %263 : vector<1x64xf32> to vector<8x64xf32>
    %265 = arith.addf %262, %264 : vector<8x64xf32>
    %c0_125 = arith.constant 0 : index
    %c0_126 = arith.constant 0 : index
    %266 = vector.load %arg39[%c0_125, %c0_126] : memref<1x64xf32, #tpu.memory_space<vmem>>, vector<1x64xf32>
    %c0_127 = arith.constant 0 : index
    %c0_128 = arith.constant 0 : index
    %267 = vector.load %arg40[%c0_127, %c0_128] : memref<1x64xf32, #tpu.memory_space<vmem>>, vector<1x64xf32>
    %268 = arith.addf %251, %265 : vector<8x64xf32>
    %cst_129 = arith.constant dense<0.000000e+00> : vector<8xf32>
    %269 = vector.multi_reduction <add>, %268, %cst_129 [1] : vector<8x64xf32> to vector<8xf32>
    %270 = vector.shape_cast %269 : vector<8xf32> to vector<8x1xf32>
    %cst_130 = arith.constant 6.400000e+01 : f32
    %271 = vector.broadcast %cst_130 : f32 to vector<8x1xf32>
    %272 = arith.divf %270, %271 : vector<8x1xf32>
    %273 = vector.broadcast %272 : vector<8x1xf32> to vector<8x64xf32>
    %274 = arith.subf %268, %273 : vector<8x64xf32>
    %275 = arith.mulf %274, %274 : vector<8x64xf32>
    %cst_131 = arith.constant dense<0.000000e+00> : vector<8xf32>
    %276 = vector.multi_reduction <add>, %275, %cst_131 [1] : vector<8x64xf32> to vector<8xf32>
    %277 = vector.shape_cast %276 : vector<8xf32> to vector<8x1xf32>
    %cst_132 = arith.constant 6.400000e+01 : f32
    %278 = vector.broadcast %cst_132 : f32 to vector<8x1xf32>
    %279 = arith.divf %277, %278 : vector<8x1xf32>
    %cst_133 = arith.constant 9.99999974E-6 : f32
    %280 = vector.broadcast %cst_133 : f32 to vector<8x1xf32>
    %281 = arith.addf %279, %280 : vector<8x1xf32>
    %282 = math.rsqrt %281 : vector<8x1xf32>
    %283 = vector.broadcast %282 : vector<8x1xf32> to vector<8x64xf32>
    %284 = arith.mulf %274, %283 : vector<8x64xf32>
    %285 = vector.broadcast %266 : vector<1x64xf32> to vector<8x64xf32>
    %286 = arith.mulf %284, %285 : vector<8x64xf32>
    %287 = vector.broadcast %267 : vector<1x64xf32> to vector<8x64xf32>
    %288 = arith.addf %286, %287 : vector<8x64xf32>
    %c0_134 = arith.constant 0 : index
    %c0_135 = arith.constant 0 : index
    %c0_136 = arith.constant 0 : index
    %289 = vector.load %arg41[%c0_134, %c0_135, %c0_136] : memref<1x8x64xf32, #tpu.memory_space<vmem>>, vector<1x8x64xf32>
    %290 = vector.shape_cast %289 : vector<1x8x64xf32> to vector<8x64xf32>
    %291 = vector.shape_cast %288 : vector<8x64xf32> to vector<1x8x64xf32>
    tpu.vector_store %arg41[%c0_134, %c0_135, %c0_136], %291 {strides = array<i32>} : memref<1x8x64xf32, #tpu.memory_space<vmem>>, vector<1x8x64xf32>,
    return
  }
  func.func @transform_0(%arg0: i32, %arg1: i32) -> (i32, i32, i32) {
    %c0_i32 = arith.constant 0 : i32
    %c0_i32_0 = arith.constant 0 : i32
    return %arg0, %arg1, %c0_i32 : i32, i32, i32
  }
  func.func @transform_1(%arg0: i32, %arg1: i32) -> (i32, i32, i32) {
    %c0_i32 = arith.constant 0 : i32
    %c0_i32_0 = arith.constant 0 : i32
    %c0_i32_1 = arith.constant 0 : i32
    return %arg0, %c0_i32, %c0_i32_0 : i32, i32, i32
  }
  func.func @transform_2(%arg0: i32, %arg1: i32) -> (i32, i32) {
    %c0_i32 = arith.constant 0 : i32
    %c0_i32_0 = arith.constant 0 : i32
    return %arg1, %c0_i32 : i32, i32
  }
  func.func @transform_3(%arg0: i32, %arg1: i32) -> (i32, i32, i32) {
    %c0_i32 = arith.constant 0 : i32
    %c0_i32_0 = arith.constant 0 : i32
    %c0_i32_1 = arith.constant 0 : i32
    return %arg0, %c0_i32, %c0_i32_0 : i32, i32, i32
  }
  func.func @transform_4(%arg0: i32, %arg1: i32) -> (i32, i32, i32) {
    %c0_i32 = arith.constant 0 : i32
    %c0_i32_0 = arith.constant 0 : i32
    %c0_i32_1 = arith.constant 0 : i32
    return %arg0, %c0_i32, %c0_i32_0 : i32, i32, i32
  }
  func.func @transform_5(%arg0: i32, %arg1: i32) -> (i32, i32, i32) {
    %c0_i32 = arith.constant 0 : i32
    %c0_i32_0 = arith.constant 0 : i32
    %c0_i32_1 = arith.constant 0 : i32
    return %arg0, %c0_i32, %c0_i32_0 : i32, i32, i32
  }
  func.func @transform_6(%arg0: i32, %arg1: i32) -> (i32, i32, i32) {
    %c0_i32 = arith.constant 0 : i32
    %c0_i32_0 = arith.constant 0 : i32
    %c0_i32_1 = arith.constant 0 : i32
    return %arg0, %c0_i32, %c0_i32_0 : i32, i32, i32
  }
  func.func @transform_7(%arg0: i32, %arg1: i32) -> (i32, i32, i32) {
    %c0_i32 = arith.constant 0 : i32
    %c0_i32_0 = arith.constant 0 : i32
    %c0_i32_1 = arith.constant 0 : i32
    return %arg0, %c0_i32, %c0_i32_0 : i32, i32, i32
  }
  func.func @transform_8(%arg0: i32, %arg1: i32) -> (i32, i32, i32) {
    %c0_i32 = arith.constant 0 : i32
    %c0_i32_0 = arith.constant 0 : i32
    %c0_i32_1 = arith.constant 0 : i32
    return %arg0, %c0_i32, %c0_i32_0 : i32, i32, i32
  }
  func.func @transform_9(%arg0: i32, %arg1: i32) -> (i32, i32) {
    %c0_i32 = arith.constant 0 : i32
    %c0_i32_0 = arith.constant 0 : i32
    %c0_i32_1 = arith.constant 0 : i32
    return %c0_i32, %c0_i32_0 : i32, i32
  }
  func.func @transform_10(%arg0: i32, %arg1: i32) -> (i32, i32) {
    %c0_i32 = arith.constant 0 : i32
    %c0_i32_0 = arith.constant 0 : i32
    %c0_i32_1 = arith.constant 0 : i32
    return %c0_i32, %c0_i32_0 : i32, i32
  }
  func.func @transform_11(%arg0: i32, %arg1: i32) -> (i32, i32) {
    %c0_i32 = arith.constant 0 : i32
    %c0_i32_0 = arith.constant 0 : i32
    %c0_i32_1 = arith.constant 0 : i32
    return %c0_i32, %c0_i32_0 : i32, i32
  }
  func.func @transform_12(%arg0: i32, %arg1: i32) -> (i32, i32) {
    %c0_i32 = arith.constant 0 : i32
    %c0_i32_0 = arith.constant 0 : i32
    %c0_i32_1 = arith.constant 0 : i32
    return %c0_i32, %c0_i32_0 : i32, i32
  }
  func.func @transform_13(%arg0: i32, %arg1: i32) -> (i32, i32) {
    %c0_i32 = arith.constant 0 : i32
    %c0_i32_0 = arith.constant 0 : i32
    %c0_i32_1 = arith.constant 0 : i32
    return %c0_i32, %c0_i32_0 : i32, i32
  }
  func.func @transform_14(%arg0: i32, %arg1: i32) -> (i32, i32) {
    %c0_i32 = arith.constant 0 : i32
    %c0_i32_0 = arith.constant 0 : i32
    %c0_i32_1 = arith.constant 0 : i32
    return %c0_i32, %c0_i32_0 : i32, i32
  }
  func.func @transform_15(%arg0: i32, %arg1: i32) -> (i32, i32) {
    %c0_i32 = arith.constant 0 : i32
    %c0_i32_0 = arith.constant 0 : i32
    %c0_i32_1 = arith.constant 0 : i32
    return %c0_i32, %c0_i32_0 : i32, i32
  }
  func.func @transform_16(%arg0: i32, %arg1: i32) -> (i32, i32) {
    %c0_i32 = arith.constant 0 : i32
    %c0_i32_0 = arith.constant 0 : i32
    %c0_i32_1 = arith.constant 0 : i32
    return %c0_i32, %c0_i32_0 : i32, i32
  }
  func.func @transform_17(%arg0: i32, %arg1: i32) -> (i32, i32) {
    %c0_i32 = arith.constant 0 : i32
    %c0_i32_0 = arith.constant 0 : i32
    %c0_i32_1 = arith.constant 0 : i32
    return %c0_i32, %c0_i32_0 : i32, i32
  }
  func.func @transform_18(%arg0: i32, %arg1: i32) -> (i32, i32) {
    %c0_i32 = arith.constant 0 : i32
    %c0_i32_0 = arith.constant 0 : i32
    %c0_i32_1 = arith.constant 0 : i32
    return %c0_i32, %c0_i32_0 : i32, i32
  }
  func.func @transform_19(%arg0: i32, %arg1: i32) -> (i32, i32) {
    %c0_i32 = arith.constant 0 : i32
    %c0_i32_0 = arith.constant 0 : i32
    %c0_i32_1 = arith.constant 0 : i32
    return %c0_i32, %c0_i32_0 : i32, i32
  }
  func.func @transform_20(%arg0: i32, %arg1: i32) -> (i32, i32) {
    %c0_i32 = arith.constant 0 : i32
    %c0_i32_0 = arith.constant 0 : i32
    %c0_i32_1 = arith.constant 0 : i32
    return %c0_i32, %c0_i32_0 : i32, i32
  }
  func.func @transform_21(%arg0: i32, %arg1: i32) -> (i32, i32) {
    %c0_i32 = arith.constant 0 : i32
    %c0_i32_0 = arith.constant 0 : i32
    %c0_i32_1 = arith.constant 0 : i32
    return %c0_i32, %c0_i32_0 : i32, i32
  }
  func.func @transform_22(%arg0: i32, %arg1: i32) -> (i32, i32) {
    %c0_i32 = arith.constant 0 : i32
    %c0_i32_0 = arith.constant 0 : i32
    %c0_i32_1 = arith.constant 0 : i32
    return %c0_i32, %c0_i32_0 : i32, i32
  }
  func.func @transform_23(%arg0: i32, %arg1: i32) -> (i32, i32) {
    %c0_i32 = arith.constant 0 : i32
    %c0_i32_0 = arith.constant 0 : i32
    %c0_i32_1 = arith.constant 0 : i32
    return %c0_i32, %c0_i32_0 : i32, i32
  }
  func.func @transform_24(%arg0: i32, %arg1: i32) -> (i32, i32) {
    %c0_i32 = arith.constant 0 : i32
    %c0_i32_0 = arith.constant 0 : i32
    %c0_i32_1 = arith.constant 0 : i32
    return %c0_i32, %c0_i32_0 : i32, i32
  }
  func.func @transform_25(%arg0: i32, %arg1: i32) -> (i32, i32) {
    %c0_i32 = arith.constant 0 : i32
    %c0_i32_0 = arith.constant 0 : i32
    %c0_i32_1 = arith.constant 0 : i32
    return %c0_i32, %c0_i32_0 : i32, i32
  }
  func.func @transform_26(%arg0: i32, %arg1: i32) -> (i32, i32) {
    %c0_i32 = arith.constant 0 : i32
    %c0_i32_0 = arith.constant 0 : i32
    %c0_i32_1 = arith.constant 0 : i32
    return %c0_i32, %c0_i32_0 : i32, i32
  }
  func.func @transform_27(%arg0: i32, %arg1: i32) -> (i32, i32) {
    %c0_i32 = arith.constant 0 : i32
    %c0_i32_0 = arith.constant 0 : i32
    %c0_i32_1 = arith.constant 0 : i32
    return %c0_i32, %c0_i32_0 : i32, i32
  }
  func.func @transform_28(%arg0: i32, %arg1: i32) -> (i32, i32) {
    %c0_i32 = arith.constant 0 : i32
    %c0_i32_0 = arith.constant 0 : i32
    %c0_i32_1 = arith.constant 0 : i32
    return %c0_i32, %c0_i32_0 : i32, i32
  }
  func.func @transform_29(%arg0: i32, %arg1: i32) -> (i32, i32) {
    %c0_i32 = arith.constant 0 : i32
    %c0_i32_0 = arith.constant 0 : i32
    %c0_i32_1 = arith.constant 0 : i32
    return %c0_i32, %c0_i32_0 : i32, i32
  }
  func.func @transform_30(%arg0: i32, %arg1: i32) -> (i32, i32) {
    %c0_i32 = arith.constant 0 : i32
    %c0_i32_0 = arith.constant 0 : i32
    %c0_i32_1 = arith.constant 0 : i32
    return %c0_i32, %c0_i32_0 : i32, i32
  }
  func.func @transform_31(%arg0: i32, %arg1: i32) -> (i32, i32) {
    %c0_i32 = arith.constant 0 : i32
    %c0_i32_0 = arith.constant 0 : i32
    %c0_i32_1 = arith.constant 0 : i32
    return %c0_i32, %c0_i32_0 : i32, i32
  }
  func.func @transform_32(%arg0: i32, %arg1: i32) -> (i32, i32) {
    %c0_i32 = arith.constant 0 : i32
    %c0_i32_0 = arith.constant 0 : i32
    %c0_i32_1 = arith.constant 0 : i32
    return %c0_i32, %c0_i32_0 : i32, i32
  }
  func.func @transform_33(%arg0: i32, %arg1: i32) -> (i32, i32) {
    %c0_i32 = arith.constant 0 : i32
    %c0_i32_0 = arith.constant 0 : i32
    %c0_i32_1 = arith.constant 0 : i32
    return %c0_i32, %c0_i32_0 : i32, i32
  }
  func.func @transform_34(%arg0: i32, %arg1: i32) -> (i32, i32) {
    %c0_i32 = arith.constant 0 : i32
    %c0_i32_0 = arith.constant 0 : i32
    %c0_i32_1 = arith.constant 0 : i32
    return %c0_i32, %c0_i32_0 : i32, i32
  }
  func.func @transform_35(%arg0: i32, %arg1: i32) -> (i32, i32) {
    %c0_i32 = arith.constant 0 : i32
    %c0_i32_0 = arith.constant 0 : i32
    %c0_i32_1 = arith.constant 0 : i32
    return %c0_i32, %c0_i32_0 : i32, i32
  }
  func.func @transform_36(%arg0: i32, %arg1: i32) -> (i32, i32) {
    %c0_i32 = arith.constant 0 : i32
    %c0_i32_0 = arith.constant 0 : i32
    %c0_i32_1 = arith.constant 0 : i32
    return %c0_i32, %c0_i32_0 : i32, i32
  }
  func.func @transform_37(%arg0: i32, %arg1: i32) -> (i32, i32) {
    %c0_i32 = arith.constant 0 : i32
    %c0_i32_0 = arith.constant 0 : i32
    %c0_i32_1 = arith.constant 0 : i32
    return %c0_i32, %c0_i32_0 : i32, i32
  }
  func.func @transform_38(%arg0: i32, %arg1: i32) -> (i32, i32) {
    %c0_i32 = arith.constant 0 : i32
    %c0_i32_0 = arith.constant 0 : i32
    %c0_i32_1 = arith.constant 0 : i32
    return %c0_i32, %c0_i32_0 : i32, i32
  }
  func.func @transform_39(%arg0: i32, %arg1: i32) -> (i32, i32, i32) {
    %c0_i32 = arith.constant 0 : i32
    %c0_i32_0 = arith.constant 0 : i32
    return %arg0, %arg1, %c0_i32 : i32, i32, i32
  }
}

</mosaic_0001>

<bundles_post_ra>
// kernel: decoder_forward.2
= control target key start
LH: loop header
LB: loop body
LE: loop exit
PB: predicated region body
PF: predicated region fallthrough
CT: control target
= control target key end

     0   :  { %s8070_s6 = smov 1   ;;  %s8071_s10 = smov 2   ;;  %s9463_s0 = inlined_call_operand.smem [shape: u32[40], index: -1, kind: input, shape index: {}] }
   0x1   :  { %s8148_s5 = sld [smem:[%s9463_s0]]   ;;  %s8072_s14 = smov 3  }
   0x2   :  { %s8153_s9 = sld [smem:[%s9463_s0 + %s8070_s6]]   ;;  %s8073_s18 = smov 4  }
   0x3   :  { %s8158_s13 = sld [smem:[%s9463_s0 + %s8071_s10]]   ;;  %s8074_s22 = smov 5  }
   0x4   :  { %s8163_s17 = sld [smem:[%s9463_s0 + %s8072_s14]]   ;;  %s8075_s26 = smov 6  }
   0x5   :  { %s8168_s21 = sld [smem:[%s9463_s0 + %s8073_s18]]   ;;  %s8076_s30 = smov 7  }
   0x6   :  { %s8173_s25 = sld [smem:[%s9463_s0 + %s8074_s22]]   ;;  %s8077_s4 = smov 8  }
   0x7   :  { %s8178_s29 = sld [smem:[%s9463_s0 + %s8075_s26]]   ;;  %s8078_s10 = smov 9  }
   0x8   :  { %9482 = sst [smem:[#allocation32_spill]] %s8153_s9  ;;  %s8079_s15 = smov 10  }
   0x9   :  { %9483 = sst [smem:[#allocation33_spill]] %s8158_s13  ;;  %s8080_s20 = smov 11  }
   0xa   :  { %9484 = sst [smem:[#allocation34_spill]] %s8163_s17  ;;  %s8081_s26 = smov 12  }
   0xb   :  { %9485 = sst [smem:[#allocation35_spill]] %s8168_s21  ;;  %s8082_s1 = smov 13  }
   0xc   :  { %9486 = sst [smem:[#allocation36_spill]] %s8173_s25  ;;  %s8083_s7 = smov 14  }
   0xd   :  { %9487 = sst [smem:[#allocation37_spill]] %s8178_s29  ;;  %s8085_s22 = smov 16  }
   0xe   :  { %s8183_s3 = sld [smem:[%s9463_s0 + %s8076_s30]]   ;;  %s8086_s28 = smov 17  }
   0xf   :  { %s8188_s8 = sld [smem:[%s9463_s0 + %s8077_s4]]  }
  0x10   :  { %s8193_s14 = sld [smem:[%s9463_s0 + %s8078_s10]]  }
  0x11   :  { %s8198_s19 = sld [smem:[%s9463_s0 + %s8079_s15]]   ;;  %s8084_s15 = smov 15  }
  0x12   :  { %s8203_s24 = sld [smem:[%s9463_s0 + %s8080_s20]]  }
  0x13   :  { %s8208_s30 = sld [smem:[%s9463_s0 + %s8081_s26]]  }
  0x14   :  { %9488 = sst [smem:[#allocation38_spill]] %s8183_s3 }
  0x15   :  { %9489 = sst [smem:[#allocation39_spill]] %s8188_s8 }
  0x16   :  { %s8213_s6 = sld [smem:[%s9463_s0 + %s8082_s1]]  }
  0x17   :  { %9490 = sst [smem:[#allocation40_spill]] %s8198_s19 }
  0x18   :  { %s8218_s12 = sld [smem:[%s9463_s0 + %s8083_s7]]   ;;  %s8087_s7 = smov 18  }
  0x19   :  { %9491 = sst [smem:[#allocation41_spill]] %s8208_s30 }
  0x1a   :  { %s8223_s20 = sld [smem:[%s9463_s0 + %s8084_s15]]   ;;  %s8088_s15 = smov 19  }
  0x1b   :  { %s8228_s27 = sld [smem:[%s9463_s0 + %s8085_s22]]   ;;  %s8089_s22 = smov 20  }
  0x1c   :  { %9492 = sst [smem:[#allocation42_spill]] %s8213_s6 }
  0x1d   :  { %s8233_s4 = sld [smem:[%s9463_s0 + %s8086_s28]]   ;;  %s8090_s28 = smov 21  }
  0x1e   :  { %9493 = sst [smem:[#allocation43_spill]] %s8218_s12 }
  0x1f   :  { %s8238_s8 = sld [smem:[%s9463_s0 + %s8087_s7]]   ;;  %s8091_s7 = smov 22  }
  0x20   :  { %9494 = sst [smem:[#allocation44_spill]] %s8223_s20 }
  0x21   :  { %9495 = sst [smem:[#allocation45_spill]] %s8228_s27 }
  0x22   :  { %s8243_s29 = sld [smem:[%s9463_s0 + %s8088_s15]]   ;;  %s8092_s15 = smov 23  }
  0x23   :  { %s8248_s3 = sld [smem:[%s9463_s0 + %s8089_s22]]   ;;  %s8093_s22 = smov 24  }
  0x24   :  { %s8253_s25 = sld [smem:[%s9463_s0 + %s8090_s28]]   ;;  %s8094_s28 = smov 25  }
  0x25   :  { %9496 = sst [smem:[#allocation46_spill]] %s8238_s8 }
  0x26   :  { %s8258_s21 = sld [smem:[%s9463_s0 + %s8091_s7]]   ;;  %s8095_s7 = smov 26  }
  0x27   :  { %s8268_s27 = sld [smem:[%s9463_s0 + %s8093_s22]]   ;;  %s8097_s22 = smov 28  }
  0x28   :  { %9497 = sst [smem:[#allocation47_spill]] %s8243_s29 }
  0x29   :  { %s8263_s29 = sld [smem:[%s9463_s0 + %s8092_s15]]   ;;  %s8096_s15 = smov 27  }
  0x2a   :  { %s8273_s20 = sld [smem:[%s9463_s0 + %s8094_s28]]   ;;  %s8098_s28 = smov 29  }
  0x2b   :  { %s8278_s12 = sld [smem:[%s9463_s0 + %s8095_s7]]   ;;  %s8099_s7 = smov 30  }
  0x2d   :  { %9499 = sst [smem:[#allocation49_spill]] %s8268_s27 }
  0x2e   :  { %s8288_s27 = sld [smem:[%s9463_s0 + %s8097_s22]]   ;;  %s8101_s22 = smov 32  }
  0x2f   :  { %9498 = sst [smem:[#allocation48_spill]] %s8263_s29 }
  0x30   :  { %9500 = sst [smem:[#allocation50_spill]] %s8273_s20 }
  0x31   :  { %9501 = sst [smem:[#allocation51_spill]] %s8278_s12 }
  0x32   :  { %s8283_s29 = sld [smem:[%s9463_s0 + %s8096_s15]]   ;;  %s8100_s15 = smov 31  }
  0x33   :  { %s8293_s20 = sld [smem:[%s9463_s0 + %s8098_s28]]   ;;  %s8102_s28 = smov 33  }
  0x34   :  { %9502 = sst [smem:[#allocation52_spill]] %s8288_s27 }
  0x35   :  { %s8298_s12 = sld [smem:[%s9463_s0 + %s8099_s7]]   ;;  %s8103_s7 = smov 34  }
  0x36   :  { %s8303_s17 = sld [smem:[%s9463_s0 + %s8100_s15]]   ;;  %s8104_s15 = smov 35  }
  0x37   :  { %s8308_s27 = sld [smem:[%s9463_s0 + %s8101_s22]]   ;;  %s8105_s22 = smov 36  }
  0x38   :  { %s8313_s13 = sld [smem:[%s9463_s0 + %s8102_s28]]   ;;  %s8106_s28 = smov 37  }
  0x39   :  { %s8323_s6 = sld [smem:[%s9463_s0 + %s8104_s15]]   ;;  %s8108_s15 = smov 39  }
  0x3a   :  { %s8328_s30 = sld [smem:[%s9463_s0 + %s8105_s22]]  }
  0x3b   :  { %9503 = sst [smem:[#allocation53_spill]] %s8298_s12 }
  0x3c   :  { %9504 = sst [smem:[#allocation54_spill]] %s8303_s17 }
  0x3d   :  { %s8318_s12 = sld [smem:[%s9463_s0 + %s8103_s7]]   ;;  %s8107_s7 = smov 38  }
  0x3e   :  { %9505 = sst [smem:[#allocation55_spill]] %s8313_s13 }
  0x3f   :  { %9506 = sst [smem:[#allocation56_spill]] %s8323_s6 }
  0x40   :  { %s8333_s19 = sld [smem:[%s9463_s0 + %s8106_s28]]  }
  0x41   :  { %s8338_s9 = sld [smem:[%s9463_s0 + %s8107_s7]]  }
  0x42   :  { %s8343_s6 = sld [smem:[%s9463_s0 + %s8108_s15]]  }
  0x48   :  { %9507 = sst [smem:[#allocation57_spill]] %s8343_s6 }
  0x49   :  { %84 = vsyncpa [#allocation3], 0 }
  0x4a   :  { %85 = vsyncpa [#allocation5], 0 }
  0x4b   :  { %86 = vsyncpa [#allocation8], 0 }
  0x4c   :  { %87 = vsyncpa [#allocation11], 0 }
  0x4d   :  { %88 = vsyncpa [#allocation14], 0 }
  0x4e   :  { %89 = vsyncpa [#allocation17], 0 }
  0x4f   :  { %90 = vsyncpa [#allocation20], 0 }
  0x50   :  { %91 = vsyncpa [#allocation23], 0  ;;  %s8345_s22 = smov 0   ;;  %s8347_s23 = smov 0  }
  0x51   :  { %s8349_s26 = smov 0  }
  0x52 LB: > { %9508 = sst [smem:[#allocation58_spill]] %s8068_s26  ;;  %s8109_s0 = smov [#allocation4]   ;;  %s8068_s26 = sphi %s8349_s26, %s9549_s26   ;;  %s8064_s23 = sphi %s8347_s23, %s9548_s23   ;;  %s8060_s22 = sphi %s8345_s22, %s9547_s22  }
  0x53   : > { %s1063_s28 = sshll.u32 %s8109_s0, 4  ;;  %s6690_s1 = sadd.s32 4294967295, %s8068_s26   ;;  %s1064_s28 = int_to_ptr.vmem [resolvable:$true] %s1063_s28 }
  0x54   : > { %p6692_p0 = scmp.ge.s32.totalorder %s8068_s26, 1  ;;  %p1008_p1 = scmp.lt.s32.totalorder %s8068_s26, 3 }
  0x55   : > { %p8363_p2 = scmp.eq.s32.totalorder %s6690_s1, 0  ;;  %s8110_s10 = smov [#allocation7]  }
  0x56   : > { %p8367_p3 = pnand %p6692_p0, %p1008_p1  ;;  %s1087_s11 = sshll.u32 %s8110_s10, 4  ;;  %s8373_s11 = int_to_ptr.vmem [resolvable:$true] %s1087_s11 }
  0x57   : > { %s9509_s2 = scalar_select %p8363_p2, 1, 0 }
  0x58   : > { %s9510_s7 = scalar_select %p8367_p3, 1, 0 }
  0x59   : > { %p7343_p4 = pneg %p8367_p3  ;;  %s8111_s16 = smov [#allocation10]  }
  0x5a   : > { %s1123_s18 = sshll.u32 %s8111_s16, 4  ;;  %s8112_s0 = smov [#allocation13]   ;;  %s8381_s18 = int_to_ptr.vmem [resolvable:$true] %s1123_s18 }
  0x5b   : > { %p8377_p5 = pnand %p8363_p2, %p7343_p4  ;;  %s8383_s1 = sshll.u32 %s8112_s0, 4  ;;  %s1157_s1 = int_to_ptr.vmem [resolvable:$true] %s8383_s1 }
  0x5c   : > { %s7661_s26 = scalar_lea.vmem %s1064_s28, 16  ;;  %s7668_s6 = scalar_lea.vmem %s1064_s28, 32 }
  0x5d   : > { %p8387_p6 = pneg %p8377_p5  ;;  %p7662_p7 = scmp.ne.s32.totalorder %s1064_s28, %s7661_s26 }
  0x5e   : > { %p7669_p10 = scmp.lt.s32.totalorder %s1064_s28, %s1064_s28  ;;  %p7670_p11 = scmp.lt.s32.totalorder %s7668_s6, %s7661_s26 }
  0x5f   : > { %p7664_p8 = pnand %p7662_p7, %p8387_p6 }
  0x60   : > { %p7671_p12 = por %p7670_p11, %p7669_p10 }
  0x61   : > { %p7665_p9 = pneg %p7664_p8 }
  0x63   : > { %p7672_p13 = pnand %p7671_p12, %p7665_p9 }
  0x65   : > { %7675 = shalt.err (!%p7672_p13)
}
  0x66   : > { %s9513_s8 = sld [smem:[#allocation46_spill]]  ;;  %s7687_s16 = scalar_lea.vmem %s8373_s11, 512 }
  0x67   : > { %p7688_p0 = scmp.ne.s32.totalorder %s8373_s11, %s7687_s16  ;;  %p7695_p7 = scmp.lt.s32.totalorder %s8373_s11, %s8373_s11 }
  0x68   : > { %p7696_p8 = scmp.lt.s32.totalorder %s7687_s16, %s7687_s16 }
  0x69   : > { %p7690_p1 = pnand %p7688_p0, %p8387_p6 }
  0x6a   : > { %p7697_p2 = por %p7696_p8, %p7695_p7 }
  0x6b   : > { %p7691_p4 = pneg %p7690_p1 }
  0x6c   : > { %7349 = dma.hbm_to_vmem [thread:$0]  (!%p8377_p5), %s9513_s8, 16, %s1064_s28, [#allocation5]  }
  0x6d   : > { %p7698_p10 = pnand %p7697_p2, %p7691_p4 }
  0x6f   : > { %7701 = shalt.err (!%p7698_p10)
}
  0x70   : > { %s9473_s6 = smov 64   ;;  %s9475_s26 = smov 4  }
  0x71   : > { %7355 = dma.hbm_to_vmem [thread:$0]  (!%p8377_p5), %s8253_s25, 512, %s8373_s11, [#allocation8], %s9473_s6, %s9473_s6, %s9475_s26  }
  0x72   : > { %s7713_s28 = scalar_lea.vmem %s8381_s18, 512  ;;  %p7721_p12 = scmp.lt.s32.totalorder %s8381_s18, %s8381_s18 }
  0x73   : > { %p7714_p9 = scmp.ne.s32.totalorder %s8381_s18, %s7713_s28  ;;  %p7722_p13 = scmp.lt.s32.totalorder %s7713_s28, %s7713_s28 }
  0x75   : > { %p7716_p11 = pnand %p7714_p9, %p8387_p6  ;;  %p7723_p0 = por %p7722_p13, %p7721_p12 }
  0x77   : > { %p7717_p2 = pneg %p7716_p11 }
  0x79   : > { %p7724_p1 = pnand %p7723_p0, %p7717_p2 }
  0x7b   : > { %7727 = shalt.err (!%p7724_p1)
}
  0x7c   : > { %7361 = dma.hbm_to_vmem [thread:$0]  (!%p8377_p5), %s8283_s29, 512, %s8381_s18, [#allocation11], %s9473_s6, %s9473_s6, %s9475_s26  }
  0x7d   : > { %s7739_s11 = scalar_lea.vmem %s1157_s1, 16  ;;  %s7746_s0 = scalar_lea.vmem %s1157_s1, 32 }
  0x7e   : > { %p7740_p4 = scmp.ne.s32.totalorder %s1157_s1, %s7739_s11  ;;  %p7747_p10 = scmp.lt.s32.totalorder %s1157_s1, %s1157_s1 }
  0x7f   : > { %p7748_p9 = scmp.lt.s32.totalorder %s7746_s0, %s7739_s11 }
  0x80   : > { %p7742_p7 = pnand %p7740_p4, %p8387_p6 }
  0x81   : > { %p7749_p11 = por %p7748_p9, %p7747_p10 }
  0x82   : > { %p7743_p8 = pneg %p7742_p7 }
  0x84   : > { %p7750_p2 = pnand %p7749_p11, %p7743_p8 }
  0x86   : > { %7753 = shalt.err (!%p7750_p2)
}
  0x87   : > { %s9514_s17 = sld [smem:[#allocation54_spill]]  ;;  %s8115_s16 = smov [#allocation16]  }
  0x88   : > { %s1177_s28 = sshll.u32 %s8115_s16, 4  ;;  %s8116_s18 = smov [#allocation19]   ;;  %s1178_s28 = int_to_ptr.vmem [resolvable:$true] %s1177_s28 }
  0x89   : > { %s1205_s6 = sshll.u32 %s8116_s18, 4  ;;  %s7765_s26 = scalar_lea.vmem %s1178_s28, 512  ;;  %s1206_s6 = int_to_ptr.vmem [resolvable:$true] %s1205_s6 }
  0x8a   : > { %p7766_p12 = scmp.ne.s32.totalorder %s1178_s28, %s7765_s26  ;;  %p7773_p1 = scmp.lt.s32.totalorder %s1178_s28, %s1178_s28 }
  0x8b   : > { %p7774_p4 = scmp.lt.s32.totalorder %s7765_s26, %s7765_s26 }
  0x8c   : > { %p7768_p13 = pnand %p7766_p12, %p8387_p6 }
  0x8d   : > { %7367 = dma.hbm_to_vmem [thread:$0]  (!%p8377_p5), %s9514_s17, 16, %s1157_s1, [#allocation14]  }
  0x8e   : > { %p7769_p0 = pneg %p7768_p13  ;;  %p7775_p7 = por %p7774_p4, %p7773_p1 }
  0x90   : > { %p7776_p8 = pnand %p7775_p7, %p7769_p0 }
  0x92   : > { %7779 = shalt.err (!%p7776_p8)
}
  0x93   : > { %s9515_s11 = smov 4   ;;  %s9516_s0 = smov 64  }
  0x94   : > { %s9517_s13 = sld [smem:[#allocation55_spill]]  ;;  %s7791_s1 = scalar_lea.vmem %s1206_s6, 16 }
  0x95   : > { %p7792_p10 = scmp.ne.s32.totalorder %s1206_s6, %s7791_s1  ;;  %s7798_s16 = scalar_lea.vmem %s1206_s6, 32 }
  0x96   : > { %p7799_p2 = scmp.lt.s32.totalorder %s1206_s6, %s1206_s6  ;;  %p7800_p12 = scmp.lt.s32.totalorder %s7798_s16, %s7791_s1 }
  0x97   : > { %p7794_p9 = pnand %p7792_p10, %p8387_p6 }
  0x98   : > { %p7801_p13 = por %p7800_p12, %p7799_p2 }
  0x99   : > { %p7795_p11 = pneg %p7794_p9 }
  0x9a   : > { %7373 = dma.hbm_to_vmem [thread:$0]  (!%p8377_p5), %s9517_s13, 512, %s1178_s28, [#allocation17], %s9516_s0, %s9516_s0, %s9515_s11  }
  0x9b   : > { %p7802_p0 = pnand %p7801_p13, %p7795_p11 }
  0x9d   : > { %7805 = shalt.err (!%p7802_p0)
}
  0x9e   : > { %7379 = dma.hbm_to_vmem [thread:$0]  (!%p8377_p5), %s8328_s30, 16, %s1206_s6, [#allocation20]  }
  0x9f   : > { %s109_s26 = sadd.s32 1, %s8064_s23  ;;  %s8117_s28 = smov [#allocation2]  }
  0xa0   : > { %s1052_s18 = sshll.u32 %s8117_s28, 4  ;;  %p111_p1 = scmp.ge.s32.totalorder %s109_s26, 2  ;;  %s1053_s18 = int_to_ptr.vmem [resolvable:$true] %s1052_s18 }
  0xa1   : > { %s7817_s8 = scalar_lea.vmem %s1053_s18, 16  ;;  %s7824_s1 = scalar_lea.vmem %s1053_s18, 32 }
  0xa2   : > { %p7818_p4 = scmp.ne.s32.totalorder %s1053_s18, %s7817_s8  ;;  %p7825_p10 = scmp.lt.s32.totalorder %s1053_s18, %s1053_s18 }
  0xa3   : > { %p7826_p9 = scmp.lt.s32.totalorder %s7824_s1, %s7817_s8 }
  0xa4   : > { %p7820_p7 = pnand %p7818_p4, %p8387_p6 }
  0xa5   : > { %p7827_p11 = por %p7826_p9, %p7825_p10 }
  0xa6   : > { %p7821_p8 = pneg %p7820_p7 }
  0xa8   : > { %p7828_p2 = pnand %p7827_p11, %p7821_p8 }
  0xaa   : > { %7831 = shalt.err (!%p7828_p2)
}
  0xab   : > { %7346 = dma.hbm_to_vmem [thread:$0]  (!%p8377_p5), %s8233_s4, 16, %s1053_s18, [#allocation3]  }
  0xac   : > { %s9551_s26 = smov (%p111_p1, %s109_s26), 0  ;;  %s8118_s6 = smov [#allocation6]  }
  0xad   : > { %s1077_s16 = sshll.u32 %s8118_s6, 4  ;;  %s8119_s28 = smov [#allocation9]   ;;  %s1078_s16 = int_to_ptr.vmem [resolvable:$true] %s1077_s16 }
  0xae   : > { %s1101_s13 = sshll.u32 %s8119_s28, 4  ;;  %s7843_s17 = scalar_lea.vmem %s1078_s16, 16  ;;  %s1102_s13 = int_to_ptr.vmem [resolvable:$true] %s1101_s13 }
  0xaf   : > { %p7844_p12 = scmp.ne.s32.totalorder %s1078_s16, %s7843_s17  ;;  %s7850_s8 = scalar_lea.vmem %s1078_s16, 32 }
  0xb0   : > { %p7851_p4 = scmp.lt.s32.totalorder %s1078_s16, %s1078_s16  ;;  %p7852_p7 = scmp.lt.s32.totalorder %s7850_s8, %s7843_s17 }
  0xb1   : > { %p7846_p13 = pnand %p7844_p12, %p8387_p6 }
  0xb2   : > { %p7853_p8 = por %p7852_p7, %p7851_p4 }
  0xb3   : > { %p7847_p0 = pneg %p7846_p13 }
  0xb5   : > { %p7854_p10 = pnand %p7853_p8, %p7847_p0 }
  0xb7   : > { %7857 = shalt.err (!%p7854_p10)
}
  0xb8   : > { %7352 = dma.hbm_to_vmem [thread:$0]  (!%p8377_p5), %s8248_s3, 16, %s1078_s16, [#allocation5]  }
  0xb9   : > { %s7869_s18 = scalar_lea.vmem %s1102_s13, 16  ;;  %s7876_s1 = scalar_lea.vmem %s1102_s13, 32 }
  0xba   : > { %p7870_p1 = scmp.ne.s32.totalorder %s1102_s13, %s7869_s18  ;;  %p7877_p2 = scmp.lt.s32.totalorder %s1102_s13, %s1102_s13 }
  0xbb   : > { %p7878_p12 = scmp.lt.s32.totalorder %s7876_s1, %s7869_s18 }
  0xbc   : > { %p7872_p9 = pnand %p7870_p1, %p8387_p6 }
  0xbd   : > { %p7879_p13 = por %p7878_p12, %p7877_p2 }
  0xbe   : > { %p7873_p11 = pneg %p7872_p9 }
  0xc0   : > { %p7880_p3 = pnand %p7879_p13, %p7873_p11 }
  0xc2   : > { %7883 = shalt.err (!%p7880_p3)
}
  0xc3   : > { %7358 = dma.hbm_to_vmem [thread:$0]  (!%p8377_p5), %s8258_s21, 16, %s1102_s13, [#allocation8]  }
  0xc4   : > { %s8120_s17 = smov [#allocation12]   ;;  %s8121_s28 = smov [#allocation15]  }
  0xc5   : > { %s1139_s6 = sshll.u32 %s8120_s17, 4  ;;  %s1167_s16 = sshll.u32 %s8121_s28, 4  ;;  %s1140_s6 = int_to_ptr.vmem [resolvable:$true] %s1139_s6  ;;  %s1168_s16 = int_to_ptr.vmem [resolvable:$true] %s1167_s16 }
  0xc6   : > { %s7895_s8 = scalar_lea.vmem %s1140_s6, 512  ;;  %p7903_p8 = scmp.lt.s32.totalorder %s1140_s6, %s1140_s6 }
  0xc7   : > { %p7896_p0 = scmp.ne.s32.totalorder %s1140_s6, %s7895_s8  ;;  %p7904_p10 = scmp.lt.s32.totalorder %s7895_s8, %s7895_s8 }
  0xc9   : > { %p7898_p4 = pnand %p7896_p0, %p8387_p6  ;;  %p7905_p1 = por %p7904_p10, %p7903_p8 }
  0xcb   : > { %p7899_p7 = pneg %p7898_p4 }
  0xcd   : > { %p7906_p3 = pnand %p7905_p1, %p7899_p7 }
  0xcf   : > { %7909 = shalt.err (!%p7906_p3)
}
  0xd0   : > { %7364 = dma.hbm_to_vmem [thread:$0]  (!%p8377_p5), %s8293_s20, 512, %s1140_s6, [#allocation11], %s9516_s0, %s9516_s0, %s9515_s11  }
  0xd1   : > { %s7921_s13 = scalar_lea.vmem %s1168_s16, 16  ;;  %s7928_s18 = scalar_lea.vmem %s1168_s16, 32 }
  0xd2   : > { %p7922_p9 = scmp.ne.s32.totalorder %s1168_s16, %s7921_s13  ;;  %p7929_p12 = scmp.lt.s32.totalorder %s1168_s16, %s1168_s16 }
  0xd3   : > { %p7930_p13 = scmp.lt.s32.totalorder %s7928_s18, %s7921_s13 }
  0xd4   : > { %p7924_p11 = pnand %p7922_p9, %p8387_p6 }
  0xd5   : > { %p7931_p0 = por %p7930_p13, %p7929_p12 }
  0xd6   : > { %p7925_p2 = pneg %p7924_p11 }
  0xd8   : > { %p7932_p4 = pnand %p7931_p0, %p7925_p2 }
  0xda   : > { %7935 = shalt.err (!%p7932_p4)
}
  0xdb   : > { %7370 = dma.hbm_to_vmem [thread:$0]  (!%p8377_p5), %s8308_s27, 16, %s1168_s16, [#allocation14]  }
  0xdc   : > { %s8122_s1 = smov [#allocation18]   ;;  %s8123_s28 = smov [#allocation21]  }
  0xdd   : > { %s1191_s17 = sshll.u32 %s8122_s1, 4  ;;  %s1216_s11 = sshll.u32 %s8123_s28, 4  ;;  %s1192_s17 = int_to_ptr.vmem [resolvable:$true] %s1191_s17  ;;  %s1217_s11 = int_to_ptr.vmem [resolvable:$true] %s1216_s11 }
  0xde   : > { %s7947_s0 = scalar_lea.vmem %s1192_s17, 16  ;;  %s7954_s6 = scalar_lea.vmem %s1192_s17, 32 }
  0xdf   : > { %p7948_p7 = scmp.ne.s32.totalorder %s1192_s17, %s7947_s0  ;;  %p7955_p1 = scmp.lt.s32.totalorder %s1192_s17, %s1192_s17 }
  0xe0   : > { %p7956_p3 = scmp.lt.s32.totalorder %s7954_s6, %s7947_s0 }
  0xe1   : > { %p7950_p8 = pnand %p7948_p7, %p8387_p6 }
  0xe2   : > { %p7957_p9 = por %p7956_p3, %p7955_p1 }
  0xe3   : > { %p7951_p10 = pneg %p7950_p8 }
  0xe5   : > { %p7958_p11 = pnand %p7957_p9, %p7951_p10 }
  0xe7   : > { %7961 = shalt.err (!%p7958_p11)
}
  0xe8   : > { %7376 = dma.hbm_to_vmem [thread:$0]  (!%p8377_p5), %s8318_s12, 16, %s1192_s17, [#allocation17]  }
  0xe9   : > { %s7973_s16 = scalar_lea.vmem %s1217_s11, 16  ;;  %s7980_s8 = scalar_lea.vmem %s1217_s11, 32 }
  0xea   : > { %p7974_p2 = scmp.ne.s32.totalorder %s1217_s11, %s7973_s16  ;;  %p7981_p0 = scmp.lt.s32.totalorder %s1217_s11, %s1217_s11 }
  0xeb   : > { %p7982_p4 = scmp.lt.s32.totalorder %s7980_s8, %s7973_s16 }
  0xec   : > { %p7976_p12 = pnand %p7974_p2, %p8387_p6 }
  0xed   : > { %p7983_p7 = por %p7982_p4, %p7981_p0 }
  0xee   : > { %p7977_p13 = pneg %p7976_p12 }
  0xf0   : > { %p7984_p8 = pnand %p7983_p7, %p7977_p13 }
  0xf2   : > { %7987 = shalt.err (!%p7984_p8)
}
  0xf3   : > { %7382 = dma.hbm_to_vmem [thread:$0]  (!%p8377_p5), %s8333_s19, 16, %s1217_s11, [#allocation20]  }
  0xf4   : > { %s8124_s13 = smov [#allocation22]  }
  0xf5   : > { %s1227_s18 = sshll.u32 %s8124_s13, 4  ;;  %s1228_s18 = int_to_ptr.vmem [resolvable:$true] %s1227_s18 }
  0xf6   : > { %s7999_s1 = scalar_lea.vmem %s1228_s18, 16  ;;  %s8006_s17 = scalar_lea.vmem %s1228_s18, 32 }
  0xf7   : > { %p8000_p10 = scmp.ne.s32.totalorder %s1228_s18, %s7999_s1  ;;  %p8007_p9 = scmp.lt.s32.totalorder %s1228_s18, %s1228_s18 }
  0xf8   : > { %p8008_p11 = scmp.lt.s32.totalorder %s8006_s17, %s7999_s1 }
  0xf9   : > { %p8002_p1 = pnand %p8000_p10, %p8387_p6 }
  0xfa   : > { %p8009_p2 = por %p8008_p11, %p8007_p9 }
  0xfb   : > { %p8003_p3 = pneg %p8002_p1 }
  0xfd   : > { %p8010_p12 = pnand %p8009_p2, %p8003_p3 }
  0xff   : > { %8013 = shalt.err (!%p8010_p12)
}
 0x100   : > { %7385 = dma.hbm_to_vmem [thread:$0]  (!%p8377_p5), %s8338_s9, 16, %s1228_s18, [#allocation23]  }
 0x101   : > { %p9518_p13 = scmp.ne.s32.totalorder %s9510_s7, 0 }
 0x102   : > { %p9519_p0 = scmp.ne.s32.totalorder (!%p9518_p13), %s9509_s2, 0 }
 0x103   : > { %1297 = sbr.rel (%p9518_p13) target bundleno = 5027 (0x13a3), region = 176 }
 0x108   : > { %8027 = dma.done.wait (%p9519_p0), [#allocation3], 16  }
 0x109   : > { %8029 = vsyncadd (%p9519_p0), [#allocation3], 4294967280 }
 0x10a   : > { %8031 = dma.done.wait (%p9519_p0), [#allocation5], 32  }
 0x10b   : > { %8033 = vsyncadd (%p9519_p0), [#allocation5], 4294967264 }
 0x10c   : > { %8035 = dma.done.wait (%p9519_p0), [#allocation8], 528  }
 0x10d   : > { %8037 = vsyncadd (%p9519_p0), [#allocation8], 4294966768 }
 0x10e   : > { %8039 = dma.done.wait (%p9519_p0), [#allocation11], 1024  }
 0x10f   : > { %8041 = vsyncadd (%p9519_p0), [#allocation11], 4294966272 }
 0x110   : > { %8043 = dma.done.wait (%p9519_p0), [#allocation14], 32  }
 0x111   : > { %8045 = vsyncadd (%p9519_p0), [#allocation14], 4294967264 }
 0x112   : > { %8047 = dma.done.wait (%p9519_p0), [#allocation17], 528  }
 0x113   : > { %8049 = vsyncadd (%p9519_p0), [#allocation17], 4294966768 }
 0x114   : > { %8051 = dma.done.wait (%p9519_p0), [#allocation20], 32  }
 0x115   : > { %8053 = vsyncadd (%p9519_p0), [#allocation20], 4294967264 }
 0x116   : > { %8055 = dma.done.wait (%p9519_p0), [#allocation23], 16  }
 0x117   : > { %8057 = vsyncadd (%p9519_p0), [#allocation23], 4294967280  ;;  %v8125_v0 = vmov 0.0   ;;  %vm8126_vm0 = vmmov 0   ;;  %p1479_p5 = scmp.lt.s32.totalorder %s8060_s22, 1  ;;  %v7512_v1 = vld [vmem:[%s8193_s14 + $0x18] sm:$0xff]   ;;  %v1787_v31 = vlaneseq }
 0x118   : > { %7002 = vmatprep.subr.bf16.mxu1 %v8125_v0  ;;  %7010 = vmatprep.mubr.msk.bf16.mxu1 %vm8126_vm0, %v8125_v0  ;;  %v7513_v2 = vld [vmem:[%s8193_s14 + $0x10] sm:$0xff]   ;;  %v7514_v3 = vld [vmem:[%s8193_s14 + $0x8] sm:$0xff]   ;;  %s9520_s15 = sld [smem:[#allocation32_spill]]  ;;  %v7515_v4 = vld [vmem:[%s8193_s14] sm:$0xff]   ;;  %vm1567_vm1 = vcmask 523264   ;;  %s8127_s0 = smov 112  }
 0x119   : > { %7026 = vmatprep.subr.bf16.mxu0 %v8125_v0  ;;  %7034 = vmatprep.mubr.msk.bf16.mxu0 %vm8126_vm0, %v8125_v0  ;;  %s9553_s22 = smov (!%p1479_p5, %s8060_s22), 1  ;;  %v7516_v6 = vld [vmem:[%s8203_s24 + $0x18] sm:$0xff]   ;;  %v7517_v8 = vld [vmem:[%s8203_s24 + $0x10] sm:$0xff]   ;;  %s9521_s10 = sld [smem:[#allocation40_spill]]  ;;  %v7518_v9 = vld [vmem:[%s8203_s24 + $0x8] sm:$0xff]   ;;  %v8588_v36 = vshrl.u32 %v1787_v31, 7 }
 0x11a   : > { %7003 = vmatpush3.bf16.msra.mxu1 %v7512_v1  ;;  %s8534_s2 = sshll.u32 %s9553_s22, 3  ;;  %v7519_v10 = vld [vmem:[%s8203_s24] sm:$0xff]   ;;  %s9522_s11 = sld [smem:[#allocation41_spill]]  ;;  %v8130_v29 = vmov 1983009808   ;;  %vm2064_vm2 = vcmask 130048  }
 0x11b   : > { %7004 = vmatprep.subr.bf16.mxu1 %v8125_v0  ;;  %s1485_s7 = scalar_lea.vmem %s8148_s5, %s8534_s2  ;;  %s9523_s6 = sld [smem:[#allocation42_spill]]  ;;  %v1785_v30 = vunpack.c.l.s4 %v8130_v29  ;;  %v8131_v33 = vmov 1934713408   ;;  %vm2387_vm3 = vcmask 64512   ;;  %vm2589_vm4 = vcmask 1043456  }
 0x11c   : > { %v8542_v5 = vld [vmem:[%s1485_s7] sm:$0xff]  ;;  %s8128_s16 = smov 80   ;;  %s8129_s8 = smov 96   ;;  %v1817_v34 = vunpack.c.l.s4 %v8131_v33  ;;  %vm2920_vm5 = vcmask 261120   ;;  %vm2922_vm6 = vcmask 392192   ;;  %vm3746_vm7 = vcmask 23552  }
 0x11d   : > { %v1526_v7 = vpack.c.bf16 %v8542_v5, %v8542_v5  ;;  %v1786_v35 = vunpack.c.0.s8 %v1785_v30  ;;  %s9524_s13 = sld [smem:[#allocation33_spill]]  ;;  %vm5062_vm8 = vcmask 130112   ;;  %vm5143_vm9 = vcmask 195712  }
 0x11e   : > { %7005 = vmatpush3.bf16.msra.mxu1 %v7513_v2  ;;  %s1489_s28 = scalar_lea.vmem %s9520_s15, %s8534_s2  ;;  %v1818_v39 = vunpack.c.0.s8 %v1817_v34  ;;  %s9525_s18 = sld [smem:[#allocation34_spill]]  ;;  %vm5670_vm10 = vcmask 195584  }
 0x11f   : > { %7006 = vmatprep.subr.bf16.mxu1 %v8125_v0  ;;  %v1525_v11 = vld [vmem:[%s1489_s28] sm:$0xff]  ;;  %v8591_v40 = vsub.s32 %v1786_v35, %v8588_v36  ;;  %s9526_s17 = sld [smem:[#allocation43_spill]]  ;;  %s9479_s15 = smov 32  }
 0x120   : > { %v1527_v12 = vpack.c.bf16 %v1525_v11, %v1525_v11  ;;  %v6730_v13 = vld [vmem:[%s9521_s10] ss:$0 sm:$0xff]  ;;  %v8594_v47 = vsub.s32 %v1818_v39, %v8588_v36  ;;  %s9527_s7 = sld [smem:[#allocation44_spill]]  ;;  %s9480_s10 = smov 16  }
 0x121   : > { %v6736_v19 = vld [vmem:[%s9522_s11] ss:$0 sm:$0xff]  ;;  %v7520_v25 = vld [vmem:[%s9523_s6 + $0x18] sm:$0xff]   ;;  %v7521_v26 = vld [vmem:[%s9523_s6 + $0x10] sm:$0xff]   ;;  %s9528_s28 = sld [smem:[#allocation45_spill]]  ;;  %s9478_s11 = smov 48  }
 0x122   : > { %7007 = vmatpush3.bf16.msra.mxu1 %v7514_v3  ;;  %7027 = vmatpush3.bf16.msra.mxu0 %v7520_v25  ;;  %v7522_v27 = vld [vmem:[%s9523_s6 + $0x8] sm:$0xff]   ;;  %v7523_v28 = vld [vmem:[%s9523_s6] sm:$0xff]  }
 0x123   : > { %7008 = vmatprep.subr.bf16.mxu1 %v8125_v0  ;;  %7028 = vmatprep.subr.bf16.mxu0 %v8125_v0 }
 0x124   : > { %s1496_s1 = scalar_lea.vmem %s9525_s18, %s9553_s22  ;;  %s6726_s18 = sshll.u32 %s9553_s22, 2 }
 0x126   : > { %7009 = vmatpush3.bf16.msra.mxu1 %v7515_v4  ;;  %7029 = vmatpush3.bf16.msra.mxu0 %v7521_v26 }
 0x127   : > { %7014 = vmatprep.subr.bf16.mxu1 %v8125_v0  ;;  %7030 = vmatprep.subr.bf16.mxu0 %v8125_v0 }
 0x129   : > { %7011 = vmatmul.mubr.msk.bf16.vlgmr.msra.gmra.mxu1 %vm1567_vm1, %v1526_v7 }
 0x12a   : > { %7015 = vmatpush3.bf16.msra.mxu1 %v7516_v6  ;;  %7022 = vmatprep.mubr.msk.bf16.mxu1 %vm8126_vm0, %v8125_v0 }
 0x12b   : > { %7016 = vmatprep.subr.bf16.mxu1 %v8125_v0  ;;  %7031 = vmatpush3.bf16.msra.mxu0 %v7522_v27 }
 0x12c   : > { %7032 = vmatprep.subr.bf16.mxu0 %v8125_v0 }
 0x12e   : > { %7017 = vmatpush3.bf16.msra.mxu1 %v7517_v8 }
 0x12f   : > { %7018 = vmatprep.subr.bf16.mxu1 %v8125_v0  ;;  %7033 = vmatpush3.bf16.msra.mxu0 %v7523_v28 }
 0x130   : > { %7058 = vmatprep.subr.bf16.mxu0 %v8125_v0 }
 0x132   : > { %7019 = vmatpush3.bf16.msra.mxu1 %v7518_v9  ;;  %7035 = vmatmul.mubr.msk.bf16.vlgmr.msra.gmra.mxu0 %vm1567_vm1, %v1527_v12 }
 0x133   : > { %7020 = vmatprep.subr.bf16.mxu1 %v8125_v0  ;;  %7060 = vmatprep.mubr.msk.bf16.mxu0 %vm8126_vm0, %v8125_v0 }
 0x136   : > { %7021 = vmatpush3.bf16.msra.mxu1 %v7519_v10 }
 0x137   : > { %7038 = vmatprep.subr.mxu1 %v8125_v0 }
 0x139   : > { %7023 = vmatmul.mubr.msk.bf16.vlgmr.msra.gmra.mxu1 %vm1567_vm1, %v1527_v12 }
 0x13a   : > { %7040 = vmatprep.mubr.msk.f32.mxu1 %vm8126_vm0, %v8125_v0 }
 0x1e9   : > { %v1605_v14 = vpop.f32.mrf.mxu1 }
 0x1ea   : > { %v8565_v15 = vadd.f32 %v6730_v13, %v1605_v14 }
 0x1eb   : > { %v7012_v16 = vpop.f32.mrf.mxu1 }
 0x1ec   : > { %1773 = vrot.lane.b32.xlu1 %v8565_v15, %s8127_s0 }
 0x1ed   : > { %v1608_v17 = vpop.f32.mrf.mxu1 }
 0x1ef   : > { %v7013_v18 = vpop.f32.mrf.mxu1 }
 0x1f9   : > { %v1687_v20 = vpop.f32.mrf.mxu1 }
 0x1fa   : > { %v1688_v21 = vadd.f32 %v6736_v19, %v1687_v20 }
 0x1fb   : > { %v7024_v22 = vpop.f32.mrf.mxu1 }
 0x1fc   : > { %1925 = vrot.lane.b32.xlu1 %v1688_v21, %s8128_s16  ;;  %1919 = vrot.lane.b32.xlu0 %v1688_v21, %s8127_s0 }
 0x1fd   : > { %v1690_v23 = vpop.f32.mrf.mxu1 }
 0x1ff   : > { %v7025_v24 = vpop.f32.mrf.mxu1 }
 0x200   : > { %1779 = vrot.lane.b32.xlu1 %v8565_v15, %s8128_s16  ;;  %1922 = vrot.lane.b32.xlu0 %v1688_v21, %s8129_s8 }
 0x204   : > { %1776 = vrot.lane.b32.xlu0 %v8565_v15, %s8129_s8 }
 0x25e   : > { %v1774_v32 = vpop.permute.xlu1 %1773 }
 0x26e   : > { %v1926_v37 = vpop.permute.xlu1 %1925  ;;  %v1920_v38 = vpop.permute.xlu0 %1919 }
 0x26f   : > { %v1944_v41 = vcombine.low %v1920_v38, %v1926_v37  ;;  %v1945_v42 = vcombine.high %v1920_v38, %v1926_v37 }
 0x271   : > { %v1952_v48 = vrot.slane %v1944_v41, %v8591_v40  ;;  %v1959_v49 = vrot.slane %v1945_v42, %v8591_v40 }
 0x272   : > { %v1923_v43 = vpop.permute.xlu0 %1922  ;;  %v1780_v44 = vpop.permute.xlu1 %1779 }
 0x273   : > { %v1928_v45 = vcombine.low %v1688_v21, %v1923_v43  ;;  %v1929_v46 = vcombine.high %v1688_v21, %v1923_v43  ;;  %v1798_v52 = vcombine.low %v1774_v32, %v1780_v44  ;;  %v1799_v53 = vcombine.high %v1774_v32, %v1780_v44 }
 0x275   : > { %v1936_v50 = vrot.slane %v1928_v45, %v8591_v40  ;;  %v1943_v51 = vrot.slane %v1929_v46, %v8591_v40  ;;  %v1806_v2 = vrot.slane %v1798_v52, %v8591_v40  ;;  %v1813_v3 = vrot.slane %v1799_v53, %v8591_v40 }
 0x276   : > { %v1777_v54 = vpop.permute.xlu0 %1776 }
 0x277   : > { %v1960_v55 = vcombine.low %v1936_v50, %v1952_v48  ;;  %v1961_v56 = vcombine.high %v1936_v50, %v1952_v48  ;;  %v1976_v57 = vcombine.low %v1943_v51, %v1959_v49  ;;  %v1977_v58 = vcombine.high %v1943_v51, %v1959_v49 }
 0x278   : > { %v1782_v59 = vcombine.low %v8565_v15, %v1777_v54  ;;  %v1783_v60 = vcombine.high %v8565_v15, %v1777_v54 }
 0x279   : > { %v1968_v61 = vrot.slane %v1960_v55, %v8594_v47  ;;  %v1975_v62 = vrot.slane %v1961_v56, %v8594_v47  ;;  %v1984_v63 = vrot.slane %v1976_v57, %v8594_v47  ;;  %v1991_v1 = vrot.slane %v1977_v58, %v8594_v47  ;;  %v1766_v58 = vpop.f32.mrf.mxu0 }
 0x27a   : > { %v1790_v4 = vrot.slane %v1782_v59, %v8591_v40  ;;  %v1797_v6 = vrot.slane %v1783_v60, %v8591_v40 }
 0x27b   : > { %v1996_v7 = vcombine.low %v1968_v61, %v1975_v62  ;;  %v6750_v8 = vcombine.high %v1968_v61, %v1975_v62  ;;  %v2012_v9 = vcombine.low %v1984_v63, %v1991_v1  ;;  %v6751_v10 = vcombine.high %v1984_v63, %v1991_v1  ;;  %v7036_v59 = vpop.f32.mrf.mxu0  ;;  %v2373_v62 = vld [vmem:[%s9524_s13] sm:$0xff]  ;;  %s9529_s13 = sld [smem:[#allocation35_spill]] }
 0x27c   : > { %v1814_v11 = vcombine.low %v1790_v4, %v1806_v2  ;;  %v1815_v12 = vcombine.high %v1790_v4, %v1806_v2  ;;  %v1830_v13 = vcombine.low %v1797_v6, %v1813_v3  ;;  %v1831_v14 = vcombine.high %v1797_v6, %v1813_v3  ;;  %v6760_v1 = vld [vmem:[%s1496_s1] ss:$0 sm:$0xff] }
 0x27d   : > { %v2003_v15 = vrot.slane %v1996_v7, %v8591_v40  ;;  %v2011_v16 = vrot.slane %v6750_v8, %v8591_v40  ;;  %v2019_v17 = vrot.slane %v2012_v9, %v8591_v40  ;;  %v2027_v18 = vrot.slane %v6751_v10, %v8591_v40  ;;  %v1769_v60 = vpop.f32.mrf.mxu0 }
 0x27e   : > { %v1822_v19 = vrot.slane %v1814_v11, %v8594_v47  ;;  %v1829_v20 = vrot.slane %v1815_v12, %v8594_v47  ;;  %v1838_v21 = vrot.slane %v1830_v13, %v8594_v47  ;;  %v1845_v22 = vrot.slane %v1831_v14, %v8594_v47 }
 0x27f   : > { %v2028_v23 = vcombine.low %v2003_v15, %v2011_v16  ;;  %v2044_v24 = vcombine.low %v2019_v17, %v2027_v18  ;;  %v2029_v39 = vcombine.high %v2003_v15, %v2011_v16  ;;  %v2045_v41 = vcombine.high %v2019_v17, %v2027_v18  ;;  %v7037_v61 = vpop.f32.mrf.mxu0 }
 0x280   : > { %v1850_v25 = vcombine.low %v1822_v19, %v1829_v20  ;;  %v6748_v26 = vcombine.high %v1822_v19, %v1829_v20  ;;  %v1866_v27 = vcombine.low %v1838_v21, %v1845_v22  ;;  %v6749_v28 = vcombine.high %v1838_v21, %v1845_v22 }
 0x281   : > { %v2036_v29 = vrot.slane %v2028_v23, %v8594_v47  ;;  %v2052_v30 = vrot.slane %v2044_v24, %v8594_v47  ;;  %v2043_v49 = vrot.slane %v2029_v39, %v8594_v47  ;;  %v2059_v50 = vrot.slane %v2045_v41, %v8594_v47  ;;  %v6742_v24 = vld [vmem:[%s9526_s17] ss:$0 sm:$0xff]  ;;  %s1500_s1 = scalar_lea.vmem %s9529_s13, %s6726_s18  ;;  %s9530_s17 = sld [smem:[#allocation47_spill]] }
 0x282   : > { %v1857_v31 = vrot.slane %v1850_v25, %v8591_v40  ;;  %v1865_v32 = vrot.slane %v6748_v26, %v8591_v40  ;;  %v1873_v33 = vrot.slane %v1866_v27, %v8591_v40  ;;  %v1881_v34 = vrot.slane %v6749_v28, %v8591_v40  ;;  %s9532_s13 = sld [smem:[#allocation36_spill]] }
 0x283   : > { %v2060_v35 = vcombine.low %v2036_v29, %v2052_v30  ;;  %v2061_v48 = vcombine.high %v2036_v29, %v2052_v30  ;;  %v2062_v54 = vcombine.low %v2043_v49, %v2059_v50  ;;  %v2063_v56 = vcombine.high %v2043_v49, %v2059_v50 }
 0x284   : > { %v1882_v37 = vcombine.low %v1857_v31, %v1865_v32  ;;  %v1898_v38 = vcombine.low %v1873_v33, %v1881_v34  ;;  %v1883_v44 = vcombine.high %v1857_v31, %v1865_v32  ;;  %v1899_v45 = vcombine.high %v1873_v33, %v1881_v34 }
 0x285   : > { %7039 = vmatpush3.xpose.msk.msra.mxu1 %vm2064_vm2, %v2060_v35  ;;  %v2374_v63 = vmax.f32 %v2373_v62, -1e+30  ;;  %v1767_v25 = vadd.f32 %v6742_v24, %v1766_v58 }
 0x286   : > { %7043 = vmatprep.subr.mxu1 %v8125_v0  ;;  %v1890_v42 = vrot.slane %v1882_v37, %v8594_v47  ;;  %v1906_v43 = vrot.slane %v1898_v38, %v8594_v47  ;;  %v1897_v52 = vrot.slane %v1883_v44, %v8594_v47  ;;  %v1913_v53 = vrot.slane %v1899_v45, %v8594_v47 }
 0x287   : > { %v2382_v2 = vadd.f32 %v6760_v1, %v2374_v63 }
 0x288   : > { %v1914_v46 = vcombine.low %v1890_v42, %v1906_v43  ;;  %v1915_v51 = vcombine.high %v1890_v42, %v1906_v43  ;;  %v1916_v55 = vcombine.low %v1897_v52, %v1913_v53  ;;  %v1917_v57 = vcombine.high %v1897_v52, %v1913_v53 }
 0x28a   : > { %7041 = vmatmul.mubr.msk.f32.vlgmr.msra.gmra.mxu1 %vm2064_vm2, %v1914_v46 }
 0x28b   : > { %7044 = vmatpush3.xpose.msk.msra.mxu1 %vm2064_vm2, %v2061_v48  ;;  %7045 = vmatprep.mubr.msk.f32.mxu1 %vm8126_vm0, %v8125_v0 }
 0x28c   : > { %7048 = vmatprep.subr.mxu1 %v8125_v0 }
 0x28e   : > { %7046 = vmatmul.mubr.msk.f32.vlgmr.msra.gmra.mxu1 %vm2064_vm2, %v1915_v51 }
 0x28f   : > { %7049 = vmatpush3.xpose.msk.msra.mxu1 %vm2064_vm2, %v2062_v54  ;;  %7050 = vmatprep.mubr.msk.f32.mxu1 %vm8126_vm0, %v8125_v0 }
 0x290   : > { %7053 = vmatprep.subr.mxu1 %v8125_v0 }
 0x292   : > { %7051 = vmatmul.mubr.msk.f32.vlgmr.msra.gmra.mxu1 %vm2064_vm2, %v1916_v55 }
 0x293   : > { %7054 = vmatpush3.xpose.msk.msra.mxu1 %vm2064_vm2, %v2063_v56  ;;  %7055 = vmatprep.mubr.msk.f32.mxu1 %vm8126_vm0, %v8125_v0 }
 0x294   : > { %7064 = vmatprep.subr.bf16.mxu1 %v8125_v0 }
 0x296   : > { %7056 = vmatmul.mubr.msk.f32.vlgmr.msra.gmra.mxu1 %vm2064_vm2, %v1917_v57 }
 0x297   : > { %7066 = vmatprep.mubr.msk.bf16.mxu1 %vm8126_vm0, %v8125_v0 }
 0x34a   : > { %v2137_v3 = vpop.f32.mrf.mxu1 }
 0x34b   : > { %v2369_v4 = vmul.f32 0.25, %v2137_v3 }
 0x34c   : > { %v7042_v6 = vpop.f32.mrf.mxu1 }
 0x34d   : > { %v2383_v7 = vadd.f32 %v2382_v2, %v2369_v4 }
 0x34e   : > { %v2213_v8 = vpop.f32.mrf.mxu1 }
 0x34f   : > { %v2370_v9 = vmul.f32 0.25, %v2213_v8  ;;  %v2388_v10 = vsel %vm2387_vm3, %v2383_v7, -inf }
 0x350   : > { %2389 = vmax.xlane.f32.xlu0 %v2388_v10  ;;  %v7047_v11 = vpop.f32.mrf.mxu1 }
 0x351   : > { %v2384_v12 = vadd.f32 %v2382_v2, %v2370_v9 }
 0x352   : > { %v2289_v13 = vpop.f32.mrf.mxu1 }
 0x353   : > { %v2371_v14 = vmul.f32 0.25, %v2289_v13  ;;  %v2391_v15 = vsel %vm2387_vm3, %v2384_v12, -inf }
 0x354   : > { %2392 = vmax.xlane.f32.xlu1 %v2391_v15  ;;  %v7052_v16 = vpop.f32.mrf.mxu1 }
 0x355   : > { %v2385_v17 = vadd.f32 %v2382_v2, %v2371_v14 }
 0x356   : > { %v2365_v18 = vpop.f32.mrf.mxu1 }
 0x357   : > { %v2372_v19 = vmul.f32 0.25, %v2365_v18  ;;  %v2394_v20 = vsel %vm2387_vm3, %v2385_v17, -inf }
 0x358   : > { %2395 = vmax.xlane.f32.xlu0 %v2394_v20  ;;  %v7057_v21 = vpop.f32.mrf.mxu1 }
 0x359   : > { %v2386_v22 = vadd.f32 %v2382_v2, %v2372_v19 }
 0x35b   : > { %v2397_v23 = vsel %vm2387_vm3, %v2386_v22, -inf }
 0x35c   : > { %2398 = vmax.xlane.f32.xlu0 %v2397_v23 }
 0x365   : > { %2437 = vrot.lane.b32.xlu1 %v1767_v25, %s8127_s0 }
 0x3d9   : > { %v2390_v26 = vpop.xlane.xlu0 %2389 }
 0x3da   : > { %v2400_v27 = vsub.f32 %v2383_v7, %v2390_v26 }
 0x3dc   : > { %v2404_v28 = vmul.f32 1.442695, %v2400_v27 }
 0x3dd   : > { %v2393_v29 = vpop.xlane.xlu1 %2392 }
 0x3de   : > { %7564 = vpow2.f32 %v2404_v28  ;;  %v2401_v30 = vsub.f32 %v2384_v12, %v2393_v29 }
 0x3e0   : > { %v2406_v31 = vmul.f32 1.442695, %v2401_v30 }
 0x3e1   : > { %v2396_v37 = vpop.xlane.xlu0 %2395  ;;  %v2438_v49 = vpop.permute.xlu1 %2437 }
 0x3e2   : > { %7566 = vpow2.f32 %v2406_v31  ;;  %v2402_v38 = vsub.f32 %v2385_v17, %v2396_v37 }
 0x3e4   : > { %v2408_v41 = vmul.f32 1.442695, %v2402_v38 }
 0x3e5   : > { %v2399_v39 = vpop.xlane.xlu0 %2398 }
 0x3e6   : > { %v2403_v42 = vsub.f32 %v2386_v22, %v2399_v39  ;;  %7568 = vpow2.f32 %v2408_v41 }
 0x3e8   : > { %v2410_v43 = vmul.f32 1.442695, %v2403_v42 }
 0x3ea   : > { %7570 = vpow2.f32 %v2410_v43 }
 0x3eb   : > { %v8659_v32 = vpop.eup %7564 }
 0x3ec   : > { %v2412_v33 = vsel %vm2387_vm3, %v8659_v32, 0.0 }
 0x3ed   : > { %2413 = vadd.xlane.f32.xlu1 %v2412_v33 }
 0x3ef   : > { %v8663_v34 = vpop.eup %7566 }
 0x3f0   : > { %v2415_v35 = vsel %vm2387_vm3, %v8663_v34, 0.0 }
 0x3f1   : > { %2416 = vadd.xlane.f32.xlu0 %v2415_v35 }
 0x3f3   : > { %v8669_v44 = vpop.eup %7568 }
 0x3f4   : > { %v2418_v45 = vsel %vm2387_vm3, %v8669_v44, 0.0 }
 0x3f7   : > { %v8673_v46 = vpop.eup %7570 }
 0x3f8   : > { %v2421_v48 = vsel %vm2387_vm3, %v8673_v46, 0.0 }
 0x3fe   : > { %2443 = vrot.lane.b32.xlu1 %v1767_v25, %s8128_s16 }
 0x407   : > { %2440 = vrot.lane.b32.xlu0 %v1767_v25, %s8129_s8 }
 0x422   : > { %2419 = vadd.xlane.f32.xlu1 %v2418_v45 }
 0x426   : > { %2422 = vadd.xlane.f32.xlu0 %v2421_v48 }
 0x476   : > { %v2414_v50 = vpop.xlane.xlu1 %2413 }
 0x477   : > { %7572 = vrcp.f32 %v2414_v50 }
 0x47a   : > { %v2444_v51 = vpop.permute.xlu1 %2443  ;;  %v2417_v52 = vpop.xlane.xlu0 %2416 }
 0x47b   : > { %v2462_v53 = vcombine.low %v2438_v49, %v2444_v51  ;;  %v2463_v54 = vcombine.high %v2438_v49, %v2444_v51  ;;  %7574 = vrcp.f32 %v2417_v52 }
 0x47d   : > { %v2470_v58 = vrot.slane %v2462_v53, %v8591_v40  ;;  %v2477_v59 = vrot.slane %v2463_v54, %v8591_v40 }
 0x47e   : > { %v2441_v55 = vpop.permute.xlu0 %2440 }
 0x47f   : > { %v2446_v56 = vcombine.low %v1767_v25, %v2441_v55  ;;  %v2447_v57 = vcombine.high %v1767_v25, %v2441_v55  ;;  %v7524_v55 = vld [vmem:[%s9527_s7 + $0x18] sm:$0xff]  }
 0x481   : > { %v2454_v60 = vrot.slane %v2446_v56, %v8591_v40  ;;  %v2461_v61 = vrot.slane %v2447_v57, %v8591_v40  ;;  %v7525_v56 = vld [vmem:[%s9527_s7 + $0x10] sm:$0xff]  }
 0x483   : > { %v2478_v62 = vcombine.low %v2454_v60, %v2470_v58  ;;  %v2479_v63 = vcombine.high %v2454_v60, %v2470_v58  ;;  %v2494_v1 = vcombine.low %v2461_v61, %v2477_v59  ;;  %v2495_v2 = vcombine.high %v2461_v61, %v2477_v59 }
 0x484   : > { %v7573_v20 = vpop.eup %7572 }
 0x485   : > { %v2486_v3 = vrot.slane %v2478_v62, %v8594_v47  ;;  %v2493_v4 = vrot.slane %v2479_v63, %v8594_v47  ;;  %v2502_v6 = vrot.slane %v2494_v1, %v8594_v47  ;;  %v2509_v7 = vrot.slane %v2495_v2, %v8594_v47 }
 0x486   : > { %v2428_v33 = vmul.f32 %v7573_v20, %v8659_v32  ;;  %v7526_v20 = vld [vmem:[%s9527_s7 + $0x8] sm:$0xff]  }
 0x487   : > { %v2514_v8 = vcombine.low %v2486_v3, %v2493_v4  ;;  %v6761_v9 = vcombine.high %v2486_v3, %v2493_v4  ;;  %v2530_v10 = vcombine.low %v2502_v6, %v2509_v7  ;;  %v6762_v11 = vcombine.high %v2502_v6, %v2509_v7 }
 0x488   : > { %v7575_v21 = vpop.eup %7574  ;;  %v2432_v42 = vpack.c.bf16 %v2428_v33, %v2428_v33 }
 0x489   : > { %v2521_v12 = vrot.slane %v2514_v8, %v8591_v40  ;;  %v2529_v13 = vrot.slane %v6761_v9, %v8591_v40  ;;  %v2537_v14 = vrot.slane %v2530_v10, %v8591_v40  ;;  %v2545_v15 = vrot.slane %v6762_v11, %v8591_v40 }
 0x48a   : > { %v2429_v35 = vmul.f32 %v7575_v21, %v8663_v34 }
 0x48b   : > { %v2546_v16 = vcombine.low %v2521_v12, %v2529_v13  ;;  %v2562_v17 = vcombine.low %v2537_v14, %v2545_v15  ;;  %v2547_v18 = vcombine.high %v2521_v12, %v2529_v13  ;;  %v2563_v19 = vcombine.high %v2537_v14, %v2545_v15 }
 0x48c   : > { %v2433_v43 = vpack.c.bf16 %v2429_v35, %v2429_v35 }
 0x48d   : > { %v2554_v22 = vrot.slane %v2546_v16, %v8594_v47  ;;  %v2570_v23 = vrot.slane %v2562_v17, %v8594_v47  ;;  %v2561_v24 = vrot.slane %v2547_v18, %v8594_v47  ;;  %v2577_v25 = vrot.slane %v2563_v19, %v8594_v47 }
 0x48f   : > { %v2578_v26 = vcombine.low %v2554_v22, %v2570_v23  ;;  %v2579_v27 = vcombine.high %v2554_v22, %v2570_v23  ;;  %v2580_v28 = vcombine.low %v2561_v24, %v2577_v25  ;;  %v2581_v29 = vcombine.high %v2561_v24, %v2577_v25 }
 0x491   : > { %v2582_v30 = vpack.c.bf16 %v2578_v26, %v2578_v26  ;;  %v2583_v31 = vpack.c.bf16 %v2579_v27, %v2579_v27  ;;  %v2584_v39 = vpack.c.bf16 %v2580_v28, %v2580_v28  ;;  %v2585_v41 = vpack.c.bf16 %v2581_v29, %v2581_v29 }
 0x493   : > { %v2591_v37 = vsel %vm2589_vm4, %v2582_v30, 0  ;;  %v2637_v38 = vsel %vm2589_vm4, %v2583_v31, 0  ;;  %v2683_v32 = vsel %vm2589_vm4, %v2584_v39, 0  ;;  %v2729_v34 = vsel %vm2589_vm4, %v2585_v41, 0  ;;  %v7527_v30 = vld [vmem:[%s9527_s7] sm:$0xff]  }
 0x494   : > { %7059 = vmatpush3.bf16.msra.mxu0 %v2591_v37  ;;  %7065 = vmatpush3.bf16.msra.mxu1 %v2637_v38 }
 0x495   : > { %7070 = vmatprep.subr.bf16.mxu0 %v8125_v0  ;;  %7076 = vmatprep.subr.bf16.mxu1 %v8125_v0 }
 0x497   : > { %7061 = vmatmul.mubr.msk.bf16.vlgmr.msra.gmra.mxu0 %vm2387_vm3, %v2432_v42  ;;  %7067 = vmatmul.mubr.msk.bf16.vlgmr.msra.gmra.mxu1 %vm2387_vm3, %v2433_v43 }
 0x498   : > { %7071 = vmatpush3.bf16.msra.mxu0 %v2683_v32  ;;  %7077 = vmatpush3.bf16.msra.mxu1 %v2729_v34 }
 0x499   : > { %7072 = vmatprep.mubr.msk.bf16.mxu0 %vm8126_vm0, %v8125_v0  ;;  %7078 = vmatprep.mubr.msk.bf16.mxu1 %vm8126_vm0, %v8125_v0 }
 0x49a   : > { %7082 = vmatprep.subr.bf16.mxu0 %v8125_v0  ;;  %7094 = vmatprep.subr.bf16.mxu1 %v8125_v0 }
 0x4ab   : > { %v2420_v45 = vpop.xlane.xlu1 %2419 }
 0x4ac   : > { %7576 = vrcp.f32 %v2420_v45 }
 0x4af   : > { %v2423_v48 = vpop.xlane.xlu0 %2422 }
 0x4b0   : > { %7578 = vrcp.f32 %v2423_v48 }
 0x4b9   : > { %v7577_v49 = vpop.eup %7576 }
 0x4ba   : > { %v2430_v50 = vmul.f32 %v7577_v49, %v8669_v44 }
 0x4bc   : > { %v2434_v51 = vpack.c.bf16 %v2430_v50, %v2430_v50 }
 0x4bd   : > { %v7579_v52 = vpop.eup %7578 }
 0x4be   : > { %7073 = vmatmul.mubr.msk.bf16.vlgmr.msra.gmra.mxu0 %vm2387_vm3, %v2434_v51  ;;  %v2431_v53 = vmul.f32 %v7579_v52, %v8673_v46 }
 0x4bf   : > { %7090 = vmatprep.mubr.msk.bf16.mxu0 %vm8126_vm0, %v8125_v0  ;;  %7083 = vmatpush3.bf16.msra.mxu0 %v7524_v55 }
 0x4c0   : > { %v2435_v54 = vpack.c.bf16 %v2431_v53, %v2431_v53  ;;  %7084 = vmatprep.subr.bf16.mxu0 %v8125_v0 }
 0x4c2   : > { %7079 = vmatmul.mubr.msk.bf16.vlgmr.msra.gmra.mxu1 %vm2387_vm3, %v2435_v54 }
 0x4c3   : > { %7102 = vmatprep.mubr.msk.bf16.mxu1 %vm8126_vm0, %v8125_v0  ;;  %7085 = vmatpush3.bf16.msra.mxu0 %v7525_v56 }
 0x4c4   : > { %7086 = vmatprep.subr.bf16.mxu0 %v8125_v0 }
 0x4c7   : > { %7087 = vmatpush3.bf16.msra.mxu0 %v7526_v20 }
 0x4c8   : > { %7088 = vmatprep.subr.bf16.mxu0 %v8125_v0 }
 0x4cb   : > { %7089 = vmatpush3.bf16.msra.mxu0 %v7527_v30 }
 0x4cc   : > { %7106 = vmatprep.subr.bf16.mxu0 %v8125_v0 }
 0x557   : > { %v2627_v44 = vpop.f32.mrf.mxu0  ;;  %v2673_v57 = vpop.f32.mrf.mxu1 }
 0x559   : > { %v7062_v46 = vpop.f32.mrf.mxu0  ;;  %v7068_v58 = vpop.f32.mrf.mxu1 }
 0x55a   : > { %v6769_v46 = vld [vmem:[%s9528_s28] ss:$0 sm:$0xff]  ;;  %s9531_s28 = sld [smem:[#allocation48_spill]] }
 0x55b   : > { %v2630_v59 = vpop.f32.mrf.mxu0  ;;  %v2676_v60 = vpop.f32.mrf.mxu1 }
 0x55d   : > { %v7063_v61 = vpop.f32.mrf.mxu0  ;;  %v7069_v62 = vpop.f32.mrf.mxu1 }
 0x560   : > { %v7539_v20 = vld [vmem:[%s9531_s28] sm:$0xff]  }
 0x57e   : > { %v2719_v63 = vpop.f32.mrf.mxu0 }
 0x57f   : > { %v2771_v2 = vcombine.low %v2627_v44, %v2719_v63  ;;  %v2772_v3 = vcombine.high %v2627_v44, %v2719_v63 }
 0x580   : > { %v7074_v1 = vpop.f32.mrf.mxu0 }
 0x581   : > { %v2779_v11 = vrot.slane %v2771_v2, %v8591_v40  ;;  %v2786_v12 = vrot.slane %v2772_v3, %v8591_v40  ;;  %v7528_v2 = vld [vmem:[#allocation7 + $0x18] sm:$0xff]   ;;  %v7529_v3 = vld [vmem:[#allocation7 + $0x10] sm:$0xff]  }
 0x582   : > { %v2722_v4 = vpop.f32.mrf.mxu0  ;;  %v2765_v6 = vpop.f32.mrf.mxu1 }
 0x583   : > { %v2787_v7 = vcombine.low %v2673_v57, %v2765_v6  ;;  %v2788_v8 = vcombine.high %v2673_v57, %v2765_v6  ;;  %v7530_v4 = vld [vmem:[#allocation7 + $0x8] sm:$0xff]   ;;  %v3039_v6 = vld [vmem:[%s1500_s1] sm:$0x7]  ;;  %s7286_s1 = smul.u32 24, %s9553_s22 }
 0x584   : > { %v7075_v9 = vpop.f32.mrf.mxu0  ;;  %v7080_v10 = vpop.f32.mrf.mxu1 }
 0x585   : > { %v2795_v13 = vrot.slane %v2787_v7, %v8591_v40  ;;  %v2802_v14 = vrot.slane %v2788_v8, %v8591_v40  ;;  %v3040_v7 = vpack.c.bf16 %v3039_v6, %v3039_v6 }
 0x586   : > { %v2768_v15 = vpop.f32.mrf.mxu1 }
 0x587   : > { %v2803_v16 = vcombine.low %v2779_v11, %v2795_v13  ;;  %v2804_v17 = vcombine.high %v2779_v11, %v2795_v13  ;;  %v2819_v18 = vcombine.low %v2786_v12, %v2802_v14  ;;  %v2820_v19 = vcombine.high %v2786_v12, %v2802_v14  ;;  %v7532_v13 = vld [vmem:[%s9530_s17 + $0x18] sm:$0xff]   ;;  %v7534_v15 = vld [vmem:[%s9530_s17 + $0x10] sm:$0xff]  }
 0x588   : > { %v7081_v21 = vpop.f32.mrf.mxu1  ;;  %v7533_v14 = vld [vmem:[%s9531_s28 + $0x18] sm:$0xff]   ;;  %7095 = vmatpush3.bf16.msra.mxu1 %v7532_v13 }
 0x589   : > { %v2811_v22 = vrot.slane %v2803_v16, %v8594_v47  ;;  %v2818_v23 = vrot.slane %v2804_v17, %v8594_v47  ;;  %v2827_v24 = vrot.slane %v2819_v18, %v8594_v47  ;;  %v2834_v25 = vrot.slane %v2820_v19, %v8594_v47  ;;  %7096 = vmatprep.subr.bf16.mxu1 %v8125_v0  ;;  %v7535_v16 = vld [vmem:[%s9531_s28 + $0x10] sm:$0xff]   ;;  %v7536_v17 = vld [vmem:[%s9530_s17 + $0x8] sm:$0xff]   ;;  %v7538_v19 = vld [vmem:[%s9530_s17] sm:$0xff]  }
 0x58a   : > { %v7537_v18 = vld [vmem:[%s9531_s28 + $0x8] sm:$0xff]   ;;  %v6783_v21 = vld [vmem:[#allocation9] ss:$0 sm:$0xff] }
 0x58b   : > { %v2839_v26 = vcombine.low %v2811_v22, %v2818_v23  ;;  %v6767_v27 = vcombine.high %v2811_v22, %v2818_v23  ;;  %v2855_v28 = vcombine.low %v2827_v24, %v2834_v25  ;;  %v6768_v29 = vcombine.high %v2827_v24, %v2834_v25 }
 0x58c   : > { %7097 = vmatpush3.bf16.msra.mxu1 %v7534_v15 }
 0x58d   : > { %v2846_v31 = vrot.slane %v2839_v26, %v8591_v40  ;;  %v2854_v33 = vrot.slane %v6767_v27, %v8591_v40  ;;  %v2862_v35 = vrot.slane %v2855_v28, %v8591_v40  ;;  %v2870_v37 = vrot.slane %v6768_v29, %v8591_v40  ;;  %7098 = vmatprep.subr.bf16.mxu1 %v8125_v0 }
 0x58f   : > { %v2872_v38 = vcombine.high %v2846_v31, %v2854_v33  ;;  %v2888_v39 = vcombine.high %v2862_v35, %v2870_v37  ;;  %v2871_v41 = vcombine.low %v2846_v31, %v2854_v33  ;;  %v2887_v42 = vcombine.low %v2862_v35, %v2870_v37  ;;  %v6775_v31 = vld [vmem:[#allocation2] ss:$0 sm:$0xff]  ;;  %v6776_v35 = vld [vmem:[#allocation4] ss:$0 sm:$0xff] }
 0x590   : > { %7099 = vmatpush3.bf16.msra.mxu1 %v7536_v17 }
 0x591   : > { %v2886_v43 = vrot.slane %v2872_v38, %v8594_v47  ;;  %v2902_v32 = vrot.slane %v2888_v39, %v8594_v47  ;;  %v2879_v34 = vrot.slane %v2871_v41, %v8594_v47  ;;  %v2895_v45 = vrot.slane %v2887_v42, %v8594_v47  ;;  %7100 = vmatprep.subr.bf16.mxu1 %v8125_v0 }
 0x593   : > { %v2905_v48 = vcombine.low %v2886_v43, %v2902_v32  ;;  %v2904_v49 = vcombine.high %v2879_v34, %v2895_v45  ;;  %v2903_v50 = vcombine.low %v2879_v34, %v2895_v45  ;;  %v2906_v51 = vcombine.high %v2886_v43, %v2902_v32 }
 0x594   : > { %7101 = vmatpush3.bf16.msra.mxu1 %v7538_v19 }
 0x595   : > { %2912 = vrot.lane.b32.xlu1 %v2905_v48, %s9479_s15  ;;  %2908 = vrot.lane.b32.xlu0 %v2904_v49, %s9480_s10  ;;  %s9536_s15 = sld [smem:[#allocation38_spill]] }
 0x596   : > { %7118 = vmatprep.subr.mxu1 %v8125_v0  ;;  %s9537_s10 = sld [smem:[#allocation37_spill]] }
 0x599   : > { %2916 = vrot.lane.b32.xlu1 %v2906_v51, %s9478_s11  ;;  %s1505_s11 = scalar_lea.vmem %s9532_s13, %s7286_s1  ;;  %s9534_s13 = sld [smem:[#allocation51_spill]] }
 0x59a   : > { %v3801_v6 = vld [vmem:[%s1505_s11 + $0x8] sm:$0xff]  ;;  %s9535_s1 = sld [smem:[#allocation49_spill]] }
 0x607   : > { %v2913_v52 = vpop.permute.xlu1 %2912  ;;  %v2909_v53 = vpop.permute.xlu0 %2908 }
 0x608   : > { %v2919_v54 = vsel %vm2064_vm2, %v2903_v50, %v2909_v53 }
 0x609   : > { %v2921_v56 = vsel %vm2920_vm5, %v2919_v54, %v2913_v52 }
 0x60b   : > { %v2917_v55 = vpop.permute.xlu1 %2916 }
 0x60c   : > { %v2923_v44 = vsel %vm2922_vm6, %v2921_v56, %v2917_v55 }
 0x60d   : > { %v2924_v57 = vpack.c.bf16 %v2923_v44, %v2923_v44 }
 0x60f   : > { %7091 = vmatmul.mubr.msk.bf16.vlgmr.msra.gmra.mxu0 %vm1567_vm1, %v2924_v57 }
 0x610   : > { %7114 = vmatprep.mubr.msk.bf16.mxu0 %vm8126_vm0, %v8125_v0  ;;  %7107 = vmatpush3.bf16.msra.mxu0 %v7528_v2 }
 0x611   : > { %7108 = vmatprep.subr.bf16.mxu0 %v8125_v0 }
 0x614   : > { %7109 = vmatpush3.bf16.msra.mxu0 %v7529_v3 }
 0x615   : > { %7110 = vmatprep.subr.bf16.mxu0 %v8125_v0 }
 0x618   : > { %7111 = vmatpush3.bf16.msra.mxu0 %v7530_v4 }
 0x619   : > { %7112 = vmatprep.subr.bf16.mxu0 %v8125_v0 }
 0x6cf   : > { %v3001_v58 = vpop.f32.mrf.mxu0 }
 0x6d0   : > { %v3002_v59 = vadd.f32 %v6769_v46, %v3001_v58  ;;  %v6777_v58 = vld [vmem:[#allocation6] ss:$0 sm:$0xff] }
 0x6d1   : > { %v7092_v60 = vpop.f32.mrf.mxu0 }
 0x6d2   : > { %v3009_v61 = vadd.f32 %v3002_v59, %v8542_v5  ;;  %v7531_v5 = vld [vmem:[#allocation7] sm:$0xff]  }
 0x6d3   : > { %v3004_v62 = vpop.f32.mrf.mxu0  ;;  %7113 = vmatpush3.bf16.msra.mxu0 %v7531_v5  ;;  %v3800_v5 = vld [vmem:[%s1505_s11] sm:$0xff] }
 0x6d4   : > { %v3010_v63 = vsel %vm1567_vm1, %v3009_v61, 0.0  ;;  %7138 = vmatprep.subr.bf16.mxu0 %v8125_v0 }
 0x6d5   : > { %3011 = vadd.xlane.f32.xlu0 %v3010_v63  ;;  %v7093_v1 = vpop.f32.mrf.mxu0 }
 0x6d6   : > { %7115 = vmatmul.mubr.msk.bf16.vlgmr.msra.gmra.mxu0 %vm1567_vm1, %v3040_v7  ;;  %v8819_v7 = vpack.c.bf16 %v3801_v6, %v3800_v5 }
 0x6d7   : > { %7146 = vmatprep.mubr.msk.bf16.mxu0 %vm8126_vm0, %v8125_v0  ;;  %7139 = vmatpush3.bf16.msra.mxu0 %v7533_v14 }
 0x6d8   : > { %7140 = vmatprep.subr.bf16.mxu0 %v8125_v0 }
 0x6db   : > { %7141 = vmatpush3.bf16.msra.mxu0 %v7535_v16 }
 0x6dc   : > { %7142 = vmatprep.subr.bf16.mxu0 %v8125_v0 }
 0x6df   : > { %7143 = vmatpush3.bf16.msra.mxu0 %v7537_v18 }
 0x6e0   : > { %7144 = vmatprep.subr.bf16.mxu0 %v8125_v0 }
 0x6e3   : > { %7145 = vmatpush3.bf16.msra.mxu0 %v7539_v20 }
 0x75e   : > { %v3012_v8 = vpop.xlane.xlu0 %3011 }
 0x75f   : > { %v3014_v9 = vmul.f32 0.015625, %v3012_v8  ;;  %v7544_v8 = vld [vmem:[#allocation10 + $0x18] sm:$0xff]  }
 0x760   : > { %7162 = vmatprep.subr.bf16.mxu0 %v7544_v8 }
 0x761   : > { %v3015_v10 = vsub.f32 %v3009_v61, %v3014_v9  ;;  %v7545_v9 = vld [vmem:[#allocation10 + $0x10] sm:$0xff]  }
 0x763   : > { %v3016_v11 = vmul.f32 %v3015_v10, %v3015_v10 }
 0x765   : > { %v3017_v12 = vsel %vm1567_vm1, %v3016_v11, 0.0  ;;  %v7547_v11 = vld [vmem:[#allocation10] sm:$0xff]  }
 0x766   : > { %3018 = vadd.xlane.f32.xlu1 %v3017_v12  ;;  %v3802_v12 = vld [vmem:[%s1505_s11 + $0x10] sm:$0xff]  ;;  %s9533_s11 = sld [smem:[#allocation50_spill]] }
 0x767   : > { %v8823_v13 = vpack.c.bf16 %v3802_v12, %v3802_v12 }
 0x796   : > { %v3199_v22 = vpop.f32.mrf.mxu0 }
 0x797   : > { %v3200_v23 = vadd.f32 %v6783_v21, %v3199_v22 }
 0x798   : > { %v7116_v24 = vpop.f32.mrf.mxu0 }
 0x799   : > { %3352 = vrot.lane.b32.xlu0 %v3200_v23, %s8127_s0  ;;  %3355 = vrot.lane.b32.xlu1 %v3200_v23, %s8129_s8 }
 0x79a   : > { %v3202_v25 = vpop.f32.mrf.mxu0 }
 0x79c   : > { %v7117_v26 = vpop.f32.mrf.mxu0 }
 0x79d   : > { %3358 = vrot.lane.b32.xlu0 %v3200_v23, %s8128_s16 }
 0x7ef   : > { %v3019_v27 = vpop.xlane.xlu1 %3018 }
 0x7f0   : > { %v3020_v28 = vmul.f32 0.015625, %v3019_v27 }
 0x7f2   : > { %v3021_v29 = vadd.f32 1e-05, %v3020_v28 }
 0x7f4   : > { %7580 = vrsqrt.f32 %v3021_v29 }
 0x801   : > { %v7581_v30 = vpop.eup %7580 }
 0x802   : > { %v3023_v33 = vmul.f32 %v7581_v30, %v3015_v10  ;;  %v7546_v10 = vld [vmem:[#allocation10 + $0x8] sm:$0xff]  }
 0x804   : > { %v3030_v37 = vmul.f32 %v6775_v31, %v3023_v33 }
 0x806   : > { %v8783_v38 = vadd.f32 %v6776_v35, %v3030_v37 }
 0x808   : > { %v3038_v39 = vpack.c.bf16 %v8783_v38, %v8783_v38 }
 0x80a   : > { %7103 = vmatmul.mubr.msk.bf16.vlgmr.msra.gmra.mxu1 %vm1567_vm1, %v3038_v39  ;;  %7147 = vmatmul.mubr.msk.bf16.vlgmr.msra.gmra.mxu0 %vm1567_vm1, %v3038_v39 }
 0x80b   : > { %7120 = vmatprep.mubr.msk.f32.mxu1 %vm8126_vm0, %v8125_v0  ;;  %v3353_v41 = vpop.permute.xlu0 %3352  ;;  %v3356_v42 = vpop.permute.xlu1 %3355  ;;  %7170 = vmatprep.mubr.msk.bf16.mxu0 %vm1567_vm1, %v8819_v7 }
 0x80c   : > { %v3361_v43 = vcombine.low %v3200_v23, %v3356_v42  ;;  %7163 = vmatpush3.bf16.msra.mxu0 %v7544_v8 }
 0x80d   : > { %7164 = vmatprep.subr.bf16.mxu0 %v7545_v9 }
 0x80e   : > { %v3368_v34 = vrot.slane %v3361_v43, %v8591_v40 }
 0x80f   : > { %v3359_v32 = vpop.permute.xlu0 %3358 }
 0x810   : > { %v3369_v45 = vcombine.low %v3353_v41, %v3359_v32  ;;  %7165 = vmatpush3.bf16.msra.mxu0 %v7545_v9 }
 0x811   : > { %7166 = vmatprep.subr.bf16.mxu0 %v7546_v10 }
 0x812   : > { %v3376_v48 = vrot.slane %v3369_v45, %v8591_v40 }
 0x814   : > { %v3377_v49 = vcombine.low %v3368_v34, %v3376_v48  ;;  %v3378_v50 = vcombine.high %v3368_v34, %v3376_v48  ;;  %7167 = vmatpush3.bf16.msra.mxu0 %v7546_v10  ;;  %v6806_v10 = vld [vmem:[%s9534_s13] ss:$0 sm:$0xff]  ;;  %s1512_s13 = scalar_lea.vmem %s9536_s15, %s6726_s18  ;;  %s9538_s15 = smov 16  }
 0x815   : > { %7168 = vmatprep.subr.bf16.mxu0 %v7547_v11  ;;  %s8135_s18 = smov 8  }
 0x816   : > { %v3385_v51 = vrot.slane %v3377_v49, %v8594_v47  ;;  %v3392_v52 = vrot.slane %v3378_v50, %v8594_v47 }
 0x818   : > { %v3393_v53 = vcombine.low %v3385_v51, %v3392_v52  ;;  %v3401_v54 = vcombine.high %v3385_v51, %v8125_v0  ;;  %7169 = vmatpush3.bf16.msra.mxu0 %v7547_v11 }
 0x819   : > { %7183 = vmatprep.subr.mxu0 %v8125_v0 }
 0x81a   : > { %v8797_v55 = vrot.slane %v3393_v53, %v8591_v40  ;;  %v8800_v56 = vrot.slane %v3401_v54, %v8591_v40 }
 0x81b   : > { %7171 = vmatmul.mubr.msk.bf16.vlgmr.msra.gmra.mxu0 %vm1567_vm1, %v8823_v13 }
 0x81c   : > { %v3410_v44 = vcombine.high %v8797_v55, %v8800_v56  ;;  %v3409_v57 = vcombine.low %v8797_v55, %v8800_v56  ;;  %7189 = vmatprep.mubr.msk.f32.mxu0 %vm8126_vm0, %v8125_v0  ;;  %v7541_v56 = vld [vmem:[%s9533_s11 + $0x10] sm:$0xff]  }
 0x81e   : > { %v8807_v46 = vrot.slane %v3409_v57, %v8594_v47 }
 0x820   : > { %7119 = vmatpush3.xpose.msk.msra.mxu1 %vm2064_vm2, %v8807_v46  ;;  %v3425_v54 = vcombine.high %v8807_v46, %v8125_v0  ;;  %v3424_v46 = vrot.slane %v3410_v44, %v8594_v47  ;;  %v7542_v44 = vld [vmem:[%s9533_s11 + $0x8] sm:$0xff]  }
 0x821   : > { %7123 = vmatprep.subr.mxu1 %v8125_v0 }
 0x8ca   : > { %v3117_v59 = vpop.f32.mrf.mxu1  ;;  %v8812_v60 = vpop.f32.mrf.mxu0 }
 0x8cb   : > { %v3118_v61 = vadd.f32 %v6777_v58, %v3117_v59 }
 0x8cc   : > { %v7104_v62 = vpop.f32.mrf.mxu1  ;;  %v7148_v63 = vpop.f32.mrf.mxu0 }
 0x8cd   : > { %3209 = vrot.lane.b32.xlu0 %v3118_v61, %s8129_s8  ;;  %3206 = vrot.lane.b32.xlu1 %v3118_v61, %s8127_s0  ;;  %v7540_v62 = vld [vmem:[%s9533_s11 + $0x18] sm:$0xff]   ;;  %v3426_v63 = vcombine.high %v3424_v46, %v8125_v0 }
 0x8ce   : > { %v3120_v1 = vpop.f32.mrf.mxu1  ;;  %v3881_v2 = vpop.f32.mrf.mxu0 }
 0x8cf   : > { %v7543_v1 = vld [vmem:[%s9533_s11] sm:$0xff]  }
 0x8d0   : > { %v7105_v3 = vpop.f32.mrf.mxu1  ;;  %v7149_v4 = vpop.f32.mrf.mxu0 }
 0x8d1   : > { %3212 = vrot.lane.b32.xlu1 %v3118_v61, %s8128_s16 }
 0x93f   : > { %v3210_v14 = vpop.permute.xlu0 %3209  ;;  %v3207_v15 = vpop.permute.xlu1 %3206 }
 0x940   : > { %v3215_v16 = vcombine.low %v3118_v61, %v3210_v14  ;;  %v3216_v17 = vcombine.high %v3118_v61, %v3210_v14 }
 0x942   : > { %v3223_v21 = vrot.slane %v3215_v16, %v8591_v40  ;;  %v3230_v22 = vrot.slane %v3216_v17, %v8591_v40 }
 0x943   : > { %v3213_v18 = vpop.permute.xlu1 %3212 }
 0x944   : > { %v3231_v19 = vcombine.low %v3207_v15, %v3213_v18  ;;  %v3232_v20 = vcombine.high %v3207_v15, %v3213_v18  ;;  %v6800_v18 = vld [vmem:[%s9535_s1] ss:$0 sm:$0xff]  ;;  %s1508_s1 = scalar_lea.vmem %s9537_s10, %s9553_s22  ;;  %s9542_s10 = smov 32  }
 0x946   : > { %v3239_v23 = vrot.slane %v3231_v19, %v8591_v40  ;;  %v3246_v24 = vrot.slane %v3232_v20, %v8591_v40  ;;  %v8904_v19 = vadd.f32 %v6800_v18, %v8812_v60  ;;  %v5133_v20 = vsub.s32 2, %v8588_v36 }
 0x948   : > { %v3247_v25 = vcombine.low %v3223_v21, %v3239_v23  ;;  %v3248_v26 = vcombine.high %v3223_v21, %v3239_v23  ;;  %v3263_v27 = vcombine.low %v3230_v22, %v3246_v24  ;;  %v3264_v28 = vcombine.high %v3230_v22, %v3246_v24  ;;  %v8915_v22 = vld [vmem:[%s1512_s13] sm:$0x7]  ;;  %v7172_v24 = vpop.f32.mrf.mxu0  ;;  %s9539_s13 = sld [smem:[#allocation52_spill]] }
 0x949   : > { %v5052_v21 = vsub.s32 1, %v8588_v36  ;;  %v5134_v60 = vrot.slane %v8915_v22, %v5133_v20 }
 0x94a   : > { %v3255_v29 = vrot.slane %v3247_v25, %v8594_v47  ;;  %v3262_v30 = vrot.slane %v3248_v26, %v8594_v47  ;;  %v3271_v31 = vrot.slane %v3263_v27, %v8594_v47  ;;  %v3278_v33 = vrot.slane %v3264_v28, %v8594_v47  ;;  %v4050_v25 = vpop.f32.mrf.mxu0  ;;  %v6799_v28 = vld [vmem:[%s1508_s1] ss:$0 sm:$0xff]  ;;  %s9545_s1 = sld [smem:[#allocation57_spill]] }
 0x94b   : > { %v5053_v23 = vrot.slane %v8915_v22, %v5052_v21 }
 0x94c   : > { %v3283_v35 = vcombine.low %v3255_v29, %v3262_v30  ;;  %v6789_v37 = vcombine.high %v3255_v29, %v3262_v30  ;;  %v3299_v39 = vcombine.low %v3271_v31, %v3278_v33  ;;  %v6790_v41 = vcombine.high %v3271_v31, %v3278_v33  ;;  %v7173_v26 = vpop.f32.mrf.mxu0 }
 0x94e   : > { %v3290_v42 = vrot.slane %v3283_v35, %v8591_v40  ;;  %v3298_v43 = vrot.slane %v6789_v37, %v8591_v40  ;;  %v3306_v32 = vrot.slane %v3299_v39, %v8591_v40  ;;  %v3314_v34 = vrot.slane %v6790_v41, %v8591_v40 }
 0x950   : > { %v3315_v45 = vcombine.low %v3290_v42, %v3298_v43  ;;  %v3331_v48 = vcombine.low %v3306_v32, %v3314_v34  ;;  %v3316_v51 = vcombine.high %v3290_v42, %v3298_v43  ;;  %v3332_v52 = vcombine.high %v3306_v32, %v3314_v34  ;;  %v6813_v34 = vld [vmem:[%s9539_s13] ss:$0 sm:$0xff]  ;;  %s1522_s13 = scalar_lea.vmem %s9545_s1, %s8534_s2 }
 0x952   : > { %v3323_v49 = vrot.slane %v3315_v45, %v8594_v47  ;;  %v3339_v50 = vrot.slane %v3331_v48, %v8594_v47  ;;  %v3330_v58 = vrot.slane %v3316_v51, %v8594_v47  ;;  %v3346_v59 = vrot.slane %v3332_v52, %v8594_v47  ;;  %v4053_v48 = vpop.f32.mrf.mxu0 }
 0x953   : > { %v8943_v45 = vadd.f32 %v7172_v24, %v6813_v34 }
 0x954   : > { %v3347_v53 = vcombine.low %v3323_v49, %v3339_v50  ;;  %v3348_v57 = vcombine.high %v3323_v49, %v3339_v50  ;;  %v3349_v61 = vcombine.low %v3330_v58, %v3346_v59  ;;  %v3350_v55 = vcombine.high %v3330_v58, %v3346_v59 }
 0x955   : > { %v8949_v49 = vadd.f32 %v6813_v34, %v4053_v48  ;;  %v8951_v50 = vadd.f32 %v6813_v34, %v4050_v25 }
 0x956   : > { %7121 = vmatmul.mubr.msk.f32.vlgmr.msra.gmra.mxu1 %vm2064_vm2, %v3347_v53 }
 0x957   : > { %7124 = vmatpush3.xpose.msk.msra.mxu1 %vm2064_vm2, %v3425_v54  ;;  %7125 = vmatprep.mubr.msk.f32.mxu1 %vm8126_vm0, %v8125_v0 }
 0x958   : > { %7128 = vmatprep.subr.mxu1 %v8125_v0 }
 0x95a   : > { %7126 = vmatmul.mubr.msk.f32.vlgmr.msra.gmra.mxu1 %vm2064_vm2, %v3348_v57 }
 0x95b   : > { %7129 = vmatpush3.xpose.msk.msra.mxu1 %vm2064_vm2, %v3424_v46  ;;  %7130 = vmatprep.mubr.msk.f32.mxu1 %vm8126_vm0, %v8125_v0 }
 0x95c   : > { %7133 = vmatprep.subr.mxu1 %v8125_v0 }
 0x95e   : > { %7131 = vmatmul.mubr.msk.f32.vlgmr.msra.gmra.mxu1 %vm2064_vm2, %v3349_v61 }
 0x95f   : > { %7134 = vmatpush3.xpose.msk.msra.mxu1 %vm2064_vm2, %v3426_v63  ;;  %7135 = vmatprep.mubr.msk.f32.mxu1 %vm8126_vm0, %v8125_v0 }
 0x960   : > { %7150 = vmatprep.subr.bf16.mxu1 %v7540_v62 }
 0x962   : > { %7136 = vmatmul.mubr.msk.f32.vlgmr.msra.gmra.mxu1 %vm2064_vm2, %v3350_v55 }
 0x963   : > { %7151 = vmatpush3.bf16.msra.mxu1 %v7540_v62  ;;  %7158 = vmatprep.mubr.msk.bf16.mxu1 %vm1567_vm1, %v8819_v7 }
 0x964   : > { %7152 = vmatprep.subr.bf16.mxu1 %v7541_v56 }
 0x967   : > { %7153 = vmatpush3.bf16.msra.mxu1 %v7541_v56 }
 0x968   : > { %7154 = vmatprep.subr.bf16.mxu1 %v7542_v44 }
 0x96b   : > { %7155 = vmatpush3.bf16.msra.mxu1 %v7542_v44 }
 0x96c   : > { %7156 = vmatprep.subr.bf16.mxu1 %v7543_v1 }
 0x96f   : > { %7157 = vmatpush3.bf16.msra.mxu1 %v7543_v1 }
 0x970   : > { %7174 = vmatprep.subr.mxu1 %v8125_v0 }
 0x972   : > { %7159 = vmatmul.mubr.msk.bf16.vlgmr.msra.gmra.mxu1 %vm1567_vm1, %v8823_v13 }
 0x973   : > { %7180 = vmatprep.mubr.msk.f32.mxu1 %vm8126_vm0, %v8125_v0 }
 0xa16   : > { %v3499_v2 = vpop.f32.mrf.mxu1 }
 0xa17   : > { %v3731_v27 = vmul.f32 0.25, %v3499_v2 }
 0xa18   : > { %v7122_v3 = vpop.f32.mrf.mxu1 }
 0xa19   : > { %v8926_v30 = vadd.f32 %v6799_v28, %v3731_v27 }
 0xa1a   : > { %v3575_v4 = vpop.f32.mrf.mxu1 }
 0xa1b   : > { %v3732_v31 = vmul.f32 0.25, %v3575_v4  ;;  %v3747_v35 = vsel %vm3746_vm7, %v8926_v30, -inf }
 0xa1c   : > { %v7127_v5 = vpop.f32.mrf.mxu1 }
 0xa1d   : > { %v8932_v39 = vadd.f32 %v6799_v28, %v3732_v31 }
 0xa1e   : > { %v3651_v6 = vpop.f32.mrf.mxu1 }
 0xa1f   : > { %v3733_v29 = vmul.f32 0.25, %v3651_v6  ;;  %v3750_v43 = vsel %vm3746_vm7, %v8932_v39, -inf }
 0xa20   : > { %v7132_v7 = vpop.f32.mrf.mxu1 }
 0xa21   : > { %v8930_v37 = vadd.f32 %v6799_v28, %v3733_v29 }
 0xa22   : > { %v3727_v8 = vpop.f32.mrf.mxu1 }
 0xa23   : > { %v3734_v33 = vmul.f32 0.25, %v3727_v8  ;;  %v3753_v41 = vsel %vm3746_vm7, %v8930_v37, -inf }
 0xa24   : > { %v7137_v9 = vpop.f32.mrf.mxu1 }
 0xa25   : > { %v8936_v42 = vadd.f32 %v6799_v28, %v3734_v33 }
 0xa27   : > { %v3756_v32 = vsel %vm3746_vm7, %v8936_v42, -inf }
 0xa32   : > { %v7160_v11 = vpop.f32.mrf.mxu1 }
 0xa33   : > { %v8880_v12 = vadd.f32 %v7160_v11, %v6806_v10 }
 0xa34   : > { %v3963_v14 = vpop.f32.mrf.mxu1 }
 0xa35   : > { %4226 = vrot.lane.b32.xlu1 %v8880_v12, %s8129_s8  ;;  %4217 = vrot.lane.b32.xlu0 %v8880_v12, %s8127_s0  ;;  %v8886_v15 = vadd.f32 %v6806_v10, %v3963_v14 }
 0xa36   : > { %v7161_v13 = vpop.f32.mrf.mxu1 }
 0xa38   : > { %v3966_v16 = vpop.f32.mrf.mxu1 }
 0xa39   : > { %4235 = vrot.lane.b32.xlu0 %v8880_v12, %s8128_s16  ;;  %4222 = vrot.lane.b32.xlu1 %v8886_v15, %s8129_s8  ;;  %v8892_v17 = vadd.f32 %v6806_v10, %v3966_v16 }
 0xa3d   : > { %4215 = vrot.lane.b32.xlu1 %v8892_v17, %s8127_s0  ;;  %4213 = vrot.lane.b32.xlu0 %v8886_v15, %s8127_s0 }
 0xa41   : > { %4233 = vrot.lane.b32.xlu1 %v8892_v17, %s8128_s16  ;;  %4224 = vrot.lane.b32.xlu0 %v8892_v17, %s8129_s8 }
 0xa45   : > { %4065 = vrot.lane.b32.xlu1 %v8904_v19, %s8127_s0  ;;  %4231 = vrot.lane.b32.xlu0 %v8886_v15, %s8128_s16 }
 0xa49   : > { %4071 = vrot.lane.b32.xlu1 %v8904_v19, %s8128_s16  ;;  %4068 = vrot.lane.b32.xlu0 %v8904_v19, %s8129_s8 }
 0xa4d   : > { %5136 = vrot.lane.b32.xlu1 %v5134_v60, %s9538_s15  ;;  %5055 = vrot.lane.b32.xlu0 %v5053_v23, %s8135_s18  ;;  %s9543_s18 = smov 48  }
 0xa6c   : > { %3748 = vmax.xlane.f32.xlu0 %v3747_v35 }
 0xa70   : > { %3754 = vmax.xlane.f32.xlu0 %v3753_v41 }
 0xa71   : > { %3751 = vmax.xlane.f32.xlu1 %v3750_v43 }
 0xa74   : > { %3757 = vmax.xlane.f32.xlu0 %v3756_v32 }
 0xa82   : > { %5240 = vrot.lane.b32.xlu1 %v8943_v45, %s8129_s8 }
 0xa86   : > { %5249 = vrot.lane.b32.xlu1 %v8943_v45, %s8128_s16 }
 0xa8a   : > { %5229 = vrot.lane.b32.xlu1 %v8949_v49, %s8127_s0  ;;  %5231 = vrot.lane.b32.xlu0 %v8943_v45, %s8127_s0 }
 0xa8e   : > { %5236 = vrot.lane.b32.xlu1 %v8951_v50, %s8129_s8  ;;  %5227 = vrot.lane.b32.xlu0 %v8951_v50, %s8127_s0 }
 0xa92   : > { %5245 = vrot.lane.b32.xlu1 %v8951_v50, %s8128_s16  ;;  %5238 = vrot.lane.b32.xlu0 %v8949_v49, %s8129_s8 }
 0xa96   : > { %5247 = vrot.lane.b32.xlu0 %v8949_v49, %s8128_s16  ;;  %s8136_s16 = smov 120  }
 0xaa7   : > { %v4227_v51 = vpop.permute.xlu1 %4226  ;;  %v4218_v52 = vpop.permute.xlu0 %4217 }
 0xaa8   : > { %v4376_v53 = vcombine.low %v8880_v12, %v4227_v51  ;;  %v4377_v54 = vcombine.high %v8880_v12, %v4227_v51 }
 0xaaa   : > { %v4384_v61 = vrot.slane %v4376_v53, %v8591_v40  ;;  %v4391_v62 = vrot.slane %v4377_v54, %v8591_v40 }
 0xaab   : > { %v4236_v57 = vpop.permute.xlu0 %4235  ;;  %v4223_v58 = vpop.permute.xlu1 %4222 }
 0xaac   : > { %v4392_v59 = vcombine.low %v4218_v52, %v4236_v57  ;;  %v4393_v46 = vcombine.high %v4218_v52, %v4236_v57  ;;  %v4240_v9 = vcombine.low %v8886_v15, %v4223_v58  ;;  %v4241_v10 = vcombine.high %v8886_v15, %v4223_v58 }
 0xaae   : > { %v4400_v63 = vrot.slane %v4392_v59, %v8591_v40  ;;  %v4407_v55 = vrot.slane %v4393_v46, %v8591_v40  ;;  %v4248_v35 = vrot.slane %v4240_v9, %v8591_v40  ;;  %v4255_v41 = vrot.slane %v4241_v10, %v8591_v40 }
 0xaaf   : > { %v4216_v56 = vpop.permute.xlu1 %4215  ;;  %v4214_v44 = vpop.permute.xlu0 %4213 }
 0xab0   : > { %v4408_v1 = vcombine.low %v4384_v61, %v4400_v63  ;;  %v4409_v2 = vcombine.high %v4384_v61, %v4400_v63  ;;  %v4424_v3 = vcombine.low %v4391_v62, %v4407_v55  ;;  %v4425_v4 = vcombine.high %v4391_v62, %v4407_v55 }
 0xab2   : > { %v4416_v5 = vrot.slane %v4408_v1, %v8594_v47  ;;  %v4423_v6 = vrot.slane %v4409_v2, %v8594_v47  ;;  %v4432_v7 = vrot.slane %v4424_v3, %v8594_v47  ;;  %v4439_v8 = vrot.slane %v4425_v4, %v8594_v47 }
 0xab3   : > { %v4234_v11 = vpop.permute.xlu1 %4233  ;;  %v4225_v12 = vpop.permute.xlu0 %4224 }
 0xab4   : > { %v4580_v14 = vcombine.low %v4416_v5, %v4423_v6  ;;  %v6826_v13 = vcombine.high %v4416_v5, %v4423_v6  ;;  %v4596_v16 = vcombine.low %v4432_v7, %v4439_v8  ;;  %v6827_v18 = vcombine.high %v4432_v7, %v4439_v8 }
 0xab5   : > { %v4324_v20 = vcombine.low %v4216_v56, %v4234_v11  ;;  %v4325_v21 = vcombine.high %v4216_v56, %v4234_v11  ;;  %v4308_v60 = vcombine.low %v8892_v17, %v4225_v12  ;;  %v4309_v23 = vcombine.high %v8892_v17, %v4225_v12 }
 0xab6   : > { %v8982_v24 = vrot.slane %v4580_v14, %v8591_v40  ;;  %v8985_v25 = vrot.slane %v6826_v13, %v8591_v40  ;;  %v8988_v15 = vrot.slane %v4596_v16, %v8591_v40  ;;  %v8991_v26 = vrot.slane %v6827_v18, %v8591_v40 }
 0xab7   : > { %v4332_v27 = vrot.slane %v4324_v20, %v8591_v40  ;;  %v4339_v28 = vrot.slane %v4325_v21, %v8591_v40  ;;  %v4316_v29 = vrot.slane %v4308_v60, %v8591_v40  ;;  %v4323_v17 = vrot.slane %v4309_v23, %v8591_v40  ;;  %v4066_v31 = vpop.permute.xlu1 %4065  ;;  %v4232_v33 = vpop.permute.xlu0 %4231 }
 0xab8   : > { %v4612_v51 = vcombine.low %v8982_v24, %v8985_v25  ;;  %v4628_v52 = vcombine.low %v8988_v15, %v8991_v26  ;;  %v4256_v53 = vcombine.low %v4214_v44, %v4232_v33  ;;  %v4257_v54 = vcombine.high %v4214_v44, %v4232_v33 }
 0xab9   : > { %v4340_v43 = vcombine.low %v4316_v29, %v4332_v27  ;;  %v4341_v32 = vcombine.high %v4316_v29, %v4332_v27  ;;  %v4356_v34 = vcombine.low %v4323_v17, %v4339_v28  ;;  %v4357_v48 = vcombine.high %v4323_v17, %v4339_v28 }
 0xaba   : > { %v4264_v62 = vrot.slane %v4256_v53, %v8591_v40  ;;  %v4271_v63 = vrot.slane %v4257_v54, %v8591_v40  ;;  %v4620_v60 = vrot.slane %v4612_v51, %v8594_v47  ;;  %v4636_v23 = vrot.slane %v4628_v52, %v8594_v47 }
 0xabb   : > { %v4348_v57 = vrot.slane %v4340_v43, %v8594_v47  ;;  %v4355_v58 = vrot.slane %v4341_v32, %v8594_v47  ;;  %v4364_v59 = vrot.slane %v4356_v34, %v8594_v47  ;;  %v4371_v46 = vrot.slane %v4357_v48, %v8594_v47  ;;  %v4072_v61 = vpop.permute.xlu1 %4071  ;;  %v4069_v18 = vpop.permute.xlu0 %4068 }
 0xabc   : > { %v4090_v55 = vcombine.low %v4066_v31, %v4072_v61  ;;  %v4091_v56 = vcombine.high %v4066_v31, %v4072_v61  ;;  %v4272_v44 = vcombine.low %v4248_v35, %v4264_v62  ;;  %v4273_v5 = vcombine.high %v4248_v35, %v4264_v62 }
 0xabd   : > { %v4512_v1 = vcombine.low %v4348_v57, %v4355_v58  ;;  %v6824_v2 = vcombine.high %v4348_v57, %v4355_v58  ;;  %v4528_v3 = vcombine.low %v4364_v59, %v4371_v46  ;;  %v6825_v4 = vcombine.high %v4364_v59, %v4371_v46 }
 0xabe   : > { %v4288_v6 = vcombine.low %v4255_v41, %v4271_v63  ;;  %v4289_v7 = vcombine.high %v4255_v41, %v4271_v63  ;;  %v4280_v12 = vrot.slane %v4272_v44, %v8594_v47  ;;  %v4287_v14 = vrot.slane %v4273_v5, %v8594_v47 }
 0xabf   : > { %v9010_v8 = vrot.slane %v4512_v1, %v8591_v40  ;;  %v9013_v9 = vrot.slane %v6824_v2, %v8591_v40  ;;  %v9016_v10 = vrot.slane %v4528_v3, %v8591_v40  ;;  %v9019_v11 = vrot.slane %v6825_v4, %v8591_v40 }
 0xac0   : > { %v4296_v13 = vrot.slane %v4288_v6, %v8594_v47  ;;  %v4303_v16 = vrot.slane %v4289_v7, %v8594_v47  ;;  %v4444_v27 = vcombine.low %v4280_v12, %v4287_v14  ;;  %v6822_v28 = vcombine.high %v4280_v12, %v4287_v14 }
 0xac1   : > { %v4544_v20 = vcombine.low %v9010_v8, %v9013_v9  ;;  %v4560_v21 = vcombine.low %v9016_v10, %v9019_v11  ;;  %v4098_v31 = vrot.slane %v4090_v55, %v8591_v40  ;;  %v4105_v33 = vrot.slane %v4091_v56, %v8591_v40 }
 0xac2   : > { %v4460_v29 = vcombine.low %v4296_v13, %v4303_v16  ;;  %v6823_v17 = vcombine.high %v4296_v13, %v4303_v16  ;;  %v4074_v35 = vcombine.low %v8904_v19, %v4069_v18  ;;  %v4075_v41 = vcombine.high %v8904_v19, %v4069_v18 }
 0xac3   : > { %v9036_v43 = vrot.slane %v4444_v27, %v8591_v40  ;;  %v9039_v32 = vrot.slane %v6822_v28, %v8591_v40  ;;  %v4644_v53 = vcombine.low %v4620_v60, %v4636_v23  ;;  %v4645_v54 = vcombine.high %v4620_v60, %v4636_v23 }
 0xac4   : > { %v9042_v34 = vrot.slane %v4460_v29, %v8591_v40  ;;  %v9045_v48 = vrot.slane %v6823_v17, %v8591_v40  ;;  %v4082_v51 = vrot.slane %v4074_v35, %v8591_v40  ;;  %v4089_v52 = vrot.slane %v4075_v41, %v8591_v40 }
 0xac5   : > { %v4476_v19 = vcombine.low %v9036_v43, %v9039_v32  ;;  %7175 = vmatpush3.xpose.msk.msra.mxu1 %vm2064_vm2, %v4644_v53  ;;  %7184 = vmatpush3.xpose.msk.msra.mxu0 %vm2064_vm2, %v4645_v54  ;;  %v4552_v62 = vrot.slane %v4544_v20, %v8594_v47  ;;  %v4568_v63 = vrot.slane %v4560_v21, %v8594_v47 }
 0xac6   : > { %v4492_v57 = vcombine.low %v9042_v34, %v9045_v48  ;;  %v4106_v58 = vcombine.low %v4082_v51, %v4098_v31  ;;  %v4107_v59 = vcombine.high %v4082_v51, %v4098_v31  ;;  %v4122_v46 = vcombine.low %v4089_v52, %v4105_v33  ;;  %7176 = vmatprep.subr.mxu1 %v8125_v0 }
 0xac7   : > { %v4123_v61 = vcombine.high %v4089_v52, %v4105_v33  ;;  %v4484_v55 = vrot.slane %v4476_v19, %v8594_v47  ;;  %7185 = vmatprep.subr.mxu0 %v8125_v0  ;;  %v4613_v4 = vcombine.high %v8982_v24, %v8985_v25  ;;  %v4576_v44 = vcombine.low %v4552_v62, %v4568_v63 }
 0xac8   : > { %v4114_v56 = vrot.slane %v4106_v58, %v8594_v47  ;;  %v4121_v1 = vrot.slane %v4107_v59, %v8594_v47  ;;  %v4130_v2 = vrot.slane %v4122_v46, %v8594_v47  ;;  %v4577_v5 = vcombine.high %v4552_v62, %v4568_v63  ;;  %v9125_v62 = vpop.permute.xlu1 %5136 }
 0xac9   : > { %v4137_v3 = vrot.slane %v4123_v61, %v8594_v47  ;;  %v4500_v6 = vrot.slane %v4492_v57, %v8594_v47  ;;  %v4629_v16 = vcombine.high %v8988_v15, %v8991_v26  ;;  %7177 = vmatpush3.xpose.msk.msra.mxu1 %vm2064_vm2, %v4576_v44  ;;  %v4545_v15 = vcombine.high %v9010_v8, %v9013_v9  ;;  %v9123_v61 = vpop.permute.xlu0 %5055 }
 0xaca   : > { %v4142_v7 = vcombine.low %v4114_v56, %v4121_v1  ;;  %v6820_v12 = vcombine.high %v4114_v56, %v4121_v1  ;;  %7186 = vmatpush3.xpose.msk.msra.mxu0 %vm2064_vm2, %v4577_v5  ;;  %7178 = vmatprep.subr.mxu1 %v8125_v0  ;;  %v4561_v26 = vcombine.high %v9016_v10, %v9019_v11 }
 0xacb   : > { %v4158_v14 = vcombine.low %v4130_v2, %v4137_v3  ;;  %v6821_v13 = vcombine.high %v4130_v2, %v4137_v3  ;;  %v4508_v18 = vcombine.low %v4484_v55, %v4500_v6  ;;  %v4509_v20 = vcombine.high %v4484_v55, %v4500_v6  ;;  %7187 = vmatprep.subr.mxu0 %v8125_v0 }
 0xacc   : > { %v4149_v21 = vrot.slane %v4142_v7, %v8591_v40  ;;  %v4157_v24 = vrot.slane %v6820_v12, %v8591_v40  ;;  %v4627_v28 = vrot.slane %v4613_v4, %v8594_v47  ;;  %v4643_v29 = vrot.slane %v4629_v16, %v8594_v47 }
 0xacd   : > { %v4165_v25 = vrot.slane %v4158_v14, %v8591_v40  ;;  %v4173_v60 = vrot.slane %v6821_v13, %v8591_v40  ;;  %7179 = vmatpush3.xpose.msk.msra.mxu1 %vm2064_vm2, %v4508_v18  ;;  %v4559_v11 = vrot.slane %v4545_v15, %v8594_v47  ;;  %v4575_v31 = vrot.slane %v4561_v26, %v8594_v47 }
 0xace   : > { %v4174_v23 = vcombine.low %v4149_v21, %v4157_v24  ;;  %7188 = vmatpush3.xpose.msk.msra.mxu0 %vm2064_vm2, %v4509_v20  ;;  %7192 = vmatprep.subr.mxu1 %v8125_v0  ;;  %v4477_v33 = vcombine.high %v9036_v43, %v9039_v32  ;;  %v4493_v35 = vcombine.high %v9042_v34, %v9045_v48 }
 0xacf   : > { %v4190_v27 = vcombine.low %v4165_v25, %v4173_v60  ;;  %7201 = vmatprep.subr.mxu0 %v8125_v0  ;;  %v4646_v41 = vcombine.low %v4627_v28, %v4643_v29  ;;  %v4647_v51 = vcombine.high %v4627_v28, %v4643_v29  ;;  %v4175_v52 = vcombine.high %v4149_v21, %v4157_v24 }
 0xad0   : > { %v4182_v17 = vrot.slane %v4174_v23, %v8594_v47  ;;  %v4191_v53 = vcombine.high %v4165_v25, %v4173_v60  ;;  %v4578_v43 = vcombine.low %v4559_v11, %v4575_v31  ;;  %v4579_v32 = vcombine.high %v4559_v11, %v4575_v31 }
 0xad1   : > { %v4198_v8 = vrot.slane %v4190_v27, %v8594_v47  ;;  %v4491_v34 = vrot.slane %v4477_v33, %v8594_v47  ;;  %v4507_v48 = vrot.slane %v4493_v35, %v8594_v47  ;;  %v4189_v54 = vrot.slane %v4175_v52, %v8594_v47 }
 0xad2   : > { %v4205_v19 = vrot.slane %v4191_v53, %v8594_v47 }
 0xad3   : > { %v4206_v9 = vcombine.low %v4182_v17, %v4198_v8  ;;  %v4207_v10 = vcombine.high %v4182_v17, %v4198_v8  ;;  %v4510_v57 = vcombine.low %v4491_v34, %v4507_v48  ;;  %v4511_v58 = vcombine.high %v4491_v34, %v4507_v48 }
 0xad4   : > { %v4208_v59 = vcombine.low %v4189_v54, %v4205_v19  ;;  %v4209_v46 = vcombine.high %v4189_v54, %v4205_v19 }
 0xad5   : > { %7181 = vmatmul.mubr.msk.f32.vlgmr.msra.gmra.mxu1 %vm2064_vm2, %v4206_v9  ;;  %7190 = vmatmul.mubr.msk.f32.vlgmr.msra.gmra.mxu0 %vm2064_vm2, %v4207_v10 }
 0xad6   : > { %7193 = vmatpush3.xpose.msk.msra.mxu1 %vm2064_vm2, %v4646_v41  ;;  %7202 = vmatpush3.xpose.msk.msra.mxu0 %vm2064_vm2, %v4647_v51 }
 0xad7   : > { %7194 = vmatprep.subr.mxu1 %v8125_v0  ;;  %7203 = vmatprep.subr.mxu0 %v8125_v0 }
 0xad8   : > { %7198 = vmatprep.mubr.msk.f32.mxu1 %vm8126_vm0, %v8125_v0  ;;  %7207 = vmatprep.mubr.msk.f32.mxu0 %vm8126_vm0, %v8125_v0 }
 0xada   : > { %7195 = vmatpush3.xpose.msk.msra.mxu1 %vm2064_vm2, %v4578_v43  ;;  %7204 = vmatpush3.xpose.msk.msra.mxu0 %vm2064_vm2, %v4579_v32 }
 0xadb   : > { %7196 = vmatprep.subr.mxu1 %v8125_v0  ;;  %7205 = vmatprep.subr.mxu0 %v8125_v0 }
 0xade   : > { %7197 = vmatpush3.xpose.msk.msra.mxu1 %vm2064_vm2, %v4510_v57  ;;  %7206 = vmatpush3.xpose.msk.msra.mxu0 %vm2064_vm2, %v4511_v58 }
 0xadf   : > { %7210 = vmatprep.subr.bf16.mxu1 %v8125_v0  ;;  %7226 = vmatprep.subr.bf16.mxu0 %v8125_v0 }
 0xae1   : > { %7199 = vmatmul.mubr.msk.f32.vlgmr.msra.gmra.mxu1 %vm2064_vm2, %v4208_v59  ;;  %7208 = vmatmul.mubr.msk.f32.vlgmr.msra.gmra.mxu0 %vm2064_vm2, %v4209_v46 }
 0xae2   : > { %7214 = vmatprep.mubr.msk.bf16.mxu1 %vm8126_vm0, %v8125_v0  ;;  %7230 = vmatprep.mubr.msk.bf16.mxu0 %vm8126_vm0, %v8125_v0 }
 0xaf5   : > { %v3749_v63 = vpop.xlane.xlu0 %3748 }
 0xaf6   : > { %v3759_v55 = vsub.f32 %v8926_v30, %v3749_v63 }
 0xaf8   : > { %v3763_v56 = vmul.f32 1.442695, %v3759_v55 }
 0xaf9   : > { %v3755_v1 = vpop.xlane.xlu0 %3754 }
 0xafa   : > { %7582 = vpow2.f32 %v3763_v56  ;;  %v3761_v2 = vsub.f32 %v8930_v37, %v3755_v1  ;;  %v3752_v3 = vpop.xlane.xlu1 %3751 }
 0xafb   : > { %v3760_v4 = vsub.f32 %v8932_v39, %v3752_v3 }
 0xafc   : > { %v3767_v44 = vmul.f32 1.442695, %v3761_v2 }
 0xafd   : > { %v3765_v5 = vmul.f32 1.442695, %v3760_v4  ;;  %v3758_v6 = vpop.xlane.xlu0 %3757 }
 0xafe   : > { %7584 = vpow2.f32 %v3767_v44  ;;  %v3762_v7 = vsub.f32 %v8936_v42, %v3758_v6  ;;  %v5241_v12 = vpop.permute.xlu1 %5240 }
 0xaff   : > { %7586 = vpow2.f32 %v3765_v5  ;;  %v5390_v14 = vcombine.low %v8943_v45, %v5241_v12  ;;  %v5391_v30 = vcombine.high %v8943_v45, %v5241_v12 }
 0xb00   : > { %v3769_v13 = vmul.f32 1.442695, %v3762_v7 }
 0xb01   : > { %v5232_v16 = vpop.permute.xlu0 %5231  ;;  %v5398_v37 = vrot.slane %v5390_v14, %v8591_v40  ;;  %v5405_v39 = vrot.slane %v5391_v30, %v8591_v40 }
 0xb02   : > { %7588 = vpow2.f32 %v3769_v13  ;;  %v5250_v18 = vpop.permute.xlu1 %5249 }
 0xb03   : > { %v5406_v20 = vcombine.low %v5232_v16, %v5250_v18  ;;  %v5407_v21 = vcombine.high %v5232_v16, %v5250_v18 }
 0xb05   : > { %v5414_v24 = vrot.slane %v5406_v20, %v8591_v40  ;;  %v5421_v42 = vrot.slane %v5407_v21, %v8591_v40  ;;  %v5228_v25 = vpop.permute.xlu0 %5227 }
 0xb06   : > { %v5230_v60 = vpop.permute.xlu1 %5229 }
 0xb07   : > { %v9137_v15 = vpop.eup %7582  ;;  %v5422_v26 = vcombine.low %v5398_v37, %v5414_v24  ;;  %v5423_v45 = vcombine.high %v5398_v37, %v5414_v24  ;;  %v5438_v23 = vcombine.low %v5405_v39, %v5421_v42  ;;  %v5439_v27 = vcombine.high %v5405_v39, %v5421_v42 }
 0xb08   : > { %v3771_v28 = vsel %vm3746_vm7, %v9137_v15, 0.0 }
 0xb09   : > { %3772 = vadd.xlane.f32.xlu1 %v3771_v28  ;;  %v5430_v29 = vrot.slane %v5422_v26, %v8594_v47  ;;  %v5437_v17 = vrot.slane %v5423_v45, %v8594_v47  ;;  %v5446_v8 = vrot.slane %v5438_v23, %v8594_v47  ;;  %v5453_v9 = vrot.slane %v5439_v27, %v8594_v47  ;;  %v5239_v10 = vpop.permute.xlu0 %5238 }
 0xb0a   : > { %v5237_v11 = vpop.permute.xlu1 %5236  ;;  %v5322_v31 = vcombine.low %v8949_v49, %v5239_v10  ;;  %v5323_v33 = vcombine.high %v8949_v49, %v5239_v10 }
 0xb0b   : > { %v9147_v35 = vpop.eup %7584  ;;  %v5594_v41 = vcombine.low %v5430_v29, %v5437_v17  ;;  %v6849_v51 = vcombine.high %v5430_v29, %v5437_v17  ;;  %v5610_v52 = vcombine.low %v5446_v8, %v5453_v9  ;;  %v6850_v53 = vcombine.high %v5446_v8, %v5453_v9 }
 0xb0c   : > { %v9149_v43 = vpop.eup %7586  ;;  %v3777_v32 = vsel %vm3746_vm7, %v9147_v35, 0.0  ;;  %v5254_v34 = vcombine.low %v8951_v50, %v5237_v11  ;;  %v5255_v48 = vcombine.high %v8951_v50, %v5237_v11  ;;  %v5330_v54 = vrot.slane %v5322_v31, %v8591_v40 }
 0xb0d   : > { %3778 = vadd.xlane.f32.xlu1 %v3777_v32  ;;  %v3774_v49 = vsel %vm3746_vm7, %v9149_v43, 0.0  ;;  %v5601_v19 = vrot.slane %v5594_v41, %v8591_v40  ;;  %v5609_v57 = vrot.slane %v6849_v51, %v8591_v40  ;;  %v5617_v58 = vrot.slane %v5610_v52, %v8591_v40  ;;  %v5248_v59 = vpop.permute.xlu0 %5247 }
 0xb0e   : > { %3775 = vadd.xlane.f32.xlu0 %v3774_v49  ;;  %v5625_v46 = vrot.slane %v6850_v53, %v8591_v40  ;;  %v5262_v63 = vrot.slane %v5254_v34, %v8591_v40  ;;  %v5269_v50 = vrot.slane %v5255_v48, %v8591_v40  ;;  %v5337_v55 = vrot.slane %v5323_v33, %v8591_v40  ;;  %v5246_v56 = vpop.permute.xlu1 %5245 }
 0xb0f   : > { %v9165_v1 = vpop.eup %7588  ;;  %v5270_v2 = vcombine.low %v5228_v25, %v5246_v56  ;;  %v5271_v3 = vcombine.high %v5228_v25, %v5246_v56  ;;  %v5338_v4 = vcombine.low %v5230_v60, %v5248_v59  ;;  %v5339_v44 = vcombine.high %v5230_v60, %v5248_v59 }
 0xb10   : > { %v3780_v5 = vsel %vm3746_vm7, %v9165_v1, 0.0  ;;  %v5626_v6 = vcombine.low %v5601_v19, %v5609_v57  ;;  %v5642_v7 = vcombine.low %v5617_v58, %v5625_v46  ;;  %v5627_v12 = vcombine.high %v5601_v19, %v5609_v57 }
 0xb11   : > { %v5278_v14 = vrot.slane %v5270_v2, %v8591_v40  ;;  %v5285_v30 = vrot.slane %v5271_v3, %v8591_v40  ;;  %v5346_v13 = vrot.slane %v5338_v4, %v8591_v40  ;;  %v5353_v16 = vrot.slane %v5339_v44, %v8591_v40 }
 0xb12   : > { %3781 = vadd.xlane.f32.xlu0 %v3780_v5  ;;  %v5634_v18 = vrot.slane %v5626_v6, %v8594_v47  ;;  %v5650_v37 = vrot.slane %v5642_v7, %v8594_v47  ;;  %v9176_v39 = vrot.slane %v5627_v12, %v8594_v47  ;;  %v5643_v20 = vcombine.high %v5617_v58, %v5625_v46 }
 0xb13   : > { %v5286_v21 = vcombine.low %v5262_v63, %v5278_v14  ;;  %v5287_v24 = vcombine.high %v5262_v63, %v5278_v14  ;;  %v5302_v42 = vcombine.low %v5269_v50, %v5285_v30  ;;  %v5303_v25 = vcombine.high %v5269_v50, %v5285_v30 }
 0xb14   : > { %v5354_v60 = vcombine.low %v5330_v54, %v5346_v13  ;;  %v5355_v26 = vcombine.high %v5330_v54, %v5346_v13  ;;  %v5370_v45 = vcombine.low %v5337_v55, %v5353_v16  ;;  %v5371_v23 = vcombine.high %v5337_v55, %v5353_v16 }
 0xb15   : > { %v5294_v27 = vrot.slane %v5286_v21, %v8594_v47  ;;  %v5301_v28 = vrot.slane %v5287_v24, %v8594_v47  ;;  %v5310_v29 = vrot.slane %v5302_v42, %v8594_v47  ;;  %v5317_v17 = vrot.slane %v5303_v25, %v8594_v47 }
 0xb16   : > { %v5362_v8 = vrot.slane %v5354_v60, %v8594_v47  ;;  %v5369_v9 = vrot.slane %v5355_v26, %v8594_v47  ;;  %v5378_v10 = vrot.slane %v5370_v45, %v8594_v47  ;;  %v5385_v11 = vrot.slane %v5371_v23, %v8594_v47 }
 0xb17   : > { %v5458_v31 = vcombine.low %v5294_v27, %v5301_v28  ;;  %v6845_v33 = vcombine.high %v5294_v27, %v5301_v28  ;;  %v5474_v41 = vcombine.low %v5310_v29, %v5317_v17  ;;  %v6846_v51 = vcombine.high %v5310_v29, %v5317_v17 }
 0xb18   : > { %v5526_v52 = vcombine.low %v5362_v8, %v5369_v9  ;;  %v6847_v53 = vcombine.high %v5362_v8, %v5369_v9  ;;  %v5542_v32 = vcombine.low %v5378_v10, %v5385_v11  ;;  %v6848_v34 = vcombine.high %v5378_v10, %v5385_v11 }
 0xb19   : > { %v5465_v48 = vrot.slane %v5458_v31, %v8591_v40  ;;  %v5473_v54 = vrot.slane %v6845_v33, %v8591_v40  ;;  %v5481_v49 = vrot.slane %v5474_v41, %v8591_v40  ;;  %v5489_v19 = vrot.slane %v6846_v51, %v8591_v40 }
 0xb1a   : > { %v5533_v57 = vrot.slane %v5526_v52, %v8591_v40  ;;  %v5541_v58 = vrot.slane %v6847_v53, %v8591_v40  ;;  %v5549_v59 = vrot.slane %v5542_v32, %v8591_v40  ;;  %v5557_v46 = vrot.slane %v6848_v34, %v8591_v40 }
 0xb1b   : > { %v5658_v63 = vcombine.low %v5634_v18, %v5650_v37  ;;  %v5657_v50 = vrot.slane %v5643_v20, %v8594_v47  ;;  %v5490_v55 = vcombine.low %v5465_v48, %v5473_v54  ;;  %v5506_v56 = vcombine.low %v5481_v49, %v5489_v19 }
 0xb1c   : > { %v5558_v2 = vcombine.low %v5533_v57, %v5541_v58  ;;  %v5574_v3 = vcombine.low %v5549_v59, %v5557_v46  ;;  %v5491_v4 = vcombine.high %v5465_v48, %v5473_v54  ;;  %v5507_v44 = vcombine.high %v5481_v49, %v5489_v19 }
 0xb1d   : > { %v5663_v5 = vpack.c.bf16 %v5658_v63, %v5658_v63  ;;  %v5660_v6 = vcombine.low %v9176_v39, %v5657_v50  ;;  %v5498_v7 = vrot.slane %v5490_v55, %v8594_v47  ;;  %v5514_v12 = vrot.slane %v5506_v56, %v8594_v47 }
 0xb1e   : > { %v5566_v14 = vrot.slane %v5558_v2, %v8594_v47  ;;  %v5582_v30 = vrot.slane %v5574_v3, %v8594_v47  ;;  %v5505_v13 = vrot.slane %v5491_v4, %v8594_v47  ;;  %v5521_v16 = vrot.slane %v5507_v44, %v8594_v47 }
 0xb1f   : > { %v5675_v20 = vsel %vm2589_vm4, %v5663_v5, 0  ;;  %v5667_v21 = vpack.c.bf16 %v5660_v6, %v5660_v6  ;;  %v5522_v24 = vcombine.low %v5498_v7, %v5514_v12  ;;  %v5559_v42 = vcombine.high %v5533_v57, %v5541_v58 }
 0xb20   : > { %7211 = vmatpush3.bf16.msra.mxu1 %v5675_v20  ;;  %v5590_v25 = vcombine.low %v5566_v14, %v5582_v30  ;;  %v5575_v60 = vcombine.high %v5549_v59, %v5557_v46  ;;  %v9203_v26 = vcombine.high %v5634_v18, %v5650_v37  ;;  %v5524_v28 = vcombine.low %v5505_v13, %v5521_v16 }
 0xb21   : > { %v5767_v45 = vsel %vm2589_vm4, %v5667_v21, 0  ;;  %7212 = vmatprep.subr.bf16.mxu1 %v8125_v0  ;;  %v5573_v23 = vrot.slane %v5559_v42, %v8594_v47  ;;  %v5523_v17 = vcombine.high %v5498_v7, %v5514_v12  ;;  %v5591_v8 = vcombine.high %v5566_v14, %v5582_v30 }
 0xb22   : > { %7227 = vmatpush3.bf16.msra.mxu0 %v5767_v45  ;;  %v5662_v27 = vpack.c.bf16 %v5590_v25, %v5522_v24  ;;  %v5589_v29 = vrot.slane %v5575_v60, %v8594_v47  ;;  %v9211_v9 = vcombine.high %v9176_v39, %v5657_v50  ;;  %v5525_v18 = vcombine.high %v5505_v13, %v5521_v16 }
 0xb23   : > { %7228 = vmatprep.subr.bf16.mxu0 %v8125_v0  ;;  %v9214_v11 = vpack.c.bf16 %v5591_v8, %v5523_v17  ;;  %v4991_v51 = vsub.s32 0, %v8588_v36 }
 0xb24   : > { %7213 = vmatpush3.bf16.msra.mxu1 %v5662_v27  ;;  %v5592_v37 = vcombine.low %v5573_v23, %v5589_v29  ;;  %v5593_v10 = vcombine.high %v5573_v23, %v5589_v29 }
 0xb25   : > { %7218 = vmatprep.subr.bf16.mxu1 %v8125_v0  ;;  %v4992_v57 = vrot.slane %v8915_v22, %v4991_v51 }
 0xb26   : > { %v5666_v31 = vpack.c.bf16 %v5592_v37, %v5524_v28  ;;  %v9216_v33 = vpack.c.bf16 %v5593_v10, %v5525_v18 }
 0xb28   : > { %7229 = vmatpush3.bf16.msra.mxu0 %v5666_v31 }
 0xb29   : > { %7242 = vmatprep.subr.bf16.mxu0 %v8125_v0 }
 0xb92   : > { %v3773_v41 = vpop.xlane.xlu1 %3772 }
 0xb93   : > { %7590 = vrcp.f32 %v3773_v41 }
 0xb95   : > { %v4726_v52 = vpop.f32.mrf.mxu1  ;;  %v4808_v39 = vpop.f32.mrf.mxu0 }
 0xb96   : > { %v4976_v53 = vmul.f32 0.25, %v4726_v52  ;;  %v4977_v32 = vmul.f32 0.25, %v4808_v39  ;;  %v9265_v29 = vpop.xlane.xlu1 %3778 }
 0xb97   : > { %v7182_v34 = vpop.f32.mrf.mxu1  ;;  %v7191_v48 = vpop.f32.mrf.mxu0 }
 0xb98   : > { %v5058_v54 = vadd.f32 %v9123_v61, %v4976_v53  ;;  %v5139_v49 = vadd.f32 %v9125_v62, %v4976_v53  ;;  %v3776_v19 = vpop.xlane.xlu0 %3775  ;;  %v5059_v59 = vadd.f32 %v9123_v61, %v4977_v32  ;;  %v5140_v46 = vadd.f32 %v9125_v62, %v4977_v32 }
 0xb99   : > { %7592 = vrcp.f32 %v3776_v19  ;;  %v9229_v55 = vadd.f32 %v4992_v57, %v4976_v53  ;;  %v9231_v56 = vadd.f32 %v4992_v57, %v4977_v32 }
 0xb9a   : > { %v5063_v58 = vsel %vm5062_vm8, %v5058_v54, -inf  ;;  %v5144_v36 = vsel %vm5143_vm9, %v5139_v49, -inf  ;;  %v5066_v63 = vsel %vm5062_vm8, %v5059_v59, -inf  ;;  %v5147_v50 = vsel %vm5143_vm9, %v5140_v46, -inf }
 0xb9b   : > { %5064 = vmax.xlane.f32.xlu1 %v5063_v58  ;;  %5145 = vmax.xlane.f32.xlu0 %v5144_v36  ;;  %v4997_v5 = vsel %vm2387_vm3, %v9229_v55, -inf  ;;  %v5000_v6 = vsel %vm2387_vm3, %v9231_v56, -inf }
 0xb9c   : > { %v9267_v17 = vpop.xlane.xlu0 %3781 }
 0xb9f   : > { %5067 = vmax.xlane.f32.xlu1 %v5066_v63  ;;  %5148 = vmax.xlane.f32.xlu0 %v5147_v50 }
 0xba0   : > { %v7591_v3 = vpop.eup %7590 }
 0xba1   : > { %v4890_v22 = vpop.f32.mrf.mxu1  ;;  %v4972_v2 = vpop.f32.mrf.mxu0  ;;  %v3787_v13 = vmul.f32 %v7591_v3, %v9137_v15 }
 0xba2   : > { %v4978_v4 = vmul.f32 0.25, %v4890_v22  ;;  %v4979_v44 = vmul.f32 0.25, %v4972_v2  ;;  %v8137_v22 = vmov 1  }
 0xba3   : > { %v7200_v7 = vpop.f32.mrf.mxu1  ;;  %v7209_v12 = vpop.f32.mrf.mxu0  ;;  %4998 = vmax.xlane.f32.xlu1 %v4997_v5  ;;  %5001 = vmax.xlane.f32.xlu0 %v5000_v6 }
 0xba4   : > { %v9238_v14 = vadd.f32 %v9123_v61, %v4978_v4  ;;  %v5061_v30 = vadd.f32 %v9123_v61, %v4979_v44  ;;  %v9246_v24 = vadd.f32 %v9125_v62, %v4978_v4  ;;  %v5142_v42 = vadd.f32 %v9125_v62, %v4979_v44  ;;  %7509 = vset.pattern.permute.xlu1 %v8137_v22 }
 0xba5   : > { %v9250_v60 = vadd.f32 %v4992_v57, %v4978_v4  ;;  %v3791_v61 = vsel %vm3746_vm7, %v3787_v13, 0.0  ;;  %v9257_v27 = vadd.f32 %v4992_v57, %v4979_v44 }
 0xba6   : > { %v7593_v16 = vpop.eup %7592  ;;  %v5069_v20 = vsel %vm5062_vm8, %v9238_v14, -inf  ;;  %v5072_v21 = vsel %vm5062_vm8, %v5061_v30, -inf  ;;  %v5150_v45 = vsel %vm5143_vm9, %v9246_v24, -inf  ;;  %v5153_v23 = vsel %vm5143_vm9, %v5142_v42, -inf }
 0xba7   : > { %v3788_v25 = vmul.f32 %v7593_v16, %v9149_v43  ;;  %5070 = vmax.xlane.f32.xlu1 %v5069_v20  ;;  %5073 = vmax.xlane.f32.xlu0 %v5072_v21  ;;  %v5003_v62 = vsel %vm2387_vm3, %v9250_v60, -inf  ;;  %v5006_v43 = vsel %vm2387_vm3, %v9257_v27, -inf }
 0xba9   : > { %v3792_v15 = vsel %vm3746_vm7, %v3788_v25, 0.0 }
 0xbaa   : > { %v9259_v28 = vadd.f32 %v3792_v15, %v3791_v61 }
 0xbab   : > { %5151 = vmax.xlane.f32.xlu1 %v5150_v45  ;;  %5154 = vmax.xlane.f32.xlu0 %v5153_v23 }
 0xbaf   : > { %5004 = vmax.xlane.f32.xlu1 %v5003_v62  ;;  %5007 = vmax.xlane.f32.xlu0 %v5006_v43 }
 0xc24   : > { %v5065_v8 = vpop.xlane.xlu1 %5064  ;;  %v5146_v18 = vpop.xlane.xlu0 %5145 }
 0xc25   : > { %v5075_v37 = vsub.f32 %v5058_v54, %v5065_v8  ;;  %v5156_v10 = vsub.f32 %v5139_v49, %v5146_v18  ;;  %v8138_v18 = vmov 0  }
 0xc26   : > { %7508 = vset.pattern.permute.xlu0 %v8138_v18 }
 0xc27   : > { %v5079_v31 = vmul.f32 1.442695, %v5075_v37  ;;  %v5160_v41 = vmul.f32 1.442695, %v5156_v10 }
 0xc28   : > { %v5068_v51 = vpop.xlane.xlu1 %5067  ;;  %v5149_v52 = vpop.xlane.xlu0 %5148 }
 0xc29   : > { %7594 = vpow2.f32 %v5079_v31  ;;  %v5076_v39 = vsub.f32 %v5059_v59, %v5068_v51  ;;  %v5157_v53 = vsub.f32 %v5140_v46, %v5149_v52 }
 0xc2a   : > { %7596 = vpow2.f32 %v5160_v41 }
 0xc2b   : > { %v5081_v32 = vmul.f32 1.442695, %v5076_v39  ;;  %v5162_v48 = vmul.f32 1.442695, %v5157_v53 }
 0xc2c   : > { %v5002_v34 = vpop.xlane.xlu0 %5001  ;;  %v4999_v46 = vpop.xlane.xlu1 %4998 }
 0xc2d   : > { %7598 = vpow2.f32 %v5081_v32  ;;  %v5009_v3 = vsub.f32 %v9229_v55, %v4999_v46  ;;  %v5010_v44 = vsub.f32 %v9231_v56, %v5002_v34 }
 0xc2e   : > { %7600 = vpow2.f32 %v5162_v48 }
 0xc2f   : > { %v5013_v4 = vmul.f32 1.442695, %v5009_v3  ;;  %v5015_v7 = vmul.f32 1.442695, %v5010_v44 }
 0xc30   : > { %v5074_v19 = vpop.xlane.xlu0 %5073  ;;  %v5071_v6 = vpop.xlane.xlu1 %5070 }
 0xc31   : > { %v5078_v57 = vsub.f32 %v5061_v30, %v5074_v19  ;;  %v5077_v25 = vsub.f32 %v9238_v14, %v5071_v6 }
 0xc33   : > { %v5085_v58 = vmul.f32 1.442695, %v5078_v57  ;;  %v5083_v61 = vmul.f32 1.442695, %v5077_v25 }
 0xc34   : > { %v5155_v36 = vpop.xlane.xlu0 %5154  ;;  %v5152_v55 = vpop.xlane.xlu1 %5151 }
 0xc35   : > { %v5159_v63 = vsub.f32 %v5142_v42, %v5155_v36  ;;  %7602 = vpow2.f32 %v5085_v58  ;;  %v5158_v15 = vsub.f32 %v9246_v24, %v5152_v55 }
 0xc36   : > { %v9269_v54 = vpop.eup %7594 }
 0xc37   : > { %v9271_v49 = vpop.eup %7596  ;;  %v5166_v50 = vmul.f32 1.442695, %v5159_v63  ;;  %5091 = vrot.lane.b32.xlu1 %v9269_v54, %s8136_s16  ;;  %v5164_v45 = vmul.f32 1.442695, %v5158_v15 }
 0xc38   : > { %5172 = vrot.lane.b32.xlu0 %v9271_v49, %s8127_s0  ;;  %v5005_v30 = vpop.xlane.xlu1 %5004  ;;  %v5008_v24 = vpop.xlane.xlu0 %5007 }
 0xc39   : > { %7604 = vpow2.f32 %v5166_v50  ;;  %v5011_v56 = vsub.f32 %v9250_v60, %v5005_v30  ;;  %v5012_v43 = vsub.f32 %v9257_v27, %v5008_v24 }
 0xc3a   : > { %v9277_v59 = vpop.eup %7598  ;;  %7606 = vpow2.f32 %v5013_v4 }
 0xc3b   : > { %5093 = vrot.lane.b32.xlu1 %v9277_v59, %s8136_s16  ;;  %v9281_v2 = vpop.eup %7600  ;;  %7608 = vpow2.f32 %v5015_v7  ;;  %v5017_v21 = vmul.f32 1.442695, %v5011_v56  ;;  %v5019_v8 = vmul.f32 1.442695, %v5012_v43 }
 0xc3d   : > { %7610 = vpow2.f32 %v5017_v21 }
 0xc3e   : > { %7612 = vpow2.f32 %v5083_v61 }
 0xc3f   : > { %5174 = vrot.lane.b32.xlu1 %v9281_v2, %s8127_s0  ;;  %7614 = vpow2.f32 %v5164_v45 }
 0xc40   : > { %7616 = vpow2.f32 %v5019_v8 }
 0xc41   : > { %7618 = vrcp.f32 %v9265_v29 }
 0xc42   : > { %v9287_v5 = vpop.eup %7602  ;;  %7620 = vrcp.f32 %v9267_v17 }
 0xc43   : > { %5097 = vrot.lane.b32.xlu1 %v9287_v5, %s8136_s16 }
 0xc46   : > { %v9291_v12 = vpop.eup %7604 }
 0xc47   : > { %5178 = vrot.lane.b32.xlu1 %v9291_v12, %s8127_s0  ;;  %v9295_v13 = vpop.eup %7606 }
 0xc48   : > { %v5021_v16 = vsel %vm2387_vm3, %v9295_v13, 0.0  ;;  %v9300_v20 = vpop.eup %7608 }
 0xc49   : > { %v5024_v42 = vsel %vm2387_vm3, %v9300_v20, 0.0 }
 0xc4a   : > { %v9306_v60 = vpop.eup %7610 }
 0xc4b   : > { %v5027_v23 = vsel %vm2387_vm3, %v9306_v60, 0.0  ;;  %v9310_v62 = vpop.eup %7612 }
 0xc4c   : > { %v9314_v14 = vpop.eup %7614 }
 0xc4d   : > { %v9319_v37 = vpop.eup %7616 }
 0xc4e   : > { %v5030_v10 = vsel %vm2387_vm3, %v9319_v37, 0.0  ;;  %v7619_v29 = vpop.eup %7618 }
 0xc4f   : > { %v7621_v17 = vpop.eup %7620  ;;  %v3789_v34 = vmul.f32 %v7619_v29, %v9147_v35  ;;  %v8139_v35 = vmov 2  }
 0xc50   : > { %v3790_v57 = vmul.f32 %v7621_v17, %v9165_v1 }
 0xc51   : > { %v3794_v58 = vsel %vm3746_vm7, %v3789_v34, 0.0 }
 0xc52   : > { %v3795_v36 = vadd.f32 %v3794_v58, %v9259_v28  ;;  %v3796_v63 = vsel %vm3746_vm7, %v3790_v57, 0.0 }
 0xc54   : > { %v3797_v50 = vadd.f32 %v3796_v63, %v3795_v36 }
 0xc56   : > { %v3799_v46 = vmul.f32 0.25, %v3797_v50 }
 0xc57   : > { %5022 = vadd.xlane.f32.xlu0 %v5021_v16 }
 0xc5b   : > { %5025 = vadd.xlane.f32.xlu0 %v5024_v42 }
 0xc6b   : > { %5028 = vadd.xlane.f32.xlu1 %v5027_v23 }
 0xc71   : > { %5095 = vrot.lane.b32.xlu0 %v9310_v62, %s8136_s16 }
 0xc75   : > { %5176 = vrot.lane.b32.xlu0 %v9314_v14, %s8127_s0  ;;  %s9540_s0 = sld [smem:[#allocation39_spill]] }
 0xc7b   : > { %s1515_s8 = scalar_lea.vmem %s9540_s0, %s9553_s22  ;;  %s9541_s22 = sld [smem:[#allocation53_spill]] }
 0xc7c   : > { %v6844_v22 = vld [vmem:[%s1515_s8] ss:$0 sm:$0xff] }
 0xc7d   : > { %v9337_v3 = vmul.f32 %v6844_v22, %v3799_v46 }
 0xc94   : > { %5031 = vadd.xlane.f32.xlu0 %v5030_v10 }
 0xca9   : > { %v5092_v31 = vpop.permute.xlu1 %5091 }
 0xcaa   : > { %v5173_v41 = vpop.permute.xlu0 %5172  ;;  %v5103_v51 = vsel %vm2387_vm3, %v5092_v31, 0.0 }
 0xcab   : > { %5104 = vadd.xlane.f32.xlu1 %v5103_v51  ;;  %v5184_v27 = vsel %vm2387_vm3, %v5173_v41, 0.0 }
 0xcac   : > { %5185 = vadd.xlane.f32.xlu0 %v5184_v27 }
 0xcad   : > { %v5094_v52 = vpop.permute.xlu1 %5093 }
 0xcae   : > { %v5106_v39 = vsel %vm2387_vm3, %v5094_v52, 0.0 }
 0xcaf   : > { %5107 = vadd.xlane.f32.xlu1 %v5106_v39 }
 0xcb1   : > { %v5175_v53 = vpop.permute.xlu1 %5174 }
 0xcb2   : > { %v5187_v32 = vsel %vm2387_vm3, %v5175_v53, 0.0 }
 0xcb3   : > { %5188 = vadd.xlane.f32.xlu0 %v5187_v32 }
 0xcb5   : > { %v5098_v48 = vpop.permute.xlu1 %5097 }
 0xcb6   : > { %v5112_v19 = vsel %vm2387_vm3, %v5098_v48, 0.0 }
 0xcb7   : > { %5113 = vadd.xlane.f32.xlu1 %v5112_v19 }
 0xcb9   : > { %v5179_v1 = vpop.permute.xlu1 %5178 }
 0xcba   : > { %v5193_v55 = vsel %vm2387_vm3, %v5179_v1, 0.0 }
 0xcc8   : > { %5124 = vperm.xlu1 %7509, %v9337_v3  }
 0xccc   : > { %7510 = vset.pattern.permute.xlu1 %v8139_v35 }
 0xce0   : > { %v5023_v4 = vpop.xlane.xlu0 %5022 }
 0xce4   : > { %v5026_v44 = vpop.xlane.xlu0 %5025 }
 0xce8   : > { %v5096_v6 = vpop.permute.xlu0 %5095 }
 0xce9   : > { %v5109_v7 = vsel %vm2387_vm3, %v5096_v6, 0.0 }
 0xcea   : > { %5110 = vadd.xlane.f32.xlu0 %v5109_v7 }
 0xcec   : > { %v5177_v28 = vpop.permute.xlu0 %5176  ;;  %5194 = vadd.xlane.f32.xlu1 %v5193_v55 }
 0xced   : > { %v5190_v30 = vsel %vm2387_vm3, %v5177_v28, 0.0 }
 0xcee   : > { %5191 = vadd.xlane.f32.xlu0 %v5190_v30 }
 0xcf4   : > { %v5029_v56 = vpop.xlane.xlu1 %5028 }
 0xcfd   : > { %5205 = vperm.xlu1 %7510, %v9337_v3  }
 0xd04   : > { %5043 = vperm.xlu0 %7508, %v9337_v3  }
 0xd08   : > { %7511 = vset.pattern.permute.xlu0 %v8139_v35 }
 0xd1d   : > { %v5032_v21 = vpop.xlane.xlu0 %5031 }
 0xd34   : > { %v5105_v16 = vpop.xlane.xlu1 %5104 }
 0xd35   : > { %v5186_v25 = vpop.xlane.xlu0 %5185  ;;  %7622 = vrcp.f32 %v5105_v16 }
 0xd36   : > { %7624 = vrcp.f32 %v5023_v4 }
 0xd37   : > { %7626 = vrcp.f32 %v5026_v44 }
 0xd38   : > { %v5108_v42 = vpop.xlane.xlu1 %5107  ;;  %7628 = vrcp.f32 %v5186_v25 }
 0xd39   : > { %7630 = vrcp.f32 %v5108_v42 }
 0xd3a   : > { %7632 = vrcp.f32 %v5029_v56 }
 0xd3c   : > { %v5189_v15 = vpop.xlane.xlu0 %5188 }
 0xd40   : > { %v5114_v61 = vpop.xlane.xlu1 %5113 }
 0xd42   : > { %v7623_v8 = vpop.eup %7622 }
 0xd43   : > { %v7625_v18 = vpop.eup %7624  ;;  %v5119_v41 = vmul.f32 %v7623_v8, %v9269_v54 }
 0xd44   : > { %v9345_v45 = vpop.permute.xlu1 %5124  ;;  %v7627_v10 = vpop.eup %7626  ;;  %v5037_v52 = vmul.f32 %v7625_v18, %v9295_v13 }
 0xd45   : > { %v7629_v31 = vpop.eup %7628  ;;  %v5127_v17 = vmul.f32 %v9345_v45, %v5119_v41  ;;  %v5038_v34 = vmul.f32 %v7627_v10, %v9300_v20 }
 0xd46   : > { %v7631_v51 = vpop.eup %7630  ;;  %v5200_v39 = vmul.f32 %v7629_v31, %v9271_v49  ;;  %v5665_v49 = vpack.c.bf16 %v9203_v26, %v9203_v26 }
 0xd47   : > { %v7633_v32 = vpop.eup %7632  ;;  %v5120_v29 = vmul.f32 %v7631_v51, %v9277_v59 }
 0xd48   : > { %v5039_v35 = vmul.f32 %v7633_v32, %v9306_v60  ;;  %v5721_v26 = vsel %vm2589_vm4, %v5665_v49, 0 }
 0xd49   : > { %v5128_v50 = vmul.f32 %v9345_v45, %v5120_v29 }
 0xd73   : > { %v5111_v23 = vpop.xlane.xlu0 %5110 }
 0xd74   : > { %7634 = vrcp.f32 %v5111_v23 }
 0xd75   : > { %7636 = vrcp.f32 %v5189_v15  ;;  %v5195_v24 = vpop.xlane.xlu1 %5194 }
 0xd76   : > { %7638 = vrcp.f32 %v5032_v21  ;;  %v5669_v21 = vpack.c.bf16 %v9211_v9, %v9211_v9 }
 0xd77   : > { %v5192_v43 = vpop.xlane.xlu0 %5191 }
 0xd78   : > { %7640 = vrcp.f32 %v5192_v43 }
 0xd79   : > { %7642 = vrcp.f32 %v5195_v24  ;;  %v5206_v27 = vpop.permute.xlu1 %5205 }
 0xd7a   : > { %7644 = vrcp.f32 %v5114_v61  ;;  %v5208_v57 = vmul.f32 %v5206_v27, %v5200_v39 }
 0xd7f   : > { %v5044_v53 = vpop.permute.xlu0 %5043 }
 0xd80   : > { %v5046_v48 = vmul.f32 %v5044_v53, %v5037_v52  ;;  %v5047_v36 = vmul.f32 %v5044_v53, %v5038_v34  ;;  %v5048_v28 = vmul.f32 %v5044_v53, %v5039_v35 }
 0xd81   : > { %v7635_v19 = vpop.eup %7634 }
 0xd82   : > { %v7637_v58 = vpop.eup %7636  ;;  %v5121_v54 = vmul.f32 %v7635_v19, %v9310_v62  ;;  %v5212_v63 = vsel %vm2387_vm3, %v5046_v48, %v5127_v17  ;;  %v5213_v6 = vsel %vm2387_vm3, %v5047_v36, %v5128_v50  ;;  %v7549_v50 = vld [vmem:[#allocation12 + $0x10] sm:$0xff]  }
 0xd83   : > { %v5216_v13 = vsel %vm2064_vm2, %v5212_v63, %v5208_v57  ;;  %v7639_v59 = vpop.eup %7638  ;;  %v5201_v22 = vmul.f32 %v7637_v58, %v9281_v2 }
 0xd84   : > { %v5220_v46 = vpack.c.bf16 %v5216_v13, %v5216_v13  ;;  %v5129_v62 = vmul.f32 %v9345_v45, %v5121_v54  ;;  %v5040_v56 = vmul.f32 %v7639_v59, %v9319_v37 }
 0xd85   : > { %v7641_v20 = vpop.eup %7640  ;;  %v5209_v7 = vmul.f32 %v5206_v27, %v5201_v22 }
 0xd86   : > { %v7643_v4 = vpop.eup %7642  ;;  %v5202_v44 = vmul.f32 %v7641_v20, %v9314_v14  ;;  %7215 = vmatmul.mubr.msk.bf16.vlgmr.msra.gmra.mxu1 %vm5670_vm10, %v5220_v46  ;;  %v5214_v14 = vsel %vm2387_vm3, %v5048_v28, %v5129_v62  ;;  %v5049_v25 = vmul.f32 %v5044_v53, %v5040_v56 }
 0xd87   : > { %v7645_v1 = vpop.eup %7644  ;;  %7219 = vmatpush3.bf16.msra.mxu1 %v5721_v26  ;;  %7222 = vmatprep.mubr.msk.bf16.mxu1 %vm8126_vm0, %v8125_v0  ;;  %v5203_v60 = vmul.f32 %v7643_v4, %v9291_v12  ;;  %v5217_v55 = vsel %vm2064_vm2, %v5213_v6, %v5209_v7  ;;  %v7550_v26 = vld [vmem:[#allocation12 + $0x8] sm:$0xff]  }
 0xd88   : > { %v5210_v2 = vmul.f32 %v5206_v27, %v5202_v44  ;;  %7220 = vmatprep.subr.bf16.mxu1 %v8125_v0  ;;  %v5122_v30 = vmul.f32 %v7645_v1, %v9287_v5  ;;  %v5221_v12 = vpack.c.bf16 %v5217_v55, %v5217_v55  ;;  %v5813_v5 = vsel %vm2589_vm4, %v5669_v21, 0  ;;  %v7551_v21 = vld [vmem:[#allocation12] sm:$0xff]  }
 0xd89   : > { %v5211_v61 = vmul.f32 %v5206_v27, %v5203_v60 }
 0xd8a   : > { %v5218_v16 = vsel %vm2064_vm2, %v5214_v14, %v5210_v2  ;;  %v5130_v15 = vmul.f32 %v9345_v45, %v5122_v30  ;;  %v7548_v45 = vld [vmem:[#allocation12 + $0x18] sm:$0xff]  }
 0xd8b   : > { %7221 = vmatpush3.bf16.msra.mxu1 %v9214_v11  ;;  %v5222_v42 = vpack.c.bf16 %v5218_v16, %v5218_v16 }
 0xd8c   : > { %7234 = vmatprep.subr.bf16.mxu1 %v8125_v0  ;;  %v5215_v9 = vsel %vm2387_vm3, %v5049_v25, %v5130_v15 }
 0xd8d   : > { %7231 = vmatmul.mubr.msk.bf16.vlgmr.msra.gmra.mxu0 %vm5670_vm10, %v5222_v42  ;;  %v5219_v11 = vsel %vm2064_vm2, %v5215_v9, %v5211_v61 }
 0xd8e   : > { %7223 = vmatmul.mubr.msk.bf16.vlgmr.msra.gmra.mxu1 %vm5670_vm10, %v5221_v12  ;;  %7250 = vmatprep.mubr.msk.bf16.mxu0 %vm8126_vm0, %v8125_v0  ;;  %v5223_v37 = vpack.c.bf16 %v5219_v11, %v5219_v11 }
 0xd8f   : > { %7235 = vmatpush3.bf16.msra.mxu1 %v5813_v5  ;;  %7238 = vmatprep.mubr.msk.bf16.mxu1 %vm8126_vm0, %v8125_v0  ;;  %v6006_v5 = vsel %vm3746_vm7, %v9337_v3, 0.0 }
 0xd90   : > { %7236 = vmatprep.subr.bf16.mxu1 %v8125_v0  ;;  %7243 = vmatpush3.bf16.msra.mxu0 %v7548_v45 }
 0xd91   : > { %7244 = vmatprep.subr.bf16.mxu0 %v8125_v0 }
 0xd93   : > { %7237 = vmatpush3.bf16.msra.mxu1 %v9216_v33 }
 0xd94   : > { %7254 = vmatprep.subr.bf16.mxu1 %v8125_v0  ;;  %7245 = vmatpush3.bf16.msra.mxu0 %v7549_v50 }
 0xd95   : > { %7246 = vmatprep.subr.bf16.mxu0 %v8125_v0 }
 0xd96   : > { %7239 = vmatmul.mubr.msk.bf16.vlgmr.msra.gmra.mxu1 %vm5670_vm10, %v5223_v37 }
 0xd97   : > { %7262 = vmatprep.mubr.msk.bf16.mxu1 %vm8126_vm0, %v8125_v0 }
 0xd98   : > { %7247 = vmatpush3.bf16.msra.mxu0 %v7550_v26  ;;  %v6865_v26 = vld [vmem:[#allocation18] ss:$0 sm:$0xff] }
 0xd99   : > { %7248 = vmatprep.subr.bf16.mxu0 %v8125_v0 }
 0xd9c   : > { %7249 = vmatpush3.bf16.msra.mxu0 %v7551_v21 }
 0xd9d   : > { %7266 = vmatprep.subr.bf16.mxu0 %v8125_v0 }
 0xe46   : > { %v5711_v23 = vpop.f32.mrf.mxu1 }
 0xe48   : > { %v7216_v24 = vpop.f32.mrf.mxu1 }
 0xe4a   : > { %v5714_v43 = vpop.f32.mrf.mxu1 }
 0xe4b   : > { %v6857_v43 = vld [vmem:[%s9541_s22] ss:$0 sm:$0xff] }
 0xe4c   : > { %v7217_v8 = vpop.f32.mrf.mxu1 }
 0xe4d   : > { %v5803_v18 = vpop.f32.mrf.mxu0 }
 0xe4e   : > { %v5757_v10 = vpop.f32.mrf.mxu1  ;;  %v5855_v39 = vcombine.low %v5711_v23, %v5803_v18  ;;  %v5856_v53 = vcombine.high %v5711_v23, %v5803_v18 }
 0xe4f   : > { %v7232_v31 = vpop.f32.mrf.mxu0 }
 0xe50   : > { %v7224_v33 = vpop.f32.mrf.mxu1  ;;  %v5863_v48 = vrot.slane %v5855_v39, %v8591_v40  ;;  %v5870_v19 = vrot.slane %v5856_v53, %v8591_v40 }
 0xe51   : > { %v5806_v41 = vpop.f32.mrf.mxu0 }
 0xe52   : > { %v5760_v51 = vpop.f32.mrf.mxu1 }
 0xe53   : > { %v7233_v27 = vpop.f32.mrf.mxu0 }
 0xe54   : > { %v7225_v52 = vpop.f32.mrf.mxu1 }
 0xe56   : > { %v5849_v32 = vpop.f32.mrf.mxu1 }
 0xe57   : > { %v5871_v29 = vcombine.low %v5757_v10, %v5849_v32  ;;  %v5872_v17 = vcombine.high %v5757_v10, %v5849_v32 }
 0xe58   : > { %v7240_v34 = vpop.f32.mrf.mxu1 }
 0xe59   : > { %v5879_v57 = vrot.slane %v5871_v29, %v8591_v40  ;;  %v5886_v58 = vrot.slane %v5872_v17, %v8591_v40  ;;  %v7552_v17 = vld [vmem:[#allocation16 + $0x18] sm:$0xff]   ;;  %v7553_v34 = vld [vmem:[#allocation16 + $0x10] sm:$0xff]  }
 0xe5a   : > { %v5852_v54 = vpop.f32.mrf.mxu1  ;;  %7255 = vmatpush3.bf16.msra.mxu1 %v7552_v17 }
 0xe5b   : > { %v5887_v36 = vcombine.low %v5863_v48, %v5879_v57  ;;  %v5888_v63 = vcombine.high %v5863_v48, %v5879_v57  ;;  %v5903_v49 = vcombine.low %v5870_v19, %v5886_v58  ;;  %v5904_v13 = vcombine.high %v5870_v19, %v5886_v58  ;;  %7256 = vmatprep.subr.bf16.mxu1 %v8125_v0  ;;  %v7555_v19 = vld [vmem:[#allocation16] sm:$0xff]  }
 0xe5c   : > { %v7241_v59 = vpop.f32.mrf.mxu1 }
 0xe5d   : > { %v5895_v46 = vrot.slane %v5887_v36, %v8594_v47  ;;  %v5902_v20 = vrot.slane %v5888_v63, %v8594_v47  ;;  %v5911_v22 = vrot.slane %v5903_v49, %v8594_v47  ;;  %v5918_v35 = vrot.slane %v5904_v13, %v8594_v47 }
 0xe5e   : > { %7257 = vmatpush3.bf16.msra.mxu1 %v7553_v34 }
 0xe5f   : > { %v5923_v62 = vcombine.low %v5895_v46, %v5902_v20  ;;  %v6855_v4 = vcombine.high %v5895_v46, %v5902_v20  ;;  %v5939_v44 = vcombine.low %v5911_v22, %v5918_v35  ;;  %v6856_v6 = vcombine.high %v5911_v22, %v5918_v35  ;;  %7258 = vmatprep.subr.bf16.mxu1 %v8125_v0  ;;  %v6863_v46 = vld [vmem:[#allocation13] ss:$0 sm:$0xff]  ;;  %v6864_v22 = vld [vmem:[#allocation15] ss:$0 sm:$0xff] }
 0xe61   : > { %v5930_v1 = vrot.slane %v5923_v62, %v8591_v40  ;;  %v5938_v7 = vrot.slane %v6855_v4, %v8591_v40  ;;  %v5946_v28 = vrot.slane %v5939_v44, %v8591_v40  ;;  %v5954_v2 = vrot.slane %v6856_v6, %v8591_v40 }
 0xe63   : > { %v5955_v60 = vcombine.low %v5930_v1, %v5938_v7  ;;  %v5971_v14 = vcombine.low %v5946_v28, %v5954_v2  ;;  %v5956_v55 = vcombine.high %v5930_v1, %v5938_v7  ;;  %v5972_v30 = vcombine.high %v5946_v28, %v5954_v2 }
 0xe65   : > { %v5963_v56 = vrot.slane %v5955_v60, %v8594_v47  ;;  %v5979_v16 = vrot.slane %v5971_v14, %v8594_v47  ;;  %v5970_v25 = vrot.slane %v5956_v55, %v8594_v47  ;;  %v5986_v12 = vrot.slane %v5972_v30, %v8594_v47  ;;  %v6871_v30 = vld [vmem:[#allocation19] ss:$0 sm:$0xff] }
 0xe67   : > { %v5988_v42 = vcombine.high %v5963_v56, %v5979_v16  ;;  %v5987_v61 = vcombine.low %v5963_v56, %v5979_v16  ;;  %v5989_v40 = vcombine.low %v5970_v25, %v5986_v12  ;;  %v5990_v15 = vcombine.high %v5970_v25, %v5986_v12 }
 0xe69   : > { %5992 = vrot.lane.b32.xlu1 %v5988_v42, %s9538_s15  ;;  %s9544_s15 = sld [smem:[#allocation56_spill]] }
 0xe6d   : > { %5996 = vrot.lane.b32.xlu1 %v5989_v40, %s9542_s10 }
 0xe6f   : > { %v7556_v48 = vld [vmem:[%s9544_s15 + $0x38] sm:$0xff]   ;;  %v7557_v57 = vld [vmem:[%s9544_s15 + $0x30] sm:$0xff]   ;;  %v7558_v58 = vld [vmem:[%s9544_s15 + $0x28] sm:$0xff]  }
 0xe70   : > { %v7559_v54 = vld [vmem:[%s9544_s15 + $0x20] sm:$0xff]   ;;  %v7560_v36 = vld [vmem:[%s9544_s15 + $0x18] sm:$0xff]   ;;  %v7561_v63 = vld [vmem:[%s9544_s15 + $0x10] sm:$0xff]  }
 0xe71   : > { %6000 = vrot.lane.b32.xlu1 %v5990_v15, %s9543_s18  ;;  %v7562_v44 = vld [vmem:[%s9544_s15 + $0x8] sm:$0xff]   ;;  %v7563_v6 = vld [vmem:[%s9544_s15] sm:$0xff]  }
 0xe95   : > { %6007 = vadd.xlane.f32.xlu1 %v6006_v5 }
 0xedb   : > { %v5993_v9 = vpop.permute.xlu1 %5992 }
 0xedc   : > { %v6003_v47 = vsel %vm2064_vm2, %v5987_v61, %v5993_v9 }
 0xedf   : > { %v5997_v11 = vpop.permute.xlu1 %5996 }
 0xee0   : > { %v6004_v37 = vsel %vm2920_vm5, %v6003_v47, %v5997_v11 }
 0xee3   : > { %v6001_v45 = vpop.permute.xlu1 %6000 }
 0xee4   : > { %v6005_v23 = vsel %vm2922_vm6, %v6004_v37, %v6001_v45 }
 0xee5   : > { %v6009_v24 = vpack.c.bf16 %v6005_v23, %v6005_v23  ;;  %v6880_v23 = vld [vmem:[#allocation21] ss:$0 sm:$0xff] }
 0xee7   : > { %7251 = vmatmul.mubr.msk.bf16.vlgmr.msra.gmra.mxu0 %vm1567_vm1, %v6009_v24 }
 0xee8   : > { %7282 = vmatprep.mubr.msk.bf16.mxu0 %vm8126_vm0, %v8125_v0  ;;  %7267 = vmatpush3.bf16.msra.mxu0 %v7556_v48 }
 0xee9   : > { %7268 = vmatprep.subr.bf16.mxu0 %v8125_v0 }
 0xeec   : > { %7269 = vmatpush3.bf16.msra.mxu0 %v7557_v57 }
 0xeed   : > { %7270 = vmatprep.subr.bf16.mxu0 %v8125_v0 }
 0xef0   : > { %7271 = vmatpush3.bf16.msra.mxu0 %v7558_v58 }
 0xef1   : > { %7272 = vmatprep.subr.bf16.mxu0 %v8125_v0 }
 0xef4   : > { %7273 = vmatpush3.bf16.msra.mxu0 %v7559_v54 }
 0xef5   : > { %7274 = vmatprep.subr.bf16.mxu0 %v8125_v0 }
 0xef8   : > { %7275 = vmatpush3.bf16.msra.mxu0 %v7560_v36 }
 0xef9   : > { %7276 = vmatprep.subr.bf16.mxu0 %v8125_v0 }
 0xefc   : > { %7277 = vmatpush3.bf16.msra.mxu0 %v7561_v63 }
 0xefd   : > { %7278 = vmatprep.subr.bf16.mxu0 %v8125_v0 }
 0xf00   : > { %7279 = vmatpush3.bf16.msra.mxu0 %v7562_v44 }
 0xf01   : > { %7280 = vmatprep.subr.bf16.mxu0 %v8125_v0 }
 0xf04   : > { %7281 = vmatpush3.bf16.msra.mxu0 %v7563_v6 }
 0xf1e   : > { %v6008_v8 = vpop.xlane.xlu1 %6007 }
 0xf1f   : > { %v6025_v18 = vmul.f32 %v6857_v43, %v6008_v8  ;;  %v6881_v43 = vld [vmem:[#allocation22] ss:$0 sm:$0xff] }
 0xfa7   : > { %v6087_v3 = vpop.f32.mrf.mxu0 }
 0xfa8   : > { %v6088_v10 = vadd.f32 %v6087_v3, %v6025_v18 }
 0xfa9   : > { %v7252_v31 = vpop.f32.mrf.mxu0 }
 0xfaa   : > { %v6095_v33 = vadd.f32 %v6088_v10, %v8783_v38  ;;  %v7554_v38 = vld [vmem:[#allocation16 + $0x8] sm:$0xff]  }
 0xfab   : > { %v6090_v41 = vpop.f32.mrf.mxu0  ;;  %7259 = vmatpush3.bf16.msra.mxu1 %v7554_v38 }
 0xfac   : > { %v6096_v51 = vsel %vm1567_vm1, %v6095_v33, 0.0  ;;  %7260 = vmatprep.subr.bf16.mxu1 %v8125_v0 }
 0xfad   : > { %6097 = vadd.xlane.f32.xlu0 %v6096_v51  ;;  %v7253_v27 = vpop.f32.mrf.mxu0 }
 0xfaf   : > { %7261 = vmatpush3.bf16.msra.mxu1 %v7555_v19 }
0x1036   : > { %v6098_v52 = vpop.xlane.xlu0 %6097 }
0x1037   : > { %v6099_v39 = vmul.f32 0.015625, %v6098_v52 }
0x1039   : > { %v6100_v53 = vsub.f32 %v6095_v33, %v6099_v39 }
0x103b   : > { %v6101_v32 = vmul.f32 %v6100_v53, %v6100_v53 }
0x103d   : > { %v6102_v29 = vsel %vm1567_vm1, %v6101_v32, 0.0 }
0x103e   : > { %6103 = vadd.xlane.f32.xlu1 %v6102_v29 }
0x10c7   : > { %v6104_v49 = vpop.xlane.xlu1 %6103 }
0x10c8   : > { %v6105_v13 = vmul.f32 0.015625, %v6104_v49 }
0x10ca   : > { %v6106_v59 = vadd.f32 1e-05, %v6105_v13 }
0x10cc   : > { %7646 = vrsqrt.f32 %v6106_v59 }
0x10d9   : > { %v7647_v50 = vpop.eup %7646 }
0x10da   : > { %v6108_v20 = vmul.f32 %v7647_v50, %v6100_v53 }
0x10dc   : > { %v6115_v35 = vmul.f32 %v6863_v46, %v6108_v20 }
0x10de   : > { %v6122_v62 = vadd.f32 %v6864_v22, %v6115_v35 }
0x10e0   : > { %v6123_v4 = vpack.c.bf16 %v6122_v62, %v6122_v62 }
0x10e2   : > { %7263 = vmatmul.mubr.msk.bf16.vlgmr.msra.gmra.mxu1 %vm1567_vm1, %v6123_v4 }
0x11a2   : > { %v6200_v1 = vpop.f32.mrf.mxu1 }
0x11a3   : > { %v6201_v7 = vadd.f32 %v6865_v26, %v6200_v1 }
0x11a4   : > { %v7264_v28 = vpop.f32.mrf.mxu1 }
0x11a5   : > { %v6206_v2 = vmax.f32 %v6201_v7, 0.0 }
0x11a6   : > { %v6203_v60 = vpop.f32.mrf.mxu1 }
0x11a7   : > { %v6207_v14 = vpack.c.bf16 %v6206_v2, %v6206_v2 }
0x11a8   : > { %v7265_v55 = vpop.f32.mrf.mxu1 }
0x11a9   : > { %7283 = vmatmul.mubr.bf16.vlgmr.msra.gmra.mxu0 %v6207_v14 }
0x1269   : > { %v6313_v56 = vpop.f32.mrf.mxu0 }
0x126a   : > { %v6314_v16 = vadd.f32 %v6871_v30, %v6313_v56 }
0x126b   : > { %v7284_v21 = vpop.f32.mrf.mxu0 }
0x126c   : > { %v6321_v42 = vadd.f32 %v6314_v16, %v6122_v62 }
0x126d   : > { %v6316_v25 = vpop.f32.mrf.mxu0 }
0x126e   : > { %v6322_v12 = vsel %vm1567_vm1, %v6321_v42, 0.0 }
0x126f   : > { %6323 = vadd.xlane.f32.xlu1 %v6322_v12  ;;  %v7285_v0 = vpop.f32.mrf.mxu0 }
0x12f8   : > { %v6324_v61 = vpop.xlane.xlu1 %6323 }
0x12f9   : > { %v6325_v40 = vmul.f32 0.015625, %v6324_v61 }
0x12fb   : > { %v6326_v15 = vsub.f32 %v6321_v42, %v6325_v40 }
0x12fd   : > { %v6327_v5 = vmul.f32 %v6326_v15, %v6326_v15 }
0x12ff   : > { %v6328_v9 = vsel %vm1567_vm1, %v6327_v5, 0.0 }
0x1300   : > { %6329 = vadd.xlane.f32.xlu0 %v6328_v9 }
0x1389   : > { %v6330_v11 = vpop.xlane.xlu0 %6329 }
0x138a   : > { %v6331_v47 = vmul.f32 0.015625, %v6330_v11 }
0x138c   : > { %v6332_v37 = vadd.f32 1e-05, %v6331_v47 }
0x138e   : > { %7648 = vrsqrt.f32 %v6332_v37 }
0x139b   : > { %v7649_v45 = vpop.eup %7648 }
0x139c   : > { %v6334_v24 = vmul.f32 %v7649_v45, %v6326_v15 }
0x139e   : > { %v6341_v8 = vmul.f32 %v6880_v23, %v6334_v24 }
0x13a0   : > { %v6348_v18 = vadd.f32 %v6881_v43, %v6341_v8 }
0x13a2   : > { %6349 = vst.msk [vmem:[%s1522_s13] sm:$0xff] %vm1567_vm1, %v6348_v18 }
0x13a3 PF: > { %s9546_s16 = sld [smem:[#allocation58_spill]]  ;;  %s9547_s22 = smov %s8064_s23 }
0x13a4   : > { %s9548_s23 = smov %s9551_s26 }
0x13a9   : > { %s97_s0 = sadd.s32 1, %s9546_s16  }
0x13aa   : > { %p94_p6 = scmp.ge.s32.totalorder %s97_s0, 4   ;;  %s9549_s26 = smov %s97_s0 }
0x13ac   :  { %96 = sbr.rel (!%p94_p6) target bundleno = 82 (0x52), region = 326 }
0x13b1   :  { %6375 = vsyncpa [#allocation3], 1 }
0x13b2   :  { %6377 = vsyncpa [#allocation3 + $0x1], 1 }
0x13b3   :  { %6378 = vsyncpa [#allocation5], 1 }
0x13b4   :  { %6379 = vsyncpa [#allocation8], 1 }
0x13b5   :  { %6380 = vsyncpa [#allocation11], 1 }
0x13b6   :  { %6381 = vsyncpa [#allocation14], 1 }
0x13b7   :  { %6382 = vsyncpa [#allocation17], 1 }
0x13b8   :  { %6383 = vsyncpa [#allocation20], 1 }
0x13b9   :  { %6384 = vsyncpa [#allocation23], 1 }

// kernel: decoder_forward.3
= control target key start
LH: loop header
LB: loop body
LE: loop exit
PB: predicated region body
PF: predicated region fallthrough
CT: control target
= control target key end

     0   :  { %s7715_s6 = smov 1   ;;  %s7716_s10 = smov 2   ;;  %s9091_s0 = inlined_call_operand.smem [shape: u32[40], index: -1, kind: input, shape index: {}] }
   0x1   :  { %s7785_s5 = sld [smem:[%s9091_s0]]   ;;  %s7717_s14 = smov 3  }
   0x2   :  { %s7790_s9 = sld [smem:[%s9091_s0 + %s7715_s6]]   ;;  %s7718_s18 = smov 4  }
   0x3   :  { %s7795_s13 = sld [smem:[%s9091_s0 + %s7716_s10]]   ;;  %s7719_s22 = smov 5  }
   0x4   :  { %s7800_s17 = sld [smem:[%s9091_s0 + %s7717_s14]]   ;;  %s7720_s26 = smov 6  }
   0x5   :  { %s7805_s21 = sld [smem:[%s9091_s0 + %s7718_s18]]   ;;  %s7721_s30 = smov 7  }
   0x6   :  { %s7810_s25 = sld [smem:[%s9091_s0 + %s7719_s22]]   ;;  %s7722_s4 = smov 8  }
   0x7   :  { %9124 = sst [smem:[#allocation20_spill]] %s7785_s5  ;;  %s7723_s10 = smov 9  }
   0x8   :  { %9125 = sst [smem:[#allocation21_spill]] %s7790_s9  ;;  %s7724_s15 = smov 10  }
   0x9   :  { %s7815_s29 = sld [smem:[%s9091_s0 + %s7720_s26]]   ;;  %s7725_s20 = smov 11  }
   0xa   :  { %s7820_s3 = sld [smem:[%s9091_s0 + %s7721_s30]]   ;;  %s7726_s26 = smov 12  }
   0xb   :  { %9126 = sst [smem:[#allocation22_spill]] %s7805_s21  ;;  %s7727_s1 = smov 13  }
   0xc   :  { %9127 = sst [smem:[#allocation23_spill]] %s7810_s25  ;;  %s7728_s7 = smov 14  }
   0xd   :  { %s7825_s8 = sld [smem:[%s9091_s0 + %s7722_s4]]   ;;  %s7730_s22 = smov 16  }
   0xe   :  { %s7830_s14 = sld [smem:[%s9091_s0 + %s7723_s10]]   ;;  %s7731_s28 = smov 17  }
   0xf   :  { %9128 = sst [smem:[#allocation24_spill]] %s7815_s29 }
  0x10   :  { %9129 = sst [smem:[#allocation25_spill]] %s7820_s3 }
  0x11   :  { %s7835_s19 = sld [smem:[%s9091_s0 + %s7724_s15]]   ;;  %s7729_s15 = smov 15  }
  0x12   :  { %s7840_s24 = sld [smem:[%s9091_s0 + %s7725_s20]]  }
  0x13   :  { %9130 = sst [smem:[#allocation26_spill]] %s7825_s8 }
  0x14   :  { %s7845_s30 = sld [smem:[%s9091_s0 + %s7726_s26]]  }
  0x15   :  { %s7850_s6 = sld [smem:[%s9091_s0 + %s7727_s1]]  }
  0x16   :  { %s7855_s12 = sld [smem:[%s9091_s0 + %s7728_s7]]   ;;  %s7732_s7 = smov 18  }
  0x17   :  { %s7860_s20 = sld [smem:[%s9091_s0 + %s7729_s15]]   ;;  %s7733_s15 = smov 19  }
  0x18   :  { %s7865_s27 = sld [smem:[%s9091_s0 + %s7730_s22]]   ;;  %s7734_s22 = smov 20  }
  0x19   :  { %s7870_s4 = sld [smem:[%s9091_s0 + %s7731_s28]]   ;;  %s7735_s28 = smov 21  }
  0x1a   :  { %s7875_s8 = sld [smem:[%s9091_s0 + %s7732_s7]]   ;;  %s7736_s7 = smov 22  }
  0x1b   :  { %9131 = sst [smem:[#allocation27_spill]] %s7850_s6 }
  0x1c   :  { %s7880_s29 = sld [smem:[%s9091_s0 + %s7733_s15]]   ;;  %s7737_s15 = smov 23  }
  0x1d   :  { %9132 = sst [smem:[#allocation28_spill]] %s7860_s20 }
  0x1e   :  { %9133 = sst [smem:[#allocation29_spill]] %s7865_s27 }
  0x1f   :  { %9134 = sst [smem:[#allocation30_spill]] %s7870_s4 }
  0x20   :  { %9135 = sst [smem:[#allocation31_spill]] %s7875_s8 }
  0x21   :  { %s7885_s3 = sld [smem:[%s9091_s0 + %s7734_s22]]   ;;  %s7738_s22 = smov 24  }
  0x22   :  { %9136 = sst [smem:[#allocation32_spill]] %s7880_s29 }
  0x23   :  { %s7890_s25 = sld [smem:[%s9091_s0 + %s7735_s28]]   ;;  %s7739_s28 = smov 25  }
  0x24   :  { %s7895_s8 = sld [smem:[%s9091_s0 + %s7736_s7]]   ;;  %s7740_s7 = smov 26  }
  0x25   :  { %s7900_s4 = sld [smem:[%s9091_s0 + %s7737_s15]]   ;;  %s7741_s15 = smov 27  }
  0x26   :  { %s7910_s29 = sld [smem:[%s9091_s0 + %s7739_s28]]   ;;  %s7743_s28 = smov 29  }
  0x27   :  { %9137 = sst [smem:[#allocation33_spill]] %s7885_s3 }
  0x28   :  { %s7905_s3 = sld [smem:[%s9091_s0 + %s7738_s22]]   ;;  %s7742_s22 = smov 28  }
  0x29   :  { %9138 = sst [smem:[#allocation34_spill]] %s7890_s25 }
  0x2a   :  { %9139 = sst [smem:[#allocation35_spill]] %s7895_s8 }
  0x2b   :  { %9140 = sst [smem:[#allocation36_spill]] %s7900_s4 }
  0x2c   :  { %9142 = sst [smem:[#allocation38_spill]] %s7910_s29 }
  0x2d   :  { %s7915_s8 = sld [smem:[%s9091_s0 + %s7740_s7]]   ;;  %s7744_s7 = smov 30  }
  0x2e   :  { %9141 = sst [smem:[#allocation37_spill]] %s7905_s3 }
  0x2f   :  { %s7920_s4 = sld [smem:[%s9091_s0 + %s7741_s15]]   ;;  %s7745_s15 = smov 31  }
  0x30   :  { %s7925_s3 = sld [smem:[%s9091_s0 + %s7742_s22]]   ;;  %s7746_s22 = smov 32  }
  0x31   :  { %s7930_s29 = sld [smem:[%s9091_s0 + %s7743_s28]]   ;;  %s7747_s28 = smov 33  }
  0x33   :  { %9143 = sst [smem:[#allocation39_spill]] %s7915_s8 }
  0x34   :  { %s7935_s8 = sld [smem:[%s9091_s0 + %s7744_s7]]   ;;  %s7748_s7 = smov 34  }
  0x35   :  { %9144 = sst [smem:[#allocation40_spill]] %s7920_s4 }
  0x36   :  { %9145 = sst [smem:[#allocation41_spill]] %s7925_s3 }
  0x37   :  { %9146 = sst [smem:[#allocation42_spill]] %s7930_s29 }
  0x38   :  { %s7940_s4 = sld [smem:[%s9091_s0 + %s7745_s15]]   ;;  %s7749_s15 = smov 35  }
  0x39   :  { %s7945_s3 = sld [smem:[%s9091_s0 + %s7746_s22]]   ;;  %s7750_s22 = smov 36  }
  0x3a   :  { %9147 = sst [smem:[#allocation43_spill]] %s7935_s8 }
  0x3b   :  { %s7950_s29 = sld [smem:[%s9091_s0 + %s7747_s28]]   ;;  %s7751_s28 = smov 37  }
  0x3c   :  { %s7955_s21 = sld [smem:[%s9091_s0 + %s7748_s7]]   ;;  %s7752_s7 = smov 38  }
  0x3d   :  { %s7960_s25 = sld [smem:[%s9091_s0 + %s7749_s15]]   ;;  %s7753_s15 = smov 39  }
  0x3e   :  { %9148 = sst [smem:[#allocation44_spill]] %s7940_s4 }
  0x3f   :  { %9149 = sst [smem:[#allocation45_spill]] %s7945_s3 }
  0x40   :  { %s7965_s27 = sld [smem:[%s9091_s0 + %s7750_s22]]  }
  0x41   :  { %9150 = sst [smem:[#allocation46_spill]] %s7950_s29 }
  0x42   :  { %s7970_s29 = sld [smem:[%s9091_s0 + %s7751_s28]]  }
  0x43   :  { %9151 = sst [smem:[#allocation47_spill]] %s7960_s25 }
  0x44   :  { %s7975_s20 = sld [smem:[%s9091_s0 + %s7752_s7]]  }
  0x45   :  { %s7980_s25 = sld [smem:[%s9091_s0 + %s7753_s15]]  }
  0x4b   :  { %9152 = sst [smem:[#allocation48_spill]] %s7980_s25 }
  0x4c   :  { %84 = vsyncpa [#allocation3], 0 }
  0x4d   :  { %85 = vsyncpa [#allocation6], 0 }
  0x4e   :  { %86 = vsyncpa [#allocation9], 0 }
  0x4f   :  { %87 = vsyncpa [#allocation12], 0 }
  0x50   :  { %88 = vsyncpa [#allocation4], 0 }
  0x51   :  { %90 = vsyncpa [#allocation4 + $0x1], 0  ;;  %s7982_s22 = smov 0   ;;  %s7984_s23 = smov 0  }
  0x52   :  { %s7986_s26 = smov 0   ;;  %s7988_s28 = smov 0  }
  0x53   :  { %s7990_s1 = smov 0   ;;  %s7992_s2 = smov 0  }
  0x54 LB: > { %s9153_s6 = sld [smem:[#allocation27_spill]]  ;;  %s6532_s0 = sadd.s32 4294967295, %s7713_s2   ;;  %s7693_s22 = sphi %s7982_s22, %s9210_s22   ;;  %s7713_s2 = sphi %s7992_s2, %s96_s2   ;;  %s7709_s1 = sphi %s7990_s1, %s9214_s1   ;;  %s7705_s28 = sphi %s7988_s28, %s9213_s28   ;;  %s7701_s26 = sphi %s7986_s26, %s9212_s26   ;;  %s7697_s23 = sphi %s7984_s23, %s9211_s23  }
  0x55   : > { %9154 = sst [smem:[#allocation49_spill]] %s7693_s22  ;;  %s6533_s7 = sadd.s32 4294967294, %s7713_s2  }
  0x56   : > { %9155 = sst [smem:[#allocation50_spill]] %s7697_s23  ;;  %s108_s10 = sadd.s32 1, %s7709_s1 }
  0x57   : > { %9156 = sst [smem:[#allocation51_spill]] %s7701_s26  ;;  %s983_s11 = sadd.s32 1, %s7701_s26 }
  0x58   : > { %9157 = sst [smem:[#allocation52_spill]] %s7709_s1  ;;  %p110_p0 = scmp.ge.s32.totalorder %s108_s10, 2 }
  0x59   : > { %p993_p1 = scmp.ne.s32.totalorder %s7701_s26, %s7697_s23  ;;  %p994_p2 = scmp.eq.s32.totalorder %s6532_s0, 1 }
  0x5a   : > { %p999_p3 = scmp.ne.s32.totalorder %s7697_s23, %s7693_s22  ;;  %s9216_s10 = smov (%p110_p0, %s108_s10), 0 }
  0x5b   : > { %9158 = sst [smem:[#allocation53_spill]] %s9216_s10  ;;  %p8022_p4 = por %p994_p2, %p993_p1 }
  0x5c   : > { %p1000_p5 = scmp.eq.s32.totalorder %s6533_s7, 1  ;;  %s978_s16 = ssub.s32 %s7709_s1, %s9216_s10 }
  0x5d   : > { %s9159_s15 = scalar_select %p8022_p4, 1, 0 }
  0x5e   : > { %p6534_p6 = scmp.ge.s32.totalorder %s7713_s2, 1  ;;  %p981_p7 = scmp.eq.s32.totalorder %s978_s16, 0 }
  0x5f   : > { %p8029_p8 = por %p1000_p5, %p999_p3  ;;  %p1007_p9 = scmp.lt.s32.totalorder %s7713_s2, 3 }
  0x60   : > { %s8035_s25 = scalar_select %p981_p7, %s7701_s26, %s983_s11  }
  0x61   : > { %s9160_s18 = scalar_select %p8029_p8, 1, 0 }
  0x62   : > { %9162 = sst [smem:[#allocation55_spill]] %s8035_s25  ;;  %p8037_p10 = pnand %p6534_p6, %p1007_p9 }
  0x63   : > { %9161 = sst [smem:[#allocation54_spill]] %s9160_s18  ;;  %p8041_p11 = scmp.eq.s32.totalorder %s6532_s0, 0 }
  0x64   : > { %s9163_s22 = scalar_select %p8037_p10, 1, 0 }
  0x65   : > { %s9164_s23 = scalar_select %p8041_p11, 1, 0 }
  0x66   : > { %p7147_p12 = pneg %p8037_p10  ;;  %s7754_s7 = smov [#allocation5]  }
  0x67   : > { %s1101_s16 = sshll.u32 %s7754_s7, 4  ;;  %s7755_s10 = smov [#allocation8]   ;;  %s1102_s16 = int_to_ptr.vmem [resolvable:$true] %s1101_s16 }
  0x68   : > { %s1126_s1 = sshll.u32 %s7755_s10, 4  ;;  %p8049_p13 = pnand %p8041_p11, %p7147_p12  ;;  %s1127_s1 = int_to_ptr.vmem [resolvable:$true] %s1126_s1 }
  0x69   : > { %s7756_s25 = smov [#allocation11]   ;;  %s7450_s18 = scalar_lea.vmem %s1102_s16, 16 }
  0x6a   : > { %s1151_s0 = sshll.u32 %s7756_s25, 4  ;;  %p8055_p0 = pneg %p8049_p13  ;;  %s1152_s0 = int_to_ptr.vmem [resolvable:$true] %s1151_s0 }
  0x6b   : > { %p7451_p1 = scmp.ne.s32.totalorder %s1102_s16, %s7450_s18  ;;  %s7457_s10 = scalar_lea.vmem %s1102_s16, 32 }
  0x6c   : > { %p7458_p5 = scmp.lt.s32.totalorder %s1102_s16, %s1102_s16  ;;  %p7459_p6 = scmp.lt.s32.totalorder %s7457_s10, %s7450_s18 }
  0x6d   : > { %p7453_p2 = pnand %p7451_p1, %p8055_p0 }
  0x6e   : > { %p7460_p7 = por %p7459_p6, %p7458_p5 }
  0x6f   : > { %p7454_p3 = pneg %p7453_p2 }
  0x71   : > { %p7461_p9 = pnand %p7460_p7, %p7454_p3 }
  0x73   : > { %7464 = shalt.err (!%p7461_p9)
}
  0x74   : > { %s9167_s4 = sld [smem:[#allocation44_spill]]  ;;  %s7476_s25 = scalar_lea.vmem %s1127_s1, 16 }
  0x75   : > { %p7477_p12 = scmp.ne.s32.totalorder %s1127_s1, %s7476_s25  ;;  %s7483_s7 = scalar_lea.vmem %s1127_s1, 32 }
  0x76   : > { %p7484_p11 = scmp.lt.s32.totalorder %s1127_s1, %s1127_s1  ;;  %p7485_p1 = scmp.lt.s32.totalorder %s7483_s7, %s7476_s25 }
  0x77   : > { %p7479_p8 = pnand %p7477_p12, %p8055_p0 }
  0x78   : > { %p7486_p2 = por %p7485_p1, %p7484_p11 }
  0x79   : > { %p7480_p4 = pneg %p7479_p8 }
  0x7a   : > { %7153 = dma.hbm_to_vmem [thread:$0]  (!%p8049_p13), %s9167_s4, 16, %s1102_s16, [#allocation6]  }
  0x7b   : > { %p7487_p10 = pnand %p7486_p2, %p7480_p4 }
  0x7d   : > { %7490 = shalt.err (!%p7487_p10)
}
  0x7e   : > { %7159 = dma.hbm_to_vmem [thread:$0]  (!%p8049_p13), %s7955_s21, 16, %s1127_s1, [#allocation9]  }
  0x7f   : > { %s7502_s18 = scalar_lea.vmem %s1152_s0, 16  ;;  %s7509_s16 = scalar_lea.vmem %s1152_s0, 32 }
  0x80   : > { %p7503_p3 = scmp.ne.s32.totalorder %s1152_s0, %s7502_s18  ;;  %p7510_p7 = scmp.lt.s32.totalorder %s1152_s0, %s1152_s0 }
  0x81   : > { %p7511_p8 = scmp.lt.s32.totalorder %s7509_s16, %s7502_s18 }
  0x82   : > { %p7505_p5 = pnand %p7503_p3, %p8055_p0 }
  0x83   : > { %p7512_p9 = por %p7511_p8, %p7510_p7 }
  0x84   : > { %p7506_p6 = pneg %p7505_p5 }
  0x86   : > { %p7513_p12 = pnand %p7512_p9, %p7506_p6 }
  0x88   : > { %7516 = shalt.err (!%p7513_p12)
}
  0x89   : > { %7165 = dma.hbm_to_vmem [thread:$0]  (!%p8049_p13), %s7970_s29, 16, %s1152_s0, [#allocation12]  }
  0x8a   : > { %s7757_s10 = smov [#allocation2]   ;;  %s7758_s1 = smov [#allocation7]  }
  0x8b   : > { %s1090_s25 = sshll.u32 %s7757_s10, 4  ;;  %s1112_s7 = sshll.u32 %s7758_s1, 4  ;;  %s1091_s25 = int_to_ptr.vmem [resolvable:$true] %s1090_s25  ;;  %s1113_s7 = int_to_ptr.vmem [resolvable:$true] %s1112_s7 }
  0x8c   : > { %s7528_s4 = scalar_lea.vmem %s1091_s25, 16  ;;  %s7535_s18 = scalar_lea.vmem %s1091_s25, 32 }
  0x8d   : > { %p7529_p4 = scmp.ne.s32.totalorder %s1091_s25, %s7528_s4  ;;  %p7536_p1 = scmp.lt.s32.totalorder %s1091_s25, %s1091_s25 }
  0x8e   : > { %p7537_p2 = scmp.lt.s32.totalorder %s7535_s18, %s7528_s4 }
  0x8f   : > { %p7531_p10 = pnand %p7529_p4, %p8055_p0 }
  0x90   : > { %p7538_p3 = por %p7537_p2, %p7536_p1 }
  0x91   : > { %p7532_p11 = pneg %p7531_p10 }
  0x93   : > { %p7539_p5 = pnand %p7538_p3, %p7532_p11 }
  0x95   : > { %7542 = shalt.err (!%p7539_p5)
}
  0x96   : > { %s9168_s8 = sld [smem:[#allocation43_spill]]  ;;  %s7554_s0 = scalar_lea.vmem %s1113_s7, 16 }
  0x97   : > { %p7555_p6 = scmp.ne.s32.totalorder %s1113_s7, %s7554_s0  ;;  %s7561_s16 = scalar_lea.vmem %s1113_s7, 32 }
  0x98   : > { %p7562_p9 = scmp.lt.s32.totalorder %s1113_s7, %s1113_s7  ;;  %p7563_p12 = scmp.lt.s32.totalorder %s7561_s16, %s7554_s0 }
  0x99   : > { %p7557_p7 = pnand %p7555_p6, %p8055_p0 }
  0x9a   : > { %p7564_p4 = por %p7563_p12, %p7562_p9 }
  0x9b   : > { %p7558_p8 = pneg %p7557_p7 }
  0x9c   : > { %7150 = dma.hbm_to_vmem [thread:$0]  (!%p8049_p13), %s9168_s8, 16, %s1091_s25, [#allocation3]  }
  0x9d   : > { %p7565_p10 = pnand %p7564_p4, %p7558_p8 }
  0x9f   : > { %7568 = shalt.err (!%p7565_p10)
}
  0xa0   : > { %s9169_s3 = sld [smem:[#allocation45_spill]]  ;;  %s7759_s4 = smov [#allocation10]  }
  0xa1   : > { %s1140_s10 = sshll.u32 %s7759_s4, 4  ;;  %s7760_s1 = smov [#allocation13]   ;;  %s1141_s10 = int_to_ptr.vmem [resolvable:$true] %s1140_s10 }
  0xa2   : > { %s1162_s25 = sshll.u32 %s7760_s1, 4  ;;  %s7580_s18 = scalar_lea.vmem %s1141_s10, 16  ;;  %s1163_s25 = int_to_ptr.vmem [resolvable:$true] %s1162_s25 }
  0xa3   : > { %p7581_p11 = scmp.ne.s32.totalorder %s1141_s10, %s7580_s18  ;;  %s7587_s0 = scalar_lea.vmem %s1141_s10, 32 }
  0xa4   : > { %p7588_p3 = scmp.lt.s32.totalorder %s1141_s10, %s1141_s10  ;;  %p7589_p5 = scmp.lt.s32.totalorder %s7587_s0, %s7580_s18 }
  0xa5   : > { %p7583_p1 = pnand %p7581_p11, %p8055_p0 }
  0xa6   : > { %7156 = dma.hbm_to_vmem [thread:$0]  (!%p8049_p13), %s9169_s3, 16, %s1113_s7, [#allocation6]  }
  0xa7   : > { %p7584_p2 = pneg %p7583_p1  ;;  %p7590_p6 = por %p7589_p5, %p7588_p3 }
  0xa9   : > { %p7591_p7 = pnand %p7590_p6, %p7584_p2 }
  0xab   : > { %7594 = shalt.err (!%p7591_p7)
}
  0xac   : > { %7162 = dma.hbm_to_vmem [thread:$0]  (!%p8049_p13), %s7965_s27, 16, %s1141_s10, [#allocation9]  }
  0xad   : > { %s7606_s7 = scalar_lea.vmem %s1163_s25, 16  ;;  %s7613_s16 = scalar_lea.vmem %s1163_s25, 32 }
  0xae   : > { %p7607_p8 = scmp.ne.s32.totalorder %s1163_s25, %s7606_s7  ;;  %p7614_p4 = scmp.lt.s32.totalorder %s1163_s25, %s1163_s25 }
  0xaf   : > { %p7615_p10 = scmp.lt.s32.totalorder %s7613_s16, %s7606_s7 }
  0xb0   : > { %p7609_p9 = pnand %p7607_p8, %p8055_p0 }
  0xb1   : > { %p7616_p11 = por %p7615_p10, %p7614_p4 }
  0xb2   : > { %p7610_p12 = pneg %p7609_p9 }
  0xb4   : > { %p7617_p1 = pnand %p7616_p11, %p7610_p12 }
  0xb6   : > { %7620 = shalt.err (!%p7617_p1)
}
  0xb7   : > { %7168 = dma.hbm_to_vmem [thread:$0]  (!%p8049_p13), %s7975_s20, 16, %s1163_s25, [#allocation12]  }
  0xb8   : > { %p9170_p2 = scmp.ne.s32.totalorder %s9163_s22, 0 }
  0xb9   : > { %p9171_p3 = scmp.ne.s32.totalorder (!%p9170_p2), %s9164_s23, 0 }
  0xba   : > { %1232 = sbr.rel (%p9170_p2) target bundleno = 4958 (0x135e), region = 176 }
  0xbf   : > { %7672 = dma.done.wait (%p9171_p3), [#allocation3], 16  }
  0xc0   : > { %7674 = vsyncadd (%p9171_p3), [#allocation3], 4294967280 }
  0xc1   : > { %7676 = dma.done.wait (%p9171_p3), [#allocation6], 32  }
  0xc2   : > { %7678 = vsyncadd (%p9171_p3), [#allocation6], 4294967264 }
  0xc3   : > { %7680 = dma.done.wait (%p9171_p3), [#allocation9], 32  }
  0xc4   : > { %7682 = vsyncadd (%p9171_p3), [#allocation9], 4294967264 }
  0xc5   : > { %7684 = dma.done.wait (%p9171_p3), [#allocation12], 32  }
  0xc6   : > { %7686 = vsyncadd (%p9171_p3), [#allocation12], 4294967264  ;;  %s9172_s5 = sld [smem:[#allocation20_spill]]  ;;  %v7761_v0 = vmov 0.0   ;;  %vm7762_vm0 = vmmov 0   ;;  %p1384_p13 = scmp.lt.s32.totalorder %s7705_s28, 1  ;;  %v1685_v31 = vlaneseq }
  0xc7   : > { %6832 = vmatprep.subr.bf16.mxu1 %v7761_v0  ;;  %6840 = vmatprep.mubr.msk.bf16.mxu1 %vm7762_vm0, %v7761_v0  ;;  %v7301_v1 = vld [vmem:[%s7830_s14 + $0x18] sm:$0xff]   ;;  %v7302_v2 = vld [vmem:[%s7830_s14 + $0x10] sm:$0xff]   ;;  %v7303_v3 = vld [vmem:[%s7830_s14 + $0x8] sm:$0xff]   ;;  %s9173_s9 = sld [smem:[#allocation21_spill]]  ;;  %vm1465_vm1 = vcmask 523264   ;;  %s7763_s4 = smov 112  }
  0xc8   : > { %6856 = vmatprep.subr.bf16.mxu0 %v7761_v0  ;;  %6864 = vmatprep.mubr.msk.bf16.mxu0 %vm7762_vm0, %v7761_v0  ;;  %s8120_s22 = scalar_select %p1384_p13, %s7705_s28, 1  ;;  %v7304_v4 = vld [vmem:[%s7830_s14] sm:$0xff]   ;;  %v7305_v6 = vld [vmem:[%s7840_s24 + $0x18] sm:$0xff]   ;;  %v7306_v8 = vld [vmem:[%s7840_s24 + $0x10] sm:$0xff]   ;;  %v7766_v29 = vmov 1983009808  }
  0xc9   : > { %6833 = vmatpush3.bf16.msra.mxu1 %v7301_v1  ;;  %v7307_v9 = vld [vmem:[%s7840_s24 + $0x8] sm:$0xff]   ;;  %v7308_v10 = vld [vmem:[%s7840_s24] sm:$0xff]   ;;  %s9117_s10 = smov 80   ;;  %s7765_s1 = smov 96   ;;  %v7309_v25 = vld [vmem:[%s9153_s6 + $0x18] sm:$0xff]   ;;  %v1683_v30 = vunpack.c.l.s4 %v7766_v29  ;;  %v8175_v36 = vshrl.u32 %v1685_v31, 7 }
  0xca   : > { %s6553_s23 = sshll.u32 %s8120_s22, 3  ;;  %6834 = vmatprep.subr.bf16.mxu1 %v7761_v0  ;;  %v6558_v13 = vld [vmem:[%s7835_s19] ss:$0 sm:$0xff]  ;;  %6857 = vmatpush3.bf16.msra.mxu0 %v7309_v25  ;;  %v7310_v26 = vld [vmem:[%s9153_s6 + $0x10] sm:$0xff]   ;;  %v7311_v27 = vld [vmem:[%s9153_s6 + $0x8] sm:$0xff]   ;;  %vm1962_vm2 = vcmask 130048   ;;  %s1401_s25 = scalar_lea.vmem %s7800_s17, %s8120_s22 }
  0xcb   : > { %v6564_v19 = vld [vmem:[%s7845_s30] ss:$0 sm:$0xff]  ;;  %6858 = vmatprep.subr.bf16.mxu0 %v7761_v0  ;;  %v7767_v33 = vmov 1934713408   ;;  %v1684_v35 = vunpack.c.0.s8 %v1683_v30  ;;  %vm2285_vm3 = vcmask 64512   ;;  %vm2487_vm4 = vcmask 1043456  }
  0xcc   : > { %s1390_s26 = scalar_lea.vmem %s9172_s5, %s6553_s23  ;;  %v7312_v28 = vld [vmem:[%s9153_s6] sm:$0xff]   ;;  %v1715_v34 = vunpack.c.l.s4 %v7767_v33  ;;  %s9174_s18 = sld [smem:[#allocation28_spill]]  ;;  %vm2818_vm5 = vcmask 261120   ;;  %vm2820_vm6 = vcmask 392192   ;;  %vm3644_vm7 = vcmask 23552  }
  0xcd   : > { %6835 = vmatpush3.bf16.msra.mxu1 %v7302_v2  ;;  %v8130_v5 = vld [vmem:[%s1390_s26] sm:$0xff]  ;;  %s1394_s11 = scalar_lea.vmem %s9173_s9, %s6553_s23  ;;  %v8178_v40 = vsub.s32 %v1684_v35, %v8175_v36  ;;  %s9113_s0 = smov 32   ;;  %vm4960_vm8 = vcmask 130112   ;;  %vm5041_vm9 = vcmask 195712   ;;  %vm5568_vm10 = vcmask 195584  }
  0xce   : > { %6836 = vmatprep.subr.bf16.mxu1 %v7761_v0  ;;  %v1424_v7 = vpack.c.bf16 %v8130_v5, %v8130_v5  ;;  %v1423_v11 = vld [vmem:[%s1394_s11] sm:$0xff]  ;;  %6859 = vmatpush3.bf16.msra.mxu0 %v7310_v26  ;;  %v1716_v39 = vunpack.c.0.s8 %v1715_v34  ;;  %s9114_s7 = smov 16   ;;  %s9175_s16 = sld [smem:[#allocation29_spill]] }
  0xcf   : > { %v1425_v12 = vpack.c.bf16 %v1423_v11, %v1423_v11  ;;  %6860 = vmatprep.subr.bf16.mxu0 %v7761_v0  ;;  %s9112_s23 = smov 48   ;;  %s9176_s26 = sld [smem:[#allocation34_spill]] }
  0xd0   : > { %v8181_v47 = vsub.s32 %v1716_v39, %v8175_v36  ;;  %s9194_s5 = sld [smem:[#allocation24_spill]]  ;;  %p9206_p5 = scmp.ne.s32.totalorder %s9159_s15, 0 }
  0xd1   : > { %6837 = vmatpush3.bf16.msra.mxu1 %v7303_v3 }
  0xd2   : > { %6838 = vmatprep.subr.bf16.mxu1 %v7761_v0  ;;  %6861 = vmatpush3.bf16.msra.mxu0 %v7311_v27 }
  0xd3   : > { %6862 = vmatprep.subr.bf16.mxu0 %v7761_v0 }
  0xd5   : > { %6839 = vmatpush3.bf16.msra.mxu1 %v7304_v4  ;;  %s9177_s11 = smov %s9176_s26 }
  0xd6   : > { %6844 = vmatprep.subr.bf16.mxu1 %v7761_v0  ;;  %6863 = vmatpush3.bf16.msra.mxu0 %v7312_v28 }
  0xd7   : > { %6888 = vmatprep.subr.bf16.mxu0 %v7761_v0 }
  0xd8   : > { %6841 = vmatmul.mubr.msk.bf16.vlgmr.msra.gmra.mxu1 %vm1465_vm1, %v1424_v7 }
  0xd9   : > { %6845 = vmatpush3.bf16.msra.mxu1 %v7305_v6  ;;  %6852 = vmatprep.mubr.msk.bf16.mxu1 %vm7762_vm0, %v7761_v0 }
  0xda   : > { %6846 = vmatprep.subr.bf16.mxu1 %v7761_v0  ;;  %6865 = vmatmul.mubr.msk.bf16.vlgmr.msra.gmra.mxu0 %vm1465_vm1, %v1425_v12 }
  0xdb   : > { %6890 = vmatprep.mubr.msk.bf16.mxu0 %vm7762_vm0, %v7761_v0 }
  0xdd   : > { %6847 = vmatpush3.bf16.msra.mxu1 %v7306_v8 }
  0xde   : > { %6848 = vmatprep.subr.bf16.mxu1 %v7761_v0 }
  0xe1   : > { %6849 = vmatpush3.bf16.msra.mxu1 %v7307_v9 }
  0xe2   : > { %6850 = vmatprep.subr.bf16.mxu1 %v7761_v0 }
  0xe5   : > { %6851 = vmatpush3.bf16.msra.mxu1 %v7308_v10 }
  0xe6   : > { %6868 = vmatprep.subr.mxu1 %v7761_v0 }
  0xe8   : > { %6853 = vmatmul.mubr.msk.bf16.vlgmr.msra.gmra.mxu1 %vm1465_vm1, %v1425_v12 }
  0xe9   : > { %6870 = vmatprep.mubr.msk.f32.mxu1 %vm7762_vm0, %v7761_v0 }
 0x198   : > { %v1503_v14 = vpop.f32.mrf.mxu1 }
 0x199   : > { %v8152_v15 = vadd.f32 %v6558_v13, %v1503_v14 }
 0x19a   : > { %v6842_v16 = vpop.f32.mrf.mxu1 }
 0x19b   : > { %1671 = vrot.lane.b32.xlu1 %v8152_v15, %s7763_s4 }
 0x19c   : > { %v1506_v17 = vpop.f32.mrf.mxu1 }
 0x19e   : > { %v6843_v18 = vpop.f32.mrf.mxu1 }
 0x1a8   : > { %v1585_v20 = vpop.f32.mrf.mxu1 }
 0x1a9   : > { %v1586_v21 = vadd.f32 %v6564_v19, %v1585_v20 }
 0x1aa   : > { %v6854_v22 = vpop.f32.mrf.mxu1 }
 0x1ab   : > { %1823 = vrot.lane.b32.xlu1 %v1586_v21, %s9117_s10  ;;  %1817 = vrot.lane.b32.xlu0 %v1586_v21, %s7763_s4 }
 0x1ac   : > { %v1588_v23 = vpop.f32.mrf.mxu1 }
 0x1ae   : > { %v6855_v24 = vpop.f32.mrf.mxu1 }
 0x1af   : > { %1677 = vrot.lane.b32.xlu1 %v8152_v15, %s9117_s10  ;;  %1820 = vrot.lane.b32.xlu0 %v1586_v21, %s7765_s1 }
 0x1b3   : > { %1674 = vrot.lane.b32.xlu0 %v8152_v15, %s7765_s1 }
 0x20d   : > { %v1672_v32 = vpop.permute.xlu1 %1671 }
 0x21d   : > { %v1824_v37 = vpop.permute.xlu1 %1823  ;;  %v1818_v38 = vpop.permute.xlu0 %1817 }
 0x21e   : > { %v1842_v41 = vcombine.low %v1818_v38, %v1824_v37  ;;  %v1843_v42 = vcombine.high %v1818_v38, %v1824_v37 }
 0x220   : > { %v1850_v48 = vrot.slane %v1842_v41, %v8178_v40  ;;  %v1857_v49 = vrot.slane %v1843_v42, %v8178_v40 }
 0x221   : > { %v1821_v43 = vpop.permute.xlu0 %1820  ;;  %v1678_v44 = vpop.permute.xlu1 %1677 }
 0x222   : > { %v1826_v45 = vcombine.low %v1586_v21, %v1821_v43  ;;  %v1827_v46 = vcombine.high %v1586_v21, %v1821_v43  ;;  %v1696_v52 = vcombine.low %v1672_v32, %v1678_v44  ;;  %v1697_v53 = vcombine.high %v1672_v32, %v1678_v44 }
 0x224   : > { %v1834_v50 = vrot.slane %v1826_v45, %v8178_v40  ;;  %v1841_v51 = vrot.slane %v1827_v46, %v8178_v40  ;;  %v1704_v2 = vrot.slane %v1696_v52, %v8178_v40  ;;  %v1711_v3 = vrot.slane %v1697_v53, %v8178_v40 }
 0x225   : > { %v1675_v54 = vpop.permute.xlu0 %1674 }
 0x226   : > { %v1858_v55 = vcombine.low %v1834_v50, %v1850_v48  ;;  %v1859_v56 = vcombine.high %v1834_v50, %v1850_v48  ;;  %v1874_v57 = vcombine.low %v1841_v51, %v1857_v49  ;;  %v1875_v58 = vcombine.high %v1841_v51, %v1857_v49 }
 0x227   : > { %v1680_v59 = vcombine.low %v8152_v15, %v1675_v54  ;;  %v1681_v60 = vcombine.high %v8152_v15, %v1675_v54 }
 0x228   : > { %v1866_v61 = vrot.slane %v1858_v55, %v8181_v47  ;;  %v1873_v62 = vrot.slane %v1859_v56, %v8181_v47  ;;  %v1882_v63 = vrot.slane %v1874_v57, %v8181_v47  ;;  %v1889_v1 = vrot.slane %v1875_v58, %v8181_v47  ;;  %v1664_v58 = vpop.f32.mrf.mxu0 }
 0x229   : > { %v1688_v4 = vrot.slane %v1680_v59, %v8178_v40  ;;  %v1695_v6 = vrot.slane %v1681_v60, %v8178_v40 }
 0x22a   : > { %v1894_v7 = vcombine.low %v1866_v61, %v1873_v62  ;;  %v6578_v8 = vcombine.high %v1866_v61, %v1873_v62  ;;  %v1910_v9 = vcombine.low %v1882_v63, %v1889_v1  ;;  %v6579_v10 = vcombine.high %v1882_v63, %v1889_v1  ;;  %v6866_v59 = vpop.f32.mrf.mxu0  ;;  %v2271_v62 = vld [vmem:[%s7795_s13] sm:$0xff] }
 0x22b   : > { %v1712_v11 = vcombine.low %v1688_v4, %v1704_v2  ;;  %v1713_v12 = vcombine.high %v1688_v4, %v1704_v2  ;;  %v1728_v13 = vcombine.low %v1695_v6, %v1711_v3  ;;  %v1729_v14 = vcombine.high %v1695_v6, %v1711_v3  ;;  %v6588_v1 = vld [vmem:[%s1401_s25] ss:$0 sm:$0xff]  ;;  %s9178_s25 = sld [smem:[#allocation22_spill]] }
 0x22c   : > { %v1901_v15 = vrot.slane %v1894_v7, %v8178_v40  ;;  %v1909_v16 = vrot.slane %v6578_v8, %v8178_v40  ;;  %v1917_v17 = vrot.slane %v1910_v9, %v8178_v40  ;;  %v1925_v18 = vrot.slane %v6579_v10, %v8178_v40  ;;  %v1667_v60 = vpop.f32.mrf.mxu0 }
 0x22d   : > { %v1720_v19 = vrot.slane %v1712_v11, %v8181_v47  ;;  %v1727_v20 = vrot.slane %v1713_v12, %v8181_v47  ;;  %v1736_v21 = vrot.slane %v1728_v13, %v8181_v47  ;;  %v1743_v22 = vrot.slane %v1729_v14, %v8181_v47 }
 0x22e   : > { %v1926_v23 = vcombine.low %v1901_v15, %v1909_v16  ;;  %v1942_v24 = vcombine.low %v1917_v17, %v1925_v18  ;;  %v1927_v39 = vcombine.high %v1901_v15, %v1909_v16  ;;  %v1943_v41 = vcombine.high %v1917_v17, %v1925_v18  ;;  %v6867_v61 = vpop.f32.mrf.mxu0 }
 0x22f   : > { %v1748_v25 = vcombine.low %v1720_v19, %v1727_v20  ;;  %v6576_v26 = vcombine.high %v1720_v19, %v1727_v20  ;;  %v1764_v27 = vcombine.low %v1736_v21, %v1743_v22  ;;  %v6577_v28 = vcombine.high %v1736_v21, %v1743_v22 }
 0x230   : > { %v1934_v29 = vrot.slane %v1926_v23, %v8181_v47  ;;  %v1950_v30 = vrot.slane %v1942_v24, %v8181_v47  ;;  %v1941_v49 = vrot.slane %v1927_v39, %v8181_v47  ;;  %v1957_v50 = vrot.slane %v1943_v41, %v8181_v47  ;;  %v6570_v24 = vld [vmem:[%s7855_s12] ss:$0 sm:$0xff] }
 0x231   : > { %v1755_v31 = vrot.slane %v1748_v25, %v8178_v40  ;;  %v1763_v32 = vrot.slane %v6576_v26, %v8178_v40  ;;  %v1771_v33 = vrot.slane %v1764_v27, %v8178_v40  ;;  %v1779_v34 = vrot.slane %v6577_v28, %v8178_v40 }
 0x232   : > { %v1958_v35 = vcombine.low %v1934_v29, %v1950_v30  ;;  %v1959_v48 = vcombine.high %v1934_v29, %v1950_v30  ;;  %v1960_v54 = vcombine.low %v1941_v49, %v1957_v50  ;;  %v1961_v56 = vcombine.high %v1941_v49, %v1957_v50 }
 0x233   : > { %v1780_v37 = vcombine.low %v1755_v31, %v1763_v32  ;;  %v1796_v38 = vcombine.low %v1771_v33, %v1779_v34  ;;  %v1781_v44 = vcombine.high %v1755_v31, %v1763_v32  ;;  %v1797_v45 = vcombine.high %v1771_v33, %v1779_v34 }
 0x234   : > { %6869 = vmatpush3.xpose.msk.msra.mxu1 %vm1962_vm2, %v1958_v35  ;;  %v2272_v63 = vmax.f32 %v2271_v62, -1e+30  ;;  %v1665_v25 = vadd.f32 %v6570_v24, %v1664_v58 }
 0x235   : > { %6873 = vmatprep.subr.mxu1 %v7761_v0  ;;  %v1788_v42 = vrot.slane %v1780_v37, %v8181_v47  ;;  %v1804_v43 = vrot.slane %v1796_v38, %v8181_v47  ;;  %v1795_v52 = vrot.slane %v1781_v44, %v8181_v47  ;;  %v1811_v53 = vrot.slane %v1797_v45, %v8181_v47 }
 0x236   : > { %v2280_v2 = vadd.f32 %v6588_v1, %v2272_v63 }
 0x237   : > { %v1812_v46 = vcombine.low %v1788_v42, %v1804_v43  ;;  %v1813_v51 = vcombine.high %v1788_v42, %v1804_v43  ;;  %v1814_v55 = vcombine.low %v1795_v52, %v1811_v53  ;;  %v1815_v57 = vcombine.high %v1795_v52, %v1811_v53 }
 0x239   : > { %6871 = vmatmul.mubr.msk.f32.vlgmr.msra.gmra.mxu1 %vm1962_vm2, %v1812_v46 }
 0x23a   : > { %6874 = vmatpush3.xpose.msk.msra.mxu1 %vm1962_vm2, %v1959_v48  ;;  %6875 = vmatprep.mubr.msk.f32.mxu1 %vm7762_vm0, %v7761_v0 }
 0x23b   : > { %6878 = vmatprep.subr.mxu1 %v7761_v0 }
 0x23d   : > { %6876 = vmatmul.mubr.msk.f32.vlgmr.msra.gmra.mxu1 %vm1962_vm2, %v1813_v51 }
 0x23e   : > { %6879 = vmatpush3.xpose.msk.msra.mxu1 %vm1962_vm2, %v1960_v54  ;;  %6880 = vmatprep.mubr.msk.f32.mxu1 %vm7762_vm0, %v7761_v0 }
 0x23f   : > { %6883 = vmatprep.subr.mxu1 %v7761_v0 }
 0x241   : > { %6881 = vmatmul.mubr.msk.f32.vlgmr.msra.gmra.mxu1 %vm1962_vm2, %v1814_v55 }
 0x242   : > { %6884 = vmatpush3.xpose.msk.msra.mxu1 %vm1962_vm2, %v1961_v56  ;;  %6885 = vmatprep.mubr.msk.f32.mxu1 %vm7762_vm0, %v7761_v0 }
 0x243   : > { %6894 = vmatprep.subr.bf16.mxu1 %v7761_v0 }
 0x245   : > { %6886 = vmatmul.mubr.msk.f32.vlgmr.msra.gmra.mxu1 %vm1962_vm2, %v1815_v57 }
 0x246   : > { %6896 = vmatprep.mubr.msk.bf16.mxu1 %vm7762_vm0, %v7761_v0 }
 0x2f9   : > { %v2035_v3 = vpop.f32.mrf.mxu1 }
 0x2fa   : > { %v2267_v4 = vmul.f32 0.25, %v2035_v3 }
 0x2fb   : > { %v6872_v6 = vpop.f32.mrf.mxu1 }
 0x2fc   : > { %v2281_v7 = vadd.f32 %v2280_v2, %v2267_v4 }
 0x2fd   : > { %v2111_v8 = vpop.f32.mrf.mxu1 }
 0x2fe   : > { %v2268_v9 = vmul.f32 0.25, %v2111_v8  ;;  %v2286_v10 = vsel %vm2285_vm3, %v2281_v7, -inf }
 0x2ff   : > { %2287 = vmax.xlane.f32.xlu0 %v2286_v10  ;;  %v6877_v11 = vpop.f32.mrf.mxu1 }
 0x300   : > { %v2282_v12 = vadd.f32 %v2280_v2, %v2268_v9 }
 0x301   : > { %v2187_v13 = vpop.f32.mrf.mxu1 }
 0x302   : > { %v2269_v14 = vmul.f32 0.25, %v2187_v13  ;;  %v2289_v15 = vsel %vm2285_vm3, %v2282_v12, -inf }
 0x303   : > { %2290 = vmax.xlane.f32.xlu1 %v2289_v15  ;;  %v6882_v16 = vpop.f32.mrf.mxu1 }
 0x304   : > { %v2283_v17 = vadd.f32 %v2280_v2, %v2269_v14 }
 0x305   : > { %v2263_v18 = vpop.f32.mrf.mxu1 }
 0x306   : > { %v2270_v19 = vmul.f32 0.25, %v2263_v18  ;;  %v2292_v20 = vsel %vm2285_vm3, %v2283_v17, -inf }
 0x307   : > { %2293 = vmax.xlane.f32.xlu0 %v2292_v20  ;;  %v6887_v21 = vpop.f32.mrf.mxu1 }
 0x308   : > { %v2284_v22 = vadd.f32 %v2280_v2, %v2270_v19 }
 0x30a   : > { %v2295_v23 = vsel %vm2285_vm3, %v2284_v22, -inf }
 0x30b   : > { %2296 = vmax.xlane.f32.xlu0 %v2295_v23 }
 0x314   : > { %2335 = vrot.lane.b32.xlu1 %v1665_v25, %s7763_s4 }
 0x388   : > { %v2288_v26 = vpop.xlane.xlu0 %2287 }
 0x389   : > { %v2298_v27 = vsub.f32 %v2281_v7, %v2288_v26 }
 0x38b   : > { %v2302_v28 = vmul.f32 1.442695, %v2298_v27 }
 0x38c   : > { %v2291_v29 = vpop.xlane.xlu1 %2290 }
 0x38d   : > { %7353 = vpow2.f32 %v2302_v28  ;;  %v2299_v30 = vsub.f32 %v2282_v12, %v2291_v29 }
 0x38f   : > { %v2304_v31 = vmul.f32 1.442695, %v2299_v30 }
 0x390   : > { %v2294_v37 = vpop.xlane.xlu0 %2293  ;;  %v2336_v49 = vpop.permute.xlu1 %2335 }
 0x391   : > { %7355 = vpow2.f32 %v2304_v31  ;;  %v2300_v38 = vsub.f32 %v2283_v17, %v2294_v37 }
 0x393   : > { %v2306_v41 = vmul.f32 1.442695, %v2300_v38 }
 0x394   : > { %v2297_v39 = vpop.xlane.xlu0 %2296 }
 0x395   : > { %v2301_v42 = vsub.f32 %v2284_v22, %v2297_v39  ;;  %7357 = vpow2.f32 %v2306_v41 }
 0x397   : > { %v2308_v43 = vmul.f32 1.442695, %v2301_v42 }
 0x399   : > { %7359 = vpow2.f32 %v2308_v43 }
 0x39a   : > { %v8246_v32 = vpop.eup %7353 }
 0x39b   : > { %v2310_v33 = vsel %vm2285_vm3, %v8246_v32, 0.0 }
 0x39c   : > { %2311 = vadd.xlane.f32.xlu1 %v2310_v33 }
 0x39e   : > { %v8250_v34 = vpop.eup %7355 }
 0x39f   : > { %v2313_v35 = vsel %vm2285_vm3, %v8250_v34, 0.0 }
 0x3a0   : > { %2314 = vadd.xlane.f32.xlu0 %v2313_v35 }
 0x3a2   : > { %v8256_v44 = vpop.eup %7357 }
 0x3a3   : > { %v2316_v45 = vsel %vm2285_vm3, %v8256_v44, 0.0 }
 0x3a6   : > { %v8260_v46 = vpop.eup %7359 }
 0x3a7   : > { %v2319_v48 = vsel %vm2285_vm3, %v8260_v46, 0.0 }
 0x3ad   : > { %2341 = vrot.lane.b32.xlu1 %v1665_v25, %s9117_s10 }
 0x3b6   : > { %2338 = vrot.lane.b32.xlu0 %v1665_v25, %s7765_s1 }
 0x3d1   : > { %2317 = vadd.xlane.f32.xlu1 %v2316_v45 }
 0x3d5   : > { %2320 = vadd.xlane.f32.xlu0 %v2319_v48 }
 0x425   : > { %v2312_v50 = vpop.xlane.xlu1 %2311 }
 0x426   : > { %7361 = vrcp.f32 %v2312_v50 }
 0x429   : > { %v2342_v51 = vpop.permute.xlu1 %2341  ;;  %v2315_v52 = vpop.xlane.xlu0 %2314 }
 0x42a   : > { %v2360_v53 = vcombine.low %v2336_v49, %v2342_v51  ;;  %v2361_v54 = vcombine.high %v2336_v49, %v2342_v51  ;;  %7363 = vrcp.f32 %v2315_v52 }
 0x42c   : > { %v2368_v58 = vrot.slane %v2360_v53, %v8178_v40  ;;  %v2375_v59 = vrot.slane %v2361_v54, %v8178_v40 }
 0x42d   : > { %v2339_v55 = vpop.permute.xlu0 %2338 }
 0x42e   : > { %v2344_v56 = vcombine.low %v1665_v25, %v2339_v55  ;;  %v2345_v57 = vcombine.high %v1665_v25, %v2339_v55  ;;  %v7313_v55 = vld [vmem:[%s9174_s18 + $0x18] sm:$0xff]  }
 0x430   : > { %v2352_v60 = vrot.slane %v2344_v56, %v8178_v40  ;;  %v2359_v61 = vrot.slane %v2345_v57, %v8178_v40  ;;  %v7314_v56 = vld [vmem:[%s9174_s18 + $0x10] sm:$0xff]  }
 0x432   : > { %v2376_v62 = vcombine.low %v2352_v60, %v2368_v58  ;;  %v2377_v63 = vcombine.high %v2352_v60, %v2368_v58  ;;  %v2392_v1 = vcombine.low %v2359_v61, %v2375_v59  ;;  %v2393_v2 = vcombine.high %v2359_v61, %v2375_v59 }
 0x433   : > { %v7362_v20 = vpop.eup %7361 }
 0x434   : > { %v2384_v3 = vrot.slane %v2376_v62, %v8181_v47  ;;  %v2391_v4 = vrot.slane %v2377_v63, %v8181_v47  ;;  %v2400_v6 = vrot.slane %v2392_v1, %v8181_v47  ;;  %v2407_v7 = vrot.slane %v2393_v2, %v8181_v47 }
 0x435   : > { %v2326_v33 = vmul.f32 %v7362_v20, %v8246_v32  ;;  %v7315_v20 = vld [vmem:[%s9174_s18 + $0x8] sm:$0xff]  }
 0x436   : > { %v2412_v8 = vcombine.low %v2384_v3, %v2391_v4  ;;  %v6589_v9 = vcombine.high %v2384_v3, %v2391_v4  ;;  %v2428_v10 = vcombine.low %v2400_v6, %v2407_v7  ;;  %v6590_v11 = vcombine.high %v2400_v6, %v2407_v7 }
 0x437   : > { %v7364_v21 = vpop.eup %7363  ;;  %v2330_v42 = vpack.c.bf16 %v2326_v33, %v2326_v33 }
 0x438   : > { %v2419_v12 = vrot.slane %v2412_v8, %v8178_v40  ;;  %v2427_v13 = vrot.slane %v6589_v9, %v8178_v40  ;;  %v2435_v14 = vrot.slane %v2428_v10, %v8178_v40  ;;  %v2443_v15 = vrot.slane %v6590_v11, %v8178_v40 }
 0x439   : > { %v2327_v35 = vmul.f32 %v7364_v21, %v8250_v34 }
 0x43a   : > { %v2444_v16 = vcombine.low %v2419_v12, %v2427_v13  ;;  %v2460_v17 = vcombine.low %v2435_v14, %v2443_v15  ;;  %v2445_v18 = vcombine.high %v2419_v12, %v2427_v13  ;;  %v2461_v19 = vcombine.high %v2435_v14, %v2443_v15 }
 0x43b   : > { %v2331_v43 = vpack.c.bf16 %v2327_v35, %v2327_v35 }
 0x43c   : > { %v2452_v22 = vrot.slane %v2444_v16, %v8181_v47  ;;  %v2468_v23 = vrot.slane %v2460_v17, %v8181_v47  ;;  %v2459_v24 = vrot.slane %v2445_v18, %v8181_v47  ;;  %v2475_v25 = vrot.slane %v2461_v19, %v8181_v47 }
 0x43e   : > { %v2476_v26 = vcombine.low %v2452_v22, %v2468_v23  ;;  %v2477_v27 = vcombine.high %v2452_v22, %v2468_v23  ;;  %v2478_v28 = vcombine.low %v2459_v24, %v2475_v25  ;;  %v2479_v29 = vcombine.high %v2459_v24, %v2475_v25 }
 0x440   : > { %v2480_v30 = vpack.c.bf16 %v2476_v26, %v2476_v26  ;;  %v2481_v31 = vpack.c.bf16 %v2477_v27, %v2477_v27  ;;  %v2482_v39 = vpack.c.bf16 %v2478_v28, %v2478_v28  ;;  %v2483_v41 = vpack.c.bf16 %v2479_v29, %v2479_v29 }
 0x442   : > { %v2489_v37 = vsel %vm2487_vm4, %v2480_v30, 0  ;;  %v2535_v38 = vsel %vm2487_vm4, %v2481_v31, 0  ;;  %v2581_v32 = vsel %vm2487_vm4, %v2482_v39, 0  ;;  %v2627_v34 = vsel %vm2487_vm4, %v2483_v41, 0  ;;  %v7316_v30 = vld [vmem:[%s9174_s18] sm:$0xff]  }
 0x443   : > { %6889 = vmatpush3.bf16.msra.mxu0 %v2489_v37  ;;  %6895 = vmatpush3.bf16.msra.mxu1 %v2535_v38 }
 0x444   : > { %6900 = vmatprep.subr.bf16.mxu0 %v7761_v0  ;;  %6906 = vmatprep.subr.bf16.mxu1 %v7761_v0 }
 0x446   : > { %6891 = vmatmul.mubr.msk.bf16.vlgmr.msra.gmra.mxu0 %vm2285_vm3, %v2330_v42  ;;  %6897 = vmatmul.mubr.msk.bf16.vlgmr.msra.gmra.mxu1 %vm2285_vm3, %v2331_v43 }
 0x447   : > { %6901 = vmatpush3.bf16.msra.mxu0 %v2581_v32  ;;  %6907 = vmatpush3.bf16.msra.mxu1 %v2627_v34 }
 0x448   : > { %6902 = vmatprep.mubr.msk.bf16.mxu0 %vm7762_vm0, %v7761_v0  ;;  %6908 = vmatprep.mubr.msk.bf16.mxu1 %vm7762_vm0, %v7761_v0 }
 0x449   : > { %6912 = vmatprep.subr.bf16.mxu0 %v7761_v0  ;;  %6924 = vmatprep.subr.bf16.mxu1 %v7761_v0 }
 0x45a   : > { %v2318_v45 = vpop.xlane.xlu1 %2317 }
 0x45b   : > { %7365 = vrcp.f32 %v2318_v45 }
 0x45e   : > { %v2321_v48 = vpop.xlane.xlu0 %2320 }
 0x45f   : > { %7367 = vrcp.f32 %v2321_v48 }
 0x468   : > { %v7366_v49 = vpop.eup %7365 }
 0x469   : > { %v2328_v50 = vmul.f32 %v7366_v49, %v8256_v44 }
 0x46b   : > { %v2332_v51 = vpack.c.bf16 %v2328_v50, %v2328_v50 }
 0x46c   : > { %v7368_v52 = vpop.eup %7367 }
 0x46d   : > { %6903 = vmatmul.mubr.msk.bf16.vlgmr.msra.gmra.mxu0 %vm2285_vm3, %v2332_v51  ;;  %v2329_v53 = vmul.f32 %v7368_v52, %v8260_v46 }
 0x46e   : > { %6920 = vmatprep.mubr.msk.bf16.mxu0 %vm7762_vm0, %v7761_v0  ;;  %6913 = vmatpush3.bf16.msra.mxu0 %v7313_v55 }
 0x46f   : > { %v2333_v54 = vpack.c.bf16 %v2329_v53, %v2329_v53  ;;  %6914 = vmatprep.subr.bf16.mxu0 %v7761_v0 }
 0x471   : > { %6909 = vmatmul.mubr.msk.bf16.vlgmr.msra.gmra.mxu1 %vm2285_vm3, %v2333_v54 }
 0x472   : > { %6932 = vmatprep.mubr.msk.bf16.mxu1 %vm7762_vm0, %v7761_v0  ;;  %6915 = vmatpush3.bf16.msra.mxu0 %v7314_v56 }
 0x473   : > { %6916 = vmatprep.subr.bf16.mxu0 %v7761_v0 }
 0x476   : > { %6917 = vmatpush3.bf16.msra.mxu0 %v7315_v20 }
 0x477   : > { %6918 = vmatprep.subr.bf16.mxu0 %v7761_v0 }
 0x47a   : > { %6919 = vmatpush3.bf16.msra.mxu0 %v7316_v30 }
 0x47b   : > { %6936 = vmatprep.subr.bf16.mxu0 %v7761_v0 }
 0x506   : > { %v2525_v44 = vpop.f32.mrf.mxu0  ;;  %v2571_v57 = vpop.f32.mrf.mxu1 }
 0x508   : > { %v6892_v46 = vpop.f32.mrf.mxu0  ;;  %v6898_v58 = vpop.f32.mrf.mxu1 }
 0x509   : > { %v6597_v46 = vld [vmem:[%s9175_s16] ss:$0 sm:$0xff] }
 0x50a   : > { %v2528_v59 = vpop.f32.mrf.mxu0  ;;  %v2574_v60 = vpop.f32.mrf.mxu1 }
 0x50c   : > { %v6893_v61 = vpop.f32.mrf.mxu0  ;;  %v6899_v62 = vpop.f32.mrf.mxu1 }
 0x52d   : > { %v2617_v63 = vpop.f32.mrf.mxu0 }
 0x52e   : > { %v2669_v2 = vcombine.low %v2525_v44, %v2617_v63  ;;  %v2670_v3 = vcombine.high %v2525_v44, %v2617_v63 }
 0x52f   : > { %v6904_v1 = vpop.f32.mrf.mxu0 }
 0x530   : > { %v2677_v11 = vrot.slane %v2669_v2, %v8178_v40  ;;  %v2684_v12 = vrot.slane %v2670_v3, %v8178_v40  ;;  %v7317_v2 = vld [vmem:[%s9176_s26 + $0x18] sm:$0xff]   ;;  %v7318_v3 = vld [vmem:[%s9177_s11 + $0x10] sm:$0xff]   ;;  %s9181_s26 = sld [smem:[#allocation35_spill]] }
 0x531   : > { %v2620_v4 = vpop.f32.mrf.mxu0  ;;  %v2663_v6 = vpop.f32.mrf.mxu1 }
 0x532   : > { %v2685_v7 = vcombine.low %v2571_v57, %v2663_v6  ;;  %v2686_v8 = vcombine.high %v2571_v57, %v2663_v6  ;;  %v7319_v4 = vld [vmem:[%s9177_s11 + $0x8] sm:$0xff]  }
 0x533   : > { %v6905_v9 = vpop.f32.mrf.mxu0  ;;  %v6910_v10 = vpop.f32.mrf.mxu1 }
 0x534   : > { %v2693_v13 = vrot.slane %v2685_v7, %v8178_v40  ;;  %v2700_v14 = vrot.slane %v2686_v8, %v8178_v40 }
 0x535   : > { %v2666_v15 = vpop.f32.mrf.mxu1 }
 0x536   : > { %v2701_v16 = vcombine.low %v2677_v11, %v2693_v13  ;;  %v2702_v17 = vcombine.high %v2677_v11, %v2693_v13  ;;  %v2717_v18 = vcombine.low %v2684_v12, %v2700_v14  ;;  %v2718_v19 = vcombine.high %v2684_v12, %v2700_v14 }
 0x537   : > { %v6911_v21 = vpop.f32.mrf.mxu1 }
 0x538   : > { %v2709_v22 = vrot.slane %v2701_v16, %v8181_v47  ;;  %v2716_v23 = vrot.slane %v2702_v17, %v8181_v47  ;;  %v2725_v24 = vrot.slane %v2717_v18, %v8181_v47  ;;  %v2732_v25 = vrot.slane %v2718_v19, %v8181_v47  ;;  %v6611_v21 = vld [vmem:[%s9181_s26] ss:$0 sm:$0xff]  ;;  %s9184_s26 = sld [smem:[#allocation33_spill]] }
 0x53a   : > { %v2737_v26 = vcombine.low %v2709_v22, %v2716_v23  ;;  %v6595_v27 = vcombine.high %v2709_v22, %v2716_v23  ;;  %v2753_v28 = vcombine.low %v2725_v24, %v2732_v25  ;;  %v6596_v29 = vcombine.high %v2725_v24, %v2732_v25 }
 0x53c   : > { %v2744_v31 = vrot.slane %v2737_v26, %v8178_v40  ;;  %v2752_v33 = vrot.slane %v6595_v27, %v8178_v40  ;;  %v2760_v35 = vrot.slane %v2753_v28, %v8178_v40  ;;  %v2768_v37 = vrot.slane %v6596_v29, %v8178_v40 }
 0x53e   : > { %v2770_v38 = vcombine.high %v2744_v31, %v2752_v33  ;;  %v2786_v39 = vcombine.high %v2760_v35, %v2768_v37  ;;  %v2769_v41 = vcombine.low %v2744_v31, %v2752_v33  ;;  %v2785_v42 = vcombine.low %v2760_v35, %v2768_v37 }
 0x540   : > { %v2784_v43 = vrot.slane %v2770_v38, %v8181_v47  ;;  %v2800_v32 = vrot.slane %v2786_v39, %v8181_v47  ;;  %v2777_v34 = vrot.slane %v2769_v41, %v8181_v47  ;;  %v2793_v45 = vrot.slane %v2785_v42, %v8181_v47 }
 0x542   : > { %v2803_v48 = vcombine.low %v2784_v43, %v2800_v32  ;;  %v2802_v49 = vcombine.high %v2777_v34, %v2793_v45  ;;  %v2801_v50 = vcombine.low %v2777_v34, %v2793_v45  ;;  %v2804_v51 = vcombine.high %v2784_v43, %v2800_v32 }
 0x544   : > { %2810 = vrot.lane.b32.xlu1 %v2803_v48, %s9113_s0  ;;  %2806 = vrot.lane.b32.xlu0 %v2802_v49, %s9114_s7  ;;  %s9179_s0 = sld [smem:[#allocation32_spill]] }
 0x545   : > { %s9180_s7 = sld [smem:[#allocation36_spill]] }
 0x548   : > { %2814 = vrot.lane.b32.xlu1 %v2804_v51, %s9112_s23  ;;  %s9116_s23 = sshll.u32 %s8120_s22, 2 }
 0x549   : > { %s1405_s16 = scalar_lea.vmem %s9178_s25, %s9116_s23  ;;  %s9182_s25 = sld [smem:[#allocation30_spill]] }
 0x54a   : > { %v2937_v6 = vld [vmem:[%s1405_s16] sm:$0x7]  ;;  %v7321_v13 = vld [vmem:[%s9179_s0 + $0x18] sm:$0xff]   ;;  %v7323_v15 = vld [vmem:[%s9179_s0 + $0x10] sm:$0xff]   ;;  %s9183_s16 = sld [smem:[#allocation31_spill]] }
 0x54b   : > { %v2938_v7 = vpack.c.bf16 %v2937_v6, %v2937_v6  ;;  %v7322_v14 = vld [vmem:[%s9180_s7 + $0x18] sm:$0xff]   ;;  %6925 = vmatpush3.bf16.msra.mxu1 %v7321_v13  ;;  %v7324_v16 = vld [vmem:[%s9180_s7 + $0x10] sm:$0xff]   ;;  %v7325_v17 = vld [vmem:[%s9179_s0 + $0x8] sm:$0xff]  }
 0x54c   : > { %6926 = vmatprep.subr.bf16.mxu1 %v7761_v0  ;;  %v7326_v18 = vld [vmem:[%s9180_s7 + $0x8] sm:$0xff]   ;;  %v7327_v19 = vld [vmem:[%s9179_s0] sm:$0xff]   ;;  %s9192_s0 = smov 80  }
 0x54d   : > { %v7328_v20 = vld [vmem:[%s9180_s7] sm:$0xff]  }
 0x54f   : > { %6927 = vmatpush3.bf16.msra.mxu1 %v7323_v15  ;;  %v6603_v31 = vld [vmem:[%s9182_s25] ss:$0 sm:$0xff]  ;;  %s9185_s25 = sld [smem:[#allocation23_spill]] }
 0x550   : > { %6928 = vmatprep.subr.bf16.mxu1 %v7761_v0  ;;  %v6604_v35 = vld [vmem:[%s9183_s16] ss:$0 sm:$0xff]  ;;  %s9186_s16 = sld [smem:[#allocation40_spill]] }
 0x553   : > { %6929 = vmatpush3.bf16.msra.mxu1 %v7325_v17 }
 0x554   : > { %6930 = vmatprep.subr.bf16.mxu1 %v7761_v0 }
 0x557   : > { %6931 = vmatpush3.bf16.msra.mxu1 %v7327_v19 }
 0x558   : > { %6948 = vmatprep.subr.mxu1 %v7761_v0 }
 0x5b6   : > { %v2811_v52 = vpop.permute.xlu1 %2810  ;;  %v2807_v53 = vpop.permute.xlu0 %2806 }
 0x5b7   : > { %v2817_v54 = vsel %vm1962_vm2, %v2801_v50, %v2807_v53 }
 0x5b8   : > { %v2819_v56 = vsel %vm2818_vm5, %v2817_v54, %v2811_v52 }
 0x5ba   : > { %v2815_v55 = vpop.permute.xlu1 %2814 }
 0x5bb   : > { %v2821_v44 = vsel %vm2820_vm6, %v2819_v56, %v2815_v55 }
 0x5bc   : > { %v2822_v57 = vpack.c.bf16 %v2821_v44, %v2821_v44 }
 0x5be   : > { %6921 = vmatmul.mubr.msk.bf16.vlgmr.msra.gmra.mxu0 %vm1465_vm1, %v2822_v57 }
 0x5bf   : > { %6944 = vmatprep.mubr.msk.bf16.mxu0 %vm7762_vm0, %v7761_v0  ;;  %6937 = vmatpush3.bf16.msra.mxu0 %v7317_v2 }
 0x5c0   : > { %6938 = vmatprep.subr.bf16.mxu0 %v7761_v0 }
 0x5c3   : > { %6939 = vmatpush3.bf16.msra.mxu0 %v7318_v3 }
 0x5c4   : > { %6940 = vmatprep.subr.bf16.mxu0 %v7761_v0 }
 0x5c7   : > { %6941 = vmatpush3.bf16.msra.mxu0 %v7319_v4 }
 0x5c8   : > { %6942 = vmatprep.subr.bf16.mxu0 %v7761_v0 }
 0x67e   : > { %v2899_v58 = vpop.f32.mrf.mxu0 }
 0x67f   : > { %v2900_v59 = vadd.f32 %v6597_v46, %v2899_v58  ;;  %v6605_v58 = vld [vmem:[%s9184_s26] ss:$0 sm:$0xff]  ;;  %s7116_s26 = smul.u32 24, %s8120_s22 }
 0x680   : > { %v6922_v60 = vpop.f32.mrf.mxu0 }
 0x681   : > { %v2907_v61 = vadd.f32 %v2900_v59, %v8130_v5  ;;  %v7320_v5 = vld [vmem:[%s9177_s11] sm:$0xff]   ;;  %s1410_s23 = scalar_lea.vmem %s9185_s25, %s7116_s26  ;;  %s9189_s26 = sld [smem:[#allocation39_spill]] }
 0x682   : > { %v2902_v62 = vpop.f32.mrf.mxu0  ;;  %6943 = vmatpush3.bf16.msra.mxu0 %v7320_v5  ;;  %v3698_v5 = vld [vmem:[%s1410_s23] sm:$0xff]  ;;  %v3699_v6 = vld [vmem:[%s1410_s23 + $0x8] sm:$0xff] }
 0x683   : > { %v2908_v63 = vsel %vm1465_vm1, %v2907_v61, 0.0  ;;  %6968 = vmatprep.subr.bf16.mxu0 %v7761_v0 }
 0x684   : > { %2909 = vadd.xlane.f32.xlu0 %v2908_v63  ;;  %v6923_v1 = vpop.f32.mrf.mxu0 }
 0x685   : > { %6945 = vmatmul.mubr.msk.bf16.vlgmr.msra.gmra.mxu0 %vm1465_vm1, %v2938_v7  ;;  %v8414_v7 = vpack.c.bf16 %v3699_v6, %v3698_v5 }
 0x686   : > { %6976 = vmatprep.mubr.msk.bf16.mxu0 %vm7762_vm0, %v7761_v0  ;;  %6969 = vmatpush3.bf16.msra.mxu0 %v7322_v14 }
 0x687   : > { %6970 = vmatprep.subr.bf16.mxu0 %v7761_v0 }
 0x68a   : > { %6971 = vmatpush3.bf16.msra.mxu0 %v7324_v16 }
 0x68b   : > { %6972 = vmatprep.subr.bf16.mxu0 %v7761_v0 }
 0x68e   : > { %6973 = vmatpush3.bf16.msra.mxu0 %v7326_v18 }
 0x68f   : > { %6974 = vmatprep.subr.bf16.mxu0 %v7761_v0 }
 0x692   : > { %6975 = vmatpush3.bf16.msra.mxu0 %v7328_v20 }
 0x70d   : > { %v2910_v8 = vpop.xlane.xlu0 %2909 }
 0x70e   : > { %v2912_v9 = vmul.f32 0.015625, %v2910_v8  ;;  %v7333_v8 = vld [vmem:[%s9186_s16 + $0x18] sm:$0xff]  }
 0x70f   : > { %6992 = vmatprep.subr.bf16.mxu0 %v7333_v8 }
 0x710   : > { %v2913_v10 = vsub.f32 %v2907_v61, %v2912_v9  ;;  %v7334_v9 = vld [vmem:[%s9186_s16 + $0x10] sm:$0xff]  }
 0x712   : > { %v2914_v11 = vmul.f32 %v2913_v10, %v2913_v10 }
 0x714   : > { %v2915_v12 = vsel %vm1465_vm1, %v2914_v11, 0.0  ;;  %v7336_v11 = vld [vmem:[%s9186_s16] sm:$0xff]  }
 0x715   : > { %2916 = vadd.xlane.f32.xlu1 %v2915_v12  ;;  %v3700_v12 = vld [vmem:[%s1410_s23 + $0x10] sm:$0xff]  ;;  %s9187_s23 = sld [smem:[#allocation38_spill]] }
 0x716   : > { %v8422_v13 = vpack.c.bf16 %v3700_v12, %v3700_v12 }
 0x71b   : > { %s9188_s25 = smov %s9187_s23 }
 0x745   : > { %v3097_v22 = vpop.f32.mrf.mxu0 }
 0x746   : > { %v3098_v23 = vadd.f32 %v6611_v21, %v3097_v22 }
 0x747   : > { %v6946_v24 = vpop.f32.mrf.mxu0 }
 0x748   : > { %3250 = vrot.lane.b32.xlu0 %v3098_v23, %s7763_s4  ;;  %3253 = vrot.lane.b32.xlu1 %v3098_v23, %s7765_s1 }
 0x749   : > { %v3100_v25 = vpop.f32.mrf.mxu0 }
 0x74b   : > { %v6947_v26 = vpop.f32.mrf.mxu0 }
 0x74c   : > { %3256 = vrot.lane.b32.xlu0 %v3098_v23, %s9117_s10 }
 0x79e   : > { %v2917_v27 = vpop.xlane.xlu1 %2916 }
 0x79f   : > { %v2918_v28 = vmul.f32 0.015625, %v2917_v27 }
 0x7a1   : > { %v2919_v29 = vadd.f32 1e-05, %v2918_v28 }
 0x7a3   : > { %7369 = vrsqrt.f32 %v2919_v29 }
 0x7b0   : > { %v7370_v30 = vpop.eup %7369 }
 0x7b1   : > { %v2921_v33 = vmul.f32 %v7370_v30, %v2913_v10  ;;  %v7335_v10 = vld [vmem:[%s9186_s16 + $0x8] sm:$0xff]  }
 0x7b3   : > { %v2928_v37 = vmul.f32 %v6603_v31, %v2921_v33 }
 0x7b5   : > { %v8377_v38 = vadd.f32 %v6604_v35, %v2928_v37 }
 0x7b7   : > { %v2936_v39 = vpack.c.bf16 %v8377_v38, %v8377_v38 }
 0x7b9   : > { %6933 = vmatmul.mubr.msk.bf16.vlgmr.msra.gmra.mxu1 %vm1465_vm1, %v2936_v39  ;;  %6977 = vmatmul.mubr.msk.bf16.vlgmr.msra.gmra.mxu0 %vm1465_vm1, %v2936_v39 }
 0x7ba   : > { %6950 = vmatprep.mubr.msk.f32.mxu1 %vm7762_vm0, %v7761_v0  ;;  %v3251_v41 = vpop.permute.xlu0 %3250  ;;  %v3254_v42 = vpop.permute.xlu1 %3253  ;;  %7000 = vmatprep.mubr.msk.bf16.mxu0 %vm1465_vm1, %v8414_v7 }
 0x7bb   : > { %v3259_v43 = vcombine.low %v3098_v23, %v3254_v42  ;;  %6993 = vmatpush3.bf16.msra.mxu0 %v7333_v8 }
 0x7bc   : > { %6994 = vmatprep.subr.bf16.mxu0 %v7334_v9 }
 0x7bd   : > { %v3266_v34 = vrot.slane %v3259_v43, %v8178_v40 }
 0x7be   : > { %v3257_v32 = vpop.permute.xlu0 %3256 }
 0x7bf   : > { %v3267_v45 = vcombine.low %v3251_v41, %v3257_v32  ;;  %6995 = vmatpush3.bf16.msra.mxu0 %v7334_v9 }
 0x7c0   : > { %6996 = vmatprep.subr.bf16.mxu0 %v7335_v10 }
 0x7c1   : > { %v3274_v48 = vrot.slane %v3267_v45, %v8178_v40 }
 0x7c3   : > { %v3275_v49 = vcombine.low %v3266_v34, %v3274_v48  ;;  %v3276_v50 = vcombine.high %v3266_v34, %v3274_v48  ;;  %6997 = vmatpush3.bf16.msra.mxu0 %v7335_v10  ;;  %v6634_v10 = vld [vmem:[%s9189_s26] ss:$0 sm:$0xff]  ;;  %s9193_s26 = sshll.u32 %s8120_s22, 2 }
 0x7c4   : > { %6998 = vmatprep.subr.bf16.mxu0 %v7336_v11 }
 0x7c5   : > { %v3283_v51 = vrot.slane %v3275_v49, %v8181_v47  ;;  %v3290_v52 = vrot.slane %v3276_v50, %v8181_v47 }
 0x7c7   : > { %v3291_v53 = vcombine.low %v3283_v51, %v3290_v52  ;;  %v3299_v54 = vcombine.high %v3283_v51, %v7761_v0  ;;  %6999 = vmatpush3.bf16.msra.mxu0 %v7336_v11 }
 0x7c8   : > { %7013 = vmatprep.subr.mxu0 %v7761_v0 }
 0x7c9   : > { %v8391_v55 = vrot.slane %v3291_v53, %v8178_v40  ;;  %v8394_v56 = vrot.slane %v3299_v54, %v8178_v40 }
 0x7ca   : > { %7001 = vmatmul.mubr.msk.bf16.vlgmr.msra.gmra.mxu0 %vm1465_vm1, %v8422_v13 }
 0x7cb   : > { %v3308_v44 = vcombine.high %v8391_v55, %v8394_v56  ;;  %v3307_v57 = vcombine.low %v8391_v55, %v8394_v56  ;;  %7019 = vmatprep.mubr.msk.f32.mxu0 %vm7762_vm0, %v7761_v0  ;;  %v7330_v56 = vld [vmem:[%s9188_s25 + $0x10] sm:$0xff]  }
 0x7cd   : > { %v8401_v46 = vrot.slane %v3307_v57, %v8181_v47 }
 0x7cf   : > { %6949 = vmatpush3.xpose.msk.msra.mxu1 %vm1962_vm2, %v8401_v46  ;;  %v3323_v54 = vcombine.high %v8401_v46, %v7761_v0  ;;  %v3322_v46 = vrot.slane %v3308_v44, %v8181_v47  ;;  %v7331_v44 = vld [vmem:[%s9188_s25 + $0x8] sm:$0xff]  }
 0x7d0   : > { %6953 = vmatprep.subr.mxu1 %v7761_v0 }
 0x879   : > { %v3015_v59 = vpop.f32.mrf.mxu1  ;;  %v8407_v60 = vpop.f32.mrf.mxu0 }
 0x87a   : > { %v3016_v61 = vadd.f32 %v6605_v58, %v3015_v59 }
 0x87b   : > { %v6934_v62 = vpop.f32.mrf.mxu1  ;;  %v6978_v63 = vpop.f32.mrf.mxu0 }
 0x87c   : > { %3107 = vrot.lane.b32.xlu0 %v3016_v61, %s7765_s1  ;;  %3104 = vrot.lane.b32.xlu1 %v3016_v61, %s7763_s4  ;;  %v7329_v62 = vld [vmem:[%s9187_s23 + $0x18] sm:$0xff]   ;;  %v3324_v63 = vcombine.high %v3322_v46, %v7761_v0  ;;  %s9190_s23 = sld [smem:[#allocation37_spill]] }
 0x87d   : > { %v3018_v1 = vpop.f32.mrf.mxu1  ;;  %v3779_v2 = vpop.f32.mrf.mxu0 }
 0x87e   : > { %v7332_v1 = vld [vmem:[%s9188_s25] sm:$0xff]  }
 0x87f   : > { %v6935_v3 = vpop.f32.mrf.mxu1  ;;  %v6979_v4 = vpop.f32.mrf.mxu0 }
 0x880   : > { %3110 = vrot.lane.b32.xlu1 %v3016_v61, %s9117_s10  ;;  %s9191_s10 = sld [smem:[#allocation25_spill]] }
 0x886   : > { %s1417_s3 = scalar_lea.vmem %s9191_s10, %s9193_s26  ;;  %s9195_s10 = smov 16  }
 0x887   : > { %s1413_s26 = scalar_lea.vmem %s9194_s5, %s8120_s22  ;;  %s7772_s5 = smov 120  }
 0x8ee   : > { %v3108_v14 = vpop.permute.xlu0 %3107  ;;  %v3105_v15 = vpop.permute.xlu1 %3104 }
 0x8ef   : > { %v3113_v16 = vcombine.low %v3016_v61, %v3108_v14  ;;  %v3114_v17 = vcombine.high %v3016_v61, %v3108_v14 }
 0x8f1   : > { %v3121_v21 = vrot.slane %v3113_v16, %v8178_v40  ;;  %v3128_v22 = vrot.slane %v3114_v17, %v8178_v40 }
 0x8f2   : > { %v3111_v18 = vpop.permute.xlu1 %3110 }
 0x8f3   : > { %v3129_v19 = vcombine.low %v3105_v15, %v3111_v18  ;;  %v3130_v20 = vcombine.high %v3105_v15, %v3111_v18  ;;  %v6628_v18 = vld [vmem:[%s9190_s23] ss:$0 sm:$0xff]  ;;  %s7771_s23 = smov 8  }
 0x8f5   : > { %v3137_v23 = vrot.slane %v3129_v19, %v8178_v40  ;;  %v3144_v24 = vrot.slane %v3130_v20, %v8178_v40  ;;  %v8503_v19 = vadd.f32 %v6628_v18, %v8407_v60  ;;  %v5031_v20 = vsub.s32 2, %v8175_v36 }
 0x8f7   : > { %v3145_v25 = vcombine.low %v3121_v21, %v3137_v23  ;;  %v3146_v26 = vcombine.high %v3121_v21, %v3137_v23  ;;  %v3161_v27 = vcombine.low %v3128_v22, %v3144_v24  ;;  %v3162_v28 = vcombine.high %v3128_v22, %v3144_v24  ;;  %v8514_v22 = vld [vmem:[%s1417_s3] sm:$0x7]  ;;  %v7002_v24 = vpop.f32.mrf.mxu0  ;;  %s9196_s3 = sld [smem:[#allocation41_spill]] }
 0x8f8   : > { %v4950_v21 = vsub.s32 1, %v8175_v36  ;;  %v5032_v60 = vrot.slane %v8514_v22, %v5031_v20 }
 0x8f9   : > { %v3153_v29 = vrot.slane %v3145_v25, %v8181_v47  ;;  %v3160_v30 = vrot.slane %v3146_v26, %v8181_v47  ;;  %v3169_v31 = vrot.slane %v3161_v27, %v8181_v47  ;;  %v3176_v33 = vrot.slane %v3162_v28, %v8181_v47  ;;  %v3948_v25 = vpop.f32.mrf.mxu0  ;;  %v6627_v28 = vld [vmem:[%s1413_s26] ss:$0 sm:$0xff]  ;;  %s9201_s26 = smov 48  }
 0x8fa   : > { %v4951_v23 = vrot.slane %v8514_v22, %v4950_v21 }
 0x8fb   : > { %v3181_v35 = vcombine.low %v3153_v29, %v3160_v30  ;;  %v6617_v37 = vcombine.high %v3153_v29, %v3160_v30  ;;  %v3197_v39 = vcombine.low %v3169_v31, %v3176_v33  ;;  %v6618_v41 = vcombine.high %v3169_v31, %v3176_v33  ;;  %v7003_v26 = vpop.f32.mrf.mxu0 }
 0x8fd   : > { %v3188_v42 = vrot.slane %v3181_v35, %v8178_v40  ;;  %v3196_v43 = vrot.slane %v6617_v37, %v8178_v40  ;;  %v3204_v32 = vrot.slane %v3197_v39, %v8178_v40  ;;  %v3212_v34 = vrot.slane %v6618_v41, %v8178_v40 }
 0x8ff   : > { %v3213_v45 = vcombine.low %v3188_v42, %v3196_v43  ;;  %v3229_v48 = vcombine.low %v3204_v32, %v3212_v34  ;;  %v3214_v51 = vcombine.high %v3188_v42, %v3196_v43  ;;  %v3230_v52 = vcombine.high %v3204_v32, %v3212_v34  ;;  %v6641_v34 = vld [vmem:[%s9196_s3] ss:$0 sm:$0xff]  ;;  %s9203_s3 = sld [smem:[#allocation47_spill]] }
 0x901   : > { %v3221_v49 = vrot.slane %v3213_v45, %v8181_v47  ;;  %v3237_v50 = vrot.slane %v3229_v48, %v8181_v47  ;;  %v3228_v58 = vrot.slane %v3214_v51, %v8181_v47  ;;  %v3244_v59 = vrot.slane %v3230_v52, %v8181_v47  ;;  %v3951_v48 = vpop.f32.mrf.mxu0 }
 0x902   : > { %v8542_v45 = vadd.f32 %v7002_v24, %v6641_v34 }
 0x903   : > { %v3245_v53 = vcombine.low %v3221_v49, %v3237_v50  ;;  %v3246_v57 = vcombine.high %v3221_v49, %v3237_v50  ;;  %v3247_v61 = vcombine.low %v3228_v58, %v3244_v59  ;;  %v3248_v55 = vcombine.high %v3228_v58, %v3244_v59 }
 0x904   : > { %v8548_v49 = vadd.f32 %v6641_v34, %v3951_v48  ;;  %v8550_v50 = vadd.f32 %v6641_v34, %v3948_v25 }
 0x905   : > { %6951 = vmatmul.mubr.msk.f32.vlgmr.msra.gmra.mxu1 %vm1962_vm2, %v3245_v53 }
 0x906   : > { %6954 = vmatpush3.xpose.msk.msra.mxu1 %vm1962_vm2, %v3323_v54  ;;  %6955 = vmatprep.mubr.msk.f32.mxu1 %vm7762_vm0, %v7761_v0 }
 0x907   : > { %6958 = vmatprep.subr.mxu1 %v7761_v0 }
 0x909   : > { %6956 = vmatmul.mubr.msk.f32.vlgmr.msra.gmra.mxu1 %vm1962_vm2, %v3246_v57 }
 0x90a   : > { %6959 = vmatpush3.xpose.msk.msra.mxu1 %vm1962_vm2, %v3322_v46  ;;  %6960 = vmatprep.mubr.msk.f32.mxu1 %vm7762_vm0, %v7761_v0 }
 0x90b   : > { %6963 = vmatprep.subr.mxu1 %v7761_v0 }
 0x90d   : > { %6961 = vmatmul.mubr.msk.f32.vlgmr.msra.gmra.mxu1 %vm1962_vm2, %v3247_v61 }
 0x90e   : > { %6964 = vmatpush3.xpose.msk.msra.mxu1 %vm1962_vm2, %v3324_v63  ;;  %6965 = vmatprep.mubr.msk.f32.mxu1 %vm7762_vm0, %v7761_v0 }
 0x90f   : > { %6980 = vmatprep.subr.bf16.mxu1 %v7329_v62 }
 0x911   : > { %6966 = vmatmul.mubr.msk.f32.vlgmr.msra.gmra.mxu1 %vm1962_vm2, %v3248_v55 }
 0x912   : > { %6981 = vmatpush3.bf16.msra.mxu1 %v7329_v62  ;;  %6988 = vmatprep.mubr.msk.bf16.mxu1 %vm1465_vm1, %v8414_v7 }
 0x913   : > { %6982 = vmatprep.subr.bf16.mxu1 %v7330_v56 }
 0x916   : > { %6983 = vmatpush3.bf16.msra.mxu1 %v7330_v56 }
 0x917   : > { %6984 = vmatprep.subr.bf16.mxu1 %v7331_v44 }
 0x91a   : > { %6985 = vmatpush3.bf16.msra.mxu1 %v7331_v44 }
 0x91b   : > { %6986 = vmatprep.subr.bf16.mxu1 %v7332_v1 }
 0x91e   : > { %6987 = vmatpush3.bf16.msra.mxu1 %v7332_v1 }
 0x91f   : > { %7004 = vmatprep.subr.mxu1 %v7761_v0 }
 0x921   : > { %6989 = vmatmul.mubr.msk.bf16.vlgmr.msra.gmra.mxu1 %vm1465_vm1, %v8422_v13 }
 0x922   : > { %7010 = vmatprep.mubr.msk.f32.mxu1 %vm7762_vm0, %v7761_v0 }
 0x9c5   : > { %v3397_v2 = vpop.f32.mrf.mxu1 }
 0x9c6   : > { %v3629_v27 = vmul.f32 0.25, %v3397_v2 }
 0x9c7   : > { %v6952_v3 = vpop.f32.mrf.mxu1 }
 0x9c8   : > { %v8525_v30 = vadd.f32 %v6627_v28, %v3629_v27 }
 0x9c9   : > { %v3473_v4 = vpop.f32.mrf.mxu1 }
 0x9ca   : > { %v3630_v31 = vmul.f32 0.25, %v3473_v4  ;;  %v3645_v35 = vsel %vm3644_vm7, %v8525_v30, -inf }
 0x9cb   : > { %v6957_v5 = vpop.f32.mrf.mxu1 }
 0x9cc   : > { %v8531_v39 = vadd.f32 %v6627_v28, %v3630_v31 }
 0x9cd   : > { %v3549_v6 = vpop.f32.mrf.mxu1 }
 0x9ce   : > { %v3631_v29 = vmul.f32 0.25, %v3549_v6  ;;  %v3648_v43 = vsel %vm3644_vm7, %v8531_v39, -inf }
 0x9cf   : > { %v6962_v7 = vpop.f32.mrf.mxu1 }
 0x9d0   : > { %v8529_v37 = vadd.f32 %v6627_v28, %v3631_v29 }
 0x9d1   : > { %v3625_v8 = vpop.f32.mrf.mxu1 }
 0x9d2   : > { %v3632_v33 = vmul.f32 0.25, %v3625_v8  ;;  %v3651_v41 = vsel %vm3644_vm7, %v8529_v37, -inf }
 0x9d3   : > { %v6967_v9 = vpop.f32.mrf.mxu1 }
 0x9d4   : > { %v8535_v42 = vadd.f32 %v6627_v28, %v3632_v33 }
 0x9d6   : > { %v3654_v32 = vsel %vm3644_vm7, %v8535_v42, -inf }
 0x9e1   : > { %v6990_v11 = vpop.f32.mrf.mxu1 }
 0x9e2   : > { %v8479_v12 = vadd.f32 %v6990_v11, %v6634_v10 }
 0x9e3   : > { %v3861_v14 = vpop.f32.mrf.mxu1 }
 0x9e4   : > { %4124 = vrot.lane.b32.xlu1 %v8479_v12, %s7765_s1  ;;  %4115 = vrot.lane.b32.xlu0 %v8479_v12, %s7763_s4  ;;  %v8485_v15 = vadd.f32 %v6634_v10, %v3861_v14 }
 0x9e5   : > { %v6991_v13 = vpop.f32.mrf.mxu1 }
 0x9e7   : > { %v3864_v16 = vpop.f32.mrf.mxu1 }
 0x9e8   : > { %4133 = vrot.lane.b32.xlu0 %v8479_v12, %s9192_s0  ;;  %4120 = vrot.lane.b32.xlu1 %v8485_v15, %s7765_s1  ;;  %v8491_v17 = vadd.f32 %v6634_v10, %v3864_v16 }
 0x9ec   : > { %4113 = vrot.lane.b32.xlu1 %v8491_v17, %s7763_s4  ;;  %4111 = vrot.lane.b32.xlu0 %v8485_v15, %s7763_s4 }
 0x9f0   : > { %4131 = vrot.lane.b32.xlu1 %v8491_v17, %s9192_s0  ;;  %4122 = vrot.lane.b32.xlu0 %v8491_v17, %s7765_s1 }
 0x9f4   : > { %3963 = vrot.lane.b32.xlu1 %v8503_v19, %s7763_s4  ;;  %4129 = vrot.lane.b32.xlu0 %v8485_v15, %s9192_s0 }
 0x9f8   : > { %3969 = vrot.lane.b32.xlu1 %v8503_v19, %s9192_s0  ;;  %3966 = vrot.lane.b32.xlu0 %v8503_v19, %s7765_s1 }
 0x9fc   : > { %5034 = vrot.lane.b32.xlu1 %v5032_v60, %s9195_s10  ;;  %4953 = vrot.lane.b32.xlu0 %v4951_v23, %s7771_s23  ;;  %s9200_s23 = smov 32  }
 0xa1b   : > { %3646 = vmax.xlane.f32.xlu0 %v3645_v35 }
 0xa1f   : > { %3652 = vmax.xlane.f32.xlu0 %v3651_v41 }
 0xa20   : > { %3649 = vmax.xlane.f32.xlu1 %v3648_v43 }
 0xa23   : > { %3655 = vmax.xlane.f32.xlu0 %v3654_v32 }
 0xa31   : > { %5138 = vrot.lane.b32.xlu1 %v8542_v45, %s7765_s1 }
 0xa35   : > { %5147 = vrot.lane.b32.xlu1 %v8542_v45, %s9192_s0 }
 0xa39   : > { %5127 = vrot.lane.b32.xlu1 %v8548_v49, %s7763_s4  ;;  %5129 = vrot.lane.b32.xlu0 %v8542_v45, %s7763_s4 }
 0xa3d   : > { %5134 = vrot.lane.b32.xlu1 %v8550_v50, %s7765_s1  ;;  %5125 = vrot.lane.b32.xlu0 %v8550_v50, %s7763_s4 }
 0xa41   : > { %5143 = vrot.lane.b32.xlu1 %v8550_v50, %s9192_s0  ;;  %5136 = vrot.lane.b32.xlu0 %v8548_v49, %s7765_s1 }
 0xa45   : > { %5145 = vrot.lane.b32.xlu0 %v8548_v49, %s9192_s0 }
 0xa56   : > { %v4125_v51 = vpop.permute.xlu1 %4124  ;;  %v4116_v52 = vpop.permute.xlu0 %4115 }
 0xa57   : > { %v4274_v53 = vcombine.low %v8479_v12, %v4125_v51  ;;  %v4275_v54 = vcombine.high %v8479_v12, %v4125_v51 }
 0xa59   : > { %v4282_v61 = vrot.slane %v4274_v53, %v8178_v40  ;;  %v4289_v62 = vrot.slane %v4275_v54, %v8178_v40 }
 0xa5a   : > { %v4134_v57 = vpop.permute.xlu0 %4133  ;;  %v4121_v58 = vpop.permute.xlu1 %4120 }
 0xa5b   : > { %v4290_v59 = vcombine.low %v4116_v52, %v4134_v57  ;;  %v4291_v46 = vcombine.high %v4116_v52, %v4134_v57  ;;  %v4138_v9 = vcombine.low %v8485_v15, %v4121_v58  ;;  %v4139_v10 = vcombine.high %v8485_v15, %v4121_v58 }
 0xa5d   : > { %v4298_v63 = vrot.slane %v4290_v59, %v8178_v40  ;;  %v4305_v55 = vrot.slane %v4291_v46, %v8178_v40  ;;  %v4146_v35 = vrot.slane %v4138_v9, %v8178_v40  ;;  %v4153_v41 = vrot.slane %v4139_v10, %v8178_v40 }
 0xa5e   : > { %v4114_v56 = vpop.permute.xlu1 %4113  ;;  %v4112_v44 = vpop.permute.xlu0 %4111 }
 0xa5f   : > { %v4306_v1 = vcombine.low %v4282_v61, %v4298_v63  ;;  %v4307_v2 = vcombine.high %v4282_v61, %v4298_v63  ;;  %v4322_v3 = vcombine.low %v4289_v62, %v4305_v55  ;;  %v4323_v4 = vcombine.high %v4289_v62, %v4305_v55 }
 0xa61   : > { %v4314_v5 = vrot.slane %v4306_v1, %v8181_v47  ;;  %v4321_v6 = vrot.slane %v4307_v2, %v8181_v47  ;;  %v4330_v7 = vrot.slane %v4322_v3, %v8181_v47  ;;  %v4337_v8 = vrot.slane %v4323_v4, %v8181_v47 }
 0xa62   : > { %v4132_v11 = vpop.permute.xlu1 %4131  ;;  %v4123_v12 = vpop.permute.xlu0 %4122 }
 0xa63   : > { %v4478_v14 = vcombine.low %v4314_v5, %v4321_v6  ;;  %v6654_v13 = vcombine.high %v4314_v5, %v4321_v6  ;;  %v4494_v16 = vcombine.low %v4330_v7, %v4337_v8  ;;  %v6655_v18 = vcombine.high %v4330_v7, %v4337_v8 }
 0xa64   : > { %v4222_v20 = vcombine.low %v4114_v56, %v4132_v11  ;;  %v4223_v21 = vcombine.high %v4114_v56, %v4132_v11  ;;  %v4206_v60 = vcombine.low %v8491_v17, %v4123_v12  ;;  %v4207_v23 = vcombine.high %v8491_v17, %v4123_v12 }
 0xa65   : > { %v8581_v24 = vrot.slane %v4478_v14, %v8178_v40  ;;  %v8584_v25 = vrot.slane %v6654_v13, %v8178_v40  ;;  %v8587_v15 = vrot.slane %v4494_v16, %v8178_v40  ;;  %v8590_v26 = vrot.slane %v6655_v18, %v8178_v40 }
 0xa66   : > { %v4230_v27 = vrot.slane %v4222_v20, %v8178_v40  ;;  %v4237_v28 = vrot.slane %v4223_v21, %v8178_v40  ;;  %v4214_v29 = vrot.slane %v4206_v60, %v8178_v40  ;;  %v4221_v17 = vrot.slane %v4207_v23, %v8178_v40  ;;  %v3964_v31 = vpop.permute.xlu1 %3963  ;;  %v4130_v33 = vpop.permute.xlu0 %4129 }
 0xa67   : > { %v4510_v51 = vcombine.low %v8581_v24, %v8584_v25  ;;  %v4526_v52 = vcombine.low %v8587_v15, %v8590_v26  ;;  %v4154_v53 = vcombine.low %v4112_v44, %v4130_v33  ;;  %v4155_v54 = vcombine.high %v4112_v44, %v4130_v33 }
 0xa68   : > { %v4238_v43 = vcombine.low %v4214_v29, %v4230_v27  ;;  %v4239_v32 = vcombine.high %v4214_v29, %v4230_v27  ;;  %v4254_v34 = vcombine.low %v4221_v17, %v4237_v28  ;;  %v4255_v48 = vcombine.high %v4221_v17, %v4237_v28 }
 0xa69   : > { %v4162_v62 = vrot.slane %v4154_v53, %v8178_v40  ;;  %v4169_v63 = vrot.slane %v4155_v54, %v8178_v40  ;;  %v4518_v60 = vrot.slane %v4510_v51, %v8181_v47  ;;  %v4534_v23 = vrot.slane %v4526_v52, %v8181_v47 }
 0xa6a   : > { %v4246_v57 = vrot.slane %v4238_v43, %v8181_v47  ;;  %v4253_v58 = vrot.slane %v4239_v32, %v8181_v47  ;;  %v4262_v59 = vrot.slane %v4254_v34, %v8181_v47  ;;  %v4269_v46 = vrot.slane %v4255_v48, %v8181_v47  ;;  %v3970_v61 = vpop.permute.xlu1 %3969  ;;  %v3967_v18 = vpop.permute.xlu0 %3966 }
 0xa6b   : > { %v3988_v55 = vcombine.low %v3964_v31, %v3970_v61  ;;  %v3989_v56 = vcombine.high %v3964_v31, %v3970_v61  ;;  %v4170_v44 = vcombine.low %v4146_v35, %v4162_v62  ;;  %v4171_v5 = vcombine.high %v4146_v35, %v4162_v62 }
 0xa6c   : > { %v4410_v1 = vcombine.low %v4246_v57, %v4253_v58  ;;  %v6652_v2 = vcombine.high %v4246_v57, %v4253_v58  ;;  %v4426_v3 = vcombine.low %v4262_v59, %v4269_v46  ;;  %v6653_v4 = vcombine.high %v4262_v59, %v4269_v46 }
 0xa6d   : > { %v4186_v6 = vcombine.low %v4153_v41, %v4169_v63  ;;  %v4187_v7 = vcombine.high %v4153_v41, %v4169_v63  ;;  %v4178_v12 = vrot.slane %v4170_v44, %v8181_v47  ;;  %v4185_v14 = vrot.slane %v4171_v5, %v8181_v47 }
 0xa6e   : > { %v8609_v8 = vrot.slane %v4410_v1, %v8178_v40  ;;  %v8612_v9 = vrot.slane %v6652_v2, %v8178_v40  ;;  %v8615_v10 = vrot.slane %v4426_v3, %v8178_v40  ;;  %v8618_v11 = vrot.slane %v6653_v4, %v8178_v40 }
 0xa6f   : > { %v4194_v13 = vrot.slane %v4186_v6, %v8181_v47  ;;  %v4201_v16 = vrot.slane %v4187_v7, %v8181_v47  ;;  %v4342_v27 = vcombine.low %v4178_v12, %v4185_v14  ;;  %v6650_v28 = vcombine.high %v4178_v12, %v4185_v14 }
 0xa70   : > { %v4442_v20 = vcombine.low %v8609_v8, %v8612_v9  ;;  %v4458_v21 = vcombine.low %v8615_v10, %v8618_v11  ;;  %v3996_v31 = vrot.slane %v3988_v55, %v8178_v40  ;;  %v4003_v33 = vrot.slane %v3989_v56, %v8178_v40 }
 0xa71   : > { %v4358_v29 = vcombine.low %v4194_v13, %v4201_v16  ;;  %v6651_v17 = vcombine.high %v4194_v13, %v4201_v16  ;;  %v3972_v35 = vcombine.low %v8503_v19, %v3967_v18  ;;  %v3973_v41 = vcombine.high %v8503_v19, %v3967_v18 }
 0xa72   : > { %v8635_v43 = vrot.slane %v4342_v27, %v8178_v40  ;;  %v8638_v32 = vrot.slane %v6650_v28, %v8178_v40  ;;  %v4542_v53 = vcombine.low %v4518_v60, %v4534_v23  ;;  %v4543_v54 = vcombine.high %v4518_v60, %v4534_v23 }
 0xa73   : > { %v8641_v34 = vrot.slane %v4358_v29, %v8178_v40  ;;  %v8644_v48 = vrot.slane %v6651_v17, %v8178_v40  ;;  %v3980_v51 = vrot.slane %v3972_v35, %v8178_v40  ;;  %v3987_v52 = vrot.slane %v3973_v41, %v8178_v40 }
 0xa74   : > { %v4374_v19 = vcombine.low %v8635_v43, %v8638_v32  ;;  %7005 = vmatpush3.xpose.msk.msra.mxu1 %vm1962_vm2, %v4542_v53  ;;  %7014 = vmatpush3.xpose.msk.msra.mxu0 %vm1962_vm2, %v4543_v54  ;;  %v4450_v62 = vrot.slane %v4442_v20, %v8181_v47  ;;  %v4466_v63 = vrot.slane %v4458_v21, %v8181_v47 }
 0xa75   : > { %v4390_v57 = vcombine.low %v8641_v34, %v8644_v48  ;;  %v4004_v58 = vcombine.low %v3980_v51, %v3996_v31  ;;  %v4005_v59 = vcombine.high %v3980_v51, %v3996_v31  ;;  %v4020_v46 = vcombine.low %v3987_v52, %v4003_v33  ;;  %7006 = vmatprep.subr.mxu1 %v7761_v0 }
 0xa76   : > { %v4021_v61 = vcombine.high %v3987_v52, %v4003_v33  ;;  %v4382_v55 = vrot.slane %v4374_v19, %v8181_v47  ;;  %7015 = vmatprep.subr.mxu0 %v7761_v0  ;;  %v4511_v4 = vcombine.high %v8581_v24, %v8584_v25  ;;  %v4474_v44 = vcombine.low %v4450_v62, %v4466_v63 }
 0xa77   : > { %v4012_v56 = vrot.slane %v4004_v58, %v8181_v47  ;;  %v4019_v1 = vrot.slane %v4005_v59, %v8181_v47  ;;  %v4028_v2 = vrot.slane %v4020_v46, %v8181_v47  ;;  %v4475_v5 = vcombine.high %v4450_v62, %v4466_v63  ;;  %v8724_v62 = vpop.permute.xlu1 %5034 }
 0xa78   : > { %v4035_v3 = vrot.slane %v4021_v61, %v8181_v47  ;;  %v4398_v6 = vrot.slane %v4390_v57, %v8181_v47  ;;  %v4527_v16 = vcombine.high %v8587_v15, %v8590_v26  ;;  %7007 = vmatpush3.xpose.msk.msra.mxu1 %vm1962_vm2, %v4474_v44  ;;  %v4443_v15 = vcombine.high %v8609_v8, %v8612_v9  ;;  %v8722_v61 = vpop.permute.xlu0 %4953 }
 0xa79   : > { %v4040_v7 = vcombine.low %v4012_v56, %v4019_v1  ;;  %v6648_v12 = vcombine.high %v4012_v56, %v4019_v1  ;;  %7016 = vmatpush3.xpose.msk.msra.mxu0 %vm1962_vm2, %v4475_v5  ;;  %7008 = vmatprep.subr.mxu1 %v7761_v0  ;;  %v4459_v26 = vcombine.high %v8615_v10, %v8618_v11 }
 0xa7a   : > { %v4056_v14 = vcombine.low %v4028_v2, %v4035_v3  ;;  %v6649_v13 = vcombine.high %v4028_v2, %v4035_v3  ;;  %v4406_v18 = vcombine.low %v4382_v55, %v4398_v6  ;;  %v4407_v20 = vcombine.high %v4382_v55, %v4398_v6  ;;  %7017 = vmatprep.subr.mxu0 %v7761_v0 }
 0xa7b   : > { %v4047_v21 = vrot.slane %v4040_v7, %v8178_v40  ;;  %v4055_v24 = vrot.slane %v6648_v12, %v8178_v40  ;;  %v4525_v28 = vrot.slane %v4511_v4, %v8181_v47  ;;  %v4541_v29 = vrot.slane %v4527_v16, %v8181_v47 }
 0xa7c   : > { %v4063_v25 = vrot.slane %v4056_v14, %v8178_v40  ;;  %v4071_v60 = vrot.slane %v6649_v13, %v8178_v40  ;;  %7009 = vmatpush3.xpose.msk.msra.mxu1 %vm1962_vm2, %v4406_v18  ;;  %v4457_v11 = vrot.slane %v4443_v15, %v8181_v47  ;;  %v4473_v31 = vrot.slane %v4459_v26, %v8181_v47 }
 0xa7d   : > { %v4072_v23 = vcombine.low %v4047_v21, %v4055_v24  ;;  %7018 = vmatpush3.xpose.msk.msra.mxu0 %vm1962_vm2, %v4407_v20  ;;  %7022 = vmatprep.subr.mxu1 %v7761_v0  ;;  %v4375_v33 = vcombine.high %v8635_v43, %v8638_v32  ;;  %v4391_v35 = vcombine.high %v8641_v34, %v8644_v48 }
 0xa7e   : > { %v4088_v27 = vcombine.low %v4063_v25, %v4071_v60  ;;  %7031 = vmatprep.subr.mxu0 %v7761_v0  ;;  %v4544_v41 = vcombine.low %v4525_v28, %v4541_v29  ;;  %v4545_v51 = vcombine.high %v4525_v28, %v4541_v29  ;;  %v4073_v52 = vcombine.high %v4047_v21, %v4055_v24 }
 0xa7f   : > { %v4080_v17 = vrot.slane %v4072_v23, %v8181_v47  ;;  %v4089_v53 = vcombine.high %v4063_v25, %v4071_v60  ;;  %v4476_v43 = vcombine.low %v4457_v11, %v4473_v31  ;;  %v4477_v32 = vcombine.high %v4457_v11, %v4473_v31 }
 0xa80   : > { %v4096_v8 = vrot.slane %v4088_v27, %v8181_v47  ;;  %v4389_v34 = vrot.slane %v4375_v33, %v8181_v47  ;;  %v4405_v48 = vrot.slane %v4391_v35, %v8181_v47  ;;  %v4087_v54 = vrot.slane %v4073_v52, %v8181_v47 }
 0xa81   : > { %v4103_v19 = vrot.slane %v4089_v53, %v8181_v47 }
 0xa82   : > { %v4104_v9 = vcombine.low %v4080_v17, %v4096_v8  ;;  %v4105_v10 = vcombine.high %v4080_v17, %v4096_v8  ;;  %v4408_v57 = vcombine.low %v4389_v34, %v4405_v48  ;;  %v4409_v58 = vcombine.high %v4389_v34, %v4405_v48 }
 0xa83   : > { %v4106_v59 = vcombine.low %v4087_v54, %v4103_v19  ;;  %v4107_v46 = vcombine.high %v4087_v54, %v4103_v19 }
 0xa84   : > { %7011 = vmatmul.mubr.msk.f32.vlgmr.msra.gmra.mxu1 %vm1962_vm2, %v4104_v9  ;;  %7020 = vmatmul.mubr.msk.f32.vlgmr.msra.gmra.mxu0 %vm1962_vm2, %v4105_v10 }
 0xa85   : > { %7023 = vmatpush3.xpose.msk.msra.mxu1 %vm1962_vm2, %v4544_v41  ;;  %7032 = vmatpush3.xpose.msk.msra.mxu0 %vm1962_vm2, %v4545_v51 }
 0xa86   : > { %7024 = vmatprep.subr.mxu1 %v7761_v0  ;;  %7033 = vmatprep.subr.mxu0 %v7761_v0 }
 0xa87   : > { %7028 = vmatprep.mubr.msk.f32.mxu1 %vm7762_vm0, %v7761_v0  ;;  %7037 = vmatprep.mubr.msk.f32.mxu0 %vm7762_vm0, %v7761_v0 }
 0xa89   : > { %7025 = vmatpush3.xpose.msk.msra.mxu1 %vm1962_vm2, %v4476_v43  ;;  %7034 = vmatpush3.xpose.msk.msra.mxu0 %vm1962_vm2, %v4477_v32 }
 0xa8a   : > { %7026 = vmatprep.subr.mxu1 %v7761_v0  ;;  %7035 = vmatprep.subr.mxu0 %v7761_v0 }
 0xa8d   : > { %7027 = vmatpush3.xpose.msk.msra.mxu1 %vm1962_vm2, %v4408_v57  ;;  %7036 = vmatpush3.xpose.msk.msra.mxu0 %vm1962_vm2, %v4409_v58 }
 0xa8e   : > { %7040 = vmatprep.subr.bf16.mxu1 %v7761_v0  ;;  %7056 = vmatprep.subr.bf16.mxu0 %v7761_v0 }
 0xa90   : > { %7029 = vmatmul.mubr.msk.f32.vlgmr.msra.gmra.mxu1 %vm1962_vm2, %v4106_v59  ;;  %7038 = vmatmul.mubr.msk.f32.vlgmr.msra.gmra.mxu0 %vm1962_vm2, %v4107_v46 }
 0xa91   : > { %7044 = vmatprep.mubr.msk.bf16.mxu1 %vm7762_vm0, %v7761_v0  ;;  %7060 = vmatprep.mubr.msk.bf16.mxu0 %vm7762_vm0, %v7761_v0 }
 0xaa4   : > { %v3647_v63 = vpop.xlane.xlu0 %3646 }
 0xaa5   : > { %v3657_v55 = vsub.f32 %v8525_v30, %v3647_v63 }
 0xaa7   : > { %v3661_v56 = vmul.f32 1.442695, %v3657_v55 }
 0xaa8   : > { %v3653_v1 = vpop.xlane.xlu0 %3652 }
 0xaa9   : > { %7371 = vpow2.f32 %v3661_v56  ;;  %v3659_v2 = vsub.f32 %v8529_v37, %v3653_v1  ;;  %v3650_v3 = vpop.xlane.xlu1 %3649 }
 0xaaa   : > { %v3658_v4 = vsub.f32 %v8531_v39, %v3650_v3 }
 0xaab   : > { %v3665_v44 = vmul.f32 1.442695, %v3659_v2 }
 0xaac   : > { %v3663_v5 = vmul.f32 1.442695, %v3658_v4  ;;  %v3656_v6 = vpop.xlane.xlu0 %3655 }
 0xaad   : > { %7373 = vpow2.f32 %v3665_v44  ;;  %v3660_v7 = vsub.f32 %v8535_v42, %v3656_v6  ;;  %v5139_v12 = vpop.permute.xlu1 %5138 }
 0xaae   : > { %7375 = vpow2.f32 %v3663_v5  ;;  %v5288_v14 = vcombine.low %v8542_v45, %v5139_v12  ;;  %v5289_v30 = vcombine.high %v8542_v45, %v5139_v12 }
 0xaaf   : > { %v3667_v13 = vmul.f32 1.442695, %v3660_v7 }
 0xab0   : > { %v5130_v16 = vpop.permute.xlu0 %5129  ;;  %v5296_v37 = vrot.slane %v5288_v14, %v8178_v40  ;;  %v5303_v39 = vrot.slane %v5289_v30, %v8178_v40 }
 0xab1   : > { %7377 = vpow2.f32 %v3667_v13  ;;  %v5148_v18 = vpop.permute.xlu1 %5147 }
 0xab2   : > { %v5304_v20 = vcombine.low %v5130_v16, %v5148_v18  ;;  %v5305_v21 = vcombine.high %v5130_v16, %v5148_v18 }
 0xab4   : > { %v5312_v24 = vrot.slane %v5304_v20, %v8178_v40  ;;  %v5319_v42 = vrot.slane %v5305_v21, %v8178_v40  ;;  %v5126_v25 = vpop.permute.xlu0 %5125 }
 0xab5   : > { %v5128_v60 = vpop.permute.xlu1 %5127 }
 0xab6   : > { %v8736_v15 = vpop.eup %7371  ;;  %v5320_v26 = vcombine.low %v5296_v37, %v5312_v24  ;;  %v5321_v45 = vcombine.high %v5296_v37, %v5312_v24  ;;  %v5336_v23 = vcombine.low %v5303_v39, %v5319_v42  ;;  %v5337_v27 = vcombine.high %v5303_v39, %v5319_v42 }
 0xab7   : > { %v3669_v28 = vsel %vm3644_vm7, %v8736_v15, 0.0 }
 0xab8   : > { %3670 = vadd.xlane.f32.xlu1 %v3669_v28  ;;  %v5328_v29 = vrot.slane %v5320_v26, %v8181_v47  ;;  %v5335_v17 = vrot.slane %v5321_v45, %v8181_v47  ;;  %v5344_v8 = vrot.slane %v5336_v23, %v8181_v47  ;;  %v5351_v9 = vrot.slane %v5337_v27, %v8181_v47  ;;  %v5137_v10 = vpop.permute.xlu0 %5136 }
 0xab9   : > { %v5135_v11 = vpop.permute.xlu1 %5134  ;;  %v5220_v31 = vcombine.low %v8548_v49, %v5137_v10  ;;  %v5221_v33 = vcombine.high %v8548_v49, %v5137_v10 }
 0xaba   : > { %v8746_v35 = vpop.eup %7373  ;;  %v5492_v41 = vcombine.low %v5328_v29, %v5335_v17  ;;  %v6677_v51 = vcombine.high %v5328_v29, %v5335_v17  ;;  %v5508_v52 = vcombine.low %v5344_v8, %v5351_v9  ;;  %v6678_v53 = vcombine.high %v5344_v8, %v5351_v9 }
 0xabb   : > { %v8748_v43 = vpop.eup %7375  ;;  %v3675_v32 = vsel %vm3644_vm7, %v8746_v35, 0.0  ;;  %v5152_v34 = vcombine.low %v8550_v50, %v5135_v11  ;;  %v5153_v48 = vcombine.high %v8550_v50, %v5135_v11  ;;  %v5228_v54 = vrot.slane %v5220_v31, %v8178_v40 }
 0xabc   : > { %3676 = vadd.xlane.f32.xlu1 %v3675_v32  ;;  %v3672_v49 = vsel %vm3644_vm7, %v8748_v43, 0.0  ;;  %v5499_v19 = vrot.slane %v5492_v41, %v8178_v40  ;;  %v5507_v57 = vrot.slane %v6677_v51, %v8178_v40  ;;  %v5515_v58 = vrot.slane %v5508_v52, %v8178_v40  ;;  %v5146_v59 = vpop.permute.xlu0 %5145 }
 0xabd   : > { %3673 = vadd.xlane.f32.xlu0 %v3672_v49  ;;  %v5523_v46 = vrot.slane %v6678_v53, %v8178_v40  ;;  %v5160_v63 = vrot.slane %v5152_v34, %v8178_v40  ;;  %v5167_v50 = vrot.slane %v5153_v48, %v8178_v40  ;;  %v5235_v55 = vrot.slane %v5221_v33, %v8178_v40  ;;  %v5144_v56 = vpop.permute.xlu1 %5143 }
 0xabe   : > { %v8764_v1 = vpop.eup %7377  ;;  %v5168_v2 = vcombine.low %v5126_v25, %v5144_v56  ;;  %v5169_v3 = vcombine.high %v5126_v25, %v5144_v56  ;;  %v5236_v4 = vcombine.low %v5128_v60, %v5146_v59  ;;  %v5237_v44 = vcombine.high %v5128_v60, %v5146_v59 }
 0xabf   : > { %v3678_v5 = vsel %vm3644_vm7, %v8764_v1, 0.0  ;;  %v5524_v6 = vcombine.low %v5499_v19, %v5507_v57  ;;  %v5540_v7 = vcombine.low %v5515_v58, %v5523_v46  ;;  %v5525_v12 = vcombine.high %v5499_v19, %v5507_v57 }
 0xac0   : > { %v5176_v14 = vrot.slane %v5168_v2, %v8178_v40  ;;  %v5183_v30 = vrot.slane %v5169_v3, %v8178_v40  ;;  %v5244_v13 = vrot.slane %v5236_v4, %v8178_v40  ;;  %v5251_v16 = vrot.slane %v5237_v44, %v8178_v40 }
 0xac1   : > { %3679 = vadd.xlane.f32.xlu0 %v3678_v5  ;;  %v5532_v18 = vrot.slane %v5524_v6, %v8181_v47  ;;  %v5548_v37 = vrot.slane %v5540_v7, %v8181_v47  ;;  %v8775_v39 = vrot.slane %v5525_v12, %v8181_v47  ;;  %v5541_v20 = vcombine.high %v5515_v58, %v5523_v46 }
 0xac2   : > { %v5184_v21 = vcombine.low %v5160_v63, %v5176_v14  ;;  %v5185_v24 = vcombine.high %v5160_v63, %v5176_v14  ;;  %v5200_v42 = vcombine.low %v5167_v50, %v5183_v30  ;;  %v5201_v25 = vcombine.high %v5167_v50, %v5183_v30 }
 0xac3   : > { %v5252_v60 = vcombine.low %v5228_v54, %v5244_v13  ;;  %v5253_v26 = vcombine.high %v5228_v54, %v5244_v13  ;;  %v5268_v45 = vcombine.low %v5235_v55, %v5251_v16  ;;  %v5269_v23 = vcombine.high %v5235_v55, %v5251_v16 }
 0xac4   : > { %v5192_v27 = vrot.slane %v5184_v21, %v8181_v47  ;;  %v5199_v28 = vrot.slane %v5185_v24, %v8181_v47  ;;  %v5208_v29 = vrot.slane %v5200_v42, %v8181_v47  ;;  %v5215_v17 = vrot.slane %v5201_v25, %v8181_v47 }
 0xac5   : > { %v5260_v8 = vrot.slane %v5252_v60, %v8181_v47  ;;  %v5267_v9 = vrot.slane %v5253_v26, %v8181_v47  ;;  %v5276_v10 = vrot.slane %v5268_v45, %v8181_v47  ;;  %v5283_v11 = vrot.slane %v5269_v23, %v8181_v47 }
 0xac6   : > { %v5356_v31 = vcombine.low %v5192_v27, %v5199_v28  ;;  %v6673_v33 = vcombine.high %v5192_v27, %v5199_v28  ;;  %v5372_v41 = vcombine.low %v5208_v29, %v5215_v17  ;;  %v6674_v51 = vcombine.high %v5208_v29, %v5215_v17 }
 0xac7   : > { %v5424_v52 = vcombine.low %v5260_v8, %v5267_v9  ;;  %v6675_v53 = vcombine.high %v5260_v8, %v5267_v9  ;;  %v5440_v32 = vcombine.low %v5276_v10, %v5283_v11  ;;  %v6676_v34 = vcombine.high %v5276_v10, %v5283_v11 }
 0xac8   : > { %v5363_v48 = vrot.slane %v5356_v31, %v8178_v40  ;;  %v5371_v54 = vrot.slane %v6673_v33, %v8178_v40  ;;  %v5379_v49 = vrot.slane %v5372_v41, %v8178_v40  ;;  %v5387_v19 = vrot.slane %v6674_v51, %v8178_v40 }
 0xac9   : > { %v5431_v57 = vrot.slane %v5424_v52, %v8178_v40  ;;  %v5439_v58 = vrot.slane %v6675_v53, %v8178_v40  ;;  %v5447_v59 = vrot.slane %v5440_v32, %v8178_v40  ;;  %v5455_v46 = vrot.slane %v6676_v34, %v8178_v40 }
 0xaca   : > { %v5556_v63 = vcombine.low %v5532_v18, %v5548_v37  ;;  %v5555_v50 = vrot.slane %v5541_v20, %v8181_v47  ;;  %v5388_v55 = vcombine.low %v5363_v48, %v5371_v54  ;;  %v5404_v56 = vcombine.low %v5379_v49, %v5387_v19 }
 0xacb   : > { %v5456_v2 = vcombine.low %v5431_v57, %v5439_v58  ;;  %v5472_v3 = vcombine.low %v5447_v59, %v5455_v46  ;;  %v5389_v4 = vcombine.high %v5363_v48, %v5371_v54  ;;  %v5405_v44 = vcombine.high %v5379_v49, %v5387_v19 }
 0xacc   : > { %v5561_v5 = vpack.c.bf16 %v5556_v63, %v5556_v63  ;;  %v5558_v6 = vcombine.low %v8775_v39, %v5555_v50  ;;  %v5396_v7 = vrot.slane %v5388_v55, %v8181_v47  ;;  %v5412_v12 = vrot.slane %v5404_v56, %v8181_v47 }
 0xacd   : > { %v5464_v14 = vrot.slane %v5456_v2, %v8181_v47  ;;  %v5480_v30 = vrot.slane %v5472_v3, %v8181_v47  ;;  %v5403_v13 = vrot.slane %v5389_v4, %v8181_v47  ;;  %v5419_v16 = vrot.slane %v5405_v44, %v8181_v47 }
 0xace   : > { %v5573_v20 = vsel %vm2487_vm4, %v5561_v5, 0  ;;  %v5565_v21 = vpack.c.bf16 %v5558_v6, %v5558_v6  ;;  %v5420_v24 = vcombine.low %v5396_v7, %v5412_v12  ;;  %v5457_v42 = vcombine.high %v5431_v57, %v5439_v58 }
 0xacf   : > { %7041 = vmatpush3.bf16.msra.mxu1 %v5573_v20  ;;  %v5488_v25 = vcombine.low %v5464_v14, %v5480_v30  ;;  %v5473_v60 = vcombine.high %v5447_v59, %v5455_v46  ;;  %v8802_v26 = vcombine.high %v5532_v18, %v5548_v37  ;;  %v5422_v28 = vcombine.low %v5403_v13, %v5419_v16 }
 0xad0   : > { %v5665_v45 = vsel %vm2487_vm4, %v5565_v21, 0  ;;  %7042 = vmatprep.subr.bf16.mxu1 %v7761_v0  ;;  %v5471_v23 = vrot.slane %v5457_v42, %v8181_v47  ;;  %v5421_v17 = vcombine.high %v5396_v7, %v5412_v12  ;;  %v5489_v8 = vcombine.high %v5464_v14, %v5480_v30 }
 0xad1   : > { %7057 = vmatpush3.bf16.msra.mxu0 %v5665_v45  ;;  %v5560_v27 = vpack.c.bf16 %v5488_v25, %v5420_v24  ;;  %v5487_v29 = vrot.slane %v5473_v60, %v8181_v47  ;;  %v8810_v9 = vcombine.high %v8775_v39, %v5555_v50  ;;  %v5423_v18 = vcombine.high %v5403_v13, %v5419_v16 }
 0xad2   : > { %7058 = vmatprep.subr.bf16.mxu0 %v7761_v0  ;;  %v8813_v11 = vpack.c.bf16 %v5489_v8, %v5421_v17  ;;  %v4889_v51 = vsub.s32 0, %v8175_v36 }
 0xad3   : > { %7043 = vmatpush3.bf16.msra.mxu1 %v5560_v27  ;;  %v5490_v37 = vcombine.low %v5471_v23, %v5487_v29  ;;  %v5491_v10 = vcombine.high %v5471_v23, %v5487_v29 }
 0xad4   : > { %7048 = vmatprep.subr.bf16.mxu1 %v7761_v0  ;;  %v4890_v57 = vrot.slane %v8514_v22, %v4889_v51 }
 0xad5   : > { %v5564_v31 = vpack.c.bf16 %v5490_v37, %v5422_v28  ;;  %v8815_v33 = vpack.c.bf16 %v5491_v10, %v5423_v18 }
 0xad7   : > { %7059 = vmatpush3.bf16.msra.mxu0 %v5564_v31 }
 0xad8   : > { %7072 = vmatprep.subr.bf16.mxu0 %v7761_v0 }
 0xb41   : > { %v3671_v41 = vpop.xlane.xlu1 %3670 }
 0xb42   : > { %7379 = vrcp.f32 %v3671_v41 }
 0xb44   : > { %v4624_v52 = vpop.f32.mrf.mxu1  ;;  %v4706_v39 = vpop.f32.mrf.mxu0 }
 0xb45   : > { %v4874_v53 = vmul.f32 0.25, %v4624_v52  ;;  %v4875_v32 = vmul.f32 0.25, %v4706_v39  ;;  %v8864_v29 = vpop.xlane.xlu1 %3676 }
 0xb46   : > { %v7012_v34 = vpop.f32.mrf.mxu1  ;;  %v7021_v48 = vpop.f32.mrf.mxu0 }
 0xb47   : > { %v4956_v54 = vadd.f32 %v8722_v61, %v4874_v53  ;;  %v5037_v49 = vadd.f32 %v8724_v62, %v4874_v53  ;;  %v3674_v19 = vpop.xlane.xlu0 %3673  ;;  %v4957_v59 = vadd.f32 %v8722_v61, %v4875_v32  ;;  %v5038_v46 = vadd.f32 %v8724_v62, %v4875_v32 }
 0xb48   : > { %7381 = vrcp.f32 %v3674_v19  ;;  %v8828_v55 = vadd.f32 %v4890_v57, %v4874_v53  ;;  %v8830_v56 = vadd.f32 %v4890_v57, %v4875_v32 }
 0xb49   : > { %v4961_v58 = vsel %vm4960_vm8, %v4956_v54, -inf  ;;  %v5042_v36 = vsel %vm5041_vm9, %v5037_v49, -inf  ;;  %v4964_v63 = vsel %vm4960_vm8, %v4957_v59, -inf  ;;  %v5045_v50 = vsel %vm5041_vm9, %v5038_v46, -inf }
 0xb4a   : > { %4962 = vmax.xlane.f32.xlu1 %v4961_v58  ;;  %5043 = vmax.xlane.f32.xlu0 %v5042_v36  ;;  %v4895_v5 = vsel %vm2285_vm3, %v8828_v55, -inf  ;;  %v4898_v6 = vsel %vm2285_vm3, %v8830_v56, -inf }
 0xb4b   : > { %v8866_v17 = vpop.xlane.xlu0 %3679 }
 0xb4e   : > { %4965 = vmax.xlane.f32.xlu1 %v4964_v63  ;;  %5046 = vmax.xlane.f32.xlu0 %v5045_v50 }
 0xb4f   : > { %v7380_v3 = vpop.eup %7379 }
 0xb50   : > { %v4788_v22 = vpop.f32.mrf.mxu1  ;;  %v4870_v2 = vpop.f32.mrf.mxu0  ;;  %v3685_v13 = vmul.f32 %v7380_v3, %v8736_v15 }
 0xb51   : > { %v4876_v4 = vmul.f32 0.25, %v4788_v22  ;;  %v4877_v44 = vmul.f32 0.25, %v4870_v2  ;;  %v7773_v22 = vmov 1  }
 0xb52   : > { %v7030_v7 = vpop.f32.mrf.mxu1  ;;  %v7039_v12 = vpop.f32.mrf.mxu0  ;;  %4896 = vmax.xlane.f32.xlu1 %v4895_v5  ;;  %4899 = vmax.xlane.f32.xlu0 %v4898_v6 }
 0xb53   : > { %v8837_v14 = vadd.f32 %v8722_v61, %v4876_v4  ;;  %v4959_v30 = vadd.f32 %v8722_v61, %v4877_v44  ;;  %v8845_v24 = vadd.f32 %v8724_v62, %v4876_v4  ;;  %v5040_v42 = vadd.f32 %v8724_v62, %v4877_v44  ;;  %7298 = vset.pattern.permute.xlu1 %v7773_v22 }
 0xb54   : > { %v8849_v60 = vadd.f32 %v4890_v57, %v4876_v4  ;;  %v3689_v61 = vsel %vm3644_vm7, %v3685_v13, 0.0  ;;  %v8856_v27 = vadd.f32 %v4890_v57, %v4877_v44 }
 0xb55   : > { %v7382_v16 = vpop.eup %7381  ;;  %v4967_v20 = vsel %vm4960_vm8, %v8837_v14, -inf  ;;  %v4970_v21 = vsel %vm4960_vm8, %v4959_v30, -inf  ;;  %v5048_v45 = vsel %vm5041_vm9, %v8845_v24, -inf  ;;  %v5051_v23 = vsel %vm5041_vm9, %v5040_v42, -inf }
 0xb56   : > { %v3686_v25 = vmul.f32 %v7382_v16, %v8748_v43  ;;  %4968 = vmax.xlane.f32.xlu1 %v4967_v20  ;;  %4971 = vmax.xlane.f32.xlu0 %v4970_v21  ;;  %v4901_v62 = vsel %vm2285_vm3, %v8849_v60, -inf  ;;  %v4904_v43 = vsel %vm2285_vm3, %v8856_v27, -inf }
 0xb58   : > { %v3690_v15 = vsel %vm3644_vm7, %v3686_v25, 0.0 }
 0xb59   : > { %v8858_v28 = vadd.f32 %v3690_v15, %v3689_v61 }
 0xb5a   : > { %5049 = vmax.xlane.f32.xlu1 %v5048_v45  ;;  %5052 = vmax.xlane.f32.xlu0 %v5051_v23 }
 0xb5e   : > { %4902 = vmax.xlane.f32.xlu1 %v4901_v62  ;;  %4905 = vmax.xlane.f32.xlu0 %v4904_v43 }
 0xbd3   : > { %v4963_v8 = vpop.xlane.xlu1 %4962  ;;  %v5044_v18 = vpop.xlane.xlu0 %5043 }
 0xbd4   : > { %v4973_v37 = vsub.f32 %v4956_v54, %v4963_v8  ;;  %v5054_v10 = vsub.f32 %v5037_v49, %v5044_v18  ;;  %v7774_v18 = vmov 0  }
 0xbd5   : > { %7297 = vset.pattern.permute.xlu0 %v7774_v18 }
 0xbd6   : > { %v4977_v31 = vmul.f32 1.442695, %v4973_v37  ;;  %v5058_v41 = vmul.f32 1.442695, %v5054_v10 }
 0xbd7   : > { %v4966_v51 = vpop.xlane.xlu1 %4965  ;;  %v5047_v52 = vpop.xlane.xlu0 %5046 }
 0xbd8   : > { %7383 = vpow2.f32 %v4977_v31  ;;  %v4974_v39 = vsub.f32 %v4957_v59, %v4966_v51  ;;  %v5055_v53 = vsub.f32 %v5038_v46, %v5047_v52 }
 0xbd9   : > { %7385 = vpow2.f32 %v5058_v41 }
 0xbda   : > { %v4979_v32 = vmul.f32 1.442695, %v4974_v39  ;;  %v5060_v48 = vmul.f32 1.442695, %v5055_v53 }
 0xbdb   : > { %v4900_v34 = vpop.xlane.xlu0 %4899  ;;  %v4897_v46 = vpop.xlane.xlu1 %4896 }
 0xbdc   : > { %7387 = vpow2.f32 %v4979_v32  ;;  %v4907_v3 = vsub.f32 %v8828_v55, %v4897_v46  ;;  %v4908_v44 = vsub.f32 %v8830_v56, %v4900_v34 }
 0xbdd   : > { %7389 = vpow2.f32 %v5060_v48 }
 0xbde   : > { %v4911_v4 = vmul.f32 1.442695, %v4907_v3  ;;  %v4913_v7 = vmul.f32 1.442695, %v4908_v44 }
 0xbdf   : > { %v4972_v19 = vpop.xlane.xlu0 %4971  ;;  %v4969_v6 = vpop.xlane.xlu1 %4968 }
 0xbe0   : > { %v4976_v57 = vsub.f32 %v4959_v30, %v4972_v19  ;;  %v4975_v25 = vsub.f32 %v8837_v14, %v4969_v6 }
 0xbe2   : > { %v4983_v58 = vmul.f32 1.442695, %v4976_v57  ;;  %v4981_v61 = vmul.f32 1.442695, %v4975_v25 }
 0xbe3   : > { %v5053_v36 = vpop.xlane.xlu0 %5052  ;;  %v5050_v55 = vpop.xlane.xlu1 %5049 }
 0xbe4   : > { %v5057_v63 = vsub.f32 %v5040_v42, %v5053_v36  ;;  %7391 = vpow2.f32 %v4983_v58  ;;  %v5056_v15 = vsub.f32 %v8845_v24, %v5050_v55 }
 0xbe5   : > { %v8868_v54 = vpop.eup %7383 }
 0xbe6   : > { %v8870_v49 = vpop.eup %7385  ;;  %v5064_v50 = vmul.f32 1.442695, %v5057_v63  ;;  %4989 = vrot.lane.b32.xlu1 %v8868_v54, %s7772_s5  ;;  %v5062_v45 = vmul.f32 1.442695, %v5056_v15 }
 0xbe7   : > { %5070 = vrot.lane.b32.xlu0 %v8870_v49, %s7763_s4  ;;  %v4903_v30 = vpop.xlane.xlu1 %4902  ;;  %v4906_v24 = vpop.xlane.xlu0 %4905 }
 0xbe8   : > { %7393 = vpow2.f32 %v5064_v50  ;;  %v4909_v56 = vsub.f32 %v8849_v60, %v4903_v30  ;;  %v4910_v43 = vsub.f32 %v8856_v27, %v4906_v24 }
 0xbe9   : > { %v8876_v59 = vpop.eup %7387  ;;  %7395 = vpow2.f32 %v4911_v4 }
 0xbea   : > { %4991 = vrot.lane.b32.xlu1 %v8876_v59, %s7772_s5  ;;  %v8880_v2 = vpop.eup %7389  ;;  %7397 = vpow2.f32 %v4913_v7  ;;  %v4915_v21 = vmul.f32 1.442695, %v4909_v56  ;;  %v4917_v8 = vmul.f32 1.442695, %v4910_v43 }
 0xbec   : > { %7399 = vpow2.f32 %v4915_v21 }
 0xbed   : > { %7401 = vpow2.f32 %v4981_v61 }
 0xbee   : > { %5072 = vrot.lane.b32.xlu1 %v8880_v2, %s7763_s4  ;;  %7403 = vpow2.f32 %v5062_v45 }
 0xbef   : > { %7405 = vpow2.f32 %v4917_v8 }
 0xbf0   : > { %7407 = vrcp.f32 %v8864_v29 }
 0xbf1   : > { %v8886_v5 = vpop.eup %7391  ;;  %7409 = vrcp.f32 %v8866_v17 }
 0xbf2   : > { %4995 = vrot.lane.b32.xlu1 %v8886_v5, %s7772_s5 }
 0xbf5   : > { %v8890_v12 = vpop.eup %7393 }
 0xbf6   : > { %5076 = vrot.lane.b32.xlu1 %v8890_v12, %s7763_s4  ;;  %v8894_v13 = vpop.eup %7395 }
 0xbf7   : > { %v4919_v16 = vsel %vm2285_vm3, %v8894_v13, 0.0  ;;  %v8899_v20 = vpop.eup %7397 }
 0xbf8   : > { %v4922_v42 = vsel %vm2285_vm3, %v8899_v20, 0.0 }
 0xbf9   : > { %v8905_v60 = vpop.eup %7399 }
 0xbfa   : > { %v4925_v23 = vsel %vm2285_vm3, %v8905_v60, 0.0  ;;  %v8909_v62 = vpop.eup %7401 }
 0xbfb   : > { %v8913_v14 = vpop.eup %7403 }
 0xbfc   : > { %v8918_v37 = vpop.eup %7405 }
 0xbfd   : > { %v4928_v10 = vsel %vm2285_vm3, %v8918_v37, 0.0  ;;  %v7408_v29 = vpop.eup %7407 }
 0xbfe   : > { %v7410_v17 = vpop.eup %7409  ;;  %v3687_v34 = vmul.f32 %v7408_v29, %v8746_v35  ;;  %v7775_v35 = vmov 2  }
 0xbff   : > { %v3688_v57 = vmul.f32 %v7410_v17, %v8764_v1 }
 0xc00   : > { %v3692_v58 = vsel %vm3644_vm7, %v3687_v34, 0.0 }
 0xc01   : > { %v3693_v36 = vadd.f32 %v3692_v58, %v8858_v28  ;;  %v3694_v63 = vsel %vm3644_vm7, %v3688_v57, 0.0 }
 0xc03   : > { %v3695_v50 = vadd.f32 %v3694_v63, %v3693_v36 }
 0xc05   : > { %v3697_v46 = vmul.f32 0.25, %v3695_v50 }
 0xc06   : > { %4920 = vadd.xlane.f32.xlu0 %v4919_v16 }
 0xc0a   : > { %4923 = vadd.xlane.f32.xlu0 %v4922_v42 }
 0xc1a   : > { %4926 = vadd.xlane.f32.xlu1 %v4925_v23 }
 0xc20   : > { %4993 = vrot.lane.b32.xlu0 %v8909_v62, %s7772_s5  ;;  %s9204_s5 = sld [smem:[#allocation50_spill]] }
 0xc24   : > { %5074 = vrot.lane.b32.xlu0 %v8913_v14, %s7763_s4  ;;  %s9197_s4 = sld [smem:[#allocation26_spill]] }
 0xc2a   : > { %s1420_s1 = scalar_lea.vmem %s9197_s4, %s8120_s22  ;;  %s9198_s22 = sld [smem:[#allocation42_spill]] }
 0xc2b   : > { %v6672_v22 = vld [vmem:[%s1420_s1] ss:$0 sm:$0xff]  ;;  %s9205_s4 = sld [smem:[#allocation48_spill]]  ;;  %s1381_s1 = sand.u32 1, %s9204_s5  }
 0xc2c   : > { %v8936_v3 = vmul.f32 %v6672_v22, %v3697_v46  ;;  %s6249_s6 = scalar_lea.sflag [#allocation4], %s1381_s1  ;;  %s7776_s5 = smov [#allocation14]  }
 0xc2d   : > { %s7625_s8 = sshll.u32 %s7776_s5, 4  ;;  %s7626_s8 = int_to_ptr.vmem [resolvable:$false] %s7625_s8 }
 0xc2e   : > { %s7627_s9 = scalar_lea.vmem %s7626_s8, 256 }
 0xc30   : > { %s9199_s0 = smov %s9198_s22 }
 0xc43   : > { %4929 = vadd.xlane.f32.xlu0 %v4928_v10 }
 0xc58   : > { %v4990_v31 = vpop.permute.xlu1 %4989 }
 0xc59   : > { %v5071_v41 = vpop.permute.xlu0 %5070  ;;  %v5001_v51 = vsel %vm2285_vm3, %v4990_v31, 0.0 }
 0xc5a   : > { %5002 = vadd.xlane.f32.xlu1 %v5001_v51  ;;  %v5082_v27 = vsel %vm2285_vm3, %v5071_v41, 0.0 }
 0xc5b   : > { %5083 = vadd.xlane.f32.xlu0 %v5082_v27 }
 0xc5c   : > { %v4992_v52 = vpop.permute.xlu1 %4991 }
 0xc5d   : > { %v5004_v39 = vsel %vm2285_vm3, %v4992_v52, 0.0 }
 0xc5e   : > { %5005 = vadd.xlane.f32.xlu1 %v5004_v39 }
 0xc60   : > { %v5073_v53 = vpop.permute.xlu1 %5072 }
 0xc61   : > { %v5085_v32 = vsel %vm2285_vm3, %v5073_v53, 0.0 }
 0xc62   : > { %5086 = vadd.xlane.f32.xlu0 %v5085_v32 }
 0xc64   : > { %v4996_v48 = vpop.permute.xlu1 %4995 }
 0xc65   : > { %v5010_v19 = vsel %vm2285_vm3, %v4996_v48, 0.0 }
 0xc66   : > { %5011 = vadd.xlane.f32.xlu1 %v5010_v19 }
 0xc68   : > { %v5077_v1 = vpop.permute.xlu1 %5076 }
 0xc69   : > { %v5091_v55 = vsel %vm2285_vm3, %v5077_v1, 0.0 }
 0xc77   : > { %5022 = vperm.xlu1 %7298, %v8936_v3  }
 0xc7b   : > { %7299 = vset.pattern.permute.xlu1 %v7775_v35 }
 0xc8f   : > { %v4921_v4 = vpop.xlane.xlu0 %4920 }
 0xc93   : > { %v4924_v44 = vpop.xlane.xlu0 %4923 }
 0xc97   : > { %v4994_v6 = vpop.permute.xlu0 %4993 }
 0xc98   : > { %v5007_v7 = vsel %vm2285_vm3, %v4994_v6, 0.0 }
 0xc99   : > { %5008 = vadd.xlane.f32.xlu0 %v5007_v7 }
 0xc9b   : > { %v5075_v28 = vpop.permute.xlu0 %5074  ;;  %5092 = vadd.xlane.f32.xlu1 %v5091_v55 }
 0xc9c   : > { %v5088_v30 = vsel %vm2285_vm3, %v5075_v28, 0.0 }
 0xc9d   : > { %5089 = vadd.xlane.f32.xlu0 %v5088_v30 }
 0xca3   : > { %v4927_v56 = vpop.xlane.xlu1 %4926 }
 0xcac   : > { %5103 = vperm.xlu1 %7299, %v8936_v3  }
 0xcb3   : > { %4941 = vperm.xlu0 %7297, %v8936_v3  }
 0xcb7   : > { %7300 = vset.pattern.permute.xlu0 %v7775_v35 }
 0xccc   : > { %v4930_v21 = vpop.xlane.xlu0 %4929 }
 0xce3   : > { %v5003_v16 = vpop.xlane.xlu1 %5002 }
 0xce4   : > { %v5084_v25 = vpop.xlane.xlu0 %5083  ;;  %7411 = vrcp.f32 %v5003_v16 }
 0xce5   : > { %7413 = vrcp.f32 %v4921_v4 }
 0xce6   : > { %7415 = vrcp.f32 %v4924_v44 }
 0xce7   : > { %v5006_v42 = vpop.xlane.xlu1 %5005  ;;  %7417 = vrcp.f32 %v5084_v25 }
 0xce8   : > { %7419 = vrcp.f32 %v5006_v42 }
 0xce9   : > { %7421 = vrcp.f32 %v4927_v56 }
 0xceb   : > { %v5087_v15 = vpop.xlane.xlu0 %5086 }
 0xcef   : > { %v5012_v61 = vpop.xlane.xlu1 %5011 }
 0xcf1   : > { %v7412_v8 = vpop.eup %7411 }
 0xcf2   : > { %v7414_v18 = vpop.eup %7413  ;;  %v5017_v41 = vmul.f32 %v7412_v8, %v8868_v54 }
 0xcf3   : > { %v8944_v45 = vpop.permute.xlu1 %5022  ;;  %v7416_v10 = vpop.eup %7415  ;;  %v4935_v52 = vmul.f32 %v7414_v18, %v8894_v13 }
 0xcf4   : > { %v7418_v31 = vpop.eup %7417  ;;  %v5025_v17 = vmul.f32 %v8944_v45, %v5017_v41  ;;  %v4936_v34 = vmul.f32 %v7416_v10, %v8899_v20 }
 0xcf5   : > { %v7420_v51 = vpop.eup %7419  ;;  %v5098_v39 = vmul.f32 %v7418_v31, %v8870_v49  ;;  %v5563_v49 = vpack.c.bf16 %v8802_v26, %v8802_v26 }
 0xcf6   : > { %v7422_v32 = vpop.eup %7421  ;;  %v5018_v29 = vmul.f32 %v7420_v51, %v8876_v59 }
 0xcf7   : > { %v4937_v35 = vmul.f32 %v7422_v32, %v8905_v60  ;;  %v5619_v26 = vsel %vm2487_vm4, %v5563_v49, 0 }
 0xcf8   : > { %v5026_v50 = vmul.f32 %v8944_v45, %v5018_v29 }
 0xd22   : > { %v5009_v23 = vpop.xlane.xlu0 %5008 }
 0xd23   : > { %7423 = vrcp.f32 %v5009_v23 }
 0xd24   : > { %7425 = vrcp.f32 %v5087_v15  ;;  %v5093_v24 = vpop.xlane.xlu1 %5092 }
 0xd25   : > { %7427 = vrcp.f32 %v4930_v21  ;;  %v5567_v21 = vpack.c.bf16 %v8810_v9, %v8810_v9 }
 0xd26   : > { %v5090_v43 = vpop.xlane.xlu0 %5089 }
 0xd27   : > { %7429 = vrcp.f32 %v5090_v43 }
 0xd28   : > { %7431 = vrcp.f32 %v5093_v24  ;;  %v5104_v27 = vpop.permute.xlu1 %5103 }
 0xd29   : > { %7433 = vrcp.f32 %v5012_v61  ;;  %v5106_v57 = vmul.f32 %v5104_v27, %v5098_v39 }
 0xd2e   : > { %v4942_v53 = vpop.permute.xlu0 %4941 }
 0xd2f   : > { %v4944_v48 = vmul.f32 %v4942_v53, %v4935_v52  ;;  %v4945_v36 = vmul.f32 %v4942_v53, %v4936_v34  ;;  %v4946_v28 = vmul.f32 %v4942_v53, %v4937_v35 }
 0xd30   : > { %v7424_v19 = vpop.eup %7423 }
 0xd31   : > { %v7426_v58 = vpop.eup %7425  ;;  %v5019_v54 = vmul.f32 %v7424_v19, %v8909_v62  ;;  %v5110_v63 = vsel %vm2285_vm3, %v4944_v48, %v5025_v17  ;;  %v5111_v6 = vsel %vm2285_vm3, %v4945_v36, %v5026_v50  ;;  %v7338_v50 = vld [vmem:[%s9199_s0 + $0x10] sm:$0xff]  }
 0xd32   : > { %v5114_v13 = vsel %vm1962_vm2, %v5110_v63, %v5106_v57  ;;  %v7428_v59 = vpop.eup %7427  ;;  %v5099_v22 = vmul.f32 %v7426_v58, %v8880_v2 }
 0xd33   : > { %v5118_v46 = vpack.c.bf16 %v5114_v13, %v5114_v13  ;;  %v5027_v62 = vmul.f32 %v8944_v45, %v5019_v54  ;;  %v4938_v56 = vmul.f32 %v7428_v59, %v8918_v37  ;;  %v5711_v37 = vsel %vm2487_vm4, %v5567_v21, 0  ;;  %v7340_v21 = vld [vmem:[%s9199_s0] sm:$0xff]  }
 0xd34   : > { %v7430_v20 = vpop.eup %7429  ;;  %v5107_v7 = vmul.f32 %v5104_v27, %v5099_v22 }
 0xd35   : > { %v7432_v4 = vpop.eup %7431  ;;  %v5100_v44 = vmul.f32 %v7430_v20, %v8913_v14  ;;  %7045 = vmatmul.mubr.msk.bf16.vlgmr.msra.gmra.mxu1 %vm5568_vm10, %v5118_v46  ;;  %v5112_v14 = vsel %vm2285_vm3, %v4946_v28, %v5027_v62  ;;  %v4947_v25 = vmul.f32 %v4942_v53, %v4938_v56 }
 0xd36   : > { %v7434_v1 = vpop.eup %7433  ;;  %7049 = vmatpush3.bf16.msra.mxu1 %v5619_v26  ;;  %7052 = vmatprep.mubr.msk.bf16.mxu1 %vm7762_vm0, %v7761_v0  ;;  %v5101_v60 = vmul.f32 %v7432_v4, %v8890_v12  ;;  %v5115_v55 = vsel %vm1962_vm2, %v5111_v6, %v5107_v7  ;;  %v7339_v26 = vld [vmem:[%s9199_s0 + $0x8] sm:$0xff]  }
 0xd37   : > { %v5108_v2 = vmul.f32 %v5104_v27, %v5100_v44  ;;  %7050 = vmatprep.subr.bf16.mxu1 %v7761_v0  ;;  %v5020_v30 = vmul.f32 %v7434_v1, %v8886_v5  ;;  %v5119_v12 = vpack.c.bf16 %v5115_v55, %v5115_v55 }
 0xd38   : > { %v5109_v61 = vmul.f32 %v5104_v27, %v5101_v60 }
 0xd39   : > { %v5116_v16 = vsel %vm1962_vm2, %v5112_v14, %v5108_v2  ;;  %v5028_v5 = vmul.f32 %v8944_v45, %v5020_v30  ;;  %v7337_v45 = vld [vmem:[%s9198_s22 + $0x18] sm:$0xff]   ;;  %s6552_s22 = sshll.u32 %s1381_s1, 3 }
 0xd3a   : > { %7051 = vmatpush3.bf16.msra.mxu1 %v8813_v11  ;;  %v5120_v42 = vpack.c.bf16 %v5116_v16, %v5116_v16 }
 0xd3b   : > { %7064 = vmatprep.subr.bf16.mxu1 %v7761_v0  ;;  %v5113_v9 = vsel %vm2285_vm3, %v4947_v25, %v5028_v5 }
 0xd3c   : > { %7061 = vmatmul.mubr.msk.bf16.vlgmr.msra.gmra.mxu0 %vm5568_vm10, %v5120_v42  ;;  %v5117_v11 = vsel %vm1962_vm2, %v5113_v9, %v5109_v61 }
 0xd3d   : > { %7053 = vmatmul.mubr.msk.bf16.vlgmr.msra.gmra.mxu1 %vm5568_vm10, %v5119_v12  ;;  %7080 = vmatprep.mubr.msk.bf16.mxu0 %vm7762_vm0, %v7761_v0  ;;  %v5121_v15 = vpack.c.bf16 %v5117_v11, %v5117_v11 }
 0xd3e   : > { %7065 = vmatpush3.bf16.msra.mxu1 %v5711_v37  ;;  %7068 = vmatprep.mubr.msk.bf16.mxu1 %vm7762_vm0, %v7761_v0  ;;  %v5904_v37 = vsel %vm3644_vm7, %v8936_v3, 0.0 }
 0xd3f   : > { %7066 = vmatprep.subr.bf16.mxu1 %v7761_v0  ;;  %7073 = vmatpush3.bf16.msra.mxu0 %v7337_v45 }
 0xd40   : > { %7074 = vmatprep.subr.bf16.mxu0 %v7761_v0 }
 0xd42   : > { %7067 = vmatpush3.bf16.msra.mxu1 %v8815_v33 }
 0xd43   : > { %7084 = vmatprep.subr.bf16.mxu1 %v7761_v0  ;;  %7075 = vmatpush3.bf16.msra.mxu0 %v7338_v50 }
 0xd44   : > { %7076 = vmatprep.subr.bf16.mxu0 %v7761_v0 }
 0xd45   : > { %7069 = vmatmul.mubr.msk.bf16.vlgmr.msra.gmra.mxu1 %vm5568_vm10, %v5121_v15 }
 0xd46   : > { %7092 = vmatprep.mubr.msk.bf16.mxu1 %vm7762_vm0, %v7761_v0 }
 0xd47   : > { %7077 = vmatpush3.bf16.msra.mxu0 %v7339_v26  ;;  %v6693_v26 = vld [vmem:[#allocation8] ss:$0 sm:$0xff] }
 0xd48   : > { %7078 = vmatprep.subr.bf16.mxu0 %v7761_v0 }
 0xd4b   : > { %7079 = vmatpush3.bf16.msra.mxu0 %v7340_v21 }
 0xd4c   : > { %7096 = vmatprep.subr.bf16.mxu0 %v7761_v0 }
 0xdf5   : > { %v5609_v23 = vpop.f32.mrf.mxu1 }
 0xdf7   : > { %v7046_v24 = vpop.f32.mrf.mxu1 }
 0xdf9   : > { %v5612_v43 = vpop.f32.mrf.mxu1 }
 0xdfa   : > { %v6685_v43 = vld [vmem:[#allocation2] ss:$0 sm:$0xff] }
 0xdfb   : > { %v7047_v8 = vpop.f32.mrf.mxu1 }
 0xdfc   : > { %v5701_v18 = vpop.f32.mrf.mxu0 }
 0xdfd   : > { %v5655_v10 = vpop.f32.mrf.mxu1  ;;  %v5753_v39 = vcombine.low %v5609_v23, %v5701_v18  ;;  %v5754_v53 = vcombine.high %v5609_v23, %v5701_v18 }
 0xdfe   : > { %v7062_v31 = vpop.f32.mrf.mxu0 }
 0xdff   : > { %v7054_v33 = vpop.f32.mrf.mxu1  ;;  %v5761_v48 = vrot.slane %v5753_v39, %v8178_v40  ;;  %v5768_v19 = vrot.slane %v5754_v53, %v8178_v40 }
 0xe00   : > { %v5704_v41 = vpop.f32.mrf.mxu0 }
 0xe01   : > { %v5658_v51 = vpop.f32.mrf.mxu1 }
 0xe02   : > { %v7063_v27 = vpop.f32.mrf.mxu0 }
 0xe03   : > { %v7055_v52 = vpop.f32.mrf.mxu1 }
 0xe05   : > { %v5747_v32 = vpop.f32.mrf.mxu1 }
 0xe06   : > { %v5769_v29 = vcombine.low %v5655_v10, %v5747_v32  ;;  %v5770_v17 = vcombine.high %v5655_v10, %v5747_v32 }
 0xe07   : > { %v7070_v34 = vpop.f32.mrf.mxu1 }
 0xe08   : > { %v5777_v57 = vrot.slane %v5769_v29, %v8178_v40  ;;  %v5784_v58 = vrot.slane %v5770_v17, %v8178_v40 }
 0xe09   : > { %v5750_v54 = vpop.f32.mrf.mxu1 }
 0xe0a   : > { %v5785_v36 = vcombine.low %v5761_v48, %v5777_v57  ;;  %v5786_v63 = vcombine.high %v5761_v48, %v5777_v57  ;;  %v5801_v49 = vcombine.low %v5768_v19, %v5784_v58  ;;  %v5802_v13 = vcombine.high %v5768_v19, %v5784_v58  ;;  %v7345_v48 = vld [vmem:[%s9203_s3 + $0x38] sm:$0xff]   ;;  %v7346_v57 = vld [vmem:[%s9203_s3 + $0x30] sm:$0xff]   ;;  %v7347_v58 = vld [vmem:[%s9203_s3 + $0x28] sm:$0xff]  }
 0xe0b   : > { %v7071_v59 = vpop.f32.mrf.mxu1  ;;  %v7348_v54 = vld [vmem:[%s9203_s3 + $0x20] sm:$0xff]  }
 0xe0c   : > { %v5793_v46 = vrot.slane %v5785_v36, %v8181_v47  ;;  %v5800_v20 = vrot.slane %v5786_v63, %v8181_v47  ;;  %v5809_v22 = vrot.slane %v5801_v49, %v8181_v47  ;;  %v5816_v35 = vrot.slane %v5802_v13, %v8181_v47  ;;  %v7349_v36 = vld [vmem:[%s9203_s3 + $0x18] sm:$0xff]   ;;  %v7350_v63 = vld [vmem:[%s9203_s3 + $0x10] sm:$0xff]  }
 0xe0e   : > { %v5821_v62 = vcombine.low %v5793_v46, %v5800_v20  ;;  %v6683_v4 = vcombine.high %v5793_v46, %v5800_v20  ;;  %v5837_v44 = vcombine.low %v5809_v22, %v5816_v35  ;;  %v6684_v6 = vcombine.high %v5809_v22, %v5816_v35  ;;  %v6691_v46 = vld [vmem:[#allocation5] ss:$0 sm:$0xff]  ;;  %v6692_v22 = vld [vmem:[#allocation7] ss:$0 sm:$0xff] }
 0xe10   : > { %v5828_v1 = vrot.slane %v5821_v62, %v8178_v40  ;;  %v5836_v7 = vrot.slane %v6683_v4, %v8178_v40  ;;  %v5844_v28 = vrot.slane %v5837_v44, %v8178_v40  ;;  %v5852_v2 = vrot.slane %v6684_v6, %v8178_v40  ;;  %v7351_v44 = vld [vmem:[%s9203_s3 + $0x8] sm:$0xff]   ;;  %v7352_v6 = vld [vmem:[%s9203_s3] sm:$0xff]  }
 0xe12   : > { %v5853_v60 = vcombine.low %v5828_v1, %v5836_v7  ;;  %v5869_v14 = vcombine.low %v5844_v28, %v5852_v2  ;;  %v5854_v55 = vcombine.high %v5828_v1, %v5836_v7  ;;  %v5870_v30 = vcombine.high %v5844_v28, %v5852_v2 }
 0xe14   : > { %v5861_v56 = vrot.slane %v5853_v60, %v8181_v47  ;;  %v5877_v16 = vrot.slane %v5869_v14, %v8181_v47  ;;  %v5868_v25 = vrot.slane %v5854_v55, %v8181_v47  ;;  %v5884_v12 = vrot.slane %v5870_v30, %v8181_v47  ;;  %v6699_v30 = vld [vmem:[#allocation10] ss:$0 sm:$0xff] }
 0xe16   : > { %v5886_v42 = vcombine.high %v5861_v56, %v5877_v16  ;;  %v5885_v61 = vcombine.low %v5861_v56, %v5877_v16  ;;  %v5887_v40 = vcombine.low %v5868_v25, %v5884_v12  ;;  %v5888_v5 = vcombine.high %v5868_v25, %v5884_v12 }
 0xe18   : > { %5890 = vrot.lane.b32.xlu1 %v5886_v42, %s9195_s10  ;;  %s9202_s10 = sld [smem:[#allocation46_spill]] }
 0xe1c   : > { %5894 = vrot.lane.b32.xlu1 %v5887_v40, %s9200_s23  ;;  %s6711_s23 = sshll.u32 %s7705_s28, 7 }
 0xe1d   : > { %s6261_s3 = scalar_lea.hbm %s9205_s4, %s6711_s23 }
 0xe1e   : > { %v7341_v17 = vld [vmem:[%s9202_s10 + $0x18] sm:$0xff]   ;;  %v7343_v34 = vld [vmem:[%s9202_s10 + $0x8] sm:$0xff]   ;;  %v7344_v19 = vld [vmem:[%s9202_s10] sm:$0xff]  }
 0xe1f   : > { %7085 = vmatpush3.bf16.msra.mxu1 %v7341_v17 }
 0xe20   : > { %5898 = vrot.lane.b32.xlu1 %v5888_v5, %s9201_s26  ;;  %7086 = vmatprep.subr.bf16.mxu1 %v7761_v0  ;;  %s1383_s26 = scalar_lea.vmem [#allocation14], %s6552_s22 }
 0xe21   : > { %s6263_s0 = sshll.u32 %s1383_s26, 4  ;;  %s6264_s0 = int_to_ptr.vmem [resolvable:$true] %s6263_s0 }
 0xe22   : > { %s7621_s7 = scalar_lea.vmem %s6264_s0, 128  ;;  %p7628_p8 = scmp.lt.s32.totalorder %s6264_s0, %s7626_s8 }
 0xe23   : > { %p7622_p0 = scmp.ne.s32.totalorder %s6264_s0, %s7621_s7  ;;  %p7629_p9 = scmp.lt.s32.totalorder %s7627_s9, %s7621_s7 }
 0xe25   : > { %p7623_p6 = pnand %p7622_p0, %p9206_p5  ;;  %p7630_p12 = por %p7629_p9, %p7628_p8 }
 0xe27   : > { %p7624_p7 = pneg %p7623_p6 }
 0xe29   : > { %p7631_p4 = pnand %p7630_p12, %p7624_p7 }
 0xe44   : > { %5905 = vadd.xlane.f32.xlu1 %v5904_v37 }
 0xe8a   : > { %v5891_v9 = vpop.permute.xlu1 %5890 }
 0xe8b   : > { %v5901_v47 = vsel %vm1962_vm2, %v5885_v61, %v5891_v9 }
 0xe8e   : > { %v5895_v11 = vpop.permute.xlu1 %5894 }
 0xe8f   : > { %v5902_v15 = vsel %vm2818_vm5, %v5901_v47, %v5895_v11 }
 0xe92   : > { %v5899_v45 = vpop.permute.xlu1 %5898 }
 0xe93   : > { %v5903_v23 = vsel %vm2820_vm6, %v5902_v15, %v5899_v45 }
 0xe94   : > { %v5907_v24 = vpack.c.bf16 %v5903_v23, %v5903_v23  ;;  %v6708_v23 = vld [vmem:[#allocation11] ss:$0 sm:$0xff] }
 0xe96   : > { %7081 = vmatmul.mubr.msk.bf16.vlgmr.msra.gmra.mxu0 %vm1465_vm1, %v5907_v24 }
 0xe97   : > { %7112 = vmatprep.mubr.msk.bf16.mxu0 %vm7762_vm0, %v7761_v0  ;;  %7097 = vmatpush3.bf16.msra.mxu0 %v7345_v48 }
 0xe98   : > { %7098 = vmatprep.subr.bf16.mxu0 %v7761_v0 }
 0xe9b   : > { %7099 = vmatpush3.bf16.msra.mxu0 %v7346_v57 }
 0xe9c   : > { %7100 = vmatprep.subr.bf16.mxu0 %v7761_v0 }
 0xe9f   : > { %7101 = vmatpush3.bf16.msra.mxu0 %v7347_v58 }
 0xea0   : > { %7102 = vmatprep.subr.bf16.mxu0 %v7761_v0 }
 0xea3   : > { %7103 = vmatpush3.bf16.msra.mxu0 %v7348_v54 }
 0xea4   : > { %7104 = vmatprep.subr.bf16.mxu0 %v7761_v0 }
 0xea7   : > { %7105 = vmatpush3.bf16.msra.mxu0 %v7349_v36 }
 0xea8   : > { %7106 = vmatprep.subr.bf16.mxu0 %v7761_v0 }
 0xeab   : > { %7107 = vmatpush3.bf16.msra.mxu0 %v7350_v63 }
 0xeac   : > { %7108 = vmatprep.subr.bf16.mxu0 %v7761_v0 }
 0xeaf   : > { %7109 = vmatpush3.bf16.msra.mxu0 %v7351_v44 }
 0xeb0   : > { %7110 = vmatprep.subr.bf16.mxu0 %v7761_v0 }
 0xeb3   : > { %7111 = vmatpush3.bf16.msra.mxu0 %v7352_v6 }
 0xecd   : > { %v5906_v8 = vpop.xlane.xlu1 %5905 }
 0xece   : > { %v5923_v3 = vmul.f32 %v6685_v43, %v5906_v8  ;;  %v6709_v43 = vld [vmem:[#allocation13] ss:$0 sm:$0xff] }
 0xf56   : > { %v5985_v18 = vpop.f32.mrf.mxu0 }
 0xf57   : > { %v5986_v10 = vadd.f32 %v5985_v18, %v5923_v3 }
 0xf58   : > { %v7082_v31 = vpop.f32.mrf.mxu0 }
 0xf59   : > { %v5993_v33 = vadd.f32 %v5986_v10, %v8377_v38  ;;  %v7342_v38 = vld [vmem:[%s9202_s10 + $0x10] sm:$0xff]  }
 0xf5a   : > { %v5988_v41 = vpop.f32.mrf.mxu0  ;;  %7087 = vmatpush3.bf16.msra.mxu1 %v7342_v38 }
 0xf5b   : > { %v5994_v51 = vsel %vm1465_vm1, %v5993_v33, 0.0  ;;  %7088 = vmatprep.subr.bf16.mxu1 %v7761_v0 }
 0xf5c   : > { %5995 = vadd.xlane.f32.xlu0 %v5994_v51  ;;  %v7083_v27 = vpop.f32.mrf.mxu0 }
 0xf5e   : > { %7089 = vmatpush3.bf16.msra.mxu1 %v7343_v34 }
 0xf5f   : > { %7090 = vmatprep.subr.bf16.mxu1 %v7761_v0 }
 0xf62   : > { %7091 = vmatpush3.bf16.msra.mxu1 %v7344_v19 }
 0xfe5   : > { %v5996_v52 = vpop.xlane.xlu0 %5995 }
 0xfe6   : > { %v5997_v39 = vmul.f32 0.015625, %v5996_v52 }
 0xfe8   : > { %v5998_v53 = vsub.f32 %v5993_v33, %v5997_v39 }
 0xfea   : > { %v5999_v32 = vmul.f32 %v5998_v53, %v5998_v53 }
 0xfec   : > { %v6000_v29 = vsel %vm1465_vm1, %v5999_v32, 0.0 }
 0xfed   : > { %6001 = vadd.xlane.f32.xlu1 %v6000_v29 }
0x1076   : > { %v6002_v49 = vpop.xlane.xlu1 %6001 }
0x1077   : > { %v6003_v13 = vmul.f32 0.015625, %v6002_v49 }
0x1079   : > { %v6004_v59 = vadd.f32 1e-05, %v6003_v13 }
0x107b   : > { %7435 = vrsqrt.f32 %v6004_v59 }
0x1088   : > { %v7436_v50 = vpop.eup %7435 }
0x1089   : > { %v6006_v20 = vmul.f32 %v7436_v50, %v5998_v53 }
0x108b   : > { %v6013_v35 = vmul.f32 %v6691_v46, %v6006_v20 }
0x108d   : > { %v6020_v62 = vadd.f32 %v6692_v22, %v6013_v35 }
0x108f   : > { %v6021_v4 = vpack.c.bf16 %v6020_v62, %v6020_v62 }
0x1091   : > { %7093 = vmatmul.mubr.msk.bf16.vlgmr.msra.gmra.mxu1 %vm1465_vm1, %v6021_v4 }
0x1151   : > { %v6098_v1 = vpop.f32.mrf.mxu1 }
0x1152   : > { %v6099_v7 = vadd.f32 %v6693_v26, %v6098_v1 }
0x1153   : > { %v7094_v28 = vpop.f32.mrf.mxu1 }
0x1154   : > { %v6104_v2 = vmax.f32 %v6099_v7, 0.0 }
0x1155   : > { %v6101_v60 = vpop.f32.mrf.mxu1 }
0x1156   : > { %v6105_v14 = vpack.c.bf16 %v6104_v2, %v6104_v2 }
0x1157   : > { %v7095_v55 = vpop.f32.mrf.mxu1 }
0x1158   : > { %7113 = vmatmul.mubr.bf16.vlgmr.msra.gmra.mxu0 %v6105_v14 }
0x1218   : > { %v6211_v56 = vpop.f32.mrf.mxu0 }
0x1219   : > { %v6212_v16 = vadd.f32 %v6699_v30, %v6211_v56 }
0x121a   : > { %v7114_v21 = vpop.f32.mrf.mxu0 }
0x121b   : > { %v6219_v42 = vadd.f32 %v6212_v16, %v6020_v62 }
0x121c   : > { %v6214_v25 = vpop.f32.mrf.mxu0 }
0x121d   : > { %v6220_v12 = vsel %vm1465_vm1, %v6219_v42, 0.0 }
0x121e   : > { %6221 = vadd.xlane.f32.xlu1 %v6220_v12  ;;  %v7115_v0 = vpop.f32.mrf.mxu0 }
0x12a7   : > { %v6222_v61 = vpop.xlane.xlu1 %6221 }
0x12a8   : > { %v6223_v40 = vmul.f32 0.015625, %v6222_v61 }
0x12aa   : > { %v6224_v5 = vsub.f32 %v6219_v42, %v6223_v40 }
0x12ac   : > { %v6225_v37 = vmul.f32 %v6224_v5, %v6224_v5 }
0x12ae   : > { %v6226_v9 = vsel %vm1465_vm1, %v6225_v37, 0.0 }
0x12af   : > { %6227 = vadd.xlane.f32.xlu0 %v6226_v9 }
0x1338   : > { %v6228_v11 = vpop.xlane.xlu0 %6227 }
0x1339   : > { %v6229_v47 = vmul.f32 0.015625, %v6228_v11 }
0x133b   : > { %v6230_v15 = vadd.f32 1e-05, %v6229_v47 }
0x133d   : > { %7437 = vrsqrt.f32 %v6230_v15 }
0x134a   : > { %v7438_v45 = vpop.eup %7437 }
0x134b   : > { %v6232_v24 = vmul.f32 %v7438_v45, %v6224_v5 }
0x134d   : > { %v6239_v8 = vmul.f32 %v6708_v23, %v6232_v24 }
0x134f   : > { %v6246_v3 = vadd.f32 %v6709_v43, %v6239_v8 }
0x1351   : > { %6247 = vst.msk [vmem:[%s1383_s26] sm:$0xff] %vm1465_vm1, %v6246_v3 }
0x1352   : > { %7634 = shalt.err (!%p7631_p4)
}
0x1353   : > { %s7635_s28 = scalar_lea.hbm %s6261_s3, 128  ;;  %s7639_s1 = scalar_lea.hbm %s9205_s4, 256 }
0x1354   : > { %p7636_p10 = scmp.ne.s32.totalorder %s6261_s3, %s7635_s28  ;;  %p7640_p2 = scmp.lt.s32.totalorder %s6261_s3, %s9205_s4 }
0x1355   : > { %p7641_p3 = scmp.lt.s32.totalorder %s7639_s1, %s7635_s28 }
0x1356   : > { %p7637_p11 = pnand %p7636_p10, %p9206_p5 }
0x1357   : > { %p7642_p13 = por %p7641_p3, %p7640_p2 }
0x1358   : > { %p7638_p1 = pneg %p7637_p11 }
0x135a   : > { %p7643_p0 = pnand %p7642_p13, %p7638_p1 }
0x135c   : > { %7646 = shalt.err (!%p7643_p0)
}
0x135d   : > { %7145 = dma.vmem_to_hbm [thread:$0]  (%p9206_p5), %s6264_s0, 128, %s6261_s3, %s6249_s6  }
0x135e PF: > { %s9207_s9 = sld [smem:[#allocation49_spill]]  ;;  %p7187_p6 = scmp.ge.s32.totalorder %s7713_s2, 2 }
0x135f   : > { %s9208_s8 = sld [smem:[#allocation54_spill]] }
0x1364   : > { %s6275_s7 = sand.u32 1, %s9207_s9  }
0x1365   : > { %p9209_p7 = scmp.ne.s32.totalorder %s9208_s8, 0  ;;  %s6276_s22 = scalar_lea.sflag [#allocation4], %s6275_s7 }
0x1367   : > { %p7170_p8 = pnand %p7187_p6, %p9209_p7 }
0x1369   : > { %p7171_p9 = pneg %p7170_p8 }
0x136b   : > { %7688 = dma.done.wait (%p7171_p9), %s6276_s22, 128  }
0x136c   : > { %7690 = vsyncadd (%p7171_p9), %s6276_s22, 4294967168  ;;  %s96_s2 = sadd.s32 1, %s7713_s2   ;;  %s9210_s22 = sld [smem:[#allocation50_spill]] }
0x136d   : > { %p93_p12 = scmp.ge.s32.totalorder %s96_s2, 4   ;;  %s9211_s23 = sld [smem:[#allocation51_spill]] }
0x136e   : > { %s9212_s26 = sld [smem:[#allocation55_spill]] }
0x136f   : > { %s9213_s28 = sld [smem:[#allocation52_spill]]  ;;  %95 = sbr.rel (!%p93_p12) target bundleno = 84 (0x54), region = 303 }
0x1370   : > { %s9214_s1 = sld [smem:[#allocation53_spill]] }
0x1374   :  { %6281 = vsyncpa [#allocation3], 1 }
0x1375   :  { %6283 = vsyncpa [#allocation3 + $0x1], 1 }
0x1376   :  { %6284 = vsyncpa [#allocation6], 1 }
0x1377   :  { %6285 = vsyncpa [#allocation9], 1 }
0x1378   :  { %6286 = vsyncpa [#allocation12], 1 }
0x1379   :  { %6287 = vsyncpa [#allocation4], 1 }
0x137a   :  { %6289 = vsyncpa [#allocation4 + $0x1], 1 }

</bundles_post_ra>
